<compile_context>
chip_gen: v7x
topology: tpu7x:2x2x1
jax: 0.10.0
libtpu: 0.0.40
codegen_flags: <defaults>
</compile_context>

<pallas_src>
import functools

import numpy as np

import jax
import jax.numpy as jnp
from jax import lax
from jax.experimental import pallas as pl
from jax.experimental.pallas import tpu as pltpu

# ----------------------------- config ---------------------------------------
USE_ALPHA_INPUT = True
NDF = 8
N_LAYERS = 2
NUM_D = 2
LRELU_SLOPE = 0.2
IN_EPS = 1e-5
INPUT_NC = 4 if USE_ALPHA_INPUT else 3


def _nlayer_layer_specs(input_nc, ndf, n_layers):
    # Mirrors pix2pixHD NLayerDiscriminator layer grouping: (cin, cout, stride, has_norm)
    specs = [(input_nc, ndf, 2, False)]           # conv + lrelu
    nf = ndf
    for _ in range(1, n_layers):
        nf_prev, nf = nf, min(nf * 2, 512)
        specs.append((nf_prev, nf, 2, True))      # conv + IN + lrelu
    nf_prev, nf = nf, min(nf * 2, 512)
    specs.append((nf_prev, nf, 1, True))          # conv + IN + lrelu
    specs.append((nf, 1, 1, False))               # final conv (no act)
    return specs


LAYER_SPECS = _nlayer_layer_specs(INPUT_NC, NDF, N_LAYERS)


# --------------------------- fused conv-group kernel --------------------------
def _fused_conv_group_kernel(x_ref, w_ref, b_ref, o_ref, *,
                             stride, oh, ow, norm, slope, eps):
    """One NLayer group: 4x4 conv (+bias) [+ InstanceNorm] [+ LeakyReLU].

    x_ref : (1, HK, WK, CK) f32 padded input tile for one batch item.
            stride == 1 : CK = Cin               (plain padded NHWC)
            stride == 2 : CK = 4*Cin             (space-to-depth; channel =
                          (row_parity*2 + col_parity)*Cin + c)
    w_ref : (16*Cin, Cout) bf16 GEMM weights, rows ordered to match the
            in-kernel tap concatenation (see _prep_wmat).
    b_ref : (1, Cout) f32
    o_ref : (1, OH, OW, Cout) f32
    """
    wv = w_ref[...]                    # hoisted: (K, Cout) bf16
    bv = b_ref[...]                    # (1, Cout) f32
    rows = []
    for r in range(oh):
        if stride == 1:
            pieces = [x_ref[0, r + i, j:j + ow, :]
                      for i in range(4) for j in range(4)]
        else:
            pieces = [x_ref[0, r + qi, qj:qj + ow, :]
                      for qi in range(2) for qj in range(2)]
        a = jnp.concatenate(pieces, axis=-1).astype(jnp.bfloat16)   # (OW, K)
        rows.append(jnp.dot(a, wv, preferred_element_type=jnp.float32))
    acc = jnp.stack(rows, axis=0)                                   # (OH, OW, Cout) f32
    acc = acc + bv
    if norm:
        # InstanceNorm2d(affine=False): per-instance / per-channel, biased variance.
        mean = jnp.mean(acc, axis=(0, 1), keepdims=True)
        var = jnp.mean(acc * acc, axis=(0, 1), keepdims=True) - mean * mean
        acc = (acc - mean) * lax.rsqrt(jnp.maximum(var, 0.0) + eps)
    if slope is not None:
        acc = jnp.where(acc >= 0, acc, slope * acc)
    o_ref[0] = acc


def conv_group_pallas(x, wmat, bias, *, stride, cout, norm, act_slope):
    """4x4 conv (pad=2) + fused epilogue as a single pallas_call, grid over batch."""
    n, h, w, cin = x.shape
    pad, k = 2, 4
    oh = (h + 2 * pad - k) // stride + 1
    ow = (w + 2 * pad - k) // stride + 1
    if stride == 1:
        xk = jnp.pad(x, ((0, 0), (pad, pad), (pad, pad), (0, 0)))
    else:
        hp, wp = h + 2 * pad, w + 2 * pad
        eh, ew = hp % 2, wp % 2                      # pad up to even for the 2x2 phase split
        xp = jnp.pad(x, ((0, 0), (pad, pad + eh), (pad, pad + ew), (0, 0)))
        hpe, wpe = hp + eh, wp + ew
        # space-to-depth: (N, HPe, WPe, C) -> (N, HPe/2, WPe/2, 4C); makes every
        # in-kernel tap slice contiguous (no strided loads, no HBM im2col).
        xk = (xp.reshape(n, hpe // 2, 2, wpe // 2, 2, cin)
                .transpose(0, 1, 3, 2, 4, 5)
                .reshape(n, hpe // 2, wpe // 2, 4 * cin))
    _, hk, wk, ck = xk.shape
    kdim = 16 * cin

    kernel = functools.partial(_fused_conv_group_kernel, stride=stride, oh=oh,
                               ow=ow, norm=norm, slope=act_slope, eps=IN_EPS)
    return pl.pallas_call(
        kernel,
        out_shape=jax.ShapeDtypeStruct((n, oh, ow, cout), jnp.float32),
        grid=(n,),
        in_specs=[
            pl.BlockSpec((1, hk, wk, ck), lambda b: (b, 0, 0, 0)),
            pl.BlockSpec((kdim, cout), lambda b: (0, 0)),
            pl.BlockSpec((1, cout), lambda b: (0, 0)),
        ],
        out_specs=pl.BlockSpec((1, oh, ow, cout), lambda b: (b, 0, 0, 0)),
        compiler_params=pltpu.CompilerParams(
            dimension_semantics=("parallel",),       # shard batch across TCs on v7x
            vmem_limit_bytes=32 * 1024 * 1024,
        ),
    )(xk, wmat, bias)


# --------------------------- downsample (glue) --------------------------------
def avg_pool_3x3_s2(x):
    # TODO(synk): AvgPool2d(3, stride=2, pad=1, count_include_pad=False) kept as
    # lax.reduce_window glue (not a hot path); the divisor is a compile-time
    # constant computed with numpy instead of a second reduce_window.
    n, h, w, c = x.shape
    sums = lax.reduce_window(x, 0.0, lax.add, (1, 3, 3, 1), (1, 2, 2, 1),
                             ((0, 0), (1, 1), (1, 1), (0, 0)))
    oh, ow = sums.shape[1], sums.shape[2]
    ones_p = np.zeros((h + 2, w + 2), np.float32)
    ones_p[1:1 + h, 1:1 + w] = 1.0
    cnt = np.zeros((oh, ow), np.float32)
    for di in range(3):
        for dj in range(3):
            cnt += ones_p[di:di + 2 * oh:2, dj:dj + 2 * ow:2][:oh, :ow]
    inv = jnp.asarray((1.0 / cnt).reshape(1, oh, ow, 1))
    return sums * inv


# --------------------------- params (init + prep) ------------------------------
def init_params(key, layer_specs=LAYER_SPECS, num_d=NUM_D):
    # Deterministic synthetic weights in PyTorch Conv2d layout: w (Cout, Cin, 4, 4), b (Cout,)
    params = {}
    for d in range(num_d):
        layers = []
        for (cin, cout, _stride, _norm) in layer_specs:
            key, wk, bk = jax.random.split(key, 3)
            w = 0.05 * jax.random.normal(wk, (cout, cin, 4, 4), jnp.float32)
            b = 0.01 * jax.random.normal(bk, (cout,), jnp.float32)
            layers.append({"w": w, "b": b})
        params[f"scale{d}"] = layers
    return params


def _prep_wmat(w, stride):
    # Reorder PyTorch (Cout, Cin, 4, 4) weights into the (16*Cin, Cout) GEMM matrix
    # whose row order matches the in-kernel tap concatenation.
    cout, cin, kh, kw = w.shape
    if stride == 1:
        # columns ordered (i, j, c): row = (i*4 + j)*Cin + c
        return jnp.transpose(w, (2, 3, 1, 0)).reshape(kh * kw * cin, cout)
    # stride 2 / space-to-depth: columns ordered (qi, qj, ri, rj, c)
    w6 = w.reshape(cout, cin, 2, 2, 2, 2)               # (o, c, qi, ri, qj, rj)
    return jnp.transpose(w6, (2, 4, 3, 5, 1, 0)).reshape(16 * cin, cout)


def prepare_params(params, img_std):
    """Fold 1/std of the input normalization into layer-0 weights and convert every
    layer to bf16 GEMM layout (arrays-only pytree -> jit-friendly)."""
    prepared = {}
    for d in range(NUM_D):
        layers = []
        for li, ((cin, cout, stride, _norm), p) in enumerate(
                zip(LAYER_SPECS, params[f"scale{d}"])):
            w = p["w"]
            if li == 0:
                scale = jnp.ones((cin,), jnp.float32).at[:3].set(1.0 / img_std)
                w = w * scale[None, :, None, None]
            layers.append({
                "w": _prep_wmat(w, stride).astype(jnp.bfloat16),
                "b": p["b"].reshape(1, cout).astype(jnp.float32),
            })
        prepared[f"scale{d}"] = layers
    return prepared


# ------------------------------- forward --------------------------------------
def nlayer_forward(layer_arrays, x):
    feats = []
    last = len(LAYER_SPECS) - 1
    for i, ((_cin, cout, stride, norm), arrs) in enumerate(zip(LAYER_SPECS, layer_arrays)):
        x = conv_group_pallas(x, arrs["w"], arrs["b"], stride=stride, cout=cout,
                              norm=norm,
                              act_slope=None if i == last else LRELU_SLOPE)
        feats.append(x)
    # getIntermFeat=True: every group's output, transposed once to NCHW to match
    # the PyTorch reference (consumers could take NHWC directly and skip this).
    return [jnp.transpose(f, (0, 3, 1, 2)) for f in feats]


def mesh_rgb_discriminator_forward(prepared, imgs_in, alpha_mask):
    assert imgs_in.shape[-1] == 3
    # (imgs - mean) / std : the /std is folded into layer-0 weights (prepare_params);
    # only the mean shift remains here (keeps zero-padding semantics exact).
    img_mean = jnp.array([0.5, 0.5, 0.5], jnp.float32)
    x = imgs_in.astype(jnp.float32) - img_mean
    if USE_ALPHA_INPUT:
        x = jnp.concatenate([x, alpha_mask.astype(jnp.float32)], axis=-1)
    results = []
    for i in range(NUM_D):
        results.append(nlayer_forward(prepared[f"scale{NUM_D - 1 - i}"], x))
        if i != NUM_D - 1:
            x = avg_pool_3x3_s2(x)
    return results


# ------------------------------- main ------------------------------------------
if __name__ == "__main__":
    key = jax.random.PRNGKey(0)
    k_img, k_alpha, k_par = jax.random.split(key, 3)

    imgs_in = jax.random.uniform(k_img, (2, 16, 16, 3), jnp.float32)
    alpha_mask = (jax.random.uniform(k_alpha, (2, 16, 16, 1)) > 0.5).astype(jnp.float32)

    params = init_params(k_par)
    prepared = prepare_params(params, jnp.array([0.5, 0.5, 0.5], jnp.float32))

    fwd = jax.jit(mesh_rgb_discriminator_forward)
    result = fwd(prepared, imgs_in, alpha_mask)
    jax.tree_util.tree_map(jax.block_until_ready, result)
    print("KERNEL_OK")
</pallas_src>

<mosaic_0001>
module attributes {stable_mosaic.version = 11 : i64} {
  func.func @_fused_conv_group_kernel(%arg0: i32, %arg1: memref<1x10x10x16xf32, #tpu.memory_space<vmem>>, %arg2: memref<64x8xbf16, #tpu.memory_space<vmem>>, %arg3: memref<1x8xf32, #tpu.memory_space<vmem>>, %arg4: memref<1x9x9x8xf32, #tpu.memory_space<vmem>>) attributes {dimension_semantics = [#tpu.dimension_semantics<parallel>], iteration_bounds = array<i64: 2>, scalar_prefetch = 0 : i64, scratch_operands = 0 : i64, tpu.core_type = #tpu.core_type<tc>, window_params = [{transform_indices = @transform_0, window_bounds = array<i64: 1, 10, 10, 16>}, {pipeline_mode = #tpu.pipeline_mode<synchronous>, transform_indices = @transform_1, window_bounds = array<i64: 64, 8>}, {pipeline_mode = #tpu.pipeline_mode<synchronous>, transform_indices = @transform_2, window_bounds = array<i64: 1, 8>}, {transform_indices = @transform_3, window_bounds = array<i64: 1, 9, 9, 8>}]} {
    %c0 = arith.constant 0 : index
    %c0_0 = arith.constant 0 : index
    %0 = vector.load %arg2[%c0, %c0_0] : memref<64x8xbf16, #tpu.memory_space<vmem>>, vector<64x8xbf16>
    %c0_1 = arith.constant 0 : index
    %c0_2 = arith.constant 0 : index
    %1 = vector.load %arg3[%c0_1, %c0_2] : memref<1x8xf32, #tpu.memory_space<vmem>>, vector<1x8xf32>
    %c0_3 = arith.constant 0 : index
    %c0_4 = arith.constant 0 : index
    %c0_5 = arith.constant 0 : index
    %c0_6 = arith.constant 0 : index
    %2 = vector.load %arg1[%c0_3, %c0_4, %c0_5, %c0_6] : memref<1x10x10x16xf32, #tpu.memory_space<vmem>>, vector<1x1x9x16xf32>
    %3 = vector.shape_cast %2 : vector<1x1x9x16xf32> to vector<9x16xf32>
    %c0_7 = arith.constant 0 : index
    %c0_8 = arith.constant 0 : index
    %c1 = arith.constant 1 : index
    %c0_9 = arith.constant 0 : index
    %4 = vector.load %arg1[%c0_7, %c0_8, %c1, %c0_9] : memref<1x10x10x16xf32, #tpu.memory_space<vmem>>, vector<1x1x9x16xf32>
    %5 = vector.shape_cast %4 : vector<1x1x9x16xf32> to vector<9x16xf32>
    %c0_10 = arith.constant 0 : index
    %c1_11 = arith.constant 1 : index
    %c0_12 = arith.constant 0 : index
    %c0_13 = arith.constant 0 : index
    %6 = vector.load %arg1[%c0_10, %c1_11, %c0_12, %c0_13] : memref<1x10x10x16xf32, #tpu.memory_space<vmem>>, vector<1x1x9x16xf32>
    %7 = vector.shape_cast %6 : vector<1x1x9x16xf32> to vector<9x16xf32>
    %c0_14 = arith.constant 0 : index
    %c1_15 = arith.constant 1 : index
    %c1_16 = arith.constant 1 : index
    %c0_17 = arith.constant 0 : index
    %8 = vector.load %arg1[%c0_14, %c1_15, %c1_16, %c0_17] : memref<1x10x10x16xf32, #tpu.memory_space<vmem>>, vector<1x1x9x16xf32>
    %9 = vector.shape_cast %8 : vector<1x1x9x16xf32> to vector<9x16xf32>
    %10 = tpu.concatenate %3, %5, %7, %9 in 1 : vector<9x16xf32>, vector<9x16xf32>, vector<9x16xf32>, vector<9x16xf32> -> vector<9x64xf32>
    %11 = arith.truncf %10 : vector<9x64xf32> to vector<9x64xbf16>
    %cst = arith.constant dense<0.000000e+00> : vector<9x8xf32>
    %12 = tpu.matmul %11, %0, %cst {dimension_numbers = #tpu.dot_dimension_numbers<[1], [0], [0], [1], [0, 0, 1, 1], [], []>} : vector<9x64xbf16>, vector<64x8xbf16>, vector<9x8xf32> -> vector<9x8xf32>
    %c0_18 = arith.constant 0 : index
    %c1_19 = arith.constant 1 : index
    %c0_20 = arith.constant 0 : index
    %c0_21 = arith.constant 0 : index
    %13 = vector.load %arg1[%c0_18, %c1_19, %c0_20, %c0_21] : memref<1x10x10x16xf32, #tpu.memory_space<vmem>>, vector<1x1x9x16xf32>
    %14 = vector.shape_cast %13 : vector<1x1x9x16xf32> to vector<9x16xf32>
    %c0_22 = arith.constant 0 : index
    %c1_23 = arith.constant 1 : index
    %c1_24 = arith.constant 1 : index
    %c0_25 = arith.constant 0 : index
    %15 = vector.load %arg1[%c0_22, %c1_23, %c1_24, %c0_25] : memref<1x10x10x16xf32, #tpu.memory_space<vmem>>, vector<1x1x9x16xf32>
    %16 = vector.shape_cast %15 : vector<1x1x9x16xf32> to vector<9x16xf32>
    %c0_26 = arith.constant 0 : index
    %c2 = arith.constant 2 : index
    %c0_27 = arith.constant 0 : index
    %c0_28 = arith.constant 0 : index
    %17 = vector.load %arg1[%c0_26, %c2, %c0_27, %c0_28] : memref<1x10x10x16xf32, #tpu.memory_space<vmem>>, vector<1x1x9x16xf32>
    %18 = vector.shape_cast %17 : vector<1x1x9x16xf32> to vector<9x16xf32>
    %c0_29 = arith.constant 0 : index
    %c2_30 = arith.constant 2 : index
    %c1_31 = arith.constant 1 : index
    %c0_32 = arith.constant 0 : index
    %19 = vector.load %arg1[%c0_29, %c2_30, %c1_31, %c0_32] : memref<1x10x10x16xf32, #tpu.memory_space<vmem>>, vector<1x1x9x16xf32>
    %20 = vector.shape_cast %19 : vector<1x1x9x16xf32> to vector<9x16xf32>
    %21 = tpu.concatenate %14, %16, %18, %20 in 1 : vector<9x16xf32>, vector<9x16xf32>, vector<9x16xf32>, vector<9x16xf32> -> vector<9x64xf32>
    %22 = arith.truncf %21 : vector<9x64xf32> to vector<9x64xbf16>
    %cst_33 = arith.constant dense<0.000000e+00> : vector<9x8xf32>
    %23 = tpu.matmul %22, %0, %cst_33 {dimension_numbers = #tpu.dot_dimension_numbers<[1], [0], [0], [1], [0, 0, 1, 1], [], []>} : vector<9x64xbf16>, vector<64x8xbf16>, vector<9x8xf32> -> vector<9x8xf32>
    %c0_34 = arith.constant 0 : index
    %c2_35 = arith.constant 2 : index
    %c0_36 = arith.constant 0 : index
    %c0_37 = arith.constant 0 : index
    %24 = vector.load %arg1[%c0_34, %c2_35, %c0_36, %c0_37] : memref<1x10x10x16xf32, #tpu.memory_space<vmem>>, vector<1x1x9x16xf32>
    %25 = vector.shape_cast %24 : vector<1x1x9x16xf32> to vector<9x16xf32>
    %c0_38 = arith.constant 0 : index
    %c2_39 = arith.constant 2 : index
    %c1_40 = arith.constant 1 : index
    %c0_41 = arith.constant 0 : index
    %26 = vector.load %arg1[%c0_38, %c2_39, %c1_40, %c0_41] : memref<1x10x10x16xf32, #tpu.memory_space<vmem>>, vector<1x1x9x16xf32>
    %27 = vector.shape_cast %26 : vector<1x1x9x16xf32> to vector<9x16xf32>
    %c0_42 = arith.constant 0 : index
    %c3 = arith.constant 3 : index
    %c0_43 = arith.constant 0 : index
    %c0_44 = arith.constant 0 : index
    %28 = vector.load %arg1[%c0_42, %c3, %c0_43, %c0_44] : memref<1x10x10x16xf32, #tpu.memory_space<vmem>>, vector<1x1x9x16xf32>
    %29 = vector.shape_cast %28 : vector<1x1x9x16xf32> to vector<9x16xf32>
    %c0_45 = arith.constant 0 : index
    %c3_46 = arith.constant 3 : index
    %c1_47 = arith.constant 1 : index
    %c0_48 = arith.constant 0 : index
    %30 = vector.load %arg1[%c0_45, %c3_46, %c1_47, %c0_48] : memref<1x10x10x16xf32, #tpu.memory_space<vmem>>, vector<1x1x9x16xf32>
    %31 = vector.shape_cast %30 : vector<1x1x9x16xf32> to vector<9x16xf32>
    %32 = tpu.concatenate %25, %27, %29, %31 in 1 : vector<9x16xf32>, vector<9x16xf32>, vector<9x16xf32>, vector<9x16xf32> -> vector<9x64xf32>
    %33 = arith.truncf %32 : vector<9x64xf32> to vector<9x64xbf16>
    %cst_49 = arith.constant dense<0.000000e+00> : vector<9x8xf32>
    %34 = tpu.matmul %33, %0, %cst_49 {dimension_numbers = #tpu.dot_dimension_numbers<[1], [0], [0], [1], [0, 0, 1, 1], [], []>} : vector<9x64xbf16>, vector<64x8xbf16>, vector<9x8xf32> -> vector<9x8xf32>
    %c0_50 = arith.constant 0 : index
    %c3_51 = arith.constant 3 : index
    %c0_52 = arith.constant 0 : index
    %c0_53 = arith.constant 0 : index
    %35 = vector.load %arg1[%c0_50, %c3_51, %c0_52, %c0_53] : memref<1x10x10x16xf32, #tpu.memory_space<vmem>>, vector<1x1x9x16xf32>
    %36 = vector.shape_cast %35 : vector<1x1x9x16xf32> to vector<9x16xf32>
    %c0_54 = arith.constant 0 : index
    %c3_55 = arith.constant 3 : index
    %c1_56 = arith.constant 1 : index
    %c0_57 = arith.constant 0 : index
    %37 = vector.load %arg1[%c0_54, %c3_55, %c1_56, %c0_57] : memref<1x10x10x16xf32, #tpu.memory_space<vmem>>, vector<1x1x9x16xf32>
    %38 = vector.shape_cast %37 : vector<1x1x9x16xf32> to vector<9x16xf32>
    %c0_58 = arith.constant 0 : index
    %c4 = arith.constant 4 : index
    %c0_59 = arith.constant 0 : index
    %c0_60 = arith.constant 0 : index
    %39 = vector.load %arg1[%c0_58, %c4, %c0_59, %c0_60] : memref<1x10x10x16xf32, #tpu.memory_space<vmem>>, vector<1x1x9x16xf32>
    %40 = vector.shape_cast %39 : vector<1x1x9x16xf32> to vector<9x16xf32>
    %c0_61 = arith.constant 0 : index
    %c4_62 = arith.constant 4 : index
    %c1_63 = arith.constant 1 : index
    %c0_64 = arith.constant 0 : index
    %41 = vector.load %arg1[%c0_61, %c4_62, %c1_63, %c0_64] : memref<1x10x10x16xf32, #tpu.memory_space<vmem>>, vector<1x1x9x16xf32>
    %42 = vector.shape_cast %41 : vector<1x1x9x16xf32> to vector<9x16xf32>
    %43 = tpu.concatenate %36, %38, %40, %42 in 1 : vector<9x16xf32>, vector<9x16xf32>, vector<9x16xf32>, vector<9x16xf32> -> vector<9x64xf32>
    %44 = arith.truncf %43 : vector<9x64xf32> to vector<9x64xbf16>
    %cst_65 = arith.constant dense<0.000000e+00> : vector<9x8xf32>
    %45 = tpu.matmul %44, %0, %cst_65 {dimension_numbers = #tpu.dot_dimension_numbers<[1], [0], [0], [1], [0, 0, 1, 1], [], []>} : vector<9x64xbf16>, vector<64x8xbf16>, vector<9x8xf32> -> vector<9x8xf32>
    %c0_66 = arith.constant 0 : index
    %c4_67 = arith.constant 4 : index
    %c0_68 = arith.constant 0 : index
    %c0_69 = arith.constant 0 : index
    %46 = vector.load %arg1[%c0_66, %c4_67, %c0_68, %c0_69] : memref<1x10x10x16xf32, #tpu.memory_space<vmem>>, vector<1x1x9x16xf32>
    %47 = vector.shape_cast %46 : vector<1x1x9x16xf32> to vector<9x16xf32>
    %c0_70 = arith.constant 0 : index
    %c4_71 = arith.constant 4 : index
    %c1_72 = arith.constant 1 : index
    %c0_73 = arith.constant 0 : index
    %48 = vector.load %arg1[%c0_70, %c4_71, %c1_72, %c0_73] : memref<1x10x10x16xf32, #tpu.memory_space<vmem>>, vector<1x1x9x16xf32>
    %49 = vector.shape_cast %48 : vector<1x1x9x16xf32> to vector<9x16xf32>
    %c0_74 = arith.constant 0 : index
    %c5 = arith.constant 5 : index
    %c0_75 = arith.constant 0 : index
    %c0_76 = arith.constant 0 : index
    %50 = vector.load %arg1[%c0_74, %c5, %c0_75, %c0_76] : memref<1x10x10x16xf32, #tpu.memory_space<vmem>>, vector<1x1x9x16xf32>
    %51 = vector.shape_cast %50 : vector<1x1x9x16xf32> to vector<9x16xf32>
    %c0_77 = arith.constant 0 : index
    %c5_78 = arith.constant 5 : index
    %c1_79 = arith.constant 1 : index
    %c0_80 = arith.constant 0 : index
    %52 = vector.load %arg1[%c0_77, %c5_78, %c1_79, %c0_80] : memref<1x10x10x16xf32, #tpu.memory_space<vmem>>, vector<1x1x9x16xf32>
    %53 = vector.shape_cast %52 : vector<1x1x9x16xf32> to vector<9x16xf32>
    %54 = tpu.concatenate %47, %49, %51, %53 in 1 : vector<9x16xf32>, vector<9x16xf32>, vector<9x16xf32>, vector<9x16xf32> -> vector<9x64xf32>
    %55 = arith.truncf %54 : vector<9x64xf32> to vector<9x64xbf16>
    %cst_81 = arith.constant dense<0.000000e+00> : vector<9x8xf32>
    %56 = tpu.matmul %55, %0, %cst_81 {dimension_numbers = #tpu.dot_dimension_numbers<[1], [0], [0], [1], [0, 0, 1, 1], [], []>} : vector<9x64xbf16>, vector<64x8xbf16>, vector<9x8xf32> -> vector<9x8xf32>
    %c0_82 = arith.constant 0 : index
    %c5_83 = arith.constant 5 : index
    %c0_84 = arith.constant 0 : index
    %c0_85 = arith.constant 0 : index
    %57 = vector.load %arg1[%c0_82, %c5_83, %c0_84, %c0_85] : memref<1x10x10x16xf32, #tpu.memory_space<vmem>>, vector<1x1x9x16xf32>
    %58 = vector.shape_cast %57 : vector<1x1x9x16xf32> to vector<9x16xf32>
    %c0_86 = arith.constant 0 : index
    %c5_87 = arith.constant 5 : index
    %c1_88 = arith.constant 1 : index
    %c0_89 = arith.constant 0 : index
    %59 = vector.load %arg1[%c0_86, %c5_87, %c1_88, %c0_89] : memref<1x10x10x16xf32, #tpu.memory_space<vmem>>, vector<1x1x9x16xf32>
    %60 = vector.shape_cast %59 : vector<1x1x9x16xf32> to vector<9x16xf32>
    %c0_90 = arith.constant 0 : index
    %c6 = arith.constant 6 : index
    %c0_91 = arith.constant 0 : index
    %c0_92 = arith.constant 0 : index
    %61 = vector.load %arg1[%c0_90, %c6, %c0_91, %c0_92] : memref<1x10x10x16xf32, #tpu.memory_space<vmem>>, vector<1x1x9x16xf32>
    %62 = vector.shape_cast %61 : vector<1x1x9x16xf32> to vector<9x16xf32>
    %c0_93 = arith.constant 0 : index
    %c6_94 = arith.constant 6 : index
    %c1_95 = arith.constant 1 : index
    %c0_96 = arith.constant 0 : index
    %63 = vector.load %arg1[%c0_93, %c6_94, %c1_95, %c0_96] : memref<1x10x10x16xf32, #tpu.memory_space<vmem>>, vector<1x1x9x16xf32>
    %64 = vector.shape_cast %63 : vector<1x1x9x16xf32> to vector<9x16xf32>
    %65 = tpu.concatenate %58, %60, %62, %64 in 1 : vector<9x16xf32>, vector<9x16xf32>, vector<9x16xf32>, vector<9x16xf32> -> vector<9x64xf32>
    %66 = arith.truncf %65 : vector<9x64xf32> to vector<9x64xbf16>
    %cst_97 = arith.constant dense<0.000000e+00> : vector<9x8xf32>
    %67 = tpu.matmul %66, %0, %cst_97 {dimension_numbers = #tpu.dot_dimension_numbers<[1], [0], [0], [1], [0, 0, 1, 1], [], []>} : vector<9x64xbf16>, vector<64x8xbf16>, vector<9x8xf32> -> vector<9x8xf32>
    %c0_98 = arith.constant 0 : index
    %c6_99 = arith.constant 6 : index
    %c0_100 = arith.constant 0 : index
    %c0_101 = arith.constant 0 : index
    %68 = vector.load %arg1[%c0_98, %c6_99, %c0_100, %c0_101] : memref<1x10x10x16xf32, #tpu.memory_space<vmem>>, vector<1x1x9x16xf32>
    %69 = vector.shape_cast %68 : vector<1x1x9x16xf32> to vector<9x16xf32>
    %c0_102 = arith.constant 0 : index
    %c6_103 = arith.constant 6 : index
    %c1_104 = arith.constant 1 : index
    %c0_105 = arith.constant 0 : index
    %70 = vector.load %arg1[%c0_102, %c6_103, %c1_104, %c0_105] : memref<1x10x10x16xf32, #tpu.memory_space<vmem>>, vector<1x1x9x16xf32>
    %71 = vector.shape_cast %70 : vector<1x1x9x16xf32> to vector<9x16xf32>
    %c0_106 = arith.constant 0 : index
    %c7 = arith.constant 7 : index
    %c0_107 = arith.constant 0 : index
    %c0_108 = arith.constant 0 : index
    %72 = vector.load %arg1[%c0_106, %c7, %c0_107, %c0_108] : memref<1x10x10x16xf32, #tpu.memory_space<vmem>>, vector<1x1x9x16xf32>
    %73 = vector.shape_cast %72 : vector<1x1x9x16xf32> to vector<9x16xf32>
    %c0_109 = arith.constant 0 : index
    %c7_110 = arith.constant 7 : index
    %c1_111 = arith.constant 1 : index
    %c0_112 = arith.constant 0 : index
    %74 = vector.load %arg1[%c0_109, %c7_110, %c1_111, %c0_112] : memref<1x10x10x16xf32, #tpu.memory_space<vmem>>, vector<1x1x9x16xf32>
    %75 = vector.shape_cast %74 : vector<1x1x9x16xf32> to vector<9x16xf32>
    %76 = tpu.concatenate %69, %71, %73, %75 in 1 : vector<9x16xf32>, vector<9x16xf32>, vector<9x16xf32>, vector<9x16xf32> -> vector<9x64xf32>
    %77 = arith.truncf %76 : vector<9x64xf32> to vector<9x64xbf16>
    %cst_113 = arith.constant dense<0.000000e+00> : vector<9x8xf32>
    %78 = tpu.matmul %77, %0, %cst_113 {dimension_numbers = #tpu.dot_dimension_numbers<[1], [0], [0], [1], [0, 0, 1, 1], [], []>} : vector<9x64xbf16>, vector<64x8xbf16>, vector<9x8xf32> -> vector<9x8xf32>
    %c0_114 = arith.constant 0 : index
    %c7_115 = arith.constant 7 : index
    %c0_116 = arith.constant 0 : index
    %c0_117 = arith.constant 0 : index
    %79 = vector.load %arg1[%c0_114, %c7_115, %c0_116, %c0_117] : memref<1x10x10x16xf32, #tpu.memory_space<vmem>>, vector<1x1x9x16xf32>
    %80 = vector.shape_cast %79 : vector<1x1x9x16xf32> to vector<9x16xf32>
    %c0_118 = arith.constant 0 : index
    %c7_119 = arith.constant 7 : index
    %c1_120 = arith.constant 1 : index
    %c0_121 = arith.constant 0 : index
    %81 = vector.load %arg1[%c0_118, %c7_119, %c1_120, %c0_121] : memref<1x10x10x16xf32, #tpu.memory_space<vmem>>, vector<1x1x9x16xf32>
    %82 = vector.shape_cast %81 : vector<1x1x9x16xf32> to vector<9x16xf32>
    %c0_122 = arith.constant 0 : index
    %c8 = arith.constant 8 : index
    %c0_123 = arith.constant 0 : index
    %c0_124 = arith.constant 0 : index
    %83 = vector.load %arg1[%c0_122, %c8, %c0_123, %c0_124] : memref<1x10x10x16xf32, #tpu.memory_space<vmem>>, vector<1x1x9x16xf32>
    %84 = vector.shape_cast %83 : vector<1x1x9x16xf32> to vector<9x16xf32>
    %c0_125 = arith.constant 0 : index
    %c8_126 = arith.constant 8 : index
    %c1_127 = arith.constant 1 : index
    %c0_128 = arith.constant 0 : index
    %85 = vector.load %arg1[%c0_125, %c8_126, %c1_127, %c0_128] : memref<1x10x10x16xf32, #tpu.memory_space<vmem>>, vector<1x1x9x16xf32>
    %86 = vector.shape_cast %85 : vector<1x1x9x16xf32> to vector<9x16xf32>
    %87 = tpu.concatenate %80, %82, %84, %86 in 1 : vector<9x16xf32>, vector<9x16xf32>, vector<9x16xf32>, vector<9x16xf32> -> vector<9x64xf32>
    %88 = arith.truncf %87 : vector<9x64xf32> to vector<9x64xbf16>
    %cst_129 = arith.constant dense<0.000000e+00> : vector<9x8xf32>
    %89 = tpu.matmul %88, %0, %cst_129 {dimension_numbers = #tpu.dot_dimension_numbers<[1], [0], [0], [1], [0, 0, 1, 1], [], []>} : vector<9x64xbf16>, vector<64x8xbf16>, vector<9x8xf32> -> vector<9x8xf32>
    %c0_130 = arith.constant 0 : index
    %c8_131 = arith.constant 8 : index
    %c0_132 = arith.constant 0 : index
    %c0_133 = arith.constant 0 : index
    %90 = vector.load %arg1[%c0_130, %c8_131, %c0_132, %c0_133] : memref<1x10x10x16xf32, #tpu.memory_space<vmem>>, vector<1x1x9x16xf32>
    %91 = vector.shape_cast %90 : vector<1x1x9x16xf32> to vector<9x16xf32>
    %c0_134 = arith.constant 0 : index
    %c8_135 = arith.constant 8 : index
    %c1_136 = arith.constant 1 : index
    %c0_137 = arith.constant 0 : index
    %92 = vector.load %arg1[%c0_134, %c8_135, %c1_136, %c0_137] : memref<1x10x10x16xf32, #tpu.memory_space<vmem>>, vector<1x1x9x16xf32>
    %93 = vector.shape_cast %92 : vector<1x1x9x16xf32> to vector<9x16xf32>
    %c0_138 = arith.constant 0 : index
    %c9 = arith.constant 9 : index
    %c0_139 = arith.constant 0 : index
    %c0_140 = arith.constant 0 : index
    %94 = vector.load %arg1[%c0_138, %c9, %c0_139, %c0_140] : memref<1x10x10x16xf32, #tpu.memory_space<vmem>>, vector<1x1x9x16xf32>
    %95 = vector.shape_cast %94 : vector<1x1x9x16xf32> to vector<9x16xf32>
    %c0_141 = arith.constant 0 : index
    %c9_142 = arith.constant 9 : index
    %c1_143 = arith.constant 1 : index
    %c0_144 = arith.constant 0 : index
    %96 = vector.load %arg1[%c0_141, %c9_142, %c1_143, %c0_144] : memref<1x10x10x16xf32, #tpu.memory_space<vmem>>, vector<1x1x9x16xf32>
    %97 = vector.shape_cast %96 : vector<1x1x9x16xf32> to vector<9x16xf32>
    %98 = tpu.concatenate %91, %93, %95, %97 in 1 : vector<9x16xf32>, vector<9x16xf32>, vector<9x16xf32>, vector<9x16xf32> -> vector<9x64xf32>
    %99 = arith.truncf %98 : vector<9x64xf32> to vector<9x64xbf16>
    %cst_145 = arith.constant dense<0.000000e+00> : vector<9x8xf32>
    %100 = tpu.matmul %99, %0, %cst_145 {dimension_numbers = #tpu.dot_dimension_numbers<[1], [0], [0], [1], [0, 0, 1, 1], [], []>} : vector<9x64xbf16>, vector<64x8xbf16>, vector<9x8xf32> -> vector<9x8xf32>
    %101 = vector.shape_cast %12 : vector<9x8xf32> to vector<1x9x8xf32>
    %102 = vector.shape_cast %23 : vector<9x8xf32> to vector<1x9x8xf32>
    %103 = vector.shape_cast %34 : vector<9x8xf32> to vector<1x9x8xf32>
    %104 = vector.shape_cast %45 : vector<9x8xf32> to vector<1x9x8xf32>
    %105 = vector.shape_cast %56 : vector<9x8xf32> to vector<1x9x8xf32>
    %106 = vector.shape_cast %67 : vector<9x8xf32> to vector<1x9x8xf32>
    %107 = vector.shape_cast %78 : vector<9x8xf32> to vector<1x9x8xf32>
    %108 = vector.shape_cast %89 : vector<9x8xf32> to vector<1x9x8xf32>
    %109 = vector.shape_cast %100 : vector<9x8xf32> to vector<1x9x8xf32>
    %110 = tpu.concatenate %101, %102, %103, %104, %105, %106, %107, %108, %109 in 0 : vector<1x9x8xf32>, vector<1x9x8xf32>, vector<1x9x8xf32>, vector<1x9x8xf32>, vector<1x9x8xf32>, vector<1x9x8xf32>, vector<1x9x8xf32>, vector<1x9x8xf32>, vector<1x9x8xf32> -> vector<9x9x8xf32>
    %111 = vector.shape_cast %1 : vector<1x8xf32> to vector<1x1x8xf32>
    %112 = vector.broadcast %111 : vector<1x1x8xf32> to vector<9x9x8xf32>
    %113 = arith.addf %110, %112 : vector<9x9x8xf32>
    %cst_146 = arith.constant 0.000000e+00 : f32
    %114 = vector.broadcast %cst_146 : f32 to vector<9x9x8xf32>
    %115 = arith.cmpf oge, %113, %114 : vector<9x9x8xf32>
    %cst_147 = arith.constant 2.000000e-01 : f32
    %116 = vector.broadcast %cst_147 : f32 to vector<9x9x8xf32>
    %117 = arith.mulf %116, %113 : vector<9x9x8xf32>
    %118 = arith.select %115, %113, %117 : vector<9x9x8xi1>, vector<9x9x8xf32>
    %c0_148 = arith.constant 0 : index
    %c0_149 = arith.constant 0 : index
    %c0_150 = arith.constant 0 : index
    %c0_151 = arith.constant 0 : index
    %119 = vector.load %arg4[%c0_148, %c0_149, %c0_150, %c0_151] : memref<1x9x9x8xf32, #tpu.memory_space<vmem>>, vector<1x9x9x8xf32>
    %120 = vector.shape_cast %119 : vector<1x9x9x8xf32> to vector<9x9x8xf32>
    %121 = vector.shape_cast %118 : vector<9x9x8xf32> to vector<1x9x9x8xf32>
    tpu.vector_store %arg4[%c0_148, %c0_149, %c0_150, %c0_151], %121 {strides = array<i32>} : memref<1x9x9x8xf32, #tpu.memory_space<vmem>>, vector<1x9x9x8xf32>,
    return
  }
  func.func @transform_0(%arg0: i32) -> (i32, i32, i32, i32) {
    %c0_i32 = arith.constant 0 : i32
    %c0_i32_0 = arith.constant 0 : i32
    %c0_i32_1 = arith.constant 0 : i32
    %c0_i32_2 = arith.constant 0 : i32
    return %arg0, %c0_i32, %c0_i32_0, %c0_i32_1 : i32, i32, i32, i32
  }
  func.func @transform_1(%arg0: i32) -> (i32, i32) {
    %c0_i32 = arith.constant 0 : i32
    %c0_i32_0 = arith.constant 0 : i32
    %c0_i32_1 = arith.constant 0 : i32
    return %c0_i32, %c0_i32_0 : i32, i32
  }
  func.func @transform_2(%arg0: i32) -> (i32, i32) {
    %c0_i32 = arith.constant 0 : i32
    %c0_i32_0 = arith.constant 0 : i32
    %c0_i32_1 = arith.constant 0 : i32
    return %c0_i32, %c0_i32_0 : i32, i32
  }
  func.func @transform_3(%arg0: i32) -> (i32, i32, i32, i32) {
    %c0_i32 = arith.constant 0 : i32
    %c0_i32_0 = arith.constant 0 : i32
    %c0_i32_1 = arith.constant 0 : i32
    %c0_i32_2 = arith.constant 0 : i32
    return %arg0, %c0_i32, %c0_i32_0, %c0_i32_1 : i32, i32, i32, i32
  }
}

module attributes {stable_mosaic.version = 11 : i64} {
  func.func @_fused_conv_group_kernel(%arg0: i32, %arg1: memref<1x7x7x32xf32, #tpu.memory_space<vmem>>, %arg2: memref<128x16xbf16, #tpu.memory_space<vmem>>, %arg3: memref<1x16xf32, #tpu.memory_space<vmem>>, %arg4: memref<1x5x5x16xf32, #tpu.memory_space<vmem>>) attributes {dimension_semantics = [#tpu.dimension_semantics<parallel>], iteration_bounds = array<i64: 2>, scalar_prefetch = 0 : i64, scratch_operands = 0 : i64, tpu.core_type = #tpu.core_type<tc>, window_params = [{transform_indices = @transform_0, window_bounds = array<i64: 1, 7, 7, 32>}, {pipeline_mode = #tpu.pipeline_mode<synchronous>, transform_indices = @transform_1, window_bounds = array<i64: 128, 16>}, {pipeline_mode = #tpu.pipeline_mode<synchronous>, transform_indices = @transform_2, window_bounds = array<i64: 1, 16>}, {transform_indices = @transform_3, window_bounds = array<i64: 1, 5, 5, 16>}]} {
    %c0 = arith.constant 0 : index
    %c0_0 = arith.constant 0 : index
    %0 = vector.load %arg2[%c0, %c0_0] : memref<128x16xbf16, #tpu.memory_space<vmem>>, vector<128x16xbf16>
    %c0_1 = arith.constant 0 : index
    %c0_2 = arith.constant 0 : index
    %1 = vector.load %arg3[%c0_1, %c0_2] : memref<1x16xf32, #tpu.memory_space<vmem>>, vector<1x16xf32>
    %c0_3 = arith.constant 0 : index
    %c0_4 = arith.constant 0 : index
    %c0_5 = arith.constant 0 : index
    %c0_6 = arith.constant 0 : index
    %2 = vector.load %arg1[%c0_3, %c0_4, %c0_5, %c0_6] : memref<1x7x7x32xf32, #tpu.memory_space<vmem>>, vector<1x1x5x32xf32>
    %3 = vector.shape_cast %2 : vector<1x1x5x32xf32> to vector<5x32xf32>
    %c0_7 = arith.constant 0 : index
    %c0_8 = arith.constant 0 : index
    %c1 = arith.constant 1 : index
    %c0_9 = arith.constant 0 : index
    %4 = vector.load %arg1[%c0_7, %c0_8, %c1, %c0_9] : memref<1x7x7x32xf32, #tpu.memory_space<vmem>>, vector<1x1x5x32xf32>
    %5 = vector.shape_cast %4 : vector<1x1x5x32xf32> to vector<5x32xf32>
    %c0_10 = arith.constant 0 : index
    %c1_11 = arith.constant 1 : index
    %c0_12 = arith.constant 0 : index
    %c0_13 = arith.constant 0 : index
    %6 = vector.load %arg1[%c0_10, %c1_11, %c0_12, %c0_13] : memref<1x7x7x32xf32, #tpu.memory_space<vmem>>, vector<1x1x5x32xf32>
    %7 = vector.shape_cast %6 : vector<1x1x5x32xf32> to vector<5x32xf32>
    %c0_14 = arith.constant 0 : index
    %c1_15 = arith.constant 1 : index
    %c1_16 = arith.constant 1 : index
    %c0_17 = arith.constant 0 : index
    %8 = vector.load %arg1[%c0_14, %c1_15, %c1_16, %c0_17] : memref<1x7x7x32xf32, #tpu.memory_space<vmem>>, vector<1x1x5x32xf32>
    %9 = vector.shape_cast %8 : vector<1x1x5x32xf32> to vector<5x32xf32>
    %10 = tpu.concatenate %3, %5, %7, %9 in 1 : vector<5x32xf32>, vector<5x32xf32>, vector<5x32xf32>, vector<5x32xf32> -> vector<5x128xf32>
    %11 = arith.truncf %10 : vector<5x128xf32> to vector<5x128xbf16>
    %cst = arith.constant dense<0.000000e+00> : vector<5x16xf32>
    %12 = tpu.matmul %11, %0, %cst {dimension_numbers = #tpu.dot_dimension_numbers<[1], [0], [0], [1], [0, 0, 1, 1], [], []>} : vector<5x128xbf16>, vector<128x16xbf16>, vector<5x16xf32> -> vector<5x16xf32>
    %c0_18 = arith.constant 0 : index
    %c1_19 = arith.constant 1 : index
    %c0_20 = arith.constant 0 : index
    %c0_21 = arith.constant 0 : index
    %13 = vector.load %arg1[%c0_18, %c1_19, %c0_20, %c0_21] : memref<1x7x7x32xf32, #tpu.memory_space<vmem>>, vector<1x1x5x32xf32>
    %14 = vector.shape_cast %13 : vector<1x1x5x32xf32> to vector<5x32xf32>
    %c0_22 = arith.constant 0 : index
    %c1_23 = arith.constant 1 : index
    %c1_24 = arith.constant 1 : index
    %c0_25 = arith.constant 0 : index
    %15 = vector.load %arg1[%c0_22, %c1_23, %c1_24, %c0_25] : memref<1x7x7x32xf32, #tpu.memory_space<vmem>>, vector<1x1x5x32xf32>
    %16 = vector.shape_cast %15 : vector<1x1x5x32xf32> to vector<5x32xf32>
    %c0_26 = arith.constant 0 : index
    %c2 = arith.constant 2 : index
    %c0_27 = arith.constant 0 : index
    %c0_28 = arith.constant 0 : index
    %17 = vector.load %arg1[%c0_26, %c2, %c0_27, %c0_28] : memref<1x7x7x32xf32, #tpu.memory_space<vmem>>, vector<1x1x5x32xf32>
    %18 = vector.shape_cast %17 : vector<1x1x5x32xf32> to vector<5x32xf32>
    %c0_29 = arith.constant 0 : index
    %c2_30 = arith.constant 2 : index
    %c1_31 = arith.constant 1 : index
    %c0_32 = arith.constant 0 : index
    %19 = vector.load %arg1[%c0_29, %c2_30, %c1_31, %c0_32] : memref<1x7x7x32xf32, #tpu.memory_space<vmem>>, vector<1x1x5x32xf32>
    %20 = vector.shape_cast %19 : vector<1x1x5x32xf32> to vector<5x32xf32>
    %21 = tpu.concatenate %14, %16, %18, %20 in 1 : vector<5x32xf32>, vector<5x32xf32>, vector<5x32xf32>, vector<5x32xf32> -> vector<5x128xf32>
    %22 = arith.truncf %21 : vector<5x128xf32> to vector<5x128xbf16>
    %cst_33 = arith.constant dense<0.000000e+00> : vector<5x16xf32>
    %23 = tpu.matmul %22, %0, %cst_33 {dimension_numbers = #tpu.dot_dimension_numbers<[1], [0], [0], [1], [0, 0, 1, 1], [], []>} : vector<5x128xbf16>, vector<128x16xbf16>, vector<5x16xf32> -> vector<5x16xf32>
    %c0_34 = arith.constant 0 : index
    %c2_35 = arith.constant 2 : index
    %c0_36 = arith.constant 0 : index
    %c0_37 = arith.constant 0 : index
    %24 = vector.load %arg1[%c0_34, %c2_35, %c0_36, %c0_37] : memref<1x7x7x32xf32, #tpu.memory_space<vmem>>, vector<1x1x5x32xf32>
    %25 = vector.shape_cast %24 : vector<1x1x5x32xf32> to vector<5x32xf32>
    %c0_38 = arith.constant 0 : index
    %c2_39 = arith.constant 2 : index
    %c1_40 = arith.constant 1 : index
    %c0_41 = arith.constant 0 : index
    %26 = vector.load %arg1[%c0_38, %c2_39, %c1_40, %c0_41] : memref<1x7x7x32xf32, #tpu.memory_space<vmem>>, vector<1x1x5x32xf32>
    %27 = vector.shape_cast %26 : vector<1x1x5x32xf32> to vector<5x32xf32>
    %c0_42 = arith.constant 0 : index
    %c3 = arith.constant 3 : index
    %c0_43 = arith.constant 0 : index
    %c0_44 = arith.constant 0 : index
    %28 = vector.load %arg1[%c0_42, %c3, %c0_43, %c0_44] : memref<1x7x7x32xf32, #tpu.memory_space<vmem>>, vector<1x1x5x32xf32>
    %29 = vector.shape_cast %28 : vector<1x1x5x32xf32> to vector<5x32xf32>
    %c0_45 = arith.constant 0 : index
    %c3_46 = arith.constant 3 : index
    %c1_47 = arith.constant 1 : index
    %c0_48 = arith.constant 0 : index
    %30 = vector.load %arg1[%c0_45, %c3_46, %c1_47, %c0_48] : memref<1x7x7x32xf32, #tpu.memory_space<vmem>>, vector<1x1x5x32xf32>
    %31 = vector.shape_cast %30 : vector<1x1x5x32xf32> to vector<5x32xf32>
    %32 = tpu.concatenate %25, %27, %29, %31 in 1 : vector<5x32xf32>, vector<5x32xf32>, vector<5x32xf32>, vector<5x32xf32> -> vector<5x128xf32>
    %33 = arith.truncf %32 : vector<5x128xf32> to vector<5x128xbf16>
    %cst_49 = arith.constant dense<0.000000e+00> : vector<5x16xf32>
    %34 = tpu.matmul %33, %0, %cst_49 {dimension_numbers = #tpu.dot_dimension_numbers<[1], [0], [0], [1], [0, 0, 1, 1], [], []>} : vector<5x128xbf16>, vector<128x16xbf16>, vector<5x16xf32> -> vector<5x16xf32>
    %c0_50 = arith.constant 0 : index
    %c3_51 = arith.constant 3 : index
    %c0_52 = arith.constant 0 : index
    %c0_53 = arith.constant 0 : index
    %35 = vector.load %arg1[%c0_50, %c3_51, %c0_52, %c0_53] : memref<1x7x7x32xf32, #tpu.memory_space<vmem>>, vector<1x1x5x32xf32>
    %36 = vector.shape_cast %35 : vector<1x1x5x32xf32> to vector<5x32xf32>
    %c0_54 = arith.constant 0 : index
    %c3_55 = arith.constant 3 : index
    %c1_56 = arith.constant 1 : index
    %c0_57 = arith.constant 0 : index
    %37 = vector.load %arg1[%c0_54, %c3_55, %c1_56, %c0_57] : memref<1x7x7x32xf32, #tpu.memory_space<vmem>>, vector<1x1x5x32xf32>
    %38 = vector.shape_cast %37 : vector<1x1x5x32xf32> to vector<5x32xf32>
    %c0_58 = arith.constant 0 : index
    %c4 = arith.constant 4 : index
    %c0_59 = arith.constant 0 : index
    %c0_60 = arith.constant 0 : index
    %39 = vector.load %arg1[%c0_58, %c4, %c0_59, %c0_60] : memref<1x7x7x32xf32, #tpu.memory_space<vmem>>, vector<1x1x5x32xf32>
    %40 = vector.shape_cast %39 : vector<1x1x5x32xf32> to vector<5x32xf32>
    %c0_61 = arith.constant 0 : index
    %c4_62 = arith.constant 4 : index
    %c1_63 = arith.constant 1 : index
    %c0_64 = arith.constant 0 : index
    %41 = vector.load %arg1[%c0_61, %c4_62, %c1_63, %c0_64] : memref<1x7x7x32xf32, #tpu.memory_space<vmem>>, vector<1x1x5x32xf32>
    %42 = vector.shape_cast %41 : vector<1x1x5x32xf32> to vector<5x32xf32>
    %43 = tpu.concatenate %36, %38, %40, %42 in 1 : vector<5x32xf32>, vector<5x32xf32>, vector<5x32xf32>, vector<5x32xf32> -> vector<5x128xf32>
    %44 = arith.truncf %43 : vector<5x128xf32> to vector<5x128xbf16>
    %cst_65 = arith.constant dense<0.000000e+00> : vector<5x16xf32>
    %45 = tpu.matmul %44, %0, %cst_65 {dimension_numbers = #tpu.dot_dimension_numbers<[1], [0], [0], [1], [0, 0, 1, 1], [], []>} : vector<5x128xbf16>, vector<128x16xbf16>, vector<5x16xf32> -> vector<5x16xf32>
    %c0_66 = arith.constant 0 : index
    %c4_67 = arith.constant 4 : index
    %c0_68 = arith.constant 0 : index
    %c0_69 = arith.constant 0 : index
    %46 = vector.load %arg1[%c0_66, %c4_67, %c0_68, %c0_69] : memref<1x7x7x32xf32, #tpu.memory_space<vmem>>, vector<1x1x5x32xf32>
    %47 = vector.shape_cast %46 : vector<1x1x5x32xf32> to vector<5x32xf32>
    %c0_70 = arith.constant 0 : index
    %c4_71 = arith.constant 4 : index
    %c1_72 = arith.constant 1 : index
    %c0_73 = arith.constant 0 : index
    %48 = vector.load %arg1[%c0_70, %c4_71, %c1_72, %c0_73] : memref<1x7x7x32xf32, #tpu.memory_space<vmem>>, vector<1x1x5x32xf32>
    %49 = vector.shape_cast %48 : vector<1x1x5x32xf32> to vector<5x32xf32>
    %c0_74 = arith.constant 0 : index
    %c5 = arith.constant 5 : index
    %c0_75 = arith.constant 0 : index
    %c0_76 = arith.constant 0 : index
    %50 = vector.load %arg1[%c0_74, %c5, %c0_75, %c0_76] : memref<1x7x7x32xf32, #tpu.memory_space<vmem>>, vector<1x1x5x32xf32>
    %51 = vector.shape_cast %50 : vector<1x1x5x32xf32> to vector<5x32xf32>
    %c0_77 = arith.constant 0 : index
    %c5_78 = arith.constant 5 : index
    %c1_79 = arith.constant 1 : index
    %c0_80 = arith.constant 0 : index
    %52 = vector.load %arg1[%c0_77, %c5_78, %c1_79, %c0_80] : memref<1x7x7x32xf32, #tpu.memory_space<vmem>>, vector<1x1x5x32xf32>
    %53 = vector.shape_cast %52 : vector<1x1x5x32xf32> to vector<5x32xf32>
    %54 = tpu.concatenate %47, %49, %51, %53 in 1 : vector<5x32xf32>, vector<5x32xf32>, vector<5x32xf32>, vector<5x32xf32> -> vector<5x128xf32>
    %55 = arith.truncf %54 : vector<5x128xf32> to vector<5x128xbf16>
    %cst_81 = arith.constant dense<0.000000e+00> : vector<5x16xf32>
    %56 = tpu.matmul %55, %0, %cst_81 {dimension_numbers = #tpu.dot_dimension_numbers<[1], [0], [0], [1], [0, 0, 1, 1], [], []>} : vector<5x128xbf16>, vector<128x16xbf16>, vector<5x16xf32> -> vector<5x16xf32>
    %57 = vector.shape_cast %12 : vector<5x16xf32> to vector<1x5x16xf32>
    %58 = vector.shape_cast %23 : vector<5x16xf32> to vector<1x5x16xf32>
    %59 = vector.shape_cast %34 : vector<5x16xf32> to vector<1x5x16xf32>
    %60 = vector.shape_cast %45 : vector<5x16xf32> to vector<1x5x16xf32>
    %61 = vector.shape_cast %56 : vector<5x16xf32> to vector<1x5x16xf32>
    %62 = tpu.concatenate %57, %58, %59, %60, %61 in 0 : vector<1x5x16xf32>, vector<1x5x16xf32>, vector<1x5x16xf32>, vector<1x5x16xf32>, vector<1x5x16xf32> -> vector<5x5x16xf32>
    %63 = vector.shape_cast %1 : vector<1x16xf32> to vector<1x1x16xf32>
    %64 = vector.broadcast %63 : vector<1x1x16xf32> to vector<5x5x16xf32>
    %65 = arith.addf %62, %64 : vector<5x5x16xf32>
    %cst_82 = arith.constant dense<0.000000e+00> : vector<16xf32>
    %66 = vector.multi_reduction <add>, %65, %cst_82 [0, 1] : vector<5x5x16xf32> to vector<16xf32>
    %67 = vector.shape_cast %66 : vector<16xf32> to vector<1x1x16xf32>
    %cst_83 = arith.constant 2.500000e+01 : f32
    %68 = vector.broadcast %cst_83 : f32 to vector<1x1x16xf32>
    %69 = arith.divf %67, %68 : vector<1x1x16xf32>
    %70 = arith.mulf %65, %65 : vector<5x5x16xf32>
    %cst_84 = arith.constant dense<0.000000e+00> : vector<16xf32>
    %71 = vector.multi_reduction <add>, %70, %cst_84 [0, 1] : vector<5x5x16xf32> to vector<16xf32>
    %72 = vector.shape_cast %71 : vector<16xf32> to vector<1x1x16xf32>
    %cst_85 = arith.constant 2.500000e+01 : f32
    %73 = vector.broadcast %cst_85 : f32 to vector<1x1x16xf32>
    %74 = arith.divf %72, %73 : vector<1x1x16xf32>
    %75 = arith.mulf %69, %69 : vector<1x1x16xf32>
    %76 = arith.subf %74, %75 : vector<1x1x16xf32>
    %77 = vector.broadcast %69 : vector<1x1x16xf32> to vector<5x5x16xf32>
    %78 = arith.subf %65, %77 : vector<5x5x16xf32>
    %cst_86 = arith.constant 0.000000e+00 : f32
    %79 = vector.broadcast %cst_86 : f32 to vector<1x1x16xf32>
    %80 = arith.maximumf %76, %79 : vector<1x1x16xf32>
    %cst_87 = arith.constant 9.99999974E-6 : f32
    %81 = vector.broadcast %cst_87 : f32 to vector<1x1x16xf32>
    %82 = arith.addf %80, %81 : vector<1x1x16xf32>
    %83 = math.rsqrt %82 : vector<1x1x16xf32>
    %84 = vector.broadcast %83 : vector<1x1x16xf32> to vector<5x5x16xf32>
    %85 = arith.mulf %78, %84 : vector<5x5x16xf32>
    %cst_88 = arith.constant 0.000000e+00 : f32
    %86 = vector.broadcast %cst_88 : f32 to vector<5x5x16xf32>
    %87 = arith.cmpf oge, %85, %86 : vector<5x5x16xf32>
    %cst_89 = arith.constant 2.000000e-01 : f32
    %88 = vector.broadcast %cst_89 : f32 to vector<5x5x16xf32>
    %89 = arith.mulf %88, %85 : vector<5x5x16xf32>
    %90 = arith.select %87, %85, %89 : vector<5x5x16xi1>, vector<5x5x16xf32>
    %c0_90 = arith.constant 0 : index
    %c0_91 = arith.constant 0 : index
    %c0_92 = arith.constant 0 : index
    %c0_93 = arith.constant 0 : index
    %91 = vector.load %arg4[%c0_90, %c0_91, %c0_92, %c0_93] : memref<1x5x5x16xf32, #tpu.memory_space<vmem>>, vector<1x5x5x16xf32>
    %92 = vector.shape_cast %91 : vector<1x5x5x16xf32> to vector<5x5x16xf32>
    %93 = vector.shape_cast %90 : vector<5x5x16xf32> to vector<1x5x5x16xf32>
    tpu.vector_store %arg4[%c0_90, %c0_91, %c0_92, %c0_93], %93 {strides = array<i32>} : memref<1x5x5x16xf32, #tpu.memory_space<vmem>>, vector<1x5x5x16xf32>,
    return
  }
  func.func @transform_0(%arg0: i32) -> (i32, i32, i32, i32) {
    %c0_i32 = arith.constant 0 : i32
    %c0_i32_0 = arith.constant 0 : i32
    %c0_i32_1 = arith.constant 0 : i32
    %c0_i32_2 = arith.constant 0 : i32
    return %arg0, %c0_i32, %c0_i32_0, %c0_i32_1 : i32, i32, i32, i32
  }
  func.func @transform_1(%arg0: i32) -> (i32, i32) {
    %c0_i32 = arith.constant 0 : i32
    %c0_i32_0 = arith.constant 0 : i32
    %c0_i32_1 = arith.constant 0 : i32
    return %c0_i32, %c0_i32_0 : i32, i32
  }
  func.func @transform_2(%arg0: i32) -> (i32, i32) {
    %c0_i32 = arith.constant 0 : i32
    %c0_i32_0 = arith.constant 0 : i32
    %c0_i32_1 = arith.constant 0 : i32
    return %c0_i32, %c0_i32_0 : i32, i32
  }
  func.func @transform_3(%arg0: i32) -> (i32, i32, i32, i32) {
    %c0_i32 = arith.constant 0 : i32
    %c0_i32_0 = arith.constant 0 : i32
    %c0_i32_1 = arith.constant 0 : i32
    %c0_i32_2 = arith.constant 0 : i32
    return %arg0, %c0_i32, %c0_i32_0, %c0_i32_1 : i32, i32, i32, i32
  }
}

module attributes {stable_mosaic.version = 11 : i64} {
  func.func @_fused_conv_group_kernel(%arg0: i32, %arg1: memref<1x9x9x16xf32, #tpu.memory_space<vmem>>, %arg2: memref<256x32xbf16, #tpu.memory_space<vmem>>, %arg3: memref<1x32xf32, #tpu.memory_space<vmem>>, %arg4: memref<1x6x6x32xf32, #tpu.memory_space<vmem>>) attributes {dimension_semantics = [#tpu.dimension_semantics<parallel>], iteration_bounds = array<i64: 2>, scalar_prefetch = 0 : i64, scratch_operands = 0 : i64, tpu.core_type = #tpu.core_type<tc>, window_params = [{transform_indices = @transform_0, window_bounds = array<i64: 1, 9, 9, 16>}, {pipeline_mode = #tpu.pipeline_mode<synchronous>, transform_indices = @transform_1, window_bounds = array<i64: 256, 32>}, {pipeline_mode = #tpu.pipeline_mode<synchronous>, transform_indices = @transform_2, window_bounds = array<i64: 1, 32>}, {transform_indices = @transform_3, window_bounds = array<i64: 1, 6, 6, 32>}]} {
    %c0 = arith.constant 0 : index
    %c0_0 = arith.constant 0 : index
    %0 = vector.load %arg2[%c0, %c0_0] : memref<256x32xbf16, #tpu.memory_space<vmem>>, vector<256x32xbf16>
    %c0_1 = arith.constant 0 : index
    %c0_2 = arith.constant 0 : index
    %1 = vector.load %arg3[%c0_1, %c0_2] : memref<1x32xf32, #tpu.memory_space<vmem>>, vector<1x32xf32>
    %c0_3 = arith.constant 0 : index
    %c0_4 = arith.constant 0 : index
    %c0_5 = arith.constant 0 : index
    %c0_6 = arith.constant 0 : index
    %2 = vector.load %arg1[%c0_3, %c0_4, %c0_5, %c0_6] : memref<1x9x9x16xf32, #tpu.memory_space<vmem>>, vector<1x1x6x16xf32>
    %3 = vector.shape_cast %2 : vector<1x1x6x16xf32> to vector<6x16xf32>
    %c0_7 = arith.constant 0 : index
    %c0_8 = arith.constant 0 : index
    %c1 = arith.constant 1 : index
    %c0_9 = arith.constant 0 : index
    %4 = vector.load %arg1[%c0_7, %c0_8, %c1, %c0_9] : memref<1x9x9x16xf32, #tpu.memory_space<vmem>>, vector<1x1x6x16xf32>
    %5 = vector.shape_cast %4 : vector<1x1x6x16xf32> to vector<6x16xf32>
    %c0_10 = arith.constant 0 : index
    %c0_11 = arith.constant 0 : index
    %c2 = arith.constant 2 : index
    %c0_12 = arith.constant 0 : index
    %6 = vector.load %arg1[%c0_10, %c0_11, %c2, %c0_12] : memref<1x9x9x16xf32, #tpu.memory_space<vmem>>, vector<1x1x6x16xf32>
    %7 = vector.shape_cast %6 : vector<1x1x6x16xf32> to vector<6x16xf32>
    %c0_13 = arith.constant 0 : index
    %c0_14 = arith.constant 0 : index
    %c3 = arith.constant 3 : index
    %c0_15 = arith.constant 0 : index
    %8 = vector.load %arg1[%c0_13, %c0_14, %c3, %c0_15] : memref<1x9x9x16xf32, #tpu.memory_space<vmem>>, vector<1x1x6x16xf32>
    %9 = vector.shape_cast %8 : vector<1x1x6x16xf32> to vector<6x16xf32>
    %c0_16 = arith.constant 0 : index
    %c1_17 = arith.constant 1 : index
    %c0_18 = arith.constant 0 : index
    %c0_19 = arith.constant 0 : index
    %10 = vector.load %arg1[%c0_16, %c1_17, %c0_18, %c0_19] : memref<1x9x9x16xf32, #tpu.memory_space<vmem>>, vector<1x1x6x16xf32>
    %11 = vector.shape_cast %10 : vector<1x1x6x16xf32> to vector<6x16xf32>
    %c0_20 = arith.constant 0 : index
    %c1_21 = arith.constant 1 : index
    %c1_22 = arith.constant 1 : index
    %c0_23 = arith.constant 0 : index
    %12 = vector.load %arg1[%c0_20, %c1_21, %c1_22, %c0_23] : memref<1x9x9x16xf32, #tpu.memory_space<vmem>>, vector<1x1x6x16xf32>
    %13 = vector.shape_cast %12 : vector<1x1x6x16xf32> to vector<6x16xf32>
    %c0_24 = arith.constant 0 : index
    %c1_25 = arith.constant 1 : index
    %c2_26 = arith.constant 2 : index
    %c0_27 = arith.constant 0 : index
    %14 = vector.load %arg1[%c0_24, %c1_25, %c2_26, %c0_27] : memref<1x9x9x16xf32, #tpu.memory_space<vmem>>, vector<1x1x6x16xf32>
    %15 = vector.shape_cast %14 : vector<1x1x6x16xf32> to vector<6x16xf32>
    %c0_28 = arith.constant 0 : index
    %c1_29 = arith.constant 1 : index
    %c3_30 = arith.constant 3 : index
    %c0_31 = arith.constant 0 : index
    %16 = vector.load %arg1[%c0_28, %c1_29, %c3_30, %c0_31] : memref<1x9x9x16xf32, #tpu.memory_space<vmem>>, vector<1x1x6x16xf32>
    %17 = vector.shape_cast %16 : vector<1x1x6x16xf32> to vector<6x16xf32>
    %c0_32 = arith.constant 0 : index
    %c2_33 = arith.constant 2 : index
    %c0_34 = arith.constant 0 : index
    %c0_35 = arith.constant 0 : index
    %18 = vector.load %arg1[%c0_32, %c2_33, %c0_34, %c0_35] : memref<1x9x9x16xf32, #tpu.memory_space<vmem>>, vector<1x1x6x16xf32>
    %19 = vector.shape_cast %18 : vector<1x1x6x16xf32> to vector<6x16xf32>
    %c0_36 = arith.constant 0 : index
    %c2_37 = arith.constant 2 : index
    %c1_38 = arith.constant 1 : index
    %c0_39 = arith.constant 0 : index
    %20 = vector.load %arg1[%c0_36, %c2_37, %c1_38, %c0_39] : memref<1x9x9x16xf32, #tpu.memory_space<vmem>>, vector<1x1x6x16xf32>
    %21 = vector.shape_cast %20 : vector<1x1x6x16xf32> to vector<6x16xf32>
    %c0_40 = arith.constant 0 : index
    %c2_41 = arith.constant 2 : index
    %c2_42 = arith.constant 2 : index
    %c0_43 = arith.constant 0 : index
    %22 = vector.load %arg1[%c0_40, %c2_41, %c2_42, %c0_43] : memref<1x9x9x16xf32, #tpu.memory_space<vmem>>, vector<1x1x6x16xf32>
    %23 = vector.shape_cast %22 : vector<1x1x6x16xf32> to vector<6x16xf32>
    %c0_44 = arith.constant 0 : index
    %c2_45 = arith.constant 2 : index
    %c3_46 = arith.constant 3 : index
    %c0_47 = arith.constant 0 : index
    %24 = vector.load %arg1[%c0_44, %c2_45, %c3_46, %c0_47] : memref<1x9x9x16xf32, #tpu.memory_space<vmem>>, vector<1x1x6x16xf32>
    %25 = vector.shape_cast %24 : vector<1x1x6x16xf32> to vector<6x16xf32>
    %c0_48 = arith.constant 0 : index
    %c3_49 = arith.constant 3 : index
    %c0_50 = arith.constant 0 : index
    %c0_51 = arith.constant 0 : index
    %26 = vector.load %arg1[%c0_48, %c3_49, %c0_50, %c0_51] : memref<1x9x9x16xf32, #tpu.memory_space<vmem>>, vector<1x1x6x16xf32>
    %27 = vector.shape_cast %26 : vector<1x1x6x16xf32> to vector<6x16xf32>
    %c0_52 = arith.constant 0 : index
    %c3_53 = arith.constant 3 : index
    %c1_54 = arith.constant 1 : index
    %c0_55 = arith.constant 0 : index
    %28 = vector.load %arg1[%c0_52, %c3_53, %c1_54, %c0_55] : memref<1x9x9x16xf32, #tpu.memory_space<vmem>>, vector<1x1x6x16xf32>
    %29 = vector.shape_cast %28 : vector<1x1x6x16xf32> to vector<6x16xf32>
    %c0_56 = arith.constant 0 : index
    %c3_57 = arith.constant 3 : index
    %c2_58 = arith.constant 2 : index
    %c0_59 = arith.constant 0 : index
    %30 = vector.load %arg1[%c0_56, %c3_57, %c2_58, %c0_59] : memref<1x9x9x16xf32, #tpu.memory_space<vmem>>, vector<1x1x6x16xf32>
    %31 = vector.shape_cast %30 : vector<1x1x6x16xf32> to vector<6x16xf32>
    %c0_60 = arith.constant 0 : index
    %c3_61 = arith.constant 3 : index
    %c3_62 = arith.constant 3 : index
    %c0_63 = arith.constant 0 : index
    %32 = vector.load %arg1[%c0_60, %c3_61, %c3_62, %c0_63] : memref<1x9x9x16xf32, #tpu.memory_space<vmem>>, vector<1x1x6x16xf32>
    %33 = vector.shape_cast %32 : vector<1x1x6x16xf32> to vector<6x16xf32>
    %34 = tpu.concatenate %3, %5, %7, %9, %11, %13, %15, %17, %19, %21, %23, %25, %27, %29, %31, %33 in 1 : vector<6x16xf32>, vector<6x16xf32>, vector<6x16xf32>, vector<6x16xf32>, vector<6x16xf32>, vector<6x16xf32>, vector<6x16xf32>, vector<6x16xf32>, vector<6x16xf32>, vector<6x16xf32>, vector<6x16xf32>, vector<6x16xf32>, vector<6x16xf32>, vector<6x16xf32>, vector<6x16xf32>, vector<6x16xf32> -> vector<6x256xf32>
    %35 = arith.truncf %34 : vector<6x256xf32> to vector<6x256xbf16>
    %cst = arith.constant dense<0.000000e+00> : vector<6x32xf32>
    %36 = tpu.matmul %35, %0, %cst {dimension_numbers = #tpu.dot_dimension_numbers<[1], [0], [0], [1], [0, 0, 1, 1], [], []>} : vector<6x256xbf16>, vector<256x32xbf16>, vector<6x32xf32> -> vector<6x32xf32>
    %c0_64 = arith.constant 0 : index
    %c1_65 = arith.constant 1 : index
    %c0_66 = arith.constant 0 : index
    %c0_67 = arith.constant 0 : index
    %37 = vector.load %arg1[%c0_64, %c1_65, %c0_66, %c0_67] : memref<1x9x9x16xf32, #tpu.memory_space<vmem>>, vector<1x1x6x16xf32>
    %38 = vector.shape_cast %37 : vector<1x1x6x16xf32> to vector<6x16xf32>
    %c0_68 = arith.constant 0 : index
    %c1_69 = arith.constant 1 : index
    %c1_70 = arith.constant 1 : index
    %c0_71 = arith.constant 0 : index
    %39 = vector.load %arg1[%c0_68, %c1_69, %c1_70, %c0_71] : memref<1x9x9x16xf32, #tpu.memory_space<vmem>>, vector<1x1x6x16xf32>
    %40 = vector.shape_cast %39 : vector<1x1x6x16xf32> to vector<6x16xf32>
    %c0_72 = arith.constant 0 : index
    %c1_73 = arith.constant 1 : index
    %c2_74 = arith.constant 2 : index
    %c0_75 = arith.constant 0 : index
    %41 = vector.load %arg1[%c0_72, %c1_73, %c2_74, %c0_75] : memref<1x9x9x16xf32, #tpu.memory_space<vmem>>, vector<1x1x6x16xf32>
    %42 = vector.shape_cast %41 : vector<1x1x6x16xf32> to vector<6x16xf32>
    %c0_76 = arith.constant 0 : index
    %c1_77 = arith.constant 1 : index
    %c3_78 = arith.constant 3 : index
    %c0_79 = arith.constant 0 : index
    %43 = vector.load %arg1[%c0_76, %c1_77, %c3_78, %c0_79] : memref<1x9x9x16xf32, #tpu.memory_space<vmem>>, vector<1x1x6x16xf32>
    %44 = vector.shape_cast %43 : vector<1x1x6x16xf32> to vector<6x16xf32>
    %c0_80 = arith.constant 0 : index
    %c2_81 = arith.constant 2 : index
    %c0_82 = arith.constant 0 : index
    %c0_83 = arith.constant 0 : index
    %45 = vector.load %arg1[%c0_80, %c2_81, %c0_82, %c0_83] : memref<1x9x9x16xf32, #tpu.memory_space<vmem>>, vector<1x1x6x16xf32>
    %46 = vector.shape_cast %45 : vector<1x1x6x16xf32> to vector<6x16xf32>
    %c0_84 = arith.constant 0 : index
    %c2_85 = arith.constant 2 : index
    %c1_86 = arith.constant 1 : index
    %c0_87 = arith.constant 0 : index
    %47 = vector.load %arg1[%c0_84, %c2_85, %c1_86, %c0_87] : memref<1x9x9x16xf32, #tpu.memory_space<vmem>>, vector<1x1x6x16xf32>
    %48 = vector.shape_cast %47 : vector<1x1x6x16xf32> to vector<6x16xf32>
    %c0_88 = arith.constant 0 : index
    %c2_89 = arith.constant 2 : index
    %c2_90 = arith.constant 2 : index
    %c0_91 = arith.constant 0 : index
    %49 = vector.load %arg1[%c0_88, %c2_89, %c2_90, %c0_91] : memref<1x9x9x16xf32, #tpu.memory_space<vmem>>, vector<1x1x6x16xf32>
    %50 = vector.shape_cast %49 : vector<1x1x6x16xf32> to vector<6x16xf32>
    %c0_92 = arith.constant 0 : index
    %c2_93 = arith.constant 2 : index
    %c3_94 = arith.constant 3 : index
    %c0_95 = arith.constant 0 : index
    %51 = vector.load %arg1[%c0_92, %c2_93, %c3_94, %c0_95] : memref<1x9x9x16xf32, #tpu.memory_space<vmem>>, vector<1x1x6x16xf32>
    %52 = vector.shape_cast %51 : vector<1x1x6x16xf32> to vector<6x16xf32>
    %c0_96 = arith.constant 0 : index
    %c3_97 = arith.constant 3 : index
    %c0_98 = arith.constant 0 : index
    %c0_99 = arith.constant 0 : index
    %53 = vector.load %arg1[%c0_96, %c3_97, %c0_98, %c0_99] : memref<1x9x9x16xf32, #tpu.memory_space<vmem>>, vector<1x1x6x16xf32>
    %54 = vector.shape_cast %53 : vector<1x1x6x16xf32> to vector<6x16xf32>
    %c0_100 = arith.constant 0 : index
    %c3_101 = arith.constant 3 : index
    %c1_102 = arith.constant 1 : index
    %c0_103 = arith.constant 0 : index
    %55 = vector.load %arg1[%c0_100, %c3_101, %c1_102, %c0_103] : memref<1x9x9x16xf32, #tpu.memory_space<vmem>>, vector<1x1x6x16xf32>
    %56 = vector.shape_cast %55 : vector<1x1x6x16xf32> to vector<6x16xf32>
    %c0_104 = arith.constant 0 : index
    %c3_105 = arith.constant 3 : index
    %c2_106 = arith.constant 2 : index
    %c0_107 = arith.constant 0 : index
    %57 = vector.load %arg1[%c0_104, %c3_105, %c2_106, %c0_107] : memref<1x9x9x16xf32, #tpu.memory_space<vmem>>, vector<1x1x6x16xf32>
    %58 = vector.shape_cast %57 : vector<1x1x6x16xf32> to vector<6x16xf32>
    %c0_108 = arith.constant 0 : index
    %c3_109 = arith.constant 3 : index
    %c3_110 = arith.constant 3 : index
    %c0_111 = arith.constant 0 : index
    %59 = vector.load %arg1[%c0_108, %c3_109, %c3_110, %c0_111] : memref<1x9x9x16xf32, #tpu.memory_space<vmem>>, vector<1x1x6x16xf32>
    %60 = vector.shape_cast %59 : vector<1x1x6x16xf32> to vector<6x16xf32>
    %c0_112 = arith.constant 0 : index
    %c4 = arith.constant 4 : index
    %c0_113 = arith.constant 0 : index
    %c0_114 = arith.constant 0 : index
    %61 = vector.load %arg1[%c0_112, %c4, %c0_113, %c0_114] : memref<1x9x9x16xf32, #tpu.memory_space<vmem>>, vector<1x1x6x16xf32>
    %62 = vector.shape_cast %61 : vector<1x1x6x16xf32> to vector<6x16xf32>
    %c0_115 = arith.constant 0 : index
    %c4_116 = arith.constant 4 : index
    %c1_117 = arith.constant 1 : index
    %c0_118 = arith.constant 0 : index
    %63 = vector.load %arg1[%c0_115, %c4_116, %c1_117, %c0_118] : memref<1x9x9x16xf32, #tpu.memory_space<vmem>>, vector<1x1x6x16xf32>
    %64 = vector.shape_cast %63 : vector<1x1x6x16xf32> to vector<6x16xf32>
    %c0_119 = arith.constant 0 : index
    %c4_120 = arith.constant 4 : index
    %c2_121 = arith.constant 2 : index
    %c0_122 = arith.constant 0 : index
    %65 = vector.load %arg1[%c0_119, %c4_120, %c2_121, %c0_122] : memref<1x9x9x16xf32, #tpu.memory_space<vmem>>, vector<1x1x6x16xf32>
    %66 = vector.shape_cast %65 : vector<1x1x6x16xf32> to vector<6x16xf32>
    %c0_123 = arith.constant 0 : index
    %c4_124 = arith.constant 4 : index
    %c3_125 = arith.constant 3 : index
    %c0_126 = arith.constant 0 : index
    %67 = vector.load %arg1[%c0_123, %c4_124, %c3_125, %c0_126] : memref<1x9x9x16xf32, #tpu.memory_space<vmem>>, vector<1x1x6x16xf32>
    %68 = vector.shape_cast %67 : vector<1x1x6x16xf32> to vector<6x16xf32>
    %69 = tpu.concatenate %38, %40, %42, %44, %46, %48, %50, %52, %54, %56, %58, %60, %62, %64, %66, %68 in 1 : vector<6x16xf32>, vector<6x16xf32>, vector<6x16xf32>, vector<6x16xf32>, vector<6x16xf32>, vector<6x16xf32>, vector<6x16xf32>, vector<6x16xf32>, vector<6x16xf32>, vector<6x16xf32>, vector<6x16xf32>, vector<6x16xf32>, vector<6x16xf32>, vector<6x16xf32>, vector<6x16xf32>, vector<6x16xf32> -> vector<6x256xf32>
    %70 = arith.truncf %69 : vector<6x256xf32> to vector<6x256xbf16>
    %cst_127 = arith.constant dense<0.000000e+00> : vector<6x32xf32>
    %71 = tpu.matmul %70, %0, %cst_127 {dimension_numbers = #tpu.dot_dimension_numbers<[1], [0], [0], [1], [0, 0, 1, 1], [], []>} : vector<6x256xbf16>, vector<256x32xbf16>, vector<6x32xf32> -> vector<6x32xf32>
    %c0_128 = arith.constant 0 : index
    %c2_129 = arith.constant 2 : index
    %c0_130 = arith.constant 0 : index
    %c0_131 = arith.constant 0 : index
    %72 = vector.load %arg1[%c0_128, %c2_129, %c0_130, %c0_131] : memref<1x9x9x16xf32, #tpu.memory_space<vmem>>, vector<1x1x6x16xf32>
    %73 = vector.shape_cast %72 : vector<1x1x6x16xf32> to vector<6x16xf32>
    %c0_132 = arith.constant 0 : index
    %c2_133 = arith.constant 2 : index
    %c1_134 = arith.constant 1 : index
    %c0_135 = arith.constant 0 : index
    %74 = vector.load %arg1[%c0_132, %c2_133, %c1_134, %c0_135] : memref<1x9x9x16xf32, #tpu.memory_space<vmem>>, vector<1x1x6x16xf32>
    %75 = vector.shape_cast %74 : vector<1x1x6x16xf32> to vector<6x16xf32>
    %c0_136 = arith.constant 0 : index
    %c2_137 = arith.constant 2 : index
    %c2_138 = arith.constant 2 : index
    %c0_139 = arith.constant 0 : index
    %76 = vector.load %arg1[%c0_136, %c2_137, %c2_138, %c0_139] : memref<1x9x9x16xf32, #tpu.memory_space<vmem>>, vector<1x1x6x16xf32>
    %77 = vector.shape_cast %76 : vector<1x1x6x16xf32> to vector<6x16xf32>
    %c0_140 = arith.constant 0 : index
    %c2_141 = arith.constant 2 : index
    %c3_142 = arith.constant 3 : index
    %c0_143 = arith.constant 0 : index
    %78 = vector.load %arg1[%c0_140, %c2_141, %c3_142, %c0_143] : memref<1x9x9x16xf32, #tpu.memory_space<vmem>>, vector<1x1x6x16xf32>
    %79 = vector.shape_cast %78 : vector<1x1x6x16xf32> to vector<6x16xf32>
    %c0_144 = arith.constant 0 : index
    %c3_145 = arith.constant 3 : index
    %c0_146 = arith.constant 0 : index
    %c0_147 = arith.constant 0 : index
    %80 = vector.load %arg1[%c0_144, %c3_145, %c0_146, %c0_147] : memref<1x9x9x16xf32, #tpu.memory_space<vmem>>, vector<1x1x6x16xf32>
    %81 = vector.shape_cast %80 : vector<1x1x6x16xf32> to vector<6x16xf32>
    %c0_148 = arith.constant 0 : index
    %c3_149 = arith.constant 3 : index
    %c1_150 = arith.constant 1 : index
    %c0_151 = arith.constant 0 : index
    %82 = vector.load %arg1[%c0_148, %c3_149, %c1_150, %c0_151] : memref<1x9x9x16xf32, #tpu.memory_space<vmem>>, vector<1x1x6x16xf32>
    %83 = vector.shape_cast %82 : vector<1x1x6x16xf32> to vector<6x16xf32>
    %c0_152 = arith.constant 0 : index
    %c3_153 = arith.constant 3 : index
    %c2_154 = arith.constant 2 : index
    %c0_155 = arith.constant 0 : index
    %84 = vector.load %arg1[%c0_152, %c3_153, %c2_154, %c0_155] : memref<1x9x9x16xf32, #tpu.memory_space<vmem>>, vector<1x1x6x16xf32>
    %85 = vector.shape_cast %84 : vector<1x1x6x16xf32> to vector<6x16xf32>
    %c0_156 = arith.constant 0 : index
    %c3_157 = arith.constant 3 : index
    %c3_158 = arith.constant 3 : index
    %c0_159 = arith.constant 0 : index
    %86 = vector.load %arg1[%c0_156, %c3_157, %c3_158, %c0_159] : memref<1x9x9x16xf32, #tpu.memory_space<vmem>>, vector<1x1x6x16xf32>
    %87 = vector.shape_cast %86 : vector<1x1x6x16xf32> to vector<6x16xf32>
    %c0_160 = arith.constant 0 : index
    %c4_161 = arith.constant 4 : index
    %c0_162 = arith.constant 0 : index
    %c0_163 = arith.constant 0 : index
    %88 = vector.load %arg1[%c0_160, %c4_161, %c0_162, %c0_163] : memref<1x9x9x16xf32, #tpu.memory_space<vmem>>, vector<1x1x6x16xf32>
    %89 = vector.shape_cast %88 : vector<1x1x6x16xf32> to vector<6x16xf32>
    %c0_164 = arith.constant 0 : index
    %c4_165 = arith.constant 4 : index
    %c1_166 = arith.constant 1 : index
    %c0_167 = arith.constant 0 : index
    %90 = vector.load %arg1[%c0_164, %c4_165, %c1_166, %c0_167] : memref<1x9x9x16xf32, #tpu.memory_space<vmem>>, vector<1x1x6x16xf32>
    %91 = vector.shape_cast %90 : vector<1x1x6x16xf32> to vector<6x16xf32>
    %c0_168 = arith.constant 0 : index
    %c4_169 = arith.constant 4 : index
    %c2_170 = arith.constant 2 : index
    %c0_171 = arith.constant 0 : index
    %92 = vector.load %arg1[%c0_168, %c4_169, %c2_170, %c0_171] : memref<1x9x9x16xf32, #tpu.memory_space<vmem>>, vector<1x1x6x16xf32>
    %93 = vector.shape_cast %92 : vector<1x1x6x16xf32> to vector<6x16xf32>
    %c0_172 = arith.constant 0 : index
    %c4_173 = arith.constant 4 : index
    %c3_174 = arith.constant 3 : index
    %c0_175 = arith.constant 0 : index
    %94 = vector.load %arg1[%c0_172, %c4_173, %c3_174, %c0_175] : memref<1x9x9x16xf32, #tpu.memory_space<vmem>>, vector<1x1x6x16xf32>
    %95 = vector.shape_cast %94 : vector<1x1x6x16xf32> to vector<6x16xf32>
    %c0_176 = arith.constant 0 : index
    %c5 = arith.constant 5 : index
    %c0_177 = arith.constant 0 : index
    %c0_178 = arith.constant 0 : index
    %96 = vector.load %arg1[%c0_176, %c5, %c0_177, %c0_178] : memref<1x9x9x16xf32, #tpu.memory_space<vmem>>, vector<1x1x6x16xf32>
    %97 = vector.shape_cast %96 : vector<1x1x6x16xf32> to vector<6x16xf32>
    %c0_179 = arith.constant 0 : index
    %c5_180 = arith.constant 5 : index
    %c1_181 = arith.constant 1 : index
    %c0_182 = arith.constant 0 : index
    %98 = vector.load %arg1[%c0_179, %c5_180, %c1_181, %c0_182] : memref<1x9x9x16xf32, #tpu.memory_space<vmem>>, vector<1x1x6x16xf32>
    %99 = vector.shape_cast %98 : vector<1x1x6x16xf32> to vector<6x16xf32>
    %c0_183 = arith.constant 0 : index
    %c5_184 = arith.constant 5 : index
    %c2_185 = arith.constant 2 : index
    %c0_186 = arith.constant 0 : index
    %100 = vector.load %arg1[%c0_183, %c5_184, %c2_185, %c0_186] : memref<1x9x9x16xf32, #tpu.memory_space<vmem>>, vector<1x1x6x16xf32>
    %101 = vector.shape_cast %100 : vector<1x1x6x16xf32> to vector<6x16xf32>
    %c0_187 = arith.constant 0 : index
    %c5_188 = arith.constant 5 : index
    %c3_189 = arith.constant 3 : index
    %c0_190 = arith.constant 0 : index
    %102 = vector.load %arg1[%c0_187, %c5_188, %c3_189, %c0_190] : memref<1x9x9x16xf32, #tpu.memory_space<vmem>>, vector<1x1x6x16xf32>
    %103 = vector.shape_cast %102 : vector<1x1x6x16xf32> to vector<6x16xf32>
    %104 = tpu.concatenate %73, %75, %77, %79, %81, %83, %85, %87, %89, %91, %93, %95, %97, %99, %101, %103 in 1 : vector<6x16xf32>, vector<6x16xf32>, vector<6x16xf32>, vector<6x16xf32>, vector<6x16xf32>, vector<6x16xf32>, vector<6x16xf32>, vector<6x16xf32>, vector<6x16xf32>, vector<6x16xf32>, vector<6x16xf32>, vector<6x16xf32>, vector<6x16xf32>, vector<6x16xf32>, vector<6x16xf32>, vector<6x16xf32> -> vector<6x256xf32>
    %105 = arith.truncf %104 : vector<6x256xf32> to vector<6x256xbf16>
    %cst_191 = arith.constant dense<0.000000e+00> : vector<6x32xf32>
    %106 = tpu.matmul %105, %0, %cst_191 {dimension_numbers = #tpu.dot_dimension_numbers<[1], [0], [0], [1], [0, 0, 1, 1], [], []>} : vector<6x256xbf16>, vector<256x32xbf16>, vector<6x32xf32> -> vector<6x32xf32>
    %c0_192 = arith.constant 0 : index
    %c3_193 = arith.constant 3 : index
    %c0_194 = arith.constant 0 : index
    %c0_195 = arith.constant 0 : index
    %107 = vector.load %arg1[%c0_192, %c3_193, %c0_194, %c0_195] : memref<1x9x9x16xf32, #tpu.memory_space<vmem>>, vector<1x1x6x16xf32>
    %108 = vector.shape_cast %107 : vector<1x1x6x16xf32> to vector<6x16xf32>
    %c0_196 = arith.constant 0 : index
    %c3_197 = arith.constant 3 : index
    %c1_198 = arith.constant 1 : index
    %c0_199 = arith.constant 0 : index
    %109 = vector.load %arg1[%c0_196, %c3_197, %c1_198, %c0_199] : memref<1x9x9x16xf32, #tpu.memory_space<vmem>>, vector<1x1x6x16xf32>
    %110 = vector.shape_cast %109 : vector<1x1x6x16xf32> to vector<6x16xf32>
    %c0_200 = arith.constant 0 : index
    %c3_201 = arith.constant 3 : index
    %c2_202 = arith.constant 2 : index
    %c0_203 = arith.constant 0 : index
    %111 = vector.load %arg1[%c0_200, %c3_201, %c2_202, %c0_203] : memref<1x9x9x16xf32, #tpu.memory_space<vmem>>, vector<1x1x6x16xf32>
    %112 = vector.shape_cast %111 : vector<1x1x6x16xf32> to vector<6x16xf32>
    %c0_204 = arith.constant 0 : index
    %c3_205 = arith.constant 3 : index
    %c3_206 = arith.constant 3 : index
    %c0_207 = arith.constant 0 : index
    %113 = vector.load %arg1[%c0_204, %c3_205, %c3_206, %c0_207] : memref<1x9x9x16xf32, #tpu.memory_space<vmem>>, vector<1x1x6x16xf32>
    %114 = vector.shape_cast %113 : vector<1x1x6x16xf32> to vector<6x16xf32>
    %c0_208 = arith.constant 0 : index
    %c4_209 = arith.constant 4 : index
    %c0_210 = arith.constant 0 : index
    %c0_211 = arith.constant 0 : index
    %115 = vector.load %arg1[%c0_208, %c4_209, %c0_210, %c0_211] : memref<1x9x9x16xf32, #tpu.memory_space<vmem>>, vector<1x1x6x16xf32>
    %116 = vector.shape_cast %115 : vector<1x1x6x16xf32> to vector<6x16xf32>
    %c0_212 = arith.constant 0 : index
    %c4_213 = arith.constant 4 : index
    %c1_214 = arith.constant 1 : index
    %c0_215 = arith.constant 0 : index
    %117 = vector.load %arg1[%c0_212, %c4_213, %c1_214, %c0_215] : memref<1x9x9x16xf32, #tpu.memory_space<vmem>>, vector<1x1x6x16xf32>
    %118 = vector.shape_cast %117 : vector<1x1x6x16xf32> to vector<6x16xf32>
    %c0_216 = arith.constant 0 : index
    %c4_217 = arith.constant 4 : index
    %c2_218 = arith.constant 2 : index
    %c0_219 = arith.constant 0 : index
    %119 = vector.load %arg1[%c0_216, %c4_217, %c2_218, %c0_219] : memref<1x9x9x16xf32, #tpu.memory_space<vmem>>, vector<1x1x6x16xf32>
    %120 = vector.shape_cast %119 : vector<1x1x6x16xf32> to vector<6x16xf32>
    %c0_220 = arith.constant 0 : index
    %c4_221 = arith.constant 4 : index
    %c3_222 = arith.constant 3 : index
    %c0_223 = arith.constant 0 : index
    %121 = vector.load %arg1[%c0_220, %c4_221, %c3_222, %c0_223] : memref<1x9x9x16xf32, #tpu.memory_space<vmem>>, vector<1x1x6x16xf32>
    %122 = vector.shape_cast %121 : vector<1x1x6x16xf32> to vector<6x16xf32>
    %c0_224 = arith.constant 0 : index
    %c5_225 = arith.constant 5 : index
    %c0_226 = arith.constant 0 : index
    %c0_227 = arith.constant 0 : index
    %123 = vector.load %arg1[%c0_224, %c5_225, %c0_226, %c0_227] : memref<1x9x9x16xf32, #tpu.memory_space<vmem>>, vector<1x1x6x16xf32>
    %124 = vector.shape_cast %123 : vector<1x1x6x16xf32> to vector<6x16xf32>
    %c0_228 = arith.constant 0 : index
    %c5_229 = arith.constant 5 : index
    %c1_230 = arith.constant 1 : index
    %c0_231 = arith.constant 0 : index
    %125 = vector.load %arg1[%c0_228, %c5_229, %c1_230, %c0_231] : memref<1x9x9x16xf32, #tpu.memory_space<vmem>>, vector<1x1x6x16xf32>
    %126 = vector.shape_cast %125 : vector<1x1x6x16xf32> to vector<6x16xf32>
    %c0_232 = arith.constant 0 : index
    %c5_233 = arith.constant 5 : index
    %c2_234 = arith.constant 2 : index
    %c0_235 = arith.constant 0 : index
    %127 = vector.load %arg1[%c0_232, %c5_233, %c2_234, %c0_235] : memref<1x9x9x16xf32, #tpu.memory_space<vmem>>, vector<1x1x6x16xf32>
    %128 = vector.shape_cast %127 : vector<1x1x6x16xf32> to vector<6x16xf32>
    %c0_236 = arith.constant 0 : index
    %c5_237 = arith.constant 5 : index
    %c3_238 = arith.constant 3 : index
    %c0_239 = arith.constant 0 : index
    %129 = vector.load %arg1[%c0_236, %c5_237, %c3_238, %c0_239] : memref<1x9x9x16xf32, #tpu.memory_space<vmem>>, vector<1x1x6x16xf32>
    %130 = vector.shape_cast %129 : vector<1x1x6x16xf32> to vector<6x16xf32>
    %c0_240 = arith.constant 0 : index
    %c6 = arith.constant 6 : index
    %c0_241 = arith.constant 0 : index
    %c0_242 = arith.constant 0 : index
    %131 = vector.load %arg1[%c0_240, %c6, %c0_241, %c0_242] : memref<1x9x9x16xf32, #tpu.memory_space<vmem>>, vector<1x1x6x16xf32>
    %132 = vector.shape_cast %131 : vector<1x1x6x16xf32> to vector<6x16xf32>
    %c0_243 = arith.constant 0 : index
    %c6_244 = arith.constant 6 : index
    %c1_245 = arith.constant 1 : index
    %c0_246 = arith.constant 0 : index
    %133 = vector.load %arg1[%c0_243, %c6_244, %c1_245, %c0_246] : memref<1x9x9x16xf32, #tpu.memory_space<vmem>>, vector<1x1x6x16xf32>
    %134 = vector.shape_cast %133 : vector<1x1x6x16xf32> to vector<6x16xf32>
    %c0_247 = arith.constant 0 : index
    %c6_248 = arith.constant 6 : index
    %c2_249 = arith.constant 2 : index
    %c0_250 = arith.constant 0 : index
    %135 = vector.load %arg1[%c0_247, %c6_248, %c2_249, %c0_250] : memref<1x9x9x16xf32, #tpu.memory_space<vmem>>, vector<1x1x6x16xf32>
    %136 = vector.shape_cast %135 : vector<1x1x6x16xf32> to vector<6x16xf32>
    %c0_251 = arith.constant 0 : index
    %c6_252 = arith.constant 6 : index
    %c3_253 = arith.constant 3 : index
    %c0_254 = arith.constant 0 : index
    %137 = vector.load %arg1[%c0_251, %c6_252, %c3_253, %c0_254] : memref<1x9x9x16xf32, #tpu.memory_space<vmem>>, vector<1x1x6x16xf32>
    %138 = vector.shape_cast %137 : vector<1x1x6x16xf32> to vector<6x16xf32>
    %139 = tpu.concatenate %108, %110, %112, %114, %116, %118, %120, %122, %124, %126, %128, %130, %132, %134, %136, %138 in 1 : vector<6x16xf32>, vector<6x16xf32>, vector<6x16xf32>, vector<6x16xf32>, vector<6x16xf32>, vector<6x16xf32>, vector<6x16xf32>, vector<6x16xf32>, vector<6x16xf32>, vector<6x16xf32>, vector<6x16xf32>, vector<6x16xf32>, vector<6x16xf32>, vector<6x16xf32>, vector<6x16xf32>, vector<6x16xf32> -> vector<6x256xf32>
    %140 = arith.truncf %139 : vector<6x256xf32> to vector<6x256xbf16>
    %cst_255 = arith.constant dense<0.000000e+00> : vector<6x32xf32>
    %141 = tpu.matmul %140, %0, %cst_255 {dimension_numbers = #tpu.dot_dimension_numbers<[1], [0], [0], [1], [0, 0, 1, 1], [], []>} : vector<6x256xbf16>, vector<256x32xbf16>, vector<6x32xf32> -> vector<6x32xf32>
    %c0_256 = arith.constant 0 : index
    %c4_257 = arith.constant 4 : index
    %c0_258 = arith.constant 0 : index
    %c0_259 = arith.constant 0 : index
    %142 = vector.load %arg1[%c0_256, %c4_257, %c0_258, %c0_259] : memref<1x9x9x16xf32, #tpu.memory_space<vmem>>, vector<1x1x6x16xf32>
    %143 = vector.shape_cast %142 : vector<1x1x6x16xf32> to vector<6x16xf32>
    %c0_260 = arith.constant 0 : index
    %c4_261 = arith.constant 4 : index
    %c1_262 = arith.constant 1 : index
    %c0_263 = arith.constant 0 : index
    %144 = vector.load %arg1[%c0_260, %c4_261, %c1_262, %c0_263] : memref<1x9x9x16xf32, #tpu.memory_space<vmem>>, vector<1x1x6x16xf32>
    %145 = vector.shape_cast %144 : vector<1x1x6x16xf32> to vector<6x16xf32>
    %c0_264 = arith.constant 0 : index
    %c4_265 = arith.constant 4 : index
    %c2_266 = arith.constant 2 : index
    %c0_267 = arith.constant 0 : index
    %146 = vector.load %arg1[%c0_264, %c4_265, %c2_266, %c0_267] : memref<1x9x9x16xf32, #tpu.memory_space<vmem>>, vector<1x1x6x16xf32>
    %147 = vector.shape_cast %146 : vector<1x1x6x16xf32> to vector<6x16xf32>
    %c0_268 = arith.constant 0 : index
    %c4_269 = arith.constant 4 : index
    %c3_270 = arith.constant 3 : index
    %c0_271 = arith.constant 0 : index
    %148 = vector.load %arg1[%c0_268, %c4_269, %c3_270, %c0_271] : memref<1x9x9x16xf32, #tpu.memory_space<vmem>>, vector<1x1x6x16xf32>
    %149 = vector.shape_cast %148 : vector<1x1x6x16xf32> to vector<6x16xf32>
    %c0_272 = arith.constant 0 : index
    %c5_273 = arith.constant 5 : index
    %c0_274 = arith.constant 0 : index
    %c0_275 = arith.constant 0 : index
    %150 = vector.load %arg1[%c0_272, %c5_273, %c0_274, %c0_275] : memref<1x9x9x16xf32, #tpu.memory_space<vmem>>, vector<1x1x6x16xf32>
    %151 = vector.shape_cast %150 : vector<1x1x6x16xf32> to vector<6x16xf32>
    %c0_276 = arith.constant 0 : index
    %c5_277 = arith.constant 5 : index
    %c1_278 = arith.constant 1 : index
    %c0_279 = arith.constant 0 : index
    %152 = vector.load %arg1[%c0_276, %c5_277, %c1_278, %c0_279] : memref<1x9x9x16xf32, #tpu.memory_space<vmem>>, vector<1x1x6x16xf32>
    %153 = vector.shape_cast %152 : vector<1x1x6x16xf32> to vector<6x16xf32>
    %c0_280 = arith.constant 0 : index
    %c5_281 = arith.constant 5 : index
    %c2_282 = arith.constant 2 : index
    %c0_283 = arith.constant 0 : index
    %154 = vector.load %arg1[%c0_280, %c5_281, %c2_282, %c0_283] : memref<1x9x9x16xf32, #tpu.memory_space<vmem>>, vector<1x1x6x16xf32>
    %155 = vector.shape_cast %154 : vector<1x1x6x16xf32> to vector<6x16xf32>
    %c0_284 = arith.constant 0 : index
    %c5_285 = arith.constant 5 : index
    %c3_286 = arith.constant 3 : index
    %c0_287 = arith.constant 0 : index
    %156 = vector.load %arg1[%c0_284, %c5_285, %c3_286, %c0_287] : memref<1x9x9x16xf32, #tpu.memory_space<vmem>>, vector<1x1x6x16xf32>
    %157 = vector.shape_cast %156 : vector<1x1x6x16xf32> to vector<6x16xf32>
    %c0_288 = arith.constant 0 : index
    %c6_289 = arith.constant 6 : index
    %c0_290 = arith.constant 0 : index
    %c0_291 = arith.constant 0 : index
    %158 = vector.load %arg1[%c0_288, %c6_289, %c0_290, %c0_291] : memref<1x9x9x16xf32, #tpu.memory_space<vmem>>, vector<1x1x6x16xf32>
    %159 = vector.shape_cast %158 : vector<1x1x6x16xf32> to vector<6x16xf32>
    %c0_292 = arith.constant 0 : index
    %c6_293 = arith.constant 6 : index
    %c1_294 = arith.constant 1 : index
    %c0_295 = arith.constant 0 : index
    %160 = vector.load %arg1[%c0_292, %c6_293, %c1_294, %c0_295] : memref<1x9x9x16xf32, #tpu.memory_space<vmem>>, vector<1x1x6x16xf32>
    %161 = vector.shape_cast %160 : vector<1x1x6x16xf32> to vector<6x16xf32>
    %c0_296 = arith.constant 0 : index
    %c6_297 = arith.constant 6 : index
    %c2_298 = arith.constant 2 : index
    %c0_299 = arith.constant 0 : index
    %162 = vector.load %arg1[%c0_296, %c6_297, %c2_298, %c0_299] : memref<1x9x9x16xf32, #tpu.memory_space<vmem>>, vector<1x1x6x16xf32>
    %163 = vector.shape_cast %162 : vector<1x1x6x16xf32> to vector<6x16xf32>
    %c0_300 = arith.constant 0 : index
    %c6_301 = arith.constant 6 : index
    %c3_302 = arith.constant 3 : index
    %c0_303 = arith.constant 0 : index
    %164 = vector.load %arg1[%c0_300, %c6_301, %c3_302, %c0_303] : memref<1x9x9x16xf32, #tpu.memory_space<vmem>>, vector<1x1x6x16xf32>
    %165 = vector.shape_cast %164 : vector<1x1x6x16xf32> to vector<6x16xf32>
    %c0_304 = arith.constant 0 : index
    %c7 = arith.constant 7 : index
    %c0_305 = arith.constant 0 : index
    %c0_306 = arith.constant 0 : index
    %166 = vector.load %arg1[%c0_304, %c7, %c0_305, %c0_306] : memref<1x9x9x16xf32, #tpu.memory_space<vmem>>, vector<1x1x6x16xf32>
    %167 = vector.shape_cast %166 : vector<1x1x6x16xf32> to vector<6x16xf32>
    %c0_307 = arith.constant 0 : index
    %c7_308 = arith.constant 7 : index
    %c1_309 = arith.constant 1 : index
    %c0_310 = arith.constant 0 : index
    %168 = vector.load %arg1[%c0_307, %c7_308, %c1_309, %c0_310] : memref<1x9x9x16xf32, #tpu.memory_space<vmem>>, vector<1x1x6x16xf32>
    %169 = vector.shape_cast %168 : vector<1x1x6x16xf32> to vector<6x16xf32>
    %c0_311 = arith.constant 0 : index
    %c7_312 = arith.constant 7 : index
    %c2_313 = arith.constant 2 : index
    %c0_314 = arith.constant 0 : index
    %170 = vector.load %arg1[%c0_311, %c7_312, %c2_313, %c0_314] : memref<1x9x9x16xf32, #tpu.memory_space<vmem>>, vector<1x1x6x16xf32>
    %171 = vector.shape_cast %170 : vector<1x1x6x16xf32> to vector<6x16xf32>
    %c0_315 = arith.constant 0 : index
    %c7_316 = arith.constant 7 : index
    %c3_317 = arith.constant 3 : index
    %c0_318 = arith.constant 0 : index
    %172 = vector.load %arg1[%c0_315, %c7_316, %c3_317, %c0_318] : memref<1x9x9x16xf32, #tpu.memory_space<vmem>>, vector<1x1x6x16xf32>
    %173 = vector.shape_cast %172 : vector<1x1x6x16xf32> to vector<6x16xf32>
    %174 = tpu.concatenate %143, %145, %147, %149, %151, %153, %155, %157, %159, %161, %163, %165, %167, %169, %171, %173 in 1 : vector<6x16xf32>, vector<6x16xf32>, vector<6x16xf32>, vector<6x16xf32>, vector<6x16xf32>, vector<6x16xf32>, vector<6x16xf32>, vector<6x16xf32>, vector<6x16xf32>, vector<6x16xf32>, vector<6x16xf32>, vector<6x16xf32>, vector<6x16xf32>, vector<6x16xf32>, vector<6x16xf32>, vector<6x16xf32> -> vector<6x256xf32>
    %175 = arith.truncf %174 : vector<6x256xf32> to vector<6x256xbf16>
    %cst_319 = arith.constant dense<0.000000e+00> : vector<6x32xf32>
    %176 = tpu.matmul %175, %0, %cst_319 {dimension_numbers = #tpu.dot_dimension_numbers<[1], [0], [0], [1], [0, 0, 1, 1], [], []>} : vector<6x256xbf16>, vector<256x32xbf16>, vector<6x32xf32> -> vector<6x32xf32>
    %c0_320 = arith.constant 0 : index
    %c5_321 = arith.constant 5 : index
    %c0_322 = arith.constant 0 : index
    %c0_323 = arith.constant 0 : index
    %177 = vector.load %arg1[%c0_320, %c5_321, %c0_322, %c0_323] : memref<1x9x9x16xf32, #tpu.memory_space<vmem>>, vector<1x1x6x16xf32>
    %178 = vector.shape_cast %177 : vector<1x1x6x16xf32> to vector<6x16xf32>
    %c0_324 = arith.constant 0 : index
    %c5_325 = arith.constant 5 : index
    %c1_326 = arith.constant 1 : index
    %c0_327 = arith.constant 0 : index
    %179 = vector.load %arg1[%c0_324, %c5_325, %c1_326, %c0_327] : memref<1x9x9x16xf32, #tpu.memory_space<vmem>>, vector<1x1x6x16xf32>
    %180 = vector.shape_cast %179 : vector<1x1x6x16xf32> to vector<6x16xf32>
    %c0_328 = arith.constant 0 : index
    %c5_329 = arith.constant 5 : index
    %c2_330 = arith.constant 2 : index
    %c0_331 = arith.constant 0 : index
    %181 = vector.load %arg1[%c0_328, %c5_329, %c2_330, %c0_331] : memref<1x9x9x16xf32, #tpu.memory_space<vmem>>, vector<1x1x6x16xf32>
    %182 = vector.shape_cast %181 : vector<1x1x6x16xf32> to vector<6x16xf32>
    %c0_332 = arith.constant 0 : index
    %c5_333 = arith.constant 5 : index
    %c3_334 = arith.constant 3 : index
    %c0_335 = arith.constant 0 : index
    %183 = vector.load %arg1[%c0_332, %c5_333, %c3_334, %c0_335] : memref<1x9x9x16xf32, #tpu.memory_space<vmem>>, vector<1x1x6x16xf32>
    %184 = vector.shape_cast %183 : vector<1x1x6x16xf32> to vector<6x16xf32>
    %c0_336 = arith.constant 0 : index
    %c6_337 = arith.constant 6 : index
    %c0_338 = arith.constant 0 : index
    %c0_339 = arith.constant 0 : index
    %185 = vector.load %arg1[%c0_336, %c6_337, %c0_338, %c0_339] : memref<1x9x9x16xf32, #tpu.memory_space<vmem>>, vector<1x1x6x16xf32>
    %186 = vector.shape_cast %185 : vector<1x1x6x16xf32> to vector<6x16xf32>
    %c0_340 = arith.constant 0 : index
    %c6_341 = arith.constant 6 : index
    %c1_342 = arith.constant 1 : index
    %c0_343 = arith.constant 0 : index
    %187 = vector.load %arg1[%c0_340, %c6_341, %c1_342, %c0_343] : memref<1x9x9x16xf32, #tpu.memory_space<vmem>>, vector<1x1x6x16xf32>
    %188 = vector.shape_cast %187 : vector<1x1x6x16xf32> to vector<6x16xf32>
    %c0_344 = arith.constant 0 : index
    %c6_345 = arith.constant 6 : index
    %c2_346 = arith.constant 2 : index
    %c0_347 = arith.constant 0 : index
    %189 = vector.load %arg1[%c0_344, %c6_345, %c2_346, %c0_347] : memref<1x9x9x16xf32, #tpu.memory_space<vmem>>, vector<1x1x6x16xf32>
    %190 = vector.shape_cast %189 : vector<1x1x6x16xf32> to vector<6x16xf32>
    %c0_348 = arith.constant 0 : index
    %c6_349 = arith.constant 6 : index
    %c3_350 = arith.constant 3 : index
    %c0_351 = arith.constant 0 : index
    %191 = vector.load %arg1[%c0_348, %c6_349, %c3_350, %c0_351] : memref<1x9x9x16xf32, #tpu.memory_space<vmem>>, vector<1x1x6x16xf32>
    %192 = vector.shape_cast %191 : vector<1x1x6x16xf32> to vector<6x16xf32>
    %c0_352 = arith.constant 0 : index
    %c7_353 = arith.constant 7 : index
    %c0_354 = arith.constant 0 : index
    %c0_355 = arith.constant 0 : index
    %193 = vector.load %arg1[%c0_352, %c7_353, %c0_354, %c0_355] : memref<1x9x9x16xf32, #tpu.memory_space<vmem>>, vector<1x1x6x16xf32>
    %194 = vector.shape_cast %193 : vector<1x1x6x16xf32> to vector<6x16xf32>
    %c0_356 = arith.constant 0 : index
    %c7_357 = arith.constant 7 : index
    %c1_358 = arith.constant 1 : index
    %c0_359 = arith.constant 0 : index
    %195 = vector.load %arg1[%c0_356, %c7_357, %c1_358, %c0_359] : memref<1x9x9x16xf32, #tpu.memory_space<vmem>>, vector<1x1x6x16xf32>
    %196 = vector.shape_cast %195 : vector<1x1x6x16xf32> to vector<6x16xf32>
    %c0_360 = arith.constant 0 : index
    %c7_361 = arith.constant 7 : index
    %c2_362 = arith.constant 2 : index
    %c0_363 = arith.constant 0 : index
    %197 = vector.load %arg1[%c0_360, %c7_361, %c2_362, %c0_363] : memref<1x9x9x16xf32, #tpu.memory_space<vmem>>, vector<1x1x6x16xf32>
    %198 = vector.shape_cast %197 : vector<1x1x6x16xf32> to vector<6x16xf32>
    %c0_364 = arith.constant 0 : index
    %c7_365 = arith.constant 7 : index
    %c3_366 = arith.constant 3 : index
    %c0_367 = arith.constant 0 : index
    %199 = vector.load %arg1[%c0_364, %c7_365, %c3_366, %c0_367] : memref<1x9x9x16xf32, #tpu.memory_space<vmem>>, vector<1x1x6x16xf32>
    %200 = vector.shape_cast %199 : vector<1x1x6x16xf32> to vector<6x16xf32>
    %c0_368 = arith.constant 0 : index
    %c8 = arith.constant 8 : index
    %c0_369 = arith.constant 0 : index
    %c0_370 = arith.constant 0 : index
    %201 = vector.load %arg1[%c0_368, %c8, %c0_369, %c0_370] : memref<1x9x9x16xf32, #tpu.memory_space<vmem>>, vector<1x1x6x16xf32>
    %202 = vector.shape_cast %201 : vector<1x1x6x16xf32> to vector<6x16xf32>
    %c0_371 = arith.constant 0 : index
    %c8_372 = arith.constant 8 : index
    %c1_373 = arith.constant 1 : index
    %c0_374 = arith.constant 0 : index
    %203 = vector.load %arg1[%c0_371, %c8_372, %c1_373, %c0_374] : memref<1x9x9x16xf32, #tpu.memory_space<vmem>>, vector<1x1x6x16xf32>
    %204 = vector.shape_cast %203 : vector<1x1x6x16xf32> to vector<6x16xf32>
    %c0_375 = arith.constant 0 : index
    %c8_376 = arith.constant 8 : index
    %c2_377 = arith.constant 2 : index
    %c0_378 = arith.constant 0 : index
    %205 = vector.load %arg1[%c0_375, %c8_376, %c2_377, %c0_378] : memref<1x9x9x16xf32, #tpu.memory_space<vmem>>, vector<1x1x6x16xf32>
    %206 = vector.shape_cast %205 : vector<1x1x6x16xf32> to vector<6x16xf32>
    %c0_379 = arith.constant 0 : index
    %c8_380 = arith.constant 8 : index
    %c3_381 = arith.constant 3 : index
    %c0_382 = arith.constant 0 : index
    %207 = vector.load %arg1[%c0_379, %c8_380, %c3_381, %c0_382] : memref<1x9x9x16xf32, #tpu.memory_space<vmem>>, vector<1x1x6x16xf32>
    %208 = vector.shape_cast %207 : vector<1x1x6x16xf32> to vector<6x16xf32>
    %209 = tpu.concatenate %178, %180, %182, %184, %186, %188, %190, %192, %194, %196, %198, %200, %202, %204, %206, %208 in 1 : vector<6x16xf32>, vector<6x16xf32>, vector<6x16xf32>, vector<6x16xf32>, vector<6x16xf32>, vector<6x16xf32>, vector<6x16xf32>, vector<6x16xf32>, vector<6x16xf32>, vector<6x16xf32>, vector<6x16xf32>, vector<6x16xf32>, vector<6x16xf32>, vector<6x16xf32>, vector<6x16xf32>, vector<6x16xf32> -> vector<6x256xf32>
    %210 = arith.truncf %209 : vector<6x256xf32> to vector<6x256xbf16>
    %cst_383 = arith.constant dense<0.000000e+00> : vector<6x32xf32>
    %211 = tpu.matmul %210, %0, %cst_383 {dimension_numbers = #tpu.dot_dimension_numbers<[1], [0], [0], [1], [0, 0, 1, 1], [], []>} : vector<6x256xbf16>, vector<256x32xbf16>, vector<6x32xf32> -> vector<6x32xf32>
    %212 = vector.shape_cast %36 : vector<6x32xf32> to vector<1x6x32xf32>
    %213 = vector.shape_cast %71 : vector<6x32xf32> to vector<1x6x32xf32>
    %214 = vector.shape_cast %106 : vector<6x32xf32> to vector<1x6x32xf32>
    %215 = vector.shape_cast %141 : vector<6x32xf32> to vector<1x6x32xf32>
    %216 = vector.shape_cast %176 : vector<6x32xf32> to vector<1x6x32xf32>
    %217 = vector.shape_cast %211 : vector<6x32xf32> to vector<1x6x32xf32>
    %218 = tpu.concatenate %212, %213, %214, %215, %216, %217 in 0 : vector<1x6x32xf32>, vector<1x6x32xf32>, vector<1x6x32xf32>, vector<1x6x32xf32>, vector<1x6x32xf32>, vector<1x6x32xf32> -> vector<6x6x32xf32>
    %219 = vector.shape_cast %1 : vector<1x32xf32> to vector<1x1x32xf32>
    %220 = vector.broadcast %219 : vector<1x1x32xf32> to vector<6x6x32xf32>
    %221 = arith.addf %218, %220 : vector<6x6x32xf32>
    %cst_384 = arith.constant dense<0.000000e+00> : vector<32xf32>
    %222 = vector.multi_reduction <add>, %221, %cst_384 [0, 1] : vector<6x6x32xf32> to vector<32xf32>
    %223 = vector.shape_cast %222 : vector<32xf32> to vector<1x1x32xf32>
    %cst_385 = arith.constant 3.600000e+01 : f32
    %224 = vector.broadcast %cst_385 : f32 to vector<1x1x32xf32>
    %225 = arith.divf %223, %224 : vector<1x1x32xf32>
    %226 = arith.mulf %221, %221 : vector<6x6x32xf32>
    %cst_386 = arith.constant dense<0.000000e+00> : vector<32xf32>
    %227 = vector.multi_reduction <add>, %226, %cst_386 [0, 1] : vector<6x6x32xf32> to vector<32xf32>
    %228 = vector.shape_cast %227 : vector<32xf32> to vector<1x1x32xf32>
    %cst_387 = arith.constant 3.600000e+01 : f32
    %229 = vector.broadcast %cst_387 : f32 to vector<1x1x32xf32>
    %230 = arith.divf %228, %229 : vector<1x1x32xf32>
    %231 = arith.mulf %225, %225 : vector<1x1x32xf32>
    %232 = arith.subf %230, %231 : vector<1x1x32xf32>
    %233 = vector.broadcast %225 : vector<1x1x32xf32> to vector<6x6x32xf32>
    %234 = arith.subf %221, %233 : vector<6x6x32xf32>
    %cst_388 = arith.constant 0.000000e+00 : f32
    %235 = vector.broadcast %cst_388 : f32 to vector<1x1x32xf32>
    %236 = arith.maximumf %232, %235 : vector<1x1x32xf32>
    %cst_389 = arith.constant 9.99999974E-6 : f32
    %237 = vector.broadcast %cst_389 : f32 to vector<1x1x32xf32>
    %238 = arith.addf %236, %237 : vector<1x1x32xf32>
    %239 = math.rsqrt %238 : vector<1x1x32xf32>
    %240 = vector.broadcast %239 : vector<1x1x32xf32> to vector<6x6x32xf32>
    %241 = arith.mulf %234, %240 : vector<6x6x32xf32>
    %cst_390 = arith.constant 0.000000e+00 : f32
    %242 = vector.broadcast %cst_390 : f32 to vector<6x6x32xf32>
    %243 = arith.cmpf oge, %241, %242 : vector<6x6x32xf32>
    %cst_391 = arith.constant 2.000000e-01 : f32
    %244 = vector.broadcast %cst_391 : f32 to vector<6x6x32xf32>
    %245 = arith.mulf %244, %241 : vector<6x6x32xf32>
    %246 = arith.select %243, %241, %245 : vector<6x6x32xi1>, vector<6x6x32xf32>
    %c0_392 = arith.constant 0 : index
    %c0_393 = arith.constant 0 : index
    %c0_394 = arith.constant 0 : index
    %c0_395 = arith.constant 0 : index
    %247 = vector.load %arg4[%c0_392, %c0_393, %c0_394, %c0_395] : memref<1x6x6x32xf32, #tpu.memory_space<vmem>>, vector<1x6x6x32xf32>
    %248 = vector.shape_cast %247 : vector<1x6x6x32xf32> to vector<6x6x32xf32>
    %249 = vector.shape_cast %246 : vector<6x6x32xf32> to vector<1x6x6x32xf32>
    tpu.vector_store %arg4[%c0_392, %c0_393, %c0_394, %c0_395], %249 {strides = array<i32>} : memref<1x6x6x32xf32, #tpu.memory_space<vmem>>, vector<1x6x6x32xf32>,
    return
  }
  func.func @transform_0(%arg0: i32) -> (i32, i32, i32, i32) {
    %c0_i32 = arith.constant 0 : i32
    %c0_i32_0 = arith.constant 0 : i32
    %c0_i32_1 = arith.constant 0 : i32
    %c0_i32_2 = arith.constant 0 : i32
    return %arg0, %c0_i32, %c0_i32_0, %c0_i32_1 : i32, i32, i32, i32
  }
  func.func @transform_1(%arg0: i32) -> (i32, i32) {
    %c0_i32 = arith.constant 0 : i32
    %c0_i32_0 = arith.constant 0 : i32
    %c0_i32_1 = arith.constant 0 : i32
    return %c0_i32, %c0_i32_0 : i32, i32
  }
  func.func @transform_2(%arg0: i32) -> (i32, i32) {
    %c0_i32 = arith.constant 0 : i32
    %c0_i32_0 = arith.constant 0 : i32
    %c0_i32_1 = arith.constant 0 : i32
    return %c0_i32, %c0_i32_0 : i32, i32
  }
  func.func @transform_3(%arg0: i32) -> (i32, i32, i32, i32) {
    %c0_i32 = arith.constant 0 : i32
    %c0_i32_0 = arith.constant 0 : i32
    %c0_i32_1 = arith.constant 0 : i32
    %c0_i32_2 = arith.constant 0 : i32
    return %arg0, %c0_i32, %c0_i32_0, %c0_i32_1 : i32, i32, i32, i32
  }
}

module attributes {stable_mosaic.version = 11 : i64} {
  func.func @_fused_conv_group_kernel(%arg0: i32, %arg1: memref<1x10x10x32xf32, #tpu.memory_space<vmem>>, %arg2: memref<512x1xbf16, #tpu.memory_space<vmem>>, %arg3: memref<1x1xf32, #tpu.memory_space<vmem>>, %arg4: memref<1x7x7x1xf32, #tpu.memory_space<vmem>>) attributes {dimension_semantics = [#tpu.dimension_semantics<parallel>], iteration_bounds = array<i64: 2>, scalar_prefetch = 0 : i64, scratch_operands = 0 : i64, tpu.core_type = #tpu.core_type<tc>, window_params = [{transform_indices = @transform_0, window_bounds = array<i64: 1, 10, 10, 32>}, {pipeline_mode = #tpu.pipeline_mode<synchronous>, transform_indices = @transform_1, window_bounds = array<i64: 512, 1>}, {pipeline_mode = #tpu.pipeline_mode<synchronous>, transform_indices = @transform_2, window_bounds = array<i64: 1, 1>}, {transform_indices = @transform_3, window_bounds = array<i64: 1, 7, 7, 1>}]} {
    %c0 = arith.constant 0 : index
    %c0_0 = arith.constant 0 : index
    %0 = vector.load %arg2[%c0, %c0_0] : memref<512x1xbf16, #tpu.memory_space<vmem>>, vector<512x1xbf16>
    %c0_1 = arith.constant 0 : index
    %c0_2 = arith.constant 0 : index
    %1 = vector.load %arg3[%c0_1, %c0_2] : memref<1x1xf32, #tpu.memory_space<vmem>>, vector<1x1xf32>
    %c0_3 = arith.constant 0 : index
    %c0_4 = arith.constant 0 : index
    %c0_5 = arith.constant 0 : index
    %c0_6 = arith.constant 0 : index
    %2 = vector.load %arg1[%c0_3, %c0_4, %c0_5, %c0_6] : memref<1x10x10x32xf32, #tpu.memory_space<vmem>>, vector<1x1x7x32xf32>
    %3 = vector.shape_cast %2 : vector<1x1x7x32xf32> to vector<7x32xf32>
    %c0_7 = arith.constant 0 : index
    %c0_8 = arith.constant 0 : index
    %c1 = arith.constant 1 : index
    %c0_9 = arith.constant 0 : index
    %4 = vector.load %arg1[%c0_7, %c0_8, %c1, %c0_9] : memref<1x10x10x32xf32, #tpu.memory_space<vmem>>, vector<1x1x7x32xf32>
    %5 = vector.shape_cast %4 : vector<1x1x7x32xf32> to vector<7x32xf32>
    %c0_10 = arith.constant 0 : index
    %c0_11 = arith.constant 0 : index
    %c2 = arith.constant 2 : index
    %c0_12 = arith.constant 0 : index
    %6 = vector.load %arg1[%c0_10, %c0_11, %c2, %c0_12] : memref<1x10x10x32xf32, #tpu.memory_space<vmem>>, vector<1x1x7x32xf32>
    %7 = vector.shape_cast %6 : vector<1x1x7x32xf32> to vector<7x32xf32>
    %c0_13 = arith.constant 0 : index
    %c0_14 = arith.constant 0 : index
    %c3 = arith.constant 3 : index
    %c0_15 = arith.constant 0 : index
    %8 = vector.load %arg1[%c0_13, %c0_14, %c3, %c0_15] : memref<1x10x10x32xf32, #tpu.memory_space<vmem>>, vector<1x1x7x32xf32>
    %9 = vector.shape_cast %8 : vector<1x1x7x32xf32> to vector<7x32xf32>
    %c0_16 = arith.constant 0 : index
    %c1_17 = arith.constant 1 : index
    %c0_18 = arith.constant 0 : index
    %c0_19 = arith.constant 0 : index
    %10 = vector.load %arg1[%c0_16, %c1_17, %c0_18, %c0_19] : memref<1x10x10x32xf32, #tpu.memory_space<vmem>>, vector<1x1x7x32xf32>
    %11 = vector.shape_cast %10 : vector<1x1x7x32xf32> to vector<7x32xf32>
    %c0_20 = arith.constant 0 : index
    %c1_21 = arith.constant 1 : index
    %c1_22 = arith.constant 1 : index
    %c0_23 = arith.constant 0 : index
    %12 = vector.load %arg1[%c0_20, %c1_21, %c1_22, %c0_23] : memref<1x10x10x32xf32, #tpu.memory_space<vmem>>, vector<1x1x7x32xf32>
    %13 = vector.shape_cast %12 : vector<1x1x7x32xf32> to vector<7x32xf32>
    %c0_24 = arith.constant 0 : index
    %c1_25 = arith.constant 1 : index
    %c2_26 = arith.constant 2 : index
    %c0_27 = arith.constant 0 : index
    %14 = vector.load %arg1[%c0_24, %c1_25, %c2_26, %c0_27] : memref<1x10x10x32xf32, #tpu.memory_space<vmem>>, vector<1x1x7x32xf32>
    %15 = vector.shape_cast %14 : vector<1x1x7x32xf32> to vector<7x32xf32>
    %c0_28 = arith.constant 0 : index
    %c1_29 = arith.constant 1 : index
    %c3_30 = arith.constant 3 : index
    %c0_31 = arith.constant 0 : index
    %16 = vector.load %arg1[%c0_28, %c1_29, %c3_30, %c0_31] : memref<1x10x10x32xf32, #tpu.memory_space<vmem>>, vector<1x1x7x32xf32>
    %17 = vector.shape_cast %16 : vector<1x1x7x32xf32> to vector<7x32xf32>
    %c0_32 = arith.constant 0 : index
    %c2_33 = arith.constant 2 : index
    %c0_34 = arith.constant 0 : index
    %c0_35 = arith.constant 0 : index
    %18 = vector.load %arg1[%c0_32, %c2_33, %c0_34, %c0_35] : memref<1x10x10x32xf32, #tpu.memory_space<vmem>>, vector<1x1x7x32xf32>
    %19 = vector.shape_cast %18 : vector<1x1x7x32xf32> to vector<7x32xf32>
    %c0_36 = arith.constant 0 : index
    %c2_37 = arith.constant 2 : index
    %c1_38 = arith.constant 1 : index
    %c0_39 = arith.constant 0 : index
    %20 = vector.load %arg1[%c0_36, %c2_37, %c1_38, %c0_39] : memref<1x10x10x32xf32, #tpu.memory_space<vmem>>, vector<1x1x7x32xf32>
    %21 = vector.shape_cast %20 : vector<1x1x7x32xf32> to vector<7x32xf32>
    %c0_40 = arith.constant 0 : index
    %c2_41 = arith.constant 2 : index
    %c2_42 = arith.constant 2 : index
    %c0_43 = arith.constant 0 : index
    %22 = vector.load %arg1[%c0_40, %c2_41, %c2_42, %c0_43] : memref<1x10x10x32xf32, #tpu.memory_space<vmem>>, vector<1x1x7x32xf32>
    %23 = vector.shape_cast %22 : vector<1x1x7x32xf32> to vector<7x32xf32>
    %c0_44 = arith.constant 0 : index
    %c2_45 = arith.constant 2 : index
    %c3_46 = arith.constant 3 : index
    %c0_47 = arith.constant 0 : index
    %24 = vector.load %arg1[%c0_44, %c2_45, %c3_46, %c0_47] : memref<1x10x10x32xf32, #tpu.memory_space<vmem>>, vector<1x1x7x32xf32>
    %25 = vector.shape_cast %24 : vector<1x1x7x32xf32> to vector<7x32xf32>
    %c0_48 = arith.constant 0 : index
    %c3_49 = arith.constant 3 : index
    %c0_50 = arith.constant 0 : index
    %c0_51 = arith.constant 0 : index
    %26 = vector.load %arg1[%c0_48, %c3_49, %c0_50, %c0_51] : memref<1x10x10x32xf32, #tpu.memory_space<vmem>>, vector<1x1x7x32xf32>
    %27 = vector.shape_cast %26 : vector<1x1x7x32xf32> to vector<7x32xf32>
    %c0_52 = arith.constant 0 : index
    %c3_53 = arith.constant 3 : index
    %c1_54 = arith.constant 1 : index
    %c0_55 = arith.constant 0 : index
    %28 = vector.load %arg1[%c0_52, %c3_53, %c1_54, %c0_55] : memref<1x10x10x32xf32, #tpu.memory_space<vmem>>, vector<1x1x7x32xf32>
    %29 = vector.shape_cast %28 : vector<1x1x7x32xf32> to vector<7x32xf32>
    %c0_56 = arith.constant 0 : index
    %c3_57 = arith.constant 3 : index
    %c2_58 = arith.constant 2 : index
    %c0_59 = arith.constant 0 : index
    %30 = vector.load %arg1[%c0_56, %c3_57, %c2_58, %c0_59] : memref<1x10x10x32xf32, #tpu.memory_space<vmem>>, vector<1x1x7x32xf32>
    %31 = vector.shape_cast %30 : vector<1x1x7x32xf32> to vector<7x32xf32>
    %c0_60 = arith.constant 0 : index
    %c3_61 = arith.constant 3 : index
    %c3_62 = arith.constant 3 : index
    %c0_63 = arith.constant 0 : index
    %32 = vector.load %arg1[%c0_60, %c3_61, %c3_62, %c0_63] : memref<1x10x10x32xf32, #tpu.memory_space<vmem>>, vector<1x1x7x32xf32>
    %33 = vector.shape_cast %32 : vector<1x1x7x32xf32> to vector<7x32xf32>
    %34 = tpu.concatenate %3, %5, %7, %9, %11, %13, %15, %17, %19, %21, %23, %25, %27, %29, %31, %33 in 1 : vector<7x32xf32>, vector<7x32xf32>, vector<7x32xf32>, vector<7x32xf32>, vector<7x32xf32>, vector<7x32xf32>, vector<7x32xf32>, vector<7x32xf32>, vector<7x32xf32>, vector<7x32xf32>, vector<7x32xf32>, vector<7x32xf32>, vector<7x32xf32>, vector<7x32xf32>, vector<7x32xf32>, vector<7x32xf32> -> vector<7x512xf32>
    %35 = arith.truncf %34 : vector<7x512xf32> to vector<7x512xbf16>
    %cst = arith.constant dense<0.000000e+00> : vector<7x1xf32>
    %36 = tpu.matmul %35, %0, %cst {dimension_numbers = #tpu.dot_dimension_numbers<[1], [0], [0], [1], [0, 0, 1, 1], [], []>} : vector<7x512xbf16>, vector<512x1xbf16>, vector<7x1xf32> -> vector<7x1xf32>
    %c0_64 = arith.constant 0 : index
    %c1_65 = arith.constant 1 : index
    %c0_66 = arith.constant 0 : index
    %c0_67 = arith.constant 0 : index
    %37 = vector.load %arg1[%c0_64, %c1_65, %c0_66, %c0_67] : memref<1x10x10x32xf32, #tpu.memory_space<vmem>>, vector<1x1x7x32xf32>
    %38 = vector.shape_cast %37 : vector<1x1x7x32xf32> to vector<7x32xf32>
    %c0_68 = arith.constant 0 : index
    %c1_69 = arith.constant 1 : index
    %c1_70 = arith.constant 1 : index
    %c0_71 = arith.constant 0 : index
    %39 = vector.load %arg1[%c0_68, %c1_69, %c1_70, %c0_71] : memref<1x10x10x32xf32, #tpu.memory_space<vmem>>, vector<1x1x7x32xf32>
    %40 = vector.shape_cast %39 : vector<1x1x7x32xf32> to vector<7x32xf32>
    %c0_72 = arith.constant 0 : index
    %c1_73 = arith.constant 1 : index
    %c2_74 = arith.constant 2 : index
    %c0_75 = arith.constant 0 : index
    %41 = vector.load %arg1[%c0_72, %c1_73, %c2_74, %c0_75] : memref<1x10x10x32xf32, #tpu.memory_space<vmem>>, vector<1x1x7x32xf32>
    %42 = vector.shape_cast %41 : vector<1x1x7x32xf32> to vector<7x32xf32>
    %c0_76 = arith.constant 0 : index
    %c1_77 = arith.constant 1 : index
    %c3_78 = arith.constant 3 : index
    %c0_79 = arith.constant 0 : index
    %43 = vector.load %arg1[%c0_76, %c1_77, %c3_78, %c0_79] : memref<1x10x10x32xf32, #tpu.memory_space<vmem>>, vector<1x1x7x32xf32>
    %44 = vector.shape_cast %43 : vector<1x1x7x32xf32> to vector<7x32xf32>
    %c0_80 = arith.constant 0 : index
    %c2_81 = arith.constant 2 : index
    %c0_82 = arith.constant 0 : index
    %c0_83 = arith.constant 0 : index
    %45 = vector.load %arg1[%c0_80, %c2_81, %c0_82, %c0_83] : memref<1x10x10x32xf32, #tpu.memory_space<vmem>>, vector<1x1x7x32xf32>
    %46 = vector.shape_cast %45 : vector<1x1x7x32xf32> to vector<7x32xf32>
    %c0_84 = arith.constant 0 : index
    %c2_85 = arith.constant 2 : index
    %c1_86 = arith.constant 1 : index
    %c0_87 = arith.constant 0 : index
    %47 = vector.load %arg1[%c0_84, %c2_85, %c1_86, %c0_87] : memref<1x10x10x32xf32, #tpu.memory_space<vmem>>, vector<1x1x7x32xf32>
    %48 = vector.shape_cast %47 : vector<1x1x7x32xf32> to vector<7x32xf32>
    %c0_88 = arith.constant 0 : index
    %c2_89 = arith.constant 2 : index
    %c2_90 = arith.constant 2 : index
    %c0_91 = arith.constant 0 : index
    %49 = vector.load %arg1[%c0_88, %c2_89, %c2_90, %c0_91] : memref<1x10x10x32xf32, #tpu.memory_space<vmem>>, vector<1x1x7x32xf32>
    %50 = vector.shape_cast %49 : vector<1x1x7x32xf32> to vector<7x32xf32>
    %c0_92 = arith.constant 0 : index
    %c2_93 = arith.constant 2 : index
    %c3_94 = arith.constant 3 : index
    %c0_95 = arith.constant 0 : index
    %51 = vector.load %arg1[%c0_92, %c2_93, %c3_94, %c0_95] : memref<1x10x10x32xf32, #tpu.memory_space<vmem>>, vector<1x1x7x32xf32>
    %52 = vector.shape_cast %51 : vector<1x1x7x32xf32> to vector<7x32xf32>
    %c0_96 = arith.constant 0 : index
    %c3_97 = arith.constant 3 : index
    %c0_98 = arith.constant 0 : index
    %c0_99 = arith.constant 0 : index
    %53 = vector.load %arg1[%c0_96, %c3_97, %c0_98, %c0_99] : memref<1x10x10x32xf32, #tpu.memory_space<vmem>>, vector<1x1x7x32xf32>
    %54 = vector.shape_cast %53 : vector<1x1x7x32xf32> to vector<7x32xf32>
    %c0_100 = arith.constant 0 : index
    %c3_101 = arith.constant 3 : index
    %c1_102 = arith.constant 1 : index
    %c0_103 = arith.constant 0 : index
    %55 = vector.load %arg1[%c0_100, %c3_101, %c1_102, %c0_103] : memref<1x10x10x32xf32, #tpu.memory_space<vmem>>, vector<1x1x7x32xf32>
    %56 = vector.shape_cast %55 : vector<1x1x7x32xf32> to vector<7x32xf32>
    %c0_104 = arith.constant 0 : index
    %c3_105 = arith.constant 3 : index
    %c2_106 = arith.constant 2 : index
    %c0_107 = arith.constant 0 : index
    %57 = vector.load %arg1[%c0_104, %c3_105, %c2_106, %c0_107] : memref<1x10x10x32xf32, #tpu.memory_space<vmem>>, vector<1x1x7x32xf32>
    %58 = vector.shape_cast %57 : vector<1x1x7x32xf32> to vector<7x32xf32>
    %c0_108 = arith.constant 0 : index
    %c3_109 = arith.constant 3 : index
    %c3_110 = arith.constant 3 : index
    %c0_111 = arith.constant 0 : index
    %59 = vector.load %arg1[%c0_108, %c3_109, %c3_110, %c0_111] : memref<1x10x10x32xf32, #tpu.memory_space<vmem>>, vector<1x1x7x32xf32>
    %60 = vector.shape_cast %59 : vector<1x1x7x32xf32> to vector<7x32xf32>
    %c0_112 = arith.constant 0 : index
    %c4 = arith.constant 4 : index
    %c0_113 = arith.constant 0 : index
    %c0_114 = arith.constant 0 : index
    %61 = vector.load %arg1[%c0_112, %c4, %c0_113, %c0_114] : memref<1x10x10x32xf32, #tpu.memory_space<vmem>>, vector<1x1x7x32xf32>
    %62 = vector.shape_cast %61 : vector<1x1x7x32xf32> to vector<7x32xf32>
    %c0_115 = arith.constant 0 : index
    %c4_116 = arith.constant 4 : index
    %c1_117 = arith.constant 1 : index
    %c0_118 = arith.constant 0 : index
    %63 = vector.load %arg1[%c0_115, %c4_116, %c1_117, %c0_118] : memref<1x10x10x32xf32, #tpu.memory_space<vmem>>, vector<1x1x7x32xf32>
    %64 = vector.shape_cast %63 : vector<1x1x7x32xf32> to vector<7x32xf32>
    %c0_119 = arith.constant 0 : index
    %c4_120 = arith.constant 4 : index
    %c2_121 = arith.constant 2 : index
    %c0_122 = arith.constant 0 : index
    %65 = vector.load %arg1[%c0_119, %c4_120, %c2_121, %c0_122] : memref<1x10x10x32xf32, #tpu.memory_space<vmem>>, vector<1x1x7x32xf32>
    %66 = vector.shape_cast %65 : vector<1x1x7x32xf32> to vector<7x32xf32>
    %c0_123 = arith.constant 0 : index
    %c4_124 = arith.constant 4 : index
    %c3_125 = arith.constant 3 : index
    %c0_126 = arith.constant 0 : index
    %67 = vector.load %arg1[%c0_123, %c4_124, %c3_125, %c0_126] : memref<1x10x10x32xf32, #tpu.memory_space<vmem>>, vector<1x1x7x32xf32>
    %68 = vector.shape_cast %67 : vector<1x1x7x32xf32> to vector<7x32xf32>
    %69 = tpu.concatenate %38, %40, %42, %44, %46, %48, %50, %52, %54, %56, %58, %60, %62, %64, %66, %68 in 1 : vector<7x32xf32>, vector<7x32xf32>, vector<7x32xf32>, vector<7x32xf32>, vector<7x32xf32>, vector<7x32xf32>, vector<7x32xf32>, vector<7x32xf32>, vector<7x32xf32>, vector<7x32xf32>, vector<7x32xf32>, vector<7x32xf32>, vector<7x32xf32>, vector<7x32xf32>, vector<7x32xf32>, vector<7x32xf32> -> vector<7x512xf32>
    %70 = arith.truncf %69 : vector<7x512xf32> to vector<7x512xbf16>
    %cst_127 = arith.constant dense<0.000000e+00> : vector<7x1xf32>
    %71 = tpu.matmul %70, %0, %cst_127 {dimension_numbers = #tpu.dot_dimension_numbers<[1], [0], [0], [1], [0, 0, 1, 1], [], []>} : vector<7x512xbf16>, vector<512x1xbf16>, vector<7x1xf32> -> vector<7x1xf32>
    %c0_128 = arith.constant 0 : index
    %c2_129 = arith.constant 2 : index
    %c0_130 = arith.constant 0 : index
    %c0_131 = arith.constant 0 : index
    %72 = vector.load %arg1[%c0_128, %c2_129, %c0_130, %c0_131] : memref<1x10x10x32xf32, #tpu.memory_space<vmem>>, vector<1x1x7x32xf32>
    %73 = vector.shape_cast %72 : vector<1x1x7x32xf32> to vector<7x32xf32>
    %c0_132 = arith.constant 0 : index
    %c2_133 = arith.constant 2 : index
    %c1_134 = arith.constant 1 : index
    %c0_135 = arith.constant 0 : index
    %74 = vector.load %arg1[%c0_132, %c2_133, %c1_134, %c0_135] : memref<1x10x10x32xf32, #tpu.memory_space<vmem>>, vector<1x1x7x32xf32>
    %75 = vector.shape_cast %74 : vector<1x1x7x32xf32> to vector<7x32xf32>
    %c0_136 = arith.constant 0 : index
    %c2_137 = arith.constant 2 : index
    %c2_138 = arith.constant 2 : index
    %c0_139 = arith.constant 0 : index
    %76 = vector.load %arg1[%c0_136, %c2_137, %c2_138, %c0_139] : memref<1x10x10x32xf32, #tpu.memory_space<vmem>>, vector<1x1x7x32xf32>
    %77 = vector.shape_cast %76 : vector<1x1x7x32xf32> to vector<7x32xf32>
    %c0_140 = arith.constant 0 : index
    %c2_141 = arith.constant 2 : index
    %c3_142 = arith.constant 3 : index
    %c0_143 = arith.constant 0 : index
    %78 = vector.load %arg1[%c0_140, %c2_141, %c3_142, %c0_143] : memref<1x10x10x32xf32, #tpu.memory_space<vmem>>, vector<1x1x7x32xf32>
    %79 = vector.shape_cast %78 : vector<1x1x7x32xf32> to vector<7x32xf32>
    %c0_144 = arith.constant 0 : index
    %c3_145 = arith.constant 3 : index
    %c0_146 = arith.constant 0 : index
    %c0_147 = arith.constant 0 : index
    %80 = vector.load %arg1[%c0_144, %c3_145, %c0_146, %c0_147] : memref<1x10x10x32xf32, #tpu.memory_space<vmem>>, vector<1x1x7x32xf32>
    %81 = vector.shape_cast %80 : vector<1x1x7x32xf32> to vector<7x32xf32>
    %c0_148 = arith.constant 0 : index
    %c3_149 = arith.constant 3 : index
    %c1_150 = arith.constant 1 : index
    %c0_151 = arith.constant 0 : index
    %82 = vector.load %arg1[%c0_148, %c3_149, %c1_150, %c0_151] : memref<1x10x10x32xf32, #tpu.memory_space<vmem>>, vector<1x1x7x32xf32>
    %83 = vector.shape_cast %82 : vector<1x1x7x32xf32> to vector<7x32xf32>
    %c0_152 = arith.constant 0 : index
    %c3_153 = arith.constant 3 : index
    %c2_154 = arith.constant 2 : index
    %c0_155 = arith.constant 0 : index
    %84 = vector.load %arg1[%c0_152, %c3_153, %c2_154, %c0_155] : memref<1x10x10x32xf32, #tpu.memory_space<vmem>>, vector<1x1x7x32xf32>
    %85 = vector.shape_cast %84 : vector<1x1x7x32xf32> to vector<7x32xf32>
    %c0_156 = arith.constant 0 : index
    %c3_157 = arith.constant 3 : index
    %c3_158 = arith.constant 3 : index
    %c0_159 = arith.constant 0 : index
    %86 = vector.load %arg1[%c0_156, %c3_157, %c3_158, %c0_159] : memref<1x10x10x32xf32, #tpu.memory_space<vmem>>, vector<1x1x7x32xf32>
    %87 = vector.shape_cast %86 : vector<1x1x7x32xf32> to vector<7x32xf32>
    %c0_160 = arith.constant 0 : index
    %c4_161 = arith.constant 4 : index
    %c0_162 = arith.constant 0 : index
    %c0_163 = arith.constant 0 : index
    %88 = vector.load %arg1[%c0_160, %c4_161, %c0_162, %c0_163] : memref<1x10x10x32xf32, #tpu.memory_space<vmem>>, vector<1x1x7x32xf32>
    %89 = vector.shape_cast %88 : vector<1x1x7x32xf32> to vector<7x32xf32>
    %c0_164 = arith.constant 0 : index
    %c4_165 = arith.constant 4 : index
    %c1_166 = arith.constant 1 : index
    %c0_167 = arith.constant 0 : index
    %90 = vector.load %arg1[%c0_164, %c4_165, %c1_166, %c0_167] : memref<1x10x10x32xf32, #tpu.memory_space<vmem>>, vector<1x1x7x32xf32>
    %91 = vector.shape_cast %90 : vector<1x1x7x32xf32> to vector<7x32xf32>
    %c0_168 = arith.constant 0 : index
    %c4_169 = arith.constant 4 : index
    %c2_170 = arith.constant 2 : index
    %c0_171 = arith.constant 0 : index
    %92 = vector.load %arg1[%c0_168, %c4_169, %c2_170, %c0_171] : memref<1x10x10x32xf32, #tpu.memory_space<vmem>>, vector<1x1x7x32xf32>
    %93 = vector.shape_cast %92 : vector<1x1x7x32xf32> to vector<7x32xf32>
    %c0_172 = arith.constant 0 : index
    %c4_173 = arith.constant 4 : index
    %c3_174 = arith.constant 3 : index
    %c0_175 = arith.constant 0 : index
    %94 = vector.load %arg1[%c0_172, %c4_173, %c3_174, %c0_175] : memref<1x10x10x32xf32, #tpu.memory_space<vmem>>, vector<1x1x7x32xf32>
    %95 = vector.shape_cast %94 : vector<1x1x7x32xf32> to vector<7x32xf32>
    %c0_176 = arith.constant 0 : index
    %c5 = arith.constant 5 : index
    %c0_177 = arith.constant 0 : index
    %c0_178 = arith.constant 0 : index
    %96 = vector.load %arg1[%c0_176, %c5, %c0_177, %c0_178] : memref<1x10x10x32xf32, #tpu.memory_space<vmem>>, vector<1x1x7x32xf32>
    %97 = vector.shape_cast %96 : vector<1x1x7x32xf32> to vector<7x32xf32>
    %c0_179 = arith.constant 0 : index
    %c5_180 = arith.constant 5 : index
    %c1_181 = arith.constant 1 : index
    %c0_182 = arith.constant 0 : index
    %98 = vector.load %arg1[%c0_179, %c5_180, %c1_181, %c0_182] : memref<1x10x10x32xf32, #tpu.memory_space<vmem>>, vector<1x1x7x32xf32>
    %99 = vector.shape_cast %98 : vector<1x1x7x32xf32> to vector<7x32xf32>
    %c0_183 = arith.constant 0 : index
    %c5_184 = arith.constant 5 : index
    %c2_185 = arith.constant 2 : index
    %c0_186 = arith.constant 0 : index
    %100 = vector.load %arg1[%c0_183, %c5_184, %c2_185, %c0_186] : memref<1x10x10x32xf32, #tpu.memory_space<vmem>>, vector<1x1x7x32xf32>
    %101 = vector.shape_cast %100 : vector<1x1x7x32xf32> to vector<7x32xf32>
    %c0_187 = arith.constant 0 : index
    %c5_188 = arith.constant 5 : index
    %c3_189 = arith.constant 3 : index
    %c0_190 = arith.constant 0 : index
    %102 = vector.load %arg1[%c0_187, %c5_188, %c3_189, %c0_190] : memref<1x10x10x32xf32, #tpu.memory_space<vmem>>, vector<1x1x7x32xf32>
    %103 = vector.shape_cast %102 : vector<1x1x7x32xf32> to vector<7x32xf32>
    %104 = tpu.concatenate %73, %75, %77, %79, %81, %83, %85, %87, %89, %91, %93, %95, %97, %99, %101, %103 in 1 : vector<7x32xf32>, vector<7x32xf32>, vector<7x32xf32>, vector<7x32xf32>, vector<7x32xf32>, vector<7x32xf32>, vector<7x32xf32>, vector<7x32xf32>, vector<7x32xf32>, vector<7x32xf32>, vector<7x32xf32>, vector<7x32xf32>, vector<7x32xf32>, vector<7x32xf32>, vector<7x32xf32>, vector<7x32xf32> -> vector<7x512xf32>
    %105 = arith.truncf %104 : vector<7x512xf32> to vector<7x512xbf16>
    %cst_191 = arith.constant dense<0.000000e+00> : vector<7x1xf32>
    %106 = tpu.matmul %105, %0, %cst_191 {dimension_numbers = #tpu.dot_dimension_numbers<[1], [0], [0], [1], [0, 0, 1, 1], [], []>} : vector<7x512xbf16>, vector<512x1xbf16>, vector<7x1xf32> -> vector<7x1xf32>
    %c0_192 = arith.constant 0 : index
    %c3_193 = arith.constant 3 : index
    %c0_194 = arith.constant 0 : index
    %c0_195 = arith.constant 0 : index
    %107 = vector.load %arg1[%c0_192, %c3_193, %c0_194, %c0_195] : memref<1x10x10x32xf32, #tpu.memory_space<vmem>>, vector<1x1x7x32xf32>
    %108 = vector.shape_cast %107 : vector<1x1x7x32xf32> to vector<7x32xf32>
    %c0_196 = arith.constant 0 : index
    %c3_197 = arith.constant 3 : index
    %c1_198 = arith.constant 1 : index
    %c0_199 = arith.constant 0 : index
    %109 = vector.load %arg1[%c0_196, %c3_197, %c1_198, %c0_199] : memref<1x10x10x32xf32, #tpu.memory_space<vmem>>, vector<1x1x7x32xf32>
    %110 = vector.shape_cast %109 : vector<1x1x7x32xf32> to vector<7x32xf32>
    %c0_200 = arith.constant 0 : index
    %c3_201 = arith.constant 3 : index
    %c2_202 = arith.constant 2 : index
    %c0_203 = arith.constant 0 : index
    %111 = vector.load %arg1[%c0_200, %c3_201, %c2_202, %c0_203] : memref<1x10x10x32xf32, #tpu.memory_space<vmem>>, vector<1x1x7x32xf32>
    %112 = vector.shape_cast %111 : vector<1x1x7x32xf32> to vector<7x32xf32>
    %c0_204 = arith.constant 0 : index
    %c3_205 = arith.constant 3 : index
    %c3_206 = arith.constant 3 : index
    %c0_207 = arith.constant 0 : index
    %113 = vector.load %arg1[%c0_204, %c3_205, %c3_206, %c0_207] : memref<1x10x10x32xf32, #tpu.memory_space<vmem>>, vector<1x1x7x32xf32>
    %114 = vector.shape_cast %113 : vector<1x1x7x32xf32> to vector<7x32xf32>
    %c0_208 = arith.constant 0 : index
    %c4_209 = arith.constant 4 : index
    %c0_210 = arith.constant 0 : index
    %c0_211 = arith.constant 0 : index
    %115 = vector.load %arg1[%c0_208, %c4_209, %c0_210, %c0_211] : memref<1x10x10x32xf32, #tpu.memory_space<vmem>>, vector<1x1x7x32xf32>
    %116 = vector.shape_cast %115 : vector<1x1x7x32xf32> to vector<7x32xf32>
    %c0_212 = arith.constant 0 : index
    %c4_213 = arith.constant 4 : index
    %c1_214 = arith.constant 1 : index
    %c0_215 = arith.constant 0 : index
    %117 = vector.load %arg1[%c0_212, %c4_213, %c1_214, %c0_215] : memref<1x10x10x32xf32, #tpu.memory_space<vmem>>, vector<1x1x7x32xf32>
    %118 = vector.shape_cast %117 : vector<1x1x7x32xf32> to vector<7x32xf32>
    %c0_216 = arith.constant 0 : index
    %c4_217 = arith.constant 4 : index
    %c2_218 = arith.constant 2 : index
    %c0_219 = arith.constant 0 : index
    %119 = vector.load %arg1[%c0_216, %c4_217, %c2_218, %c0_219] : memref<1x10x10x32xf32, #tpu.memory_space<vmem>>, vector<1x1x7x32xf32>
    %120 = vector.shape_cast %119 : vector<1x1x7x32xf32> to vector<7x32xf32>
    %c0_220 = arith.constant 0 : index
    %c4_221 = arith.constant 4 : index
    %c3_222 = arith.constant 3 : index
    %c0_223 = arith.constant 0 : index
    %121 = vector.load %arg1[%c0_220, %c4_221, %c3_222, %c0_223] : memref<1x10x10x32xf32, #tpu.memory_space<vmem>>, vector<1x1x7x32xf32>
    %122 = vector.shape_cast %121 : vector<1x1x7x32xf32> to vector<7x32xf32>
    %c0_224 = arith.constant 0 : index
    %c5_225 = arith.constant 5 : index
    %c0_226 = arith.constant 0 : index
    %c0_227 = arith.constant 0 : index
    %123 = vector.load %arg1[%c0_224, %c5_225, %c0_226, %c0_227] : memref<1x10x10x32xf32, #tpu.memory_space<vmem>>, vector<1x1x7x32xf32>
    %124 = vector.shape_cast %123 : vector<1x1x7x32xf32> to vector<7x32xf32>
    %c0_228 = arith.constant 0 : index
    %c5_229 = arith.constant 5 : index
    %c1_230 = arith.constant 1 : index
    %c0_231 = arith.constant 0 : index
    %125 = vector.load %arg1[%c0_228, %c5_229, %c1_230, %c0_231] : memref<1x10x10x32xf32, #tpu.memory_space<vmem>>, vector<1x1x7x32xf32>
    %126 = vector.shape_cast %125 : vector<1x1x7x32xf32> to vector<7x32xf32>
    %c0_232 = arith.constant 0 : index
    %c5_233 = arith.constant 5 : index
    %c2_234 = arith.constant 2 : index
    %c0_235 = arith.constant 0 : index
    %127 = vector.load %arg1[%c0_232, %c5_233, %c2_234, %c0_235] : memref<1x10x10x32xf32, #tpu.memory_space<vmem>>, vector<1x1x7x32xf32>
    %128 = vector.shape_cast %127 : vector<1x1x7x32xf32> to vector<7x32xf32>
    %c0_236 = arith.constant 0 : index
    %c5_237 = arith.constant 5 : index
    %c3_238 = arith.constant 3 : index
    %c0_239 = arith.constant 0 : index
    %129 = vector.load %arg1[%c0_236, %c5_237, %c3_238, %c0_239] : memref<1x10x10x32xf32, #tpu.memory_space<vmem>>, vector<1x1x7x32xf32>
    %130 = vector.shape_cast %129 : vector<1x1x7x32xf32> to vector<7x32xf32>
    %c0_240 = arith.constant 0 : index
    %c6 = arith.constant 6 : index
    %c0_241 = arith.constant 0 : index
    %c0_242 = arith.constant 0 : index
    %131 = vector.load %arg1[%c0_240, %c6, %c0_241, %c0_242] : memref<1x10x10x32xf32, #tpu.memory_space<vmem>>, vector<1x1x7x32xf32>
    %132 = vector.shape_cast %131 : vector<1x1x7x32xf32> to vector<7x32xf32>
    %c0_243 = arith.constant 0 : index
    %c6_244 = arith.constant 6 : index
    %c1_245 = arith.constant 1 : index
    %c0_246 = arith.constant 0 : index
    %133 = vector.load %arg1[%c0_243, %c6_244, %c1_245, %c0_246] : memref<1x10x10x32xf32, #tpu.memory_space<vmem>>, vector<1x1x7x32xf32>
    %134 = vector.shape_cast %133 : vector<1x1x7x32xf32> to vector<7x32xf32>
    %c0_247 = arith.constant 0 : index
    %c6_248 = arith.constant 6 : index
    %c2_249 = arith.constant 2 : index
    %c0_250 = arith.constant 0 : index
    %135 = vector.load %arg1[%c0_247, %c6_248, %c2_249, %c0_250] : memref<1x10x10x32xf32, #tpu.memory_space<vmem>>, vector<1x1x7x32xf32>
    %136 = vector.shape_cast %135 : vector<1x1x7x32xf32> to vector<7x32xf32>
    %c0_251 = arith.constant 0 : index
    %c6_252 = arith.constant 6 : index
    %c3_253 = arith.constant 3 : index
    %c0_254 = arith.constant 0 : index
    %137 = vector.load %arg1[%c0_251, %c6_252, %c3_253, %c0_254] : memref<1x10x10x32xf32, #tpu.memory_space<vmem>>, vector<1x1x7x32xf32>
    %138 = vector.shape_cast %137 : vector<1x1x7x32xf32> to vector<7x32xf32>
    %139 = tpu.concatenate %108, %110, %112, %114, %116, %118, %120, %122, %124, %126, %128, %130, %132, %134, %136, %138 in 1 : vector<7x32xf32>, vector<7x32xf32>, vector<7x32xf32>, vector<7x32xf32>, vector<7x32xf32>, vector<7x32xf32>, vector<7x32xf32>, vector<7x32xf32>, vector<7x32xf32>, vector<7x32xf32>, vector<7x32xf32>, vector<7x32xf32>, vector<7x32xf32>, vector<7x32xf32>, vector<7x32xf32>, vector<7x32xf32> -> vector<7x512xf32>
    %140 = arith.truncf %139 : vector<7x512xf32> to vector<7x512xbf16>
    %cst_255 = arith.constant dense<0.000000e+00> : vector<7x1xf32>
    %141 = tpu.matmul %140, %0, %cst_255 {dimension_numbers = #tpu.dot_dimension_numbers<[1], [0], [0], [1], [0, 0, 1, 1], [], []>} : vector<7x512xbf16>, vector<512x1xbf16>, vector<7x1xf32> -> vector<7x1xf32>
    %c0_256 = arith.constant 0 : index
    %c4_257 = arith.constant 4 : index
    %c0_258 = arith.constant 0 : index
    %c0_259 = arith.constant 0 : index
    %142 = vector.load %arg1[%c0_256, %c4_257, %c0_258, %c0_259] : memref<1x10x10x32xf32, #tpu.memory_space<vmem>>, vector<1x1x7x32xf32>
    %143 = vector.shape_cast %142 : vector<1x1x7x32xf32> to vector<7x32xf32>
    %c0_260 = arith.constant 0 : index
    %c4_261 = arith.constant 4 : index
    %c1_262 = arith.constant 1 : index
    %c0_263 = arith.constant 0 : index
    %144 = vector.load %arg1[%c0_260, %c4_261, %c1_262, %c0_263] : memref<1x10x10x32xf32, #tpu.memory_space<vmem>>, vector<1x1x7x32xf32>
    %145 = vector.shape_cast %144 : vector<1x1x7x32xf32> to vector<7x32xf32>
    %c0_264 = arith.constant 0 : index
    %c4_265 = arith.constant 4 : index
    %c2_266 = arith.constant 2 : index
    %c0_267 = arith.constant 0 : index
    %146 = vector.load %arg1[%c0_264, %c4_265, %c2_266, %c0_267] : memref<1x10x10x32xf32, #tpu.memory_space<vmem>>, vector<1x1x7x32xf32>
    %147 = vector.shape_cast %146 : vector<1x1x7x32xf32> to vector<7x32xf32>
    %c0_268 = arith.constant 0 : index
    %c4_269 = arith.constant 4 : index
    %c3_270 = arith.constant 3 : index
    %c0_271 = arith.constant 0 : index
    %148 = vector.load %arg1[%c0_268, %c4_269, %c3_270, %c0_271] : memref<1x10x10x32xf32, #tpu.memory_space<vmem>>, vector<1x1x7x32xf32>
    %149 = vector.shape_cast %148 : vector<1x1x7x32xf32> to vector<7x32xf32>
    %c0_272 = arith.constant 0 : index
    %c5_273 = arith.constant 5 : index
    %c0_274 = arith.constant 0 : index
    %c0_275 = arith.constant 0 : index
    %150 = vector.load %arg1[%c0_272, %c5_273, %c0_274, %c0_275] : memref<1x10x10x32xf32, #tpu.memory_space<vmem>>, vector<1x1x7x32xf32>
    %151 = vector.shape_cast %150 : vector<1x1x7x32xf32> to vector<7x32xf32>
    %c0_276 = arith.constant 0 : index
    %c5_277 = arith.constant 5 : index
    %c1_278 = arith.constant 1 : index
    %c0_279 = arith.constant 0 : index
    %152 = vector.load %arg1[%c0_276, %c5_277, %c1_278, %c0_279] : memref<1x10x10x32xf32, #tpu.memory_space<vmem>>, vector<1x1x7x32xf32>
    %153 = vector.shape_cast %152 : vector<1x1x7x32xf32> to vector<7x32xf32>
    %c0_280 = arith.constant 0 : index
    %c5_281 = arith.constant 5 : index
    %c2_282 = arith.constant 2 : index
    %c0_283 = arith.constant 0 : index
    %154 = vector.load %arg1[%c0_280, %c5_281, %c2_282, %c0_283] : memref<1x10x10x32xf32, #tpu.memory_space<vmem>>, vector<1x1x7x32xf32>
    %155 = vector.shape_cast %154 : vector<1x1x7x32xf32> to vector<7x32xf32>
    %c0_284 = arith.constant 0 : index
    %c5_285 = arith.constant 5 : index
    %c3_286 = arith.constant 3 : index
    %c0_287 = arith.constant 0 : index
    %156 = vector.load %arg1[%c0_284, %c5_285, %c3_286, %c0_287] : memref<1x10x10x32xf32, #tpu.memory_space<vmem>>, vector<1x1x7x32xf32>
    %157 = vector.shape_cast %156 : vector<1x1x7x32xf32> to vector<7x32xf32>
    %c0_288 = arith.constant 0 : index
    %c6_289 = arith.constant 6 : index
    %c0_290 = arith.constant 0 : index
    %c0_291 = arith.constant 0 : index
    %158 = vector.load %arg1[%c0_288, %c6_289, %c0_290, %c0_291] : memref<1x10x10x32xf32, #tpu.memory_space<vmem>>, vector<1x1x7x32xf32>
    %159 = vector.shape_cast %158 : vector<1x1x7x32xf32> to vector<7x32xf32>
    %c0_292 = arith.constant 0 : index
    %c6_293 = arith.constant 6 : index
    %c1_294 = arith.constant 1 : index
    %c0_295 = arith.constant 0 : index
    %160 = vector.load %arg1[%c0_292, %c6_293, %c1_294, %c0_295] : memref<1x10x10x32xf32, #tpu.memory_space<vmem>>, vector<1x1x7x32xf32>
    %161 = vector.shape_cast %160 : vector<1x1x7x32xf32> to vector<7x32xf32>
    %c0_296 = arith.constant 0 : index
    %c6_297 = arith.constant 6 : index
    %c2_298 = arith.constant 2 : index
    %c0_299 = arith.constant 0 : index
    %162 = vector.load %arg1[%c0_296, %c6_297, %c2_298, %c0_299] : memref<1x10x10x32xf32, #tpu.memory_space<vmem>>, vector<1x1x7x32xf32>
    %163 = vector.shape_cast %162 : vector<1x1x7x32xf32> to vector<7x32xf32>
    %c0_300 = arith.constant 0 : index
    %c6_301 = arith.constant 6 : index
    %c3_302 = arith.constant 3 : index
    %c0_303 = arith.constant 0 : index
    %164 = vector.load %arg1[%c0_300, %c6_301, %c3_302, %c0_303] : memref<1x10x10x32xf32, #tpu.memory_space<vmem>>, vector<1x1x7x32xf32>
    %165 = vector.shape_cast %164 : vector<1x1x7x32xf32> to vector<7x32xf32>
    %c0_304 = arith.constant 0 : index
    %c7 = arith.constant 7 : index
    %c0_305 = arith.constant 0 : index
    %c0_306 = arith.constant 0 : index
    %166 = vector.load %arg1[%c0_304, %c7, %c0_305, %c0_306] : memref<1x10x10x32xf32, #tpu.memory_space<vmem>>, vector<1x1x7x32xf32>
    %167 = vector.shape_cast %166 : vector<1x1x7x32xf32> to vector<7x32xf32>
    %c0_307 = arith.constant 0 : index
    %c7_308 = arith.constant 7 : index
    %c1_309 = arith.constant 1 : index
    %c0_310 = arith.constant 0 : index
    %168 = vector.load %arg1[%c0_307, %c7_308, %c1_309, %c0_310] : memref<1x10x10x32xf32, #tpu.memory_space<vmem>>, vector<1x1x7x32xf32>
    %169 = vector.shape_cast %168 : vector<1x1x7x32xf32> to vector<7x32xf32>
    %c0_311 = arith.constant 0 : index
    %c7_312 = arith.constant 7 : index
    %c2_313 = arith.constant 2 : index
    %c0_314 = arith.constant 0 : index
    %170 = vector.load %arg1[%c0_311, %c7_312, %c2_313, %c0_314] : memref<1x10x10x32xf32, #tpu.memory_space<vmem>>, vector<1x1x7x32xf32>
    %171 = vector.shape_cast %170 : vector<1x1x7x32xf32> to vector<7x32xf32>
    %c0_315 = arith.constant 0 : index
    %c7_316 = arith.constant 7 : index
    %c3_317 = arith.constant 3 : index
    %c0_318 = arith.constant 0 : index
    %172 = vector.load %arg1[%c0_315, %c7_316, %c3_317, %c0_318] : memref<1x10x10x32xf32, #tpu.memory_space<vmem>>, vector<1x1x7x32xf32>
    %173 = vector.shape_cast %172 : vector<1x1x7x32xf32> to vector<7x32xf32>
    %174 = tpu.concatenate %143, %145, %147, %149, %151, %153, %155, %157, %159, %161, %163, %165, %167, %169, %171, %173 in 1 : vector<7x32xf32>, vector<7x32xf32>, vector<7x32xf32>, vector<7x32xf32>, vector<7x32xf32>, vector<7x32xf32>, vector<7x32xf32>, vector<7x32xf32>, vector<7x32xf32>, vector<7x32xf32>, vector<7x32xf32>, vector<7x32xf32>, vector<7x32xf32>, vector<7x32xf32>, vector<7x32xf32>, vector<7x32xf32> -> vector<7x512xf32>
    %175 = arith.truncf %174 : vector<7x512xf32> to vector<7x512xbf16>
    %cst_319 = arith.constant dense<0.000000e+00> : vector<7x1xf32>
    %176 = tpu.matmul %175, %0, %cst_319 {dimension_numbers = #tpu.dot_dimension_numbers<[1], [0], [0], [1], [0, 0, 1, 1], [], []>} : vector<7x512xbf16>, vector<512x1xbf16>, vector<7x1xf32> -> vector<7x1xf32>
    %c0_320 = arith.constant 0 : index
    %c5_321 = arith.constant 5 : index
    %c0_322 = arith.constant 0 : index
    %c0_323 = arith.constant 0 : index
    %177 = vector.load %arg1[%c0_320, %c5_321, %c0_322, %c0_323] : memref<1x10x10x32xf32, #tpu.memory_space<vmem>>, vector<1x1x7x32xf32>
    %178 = vector.shape_cast %177 : vector<1x1x7x32xf32> to vector<7x32xf32>
    %c0_324 = arith.constant 0 : index
    %c5_325 = arith.constant 5 : index
    %c1_326 = arith.constant 1 : index
    %c0_327 = arith.constant 0 : index
    %179 = vector.load %arg1[%c0_324, %c5_325, %c1_326, %c0_327] : memref<1x10x10x32xf32, #tpu.memory_space<vmem>>, vector<1x1x7x32xf32>
    %180 = vector.shape_cast %179 : vector<1x1x7x32xf32> to vector<7x32xf32>
    %c0_328 = arith.constant 0 : index
    %c5_329 = arith.constant 5 : index
    %c2_330 = arith.constant 2 : index
    %c0_331 = arith.constant 0 : index
    %181 = vector.load %arg1[%c0_328, %c5_329, %c2_330, %c0_331] : memref<1x10x10x32xf32, #tpu.memory_space<vmem>>, vector<1x1x7x32xf32>
    %182 = vector.shape_cast %181 : vector<1x1x7x32xf32> to vector<7x32xf32>
    %c0_332 = arith.constant 0 : index
    %c5_333 = arith.constant 5 : index
    %c3_334 = arith.constant 3 : index
    %c0_335 = arith.constant 0 : index
    %183 = vector.load %arg1[%c0_332, %c5_333, %c3_334, %c0_335] : memref<1x10x10x32xf32, #tpu.memory_space<vmem>>, vector<1x1x7x32xf32>
    %184 = vector.shape_cast %183 : vector<1x1x7x32xf32> to vector<7x32xf32>
    %c0_336 = arith.constant 0 : index
    %c6_337 = arith.constant 6 : index
    %c0_338 = arith.constant 0 : index
    %c0_339 = arith.constant 0 : index
    %185 = vector.load %arg1[%c0_336, %c6_337, %c0_338, %c0_339] : memref<1x10x10x32xf32, #tpu.memory_space<vmem>>, vector<1x1x7x32xf32>
    %186 = vector.shape_cast %185 : vector<1x1x7x32xf32> to vector<7x32xf32>
    %c0_340 = arith.constant 0 : index
    %c6_341 = arith.constant 6 : index
    %c1_342 = arith.constant 1 : index
    %c0_343 = arith.constant 0 : index
    %187 = vector.load %arg1[%c0_340, %c6_341, %c1_342, %c0_343] : memref<1x10x10x32xf32, #tpu.memory_space<vmem>>, vector<1x1x7x32xf32>
    %188 = vector.shape_cast %187 : vector<1x1x7x32xf32> to vector<7x32xf32>
    %c0_344 = arith.constant 0 : index
    %c6_345 = arith.constant 6 : index
    %c2_346 = arith.constant 2 : index
    %c0_347 = arith.constant 0 : index
    %189 = vector.load %arg1[%c0_344, %c6_345, %c2_346, %c0_347] : memref<1x10x10x32xf32, #tpu.memory_space<vmem>>, vector<1x1x7x32xf32>
    %190 = vector.shape_cast %189 : vector<1x1x7x32xf32> to vector<7x32xf32>
    %c0_348 = arith.constant 0 : index
    %c6_349 = arith.constant 6 : index
    %c3_350 = arith.constant 3 : index
    %c0_351 = arith.constant 0 : index
    %191 = vector.load %arg1[%c0_348, %c6_349, %c3_350, %c0_351] : memref<1x10x10x32xf32, #tpu.memory_space<vmem>>, vector<1x1x7x32xf32>
    %192 = vector.shape_cast %191 : vector<1x1x7x32xf32> to vector<7x32xf32>
    %c0_352 = arith.constant 0 : index
    %c7_353 = arith.constant 7 : index
    %c0_354 = arith.constant 0 : index
    %c0_355 = arith.constant 0 : index
    %193 = vector.load %arg1[%c0_352, %c7_353, %c0_354, %c0_355] : memref<1x10x10x32xf32, #tpu.memory_space<vmem>>, vector<1x1x7x32xf32>
    %194 = vector.shape_cast %193 : vector<1x1x7x32xf32> to vector<7x32xf32>
    %c0_356 = arith.constant 0 : index
    %c7_357 = arith.constant 7 : index
    %c1_358 = arith.constant 1 : index
    %c0_359 = arith.constant 0 : index
    %195 = vector.load %arg1[%c0_356, %c7_357, %c1_358, %c0_359] : memref<1x10x10x32xf32, #tpu.memory_space<vmem>>, vector<1x1x7x32xf32>
    %196 = vector.shape_cast %195 : vector<1x1x7x32xf32> to vector<7x32xf32>
    %c0_360 = arith.constant 0 : index
    %c7_361 = arith.constant 7 : index
    %c2_362 = arith.constant 2 : index
    %c0_363 = arith.constant 0 : index
    %197 = vector.load %arg1[%c0_360, %c7_361, %c2_362, %c0_363] : memref<1x10x10x32xf32, #tpu.memory_space<vmem>>, vector<1x1x7x32xf32>
    %198 = vector.shape_cast %197 : vector<1x1x7x32xf32> to vector<7x32xf32>
    %c0_364 = arith.constant 0 : index
    %c7_365 = arith.constant 7 : index
    %c3_366 = arith.constant 3 : index
    %c0_367 = arith.constant 0 : index
    %199 = vector.load %arg1[%c0_364, %c7_365, %c3_366, %c0_367] : memref<1x10x10x32xf32, #tpu.memory_space<vmem>>, vector<1x1x7x32xf32>
    %200 = vector.shape_cast %199 : vector<1x1x7x32xf32> to vector<7x32xf32>
    %c0_368 = arith.constant 0 : index
    %c8 = arith.constant 8 : index
    %c0_369 = arith.constant 0 : index
    %c0_370 = arith.constant 0 : index
    %201 = vector.load %arg1[%c0_368, %c8, %c0_369, %c0_370] : memref<1x10x10x32xf32, #tpu.memory_space<vmem>>, vector<1x1x7x32xf32>
    %202 = vector.shape_cast %201 : vector<1x1x7x32xf32> to vector<7x32xf32>
    %c0_371 = arith.constant 0 : index
    %c8_372 = arith.constant 8 : index
    %c1_373 = arith.constant 1 : index
    %c0_374 = arith.constant 0 : index
    %203 = vector.load %arg1[%c0_371, %c8_372, %c1_373, %c0_374] : memref<1x10x10x32xf32, #tpu.memory_space<vmem>>, vector<1x1x7x32xf32>
    %204 = vector.shape_cast %203 : vector<1x1x7x32xf32> to vector<7x32xf32>
    %c0_375 = arith.constant 0 : index
    %c8_376 = arith.constant 8 : index
    %c2_377 = arith.constant 2 : index
    %c0_378 = arith.constant 0 : index
    %205 = vector.load %arg1[%c0_375, %c8_376, %c2_377, %c0_378] : memref<1x10x10x32xf32, #tpu.memory_space<vmem>>, vector<1x1x7x32xf32>
    %206 = vector.shape_cast %205 : vector<1x1x7x32xf32> to vector<7x32xf32>
    %c0_379 = arith.constant 0 : index
    %c8_380 = arith.constant 8 : index
    %c3_381 = arith.constant 3 : index
    %c0_382 = arith.constant 0 : index
    %207 = vector.load %arg1[%c0_379, %c8_380, %c3_381, %c0_382] : memref<1x10x10x32xf32, #tpu.memory_space<vmem>>, vector<1x1x7x32xf32>
    %208 = vector.shape_cast %207 : vector<1x1x7x32xf32> to vector<7x32xf32>
    %209 = tpu.concatenate %178, %180, %182, %184, %186, %188, %190, %192, %194, %196, %198, %200, %202, %204, %206, %208 in 1 : vector<7x32xf32>, vector<7x32xf32>, vector<7x32xf32>, vector<7x32xf32>, vector<7x32xf32>, vector<7x32xf32>, vector<7x32xf32>, vector<7x32xf32>, vector<7x32xf32>, vector<7x32xf32>, vector<7x32xf32>, vector<7x32xf32>, vector<7x32xf32>, vector<7x32xf32>, vector<7x32xf32>, vector<7x32xf32> -> vector<7x512xf32>
    %210 = arith.truncf %209 : vector<7x512xf32> to vector<7x512xbf16>
    %cst_383 = arith.constant dense<0.000000e+00> : vector<7x1xf32>
    %211 = tpu.matmul %210, %0, %cst_383 {dimension_numbers = #tpu.dot_dimension_numbers<[1], [0], [0], [1], [0, 0, 1, 1], [], []>} : vector<7x512xbf16>, vector<512x1xbf16>, vector<7x1xf32> -> vector<7x1xf32>
    %c0_384 = arith.constant 0 : index
    %c6_385 = arith.constant 6 : index
    %c0_386 = arith.constant 0 : index
    %c0_387 = arith.constant 0 : index
    %212 = vector.load %arg1[%c0_384, %c6_385, %c0_386, %c0_387] : memref<1x10x10x32xf32, #tpu.memory_space<vmem>>, vector<1x1x7x32xf32>
    %213 = vector.shape_cast %212 : vector<1x1x7x32xf32> to vector<7x32xf32>
    %c0_388 = arith.constant 0 : index
    %c6_389 = arith.constant 6 : index
    %c1_390 = arith.constant 1 : index
    %c0_391 = arith.constant 0 : index
    %214 = vector.load %arg1[%c0_388, %c6_389, %c1_390, %c0_391] : memref<1x10x10x32xf32, #tpu.memory_space<vmem>>, vector<1x1x7x32xf32>
    %215 = vector.shape_cast %214 : vector<1x1x7x32xf32> to vector<7x32xf32>
    %c0_392 = arith.constant 0 : index
    %c6_393 = arith.constant 6 : index
    %c2_394 = arith.constant 2 : index
    %c0_395 = arith.constant 0 : index
    %216 = vector.load %arg1[%c0_392, %c6_393, %c2_394, %c0_395] : memref<1x10x10x32xf32, #tpu.memory_space<vmem>>, vector<1x1x7x32xf32>
    %217 = vector.shape_cast %216 : vector<1x1x7x32xf32> to vector<7x32xf32>
    %c0_396 = arith.constant 0 : index
    %c6_397 = arith.constant 6 : index
    %c3_398 = arith.constant 3 : index
    %c0_399 = arith.constant 0 : index
    %218 = vector.load %arg1[%c0_396, %c6_397, %c3_398, %c0_399] : memref<1x10x10x32xf32, #tpu.memory_space<vmem>>, vector<1x1x7x32xf32>
    %219 = vector.shape_cast %218 : vector<1x1x7x32xf32> to vector<7x32xf32>
    %c0_400 = arith.constant 0 : index
    %c7_401 = arith.constant 7 : index
    %c0_402 = arith.constant 0 : index
    %c0_403 = arith.constant 0 : index
    %220 = vector.load %arg1[%c0_400, %c7_401, %c0_402, %c0_403] : memref<1x10x10x32xf32, #tpu.memory_space<vmem>>, vector<1x1x7x32xf32>
    %221 = vector.shape_cast %220 : vector<1x1x7x32xf32> to vector<7x32xf32>
    %c0_404 = arith.constant 0 : index
    %c7_405 = arith.constant 7 : index
    %c1_406 = arith.constant 1 : index
    %c0_407 = arith.constant 0 : index
    %222 = vector.load %arg1[%c0_404, %c7_405, %c1_406, %c0_407] : memref<1x10x10x32xf32, #tpu.memory_space<vmem>>, vector<1x1x7x32xf32>
    %223 = vector.shape_cast %222 : vector<1x1x7x32xf32> to vector<7x32xf32>
    %c0_408 = arith.constant 0 : index
    %c7_409 = arith.constant 7 : index
    %c2_410 = arith.constant 2 : index
    %c0_411 = arith.constant 0 : index
    %224 = vector.load %arg1[%c0_408, %c7_409, %c2_410, %c0_411] : memref<1x10x10x32xf32, #tpu.memory_space<vmem>>, vector<1x1x7x32xf32>
    %225 = vector.shape_cast %224 : vector<1x1x7x32xf32> to vector<7x32xf32>
    %c0_412 = arith.constant 0 : index
    %c7_413 = arith.constant 7 : index
    %c3_414 = arith.constant 3 : index
    %c0_415 = arith.constant 0 : index
    %226 = vector.load %arg1[%c0_412, %c7_413, %c3_414, %c0_415] : memref<1x10x10x32xf32, #tpu.memory_space<vmem>>, vector<1x1x7x32xf32>
    %227 = vector.shape_cast %226 : vector<1x1x7x32xf32> to vector<7x32xf32>
    %c0_416 = arith.constant 0 : index
    %c8_417 = arith.constant 8 : index
    %c0_418 = arith.constant 0 : index
    %c0_419 = arith.constant 0 : index
    %228 = vector.load %arg1[%c0_416, %c8_417, %c0_418, %c0_419] : memref<1x10x10x32xf32, #tpu.memory_space<vmem>>, vector<1x1x7x32xf32>
    %229 = vector.shape_cast %228 : vector<1x1x7x32xf32> to vector<7x32xf32>
    %c0_420 = arith.constant 0 : index
    %c8_421 = arith.constant 8 : index
    %c1_422 = arith.constant 1 : index
    %c0_423 = arith.constant 0 : index
    %230 = vector.load %arg1[%c0_420, %c8_421, %c1_422, %c0_423] : memref<1x10x10x32xf32, #tpu.memory_space<vmem>>, vector<1x1x7x32xf32>
    %231 = vector.shape_cast %230 : vector<1x1x7x32xf32> to vector<7x32xf32>
    %c0_424 = arith.constant 0 : index
    %c8_425 = arith.constant 8 : index
    %c2_426 = arith.constant 2 : index
    %c0_427 = arith.constant 0 : index
    %232 = vector.load %arg1[%c0_424, %c8_425, %c2_426, %c0_427] : memref<1x10x10x32xf32, #tpu.memory_space<vmem>>, vector<1x1x7x32xf32>
    %233 = vector.shape_cast %232 : vector<1x1x7x32xf32> to vector<7x32xf32>
    %c0_428 = arith.constant 0 : index
    %c8_429 = arith.constant 8 : index
    %c3_430 = arith.constant 3 : index
    %c0_431 = arith.constant 0 : index
    %234 = vector.load %arg1[%c0_428, %c8_429, %c3_430, %c0_431] : memref<1x10x10x32xf32, #tpu.memory_space<vmem>>, vector<1x1x7x32xf32>
    %235 = vector.shape_cast %234 : vector<1x1x7x32xf32> to vector<7x32xf32>
    %c0_432 = arith.constant 0 : index
    %c9 = arith.constant 9 : index
    %c0_433 = arith.constant 0 : index
    %c0_434 = arith.constant 0 : index
    %236 = vector.load %arg1[%c0_432, %c9, %c0_433, %c0_434] : memref<1x10x10x32xf32, #tpu.memory_space<vmem>>, vector<1x1x7x32xf32>
    %237 = vector.shape_cast %236 : vector<1x1x7x32xf32> to vector<7x32xf32>
    %c0_435 = arith.constant 0 : index
    %c9_436 = arith.constant 9 : index
    %c1_437 = arith.constant 1 : index
    %c0_438 = arith.constant 0 : index
    %238 = vector.load %arg1[%c0_435, %c9_436, %c1_437, %c0_438] : memref<1x10x10x32xf32, #tpu.memory_space<vmem>>, vector<1x1x7x32xf32>
    %239 = vector.shape_cast %238 : vector<1x1x7x32xf32> to vector<7x32xf32>
    %c0_439 = arith.constant 0 : index
    %c9_440 = arith.constant 9 : index
    %c2_441 = arith.constant 2 : index
    %c0_442 = arith.constant 0 : index
    %240 = vector.load %arg1[%c0_439, %c9_440, %c2_441, %c0_442] : memref<1x10x10x32xf32, #tpu.memory_space<vmem>>, vector<1x1x7x32xf32>
    %241 = vector.shape_cast %240 : vector<1x1x7x32xf32> to vector<7x32xf32>
    %c0_443 = arith.constant 0 : index
    %c9_444 = arith.constant 9 : index
    %c3_445 = arith.constant 3 : index
    %c0_446 = arith.constant 0 : index
    %242 = vector.load %arg1[%c0_443, %c9_444, %c3_445, %c0_446] : memref<1x10x10x32xf32, #tpu.memory_space<vmem>>, vector<1x1x7x32xf32>
    %243 = vector.shape_cast %242 : vector<1x1x7x32xf32> to vector<7x32xf32>
    %244 = tpu.concatenate %213, %215, %217, %219, %221, %223, %225, %227, %229, %231, %233, %235, %237, %239, %241, %243 in 1 : vector<7x32xf32>, vector<7x32xf32>, vector<7x32xf32>, vector<7x32xf32>, vector<7x32xf32>, vector<7x32xf32>, vector<7x32xf32>, vector<7x32xf32>, vector<7x32xf32>, vector<7x32xf32>, vector<7x32xf32>, vector<7x32xf32>, vector<7x32xf32>, vector<7x32xf32>, vector<7x32xf32>, vector<7x32xf32> -> vector<7x512xf32>
    %245 = arith.truncf %244 : vector<7x512xf32> to vector<7x512xbf16>
    %cst_447 = arith.constant dense<0.000000e+00> : vector<7x1xf32>
    %246 = tpu.matmul %245, %0, %cst_447 {dimension_numbers = #tpu.dot_dimension_numbers<[1], [0], [0], [1], [0, 0, 1, 1], [], []>} : vector<7x512xbf16>, vector<512x1xbf16>, vector<7x1xf32> -> vector<7x1xf32>
    %247 = vector.shape_cast %36 : vector<7x1xf32> to vector<1x7x1xf32>
    %248 = vector.shape_cast %71 : vector<7x1xf32> to vector<1x7x1xf32>
    %249 = vector.shape_cast %106 : vector<7x1xf32> to vector<1x7x1xf32>
    %250 = vector.shape_cast %141 : vector<7x1xf32> to vector<1x7x1xf32>
    %251 = vector.shape_cast %176 : vector<7x1xf32> to vector<1x7x1xf32>
    %252 = vector.shape_cast %211 : vector<7x1xf32> to vector<1x7x1xf32>
    %253 = vector.shape_cast %246 : vector<7x1xf32> to vector<1x7x1xf32>
    %254 = tpu.concatenate %247, %248, %249, %250, %251, %252, %253 in 0 : vector<1x7x1xf32>, vector<1x7x1xf32>, vector<1x7x1xf32>, vector<1x7x1xf32>, vector<1x7x1xf32>, vector<1x7x1xf32>, vector<1x7x1xf32> -> vector<7x7x1xf32>
    %255 = vector.shape_cast %1 : vector<1x1xf32> to vector<1x1x1xf32>
    %256 = vector.broadcast %255 : vector<1x1x1xf32> to vector<7x7x1xf32>
    %257 = arith.addf %254, %256 : vector<7x7x1xf32>
    %c0_448 = arith.constant 0 : index
    %c0_449 = arith.constant 0 : index
    %c0_450 = arith.constant 0 : index
    %c0_451 = arith.constant 0 : index
    %258 = vector.load %arg4[%c0_448, %c0_449, %c0_450, %c0_451] : memref<1x7x7x1xf32, #tpu.memory_space<vmem>>, vector<1x7x7x1xf32>
    %259 = vector.shape_cast %258 : vector<1x7x7x1xf32> to vector<7x7x1xf32>
    %260 = vector.shape_cast %257 : vector<7x7x1xf32> to vector<1x7x7x1xf32>
    tpu.vector_store %arg4[%c0_448, %c0_449, %c0_450, %c0_451], %260 {strides = array<i32>} : memref<1x7x7x1xf32, #tpu.memory_space<vmem>>, vector<1x7x7x1xf32>,
    return
  }
  func.func @transform_0(%arg0: i32) -> (i32, i32, i32, i32) {
    %c0_i32 = arith.constant 0 : i32
    %c0_i32_0 = arith.constant 0 : i32
    %c0_i32_1 = arith.constant 0 : i32
    %c0_i32_2 = arith.constant 0 : i32
    return %arg0, %c0_i32, %c0_i32_0, %c0_i32_1 : i32, i32, i32, i32
  }
  func.func @transform_1(%arg0: i32) -> (i32, i32) {
    %c0_i32 = arith.constant 0 : i32
    %c0_i32_0 = arith.constant 0 : i32
    %c0_i32_1 = arith.constant 0 : i32
    return %c0_i32, %c0_i32_0 : i32, i32
  }
  func.func @transform_2(%arg0: i32) -> (i32, i32) {
    %c0_i32 = arith.constant 0 : i32
    %c0_i32_0 = arith.constant 0 : i32
    %c0_i32_1 = arith.constant 0 : i32
    return %c0_i32, %c0_i32_0 : i32, i32
  }
  func.func @transform_3(%arg0: i32) -> (i32, i32, i32, i32) {
    %c0_i32 = arith.constant 0 : i32
    %c0_i32_0 = arith.constant 0 : i32
    %c0_i32_1 = arith.constant 0 : i32
    %c0_i32_2 = arith.constant 0 : i32
    return %arg0, %c0_i32, %c0_i32_0, %c0_i32_1 : i32, i32, i32, i32
  }
}

module attributes {stable_mosaic.version = 11 : i64} {
  func.func @_fused_conv_group_kernel(%arg0: i32, %arg1: memref<1x6x6x16xf32, #tpu.memory_space<vmem>>, %arg2: memref<64x8xbf16, #tpu.memory_space<vmem>>, %arg3: memref<1x8xf32, #tpu.memory_space<vmem>>, %arg4: memref<1x5x5x8xf32, #tpu.memory_space<vmem>>) attributes {dimension_semantics = [#tpu.dimension_semantics<parallel>], iteration_bounds = array<i64: 2>, scalar_prefetch = 0 : i64, scratch_operands = 0 : i64, tpu.core_type = #tpu.core_type<tc>, window_params = [{transform_indices = @transform_0, window_bounds = array<i64: 1, 6, 6, 16>}, {pipeline_mode = #tpu.pipeline_mode<synchronous>, transform_indices = @transform_1, window_bounds = array<i64: 64, 8>}, {pipeline_mode = #tpu.pipeline_mode<synchronous>, transform_indices = @transform_2, window_bounds = array<i64: 1, 8>}, {transform_indices = @transform_3, window_bounds = array<i64: 1, 5, 5, 8>}]} {
    %c0 = arith.constant 0 : index
    %c0_0 = arith.constant 0 : index
    %0 = vector.load %arg2[%c0, %c0_0] : memref<64x8xbf16, #tpu.memory_space<vmem>>, vector<64x8xbf16>
    %c0_1 = arith.constant 0 : index
    %c0_2 = arith.constant 0 : index
    %1 = vector.load %arg3[%c0_1, %c0_2] : memref<1x8xf32, #tpu.memory_space<vmem>>, vector<1x8xf32>
    %c0_3 = arith.constant 0 : index
    %c0_4 = arith.constant 0 : index
    %c0_5 = arith.constant 0 : index
    %c0_6 = arith.constant 0 : index
    %2 = vector.load %arg1[%c0_3, %c0_4, %c0_5, %c0_6] : memref<1x6x6x16xf32, #tpu.memory_space<vmem>>, vector<1x1x5x16xf32>
    %3 = vector.shape_cast %2 : vector<1x1x5x16xf32> to vector<5x16xf32>
    %c0_7 = arith.constant 0 : index
    %c0_8 = arith.constant 0 : index
    %c1 = arith.constant 1 : index
    %c0_9 = arith.constant 0 : index
    %4 = vector.load %arg1[%c0_7, %c0_8, %c1, %c0_9] : memref<1x6x6x16xf32, #tpu.memory_space<vmem>>, vector<1x1x5x16xf32>
    %5 = vector.shape_cast %4 : vector<1x1x5x16xf32> to vector<5x16xf32>
    %c0_10 = arith.constant 0 : index
    %c1_11 = arith.constant 1 : index
    %c0_12 = arith.constant 0 : index
    %c0_13 = arith.constant 0 : index
    %6 = vector.load %arg1[%c0_10, %c1_11, %c0_12, %c0_13] : memref<1x6x6x16xf32, #tpu.memory_space<vmem>>, vector<1x1x5x16xf32>
    %7 = vector.shape_cast %6 : vector<1x1x5x16xf32> to vector<5x16xf32>
    %c0_14 = arith.constant 0 : index
    %c1_15 = arith.constant 1 : index
    %c1_16 = arith.constant 1 : index
    %c0_17 = arith.constant 0 : index
    %8 = vector.load %arg1[%c0_14, %c1_15, %c1_16, %c0_17] : memref<1x6x6x16xf32, #tpu.memory_space<vmem>>, vector<1x1x5x16xf32>
    %9 = vector.shape_cast %8 : vector<1x1x5x16xf32> to vector<5x16xf32>
    %10 = tpu.concatenate %3, %5, %7, %9 in 1 : vector<5x16xf32>, vector<5x16xf32>, vector<5x16xf32>, vector<5x16xf32> -> vector<5x64xf32>
    %11 = arith.truncf %10 : vector<5x64xf32> to vector<5x64xbf16>
    %cst = arith.constant dense<0.000000e+00> : vector<5x8xf32>
    %12 = tpu.matmul %11, %0, %cst {dimension_numbers = #tpu.dot_dimension_numbers<[1], [0], [0], [1], [0, 0, 1, 1], [], []>} : vector<5x64xbf16>, vector<64x8xbf16>, vector<5x8xf32> -> vector<5x8xf32>
    %c0_18 = arith.constant 0 : index
    %c1_19 = arith.constant 1 : index
    %c0_20 = arith.constant 0 : index
    %c0_21 = arith.constant 0 : index
    %13 = vector.load %arg1[%c0_18, %c1_19, %c0_20, %c0_21] : memref<1x6x6x16xf32, #tpu.memory_space<vmem>>, vector<1x1x5x16xf32>
    %14 = vector.shape_cast %13 : vector<1x1x5x16xf32> to vector<5x16xf32>
    %c0_22 = arith.constant 0 : index
    %c1_23 = arith.constant 1 : index
    %c1_24 = arith.constant 1 : index
    %c0_25 = arith.constant 0 : index
    %15 = vector.load %arg1[%c0_22, %c1_23, %c1_24, %c0_25] : memref<1x6x6x16xf32, #tpu.memory_space<vmem>>, vector<1x1x5x16xf32>
    %16 = vector.shape_cast %15 : vector<1x1x5x16xf32> to vector<5x16xf32>
    %c0_26 = arith.constant 0 : index
    %c2 = arith.constant 2 : index
    %c0_27 = arith.constant 0 : index
    %c0_28 = arith.constant 0 : index
    %17 = vector.load %arg1[%c0_26, %c2, %c0_27, %c0_28] : memref<1x6x6x16xf32, #tpu.memory_space<vmem>>, vector<1x1x5x16xf32>
    %18 = vector.shape_cast %17 : vector<1x1x5x16xf32> to vector<5x16xf32>
    %c0_29 = arith.constant 0 : index
    %c2_30 = arith.constant 2 : index
    %c1_31 = arith.constant 1 : index
    %c0_32 = arith.constant 0 : index
    %19 = vector.load %arg1[%c0_29, %c2_30, %c1_31, %c0_32] : memref<1x6x6x16xf32, #tpu.memory_space<vmem>>, vector<1x1x5x16xf32>
    %20 = vector.shape_cast %19 : vector<1x1x5x16xf32> to vector<5x16xf32>
    %21 = tpu.concatenate %14, %16, %18, %20 in 1 : vector<5x16xf32>, vector<5x16xf32>, vector<5x16xf32>, vector<5x16xf32> -> vector<5x64xf32>
    %22 = arith.truncf %21 : vector<5x64xf32> to vector<5x64xbf16>
    %cst_33 = arith.constant dense<0.000000e+00> : vector<5x8xf32>
    %23 = tpu.matmul %22, %0, %cst_33 {dimension_numbers = #tpu.dot_dimension_numbers<[1], [0], [0], [1], [0, 0, 1, 1], [], []>} : vector<5x64xbf16>, vector<64x8xbf16>, vector<5x8xf32> -> vector<5x8xf32>
    %c0_34 = arith.constant 0 : index
    %c2_35 = arith.constant 2 : index
    %c0_36 = arith.constant 0 : index
    %c0_37 = arith.constant 0 : index
    %24 = vector.load %arg1[%c0_34, %c2_35, %c0_36, %c0_37] : memref<1x6x6x16xf32, #tpu.memory_space<vmem>>, vector<1x1x5x16xf32>
    %25 = vector.shape_cast %24 : vector<1x1x5x16xf32> to vector<5x16xf32>
    %c0_38 = arith.constant 0 : index
    %c2_39 = arith.constant 2 : index
    %c1_40 = arith.constant 1 : index
    %c0_41 = arith.constant 0 : index
    %26 = vector.load %arg1[%c0_38, %c2_39, %c1_40, %c0_41] : memref<1x6x6x16xf32, #tpu.memory_space<vmem>>, vector<1x1x5x16xf32>
    %27 = vector.shape_cast %26 : vector<1x1x5x16xf32> to vector<5x16xf32>
    %c0_42 = arith.constant 0 : index
    %c3 = arith.constant 3 : index
    %c0_43 = arith.constant 0 : index
    %c0_44 = arith.constant 0 : index
    %28 = vector.load %arg1[%c0_42, %c3, %c0_43, %c0_44] : memref<1x6x6x16xf32, #tpu.memory_space<vmem>>, vector<1x1x5x16xf32>
    %29 = vector.shape_cast %28 : vector<1x1x5x16xf32> to vector<5x16xf32>
    %c0_45 = arith.constant 0 : index
    %c3_46 = arith.constant 3 : index
    %c1_47 = arith.constant 1 : index
    %c0_48 = arith.constant 0 : index
    %30 = vector.load %arg1[%c0_45, %c3_46, %c1_47, %c0_48] : memref<1x6x6x16xf32, #tpu.memory_space<vmem>>, vector<1x1x5x16xf32>
    %31 = vector.shape_cast %30 : vector<1x1x5x16xf32> to vector<5x16xf32>
    %32 = tpu.concatenate %25, %27, %29, %31 in 1 : vector<5x16xf32>, vector<5x16xf32>, vector<5x16xf32>, vector<5x16xf32> -> vector<5x64xf32>
    %33 = arith.truncf %32 : vector<5x64xf32> to vector<5x64xbf16>
    %cst_49 = arith.constant dense<0.000000e+00> : vector<5x8xf32>
    %34 = tpu.matmul %33, %0, %cst_49 {dimension_numbers = #tpu.dot_dimension_numbers<[1], [0], [0], [1], [0, 0, 1, 1], [], []>} : vector<5x64xbf16>, vector<64x8xbf16>, vector<5x8xf32> -> vector<5x8xf32>
    %c0_50 = arith.constant 0 : index
    %c3_51 = arith.constant 3 : index
    %c0_52 = arith.constant 0 : index
    %c0_53 = arith.constant 0 : index
    %35 = vector.load %arg1[%c0_50, %c3_51, %c0_52, %c0_53] : memref<1x6x6x16xf32, #tpu.memory_space<vmem>>, vector<1x1x5x16xf32>
    %36 = vector.shape_cast %35 : vector<1x1x5x16xf32> to vector<5x16xf32>
    %c0_54 = arith.constant 0 : index
    %c3_55 = arith.constant 3 : index
    %c1_56 = arith.constant 1 : index
    %c0_57 = arith.constant 0 : index
    %37 = vector.load %arg1[%c0_54, %c3_55, %c1_56, %c0_57] : memref<1x6x6x16xf32, #tpu.memory_space<vmem>>, vector<1x1x5x16xf32>
    %38 = vector.shape_cast %37 : vector<1x1x5x16xf32> to vector<5x16xf32>
    %c0_58 = arith.constant 0 : index
    %c4 = arith.constant 4 : index
    %c0_59 = arith.constant 0 : index
    %c0_60 = arith.constant 0 : index
    %39 = vector.load %arg1[%c0_58, %c4, %c0_59, %c0_60] : memref<1x6x6x16xf32, #tpu.memory_space<vmem>>, vector<1x1x5x16xf32>
    %40 = vector.shape_cast %39 : vector<1x1x5x16xf32> to vector<5x16xf32>
    %c0_61 = arith.constant 0 : index
    %c4_62 = arith.constant 4 : index
    %c1_63 = arith.constant 1 : index
    %c0_64 = arith.constant 0 : index
    %41 = vector.load %arg1[%c0_61, %c4_62, %c1_63, %c0_64] : memref<1x6x6x16xf32, #tpu.memory_space<vmem>>, vector<1x1x5x16xf32>
    %42 = vector.shape_cast %41 : vector<1x1x5x16xf32> to vector<5x16xf32>
    %43 = tpu.concatenate %36, %38, %40, %42 in 1 : vector<5x16xf32>, vector<5x16xf32>, vector<5x16xf32>, vector<5x16xf32> -> vector<5x64xf32>
    %44 = arith.truncf %43 : vector<5x64xf32> to vector<5x64xbf16>
    %cst_65 = arith.constant dense<0.000000e+00> : vector<5x8xf32>
    %45 = tpu.matmul %44, %0, %cst_65 {dimension_numbers = #tpu.dot_dimension_numbers<[1], [0], [0], [1], [0, 0, 1, 1], [], []>} : vector<5x64xbf16>, vector<64x8xbf16>, vector<5x8xf32> -> vector<5x8xf32>
    %c0_66 = arith.constant 0 : index
    %c4_67 = arith.constant 4 : index
    %c0_68 = arith.constant 0 : index
    %c0_69 = arith.constant 0 : index
    %46 = vector.load %arg1[%c0_66, %c4_67, %c0_68, %c0_69] : memref<1x6x6x16xf32, #tpu.memory_space<vmem>>, vector<1x1x5x16xf32>
    %47 = vector.shape_cast %46 : vector<1x1x5x16xf32> to vector<5x16xf32>
    %c0_70 = arith.constant 0 : index
    %c4_71 = arith.constant 4 : index
    %c1_72 = arith.constant 1 : index
    %c0_73 = arith.constant 0 : index
    %48 = vector.load %arg1[%c0_70, %c4_71, %c1_72, %c0_73] : memref<1x6x6x16xf32, #tpu.memory_space<vmem>>, vector<1x1x5x16xf32>
    %49 = vector.shape_cast %48 : vector<1x1x5x16xf32> to vector<5x16xf32>
    %c0_74 = arith.constant 0 : index
    %c5 = arith.constant 5 : index
    %c0_75 = arith.constant 0 : index
    %c0_76 = arith.constant 0 : index
    %50 = vector.load %arg1[%c0_74, %c5, %c0_75, %c0_76] : memref<1x6x6x16xf32, #tpu.memory_space<vmem>>, vector<1x1x5x16xf32>
    %51 = vector.shape_cast %50 : vector<1x1x5x16xf32> to vector<5x16xf32>
    %c0_77 = arith.constant 0 : index
    %c5_78 = arith.constant 5 : index
    %c1_79 = arith.constant 1 : index
    %c0_80 = arith.constant 0 : index
    %52 = vector.load %arg1[%c0_77, %c5_78, %c1_79, %c0_80] : memref<1x6x6x16xf32, #tpu.memory_space<vmem>>, vector<1x1x5x16xf32>
    %53 = vector.shape_cast %52 : vector<1x1x5x16xf32> to vector<5x16xf32>
    %54 = tpu.concatenate %47, %49, %51, %53 in 1 : vector<5x16xf32>, vector<5x16xf32>, vector<5x16xf32>, vector<5x16xf32> -> vector<5x64xf32>
    %55 = arith.truncf %54 : vector<5x64xf32> to vector<5x64xbf16>
    %cst_81 = arith.constant dense<0.000000e+00> : vector<5x8xf32>
    %56 = tpu.matmul %55, %0, %cst_81 {dimension_numbers = #tpu.dot_dimension_numbers<[1], [0], [0], [1], [0, 0, 1, 1], [], []>} : vector<5x64xbf16>, vector<64x8xbf16>, vector<5x8xf32> -> vector<5x8xf32>
    %57 = vector.shape_cast %12 : vector<5x8xf32> to vector<1x5x8xf32>
    %58 = vector.shape_cast %23 : vector<5x8xf32> to vector<1x5x8xf32>
    %59 = vector.shape_cast %34 : vector<5x8xf32> to vector<1x5x8xf32>
    %60 = vector.shape_cast %45 : vector<5x8xf32> to vector<1x5x8xf32>
    %61 = vector.shape_cast %56 : vector<5x8xf32> to vector<1x5x8xf32>
    %62 = tpu.concatenate %57, %58, %59, %60, %61 in 0 : vector<1x5x8xf32>, vector<1x5x8xf32>, vector<1x5x8xf32>, vector<1x5x8xf32>, vector<1x5x8xf32> -> vector<5x5x8xf32>
    %63 = vector.shape_cast %1 : vector<1x8xf32> to vector<1x1x8xf32>
    %64 = vector.broadcast %63 : vector<1x1x8xf32> to vector<5x5x8xf32>
    %65 = arith.addf %62, %64 : vector<5x5x8xf32>
    %cst_82 = arith.constant 0.000000e+00 : f32
    %66 = vector.broadcast %cst_82 : f32 to vector<5x5x8xf32>
    %67 = arith.cmpf oge, %65, %66 : vector<5x5x8xf32>
    %cst_83 = arith.constant 2.000000e-01 : f32
    %68 = vector.broadcast %cst_83 : f32 to vector<5x5x8xf32>
    %69 = arith.mulf %68, %65 : vector<5x5x8xf32>
    %70 = arith.select %67, %65, %69 : vector<5x5x8xi1>, vector<5x5x8xf32>
    %c0_84 = arith.constant 0 : index
    %c0_85 = arith.constant 0 : index
    %c0_86 = arith.constant 0 : index
    %c0_87 = arith.constant 0 : index
    %71 = vector.load %arg4[%c0_84, %c0_85, %c0_86, %c0_87] : memref<1x5x5x8xf32, #tpu.memory_space<vmem>>, vector<1x5x5x8xf32>
    %72 = vector.shape_cast %71 : vector<1x5x5x8xf32> to vector<5x5x8xf32>
    %73 = vector.shape_cast %70 : vector<5x5x8xf32> to vector<1x5x5x8xf32>
    tpu.vector_store %arg4[%c0_84, %c0_85, %c0_86, %c0_87], %73 {strides = array<i32>} : memref<1x5x5x8xf32, #tpu.memory_space<vmem>>, vector<1x5x5x8xf32>,
    return
  }
  func.func @transform_0(%arg0: i32) -> (i32, i32, i32, i32) {
    %c0_i32 = arith.constant 0 : i32
    %c0_i32_0 = arith.constant 0 : i32
    %c0_i32_1 = arith.constant 0 : i32
    %c0_i32_2 = arith.constant 0 : i32
    return %arg0, %c0_i32, %c0_i32_0, %c0_i32_1 : i32, i32, i32, i32
  }
  func.func @transform_1(%arg0: i32) -> (i32, i32) {
    %c0_i32 = arith.constant 0 : i32
    %c0_i32_0 = arith.constant 0 : i32
    %c0_i32_1 = arith.constant 0 : i32
    return %c0_i32, %c0_i32_0 : i32, i32
  }
  func.func @transform_2(%arg0: i32) -> (i32, i32) {
    %c0_i32 = arith.constant 0 : i32
    %c0_i32_0 = arith.constant 0 : i32
    %c0_i32_1 = arith.constant 0 : i32
    return %c0_i32, %c0_i32_0 : i32, i32
  }
  func.func @transform_3(%arg0: i32) -> (i32, i32, i32, i32) {
    %c0_i32 = arith.constant 0 : i32
    %c0_i32_0 = arith.constant 0 : i32
    %c0_i32_1 = arith.constant 0 : i32
    %c0_i32_2 = arith.constant 0 : i32
    return %arg0, %c0_i32, %c0_i32_0, %c0_i32_1 : i32, i32, i32, i32
  }
}

module attributes {stable_mosaic.version = 11 : i64} {
  func.func @_fused_conv_group_kernel(%arg0: i32, %arg1: memref<1x5x5x32xf32, #tpu.memory_space<vmem>>, %arg2: memref<128x16xbf16, #tpu.memory_space<vmem>>, %arg3: memref<1x16xf32, #tpu.memory_space<vmem>>, %arg4: memref<1x3x3x16xf32, #tpu.memory_space<vmem>>) attributes {dimension_semantics = [#tpu.dimension_semantics<parallel>], iteration_bounds = array<i64: 2>, scalar_prefetch = 0 : i64, scratch_operands = 0 : i64, tpu.core_type = #tpu.core_type<tc>, window_params = [{transform_indices = @transform_0, window_bounds = array<i64: 1, 5, 5, 32>}, {pipeline_mode = #tpu.pipeline_mode<synchronous>, transform_indices = @transform_1, window_bounds = array<i64: 128, 16>}, {pipeline_mode = #tpu.pipeline_mode<synchronous>, transform_indices = @transform_2, window_bounds = array<i64: 1, 16>}, {transform_indices = @transform_3, window_bounds = array<i64: 1, 3, 3, 16>}]} {
    %c0 = arith.constant 0 : index
    %c0_0 = arith.constant 0 : index
    %0 = vector.load %arg2[%c0, %c0_0] : memref<128x16xbf16, #tpu.memory_space<vmem>>, vector<128x16xbf16>
    %c0_1 = arith.constant 0 : index
    %c0_2 = arith.constant 0 : index
    %1 = vector.load %arg3[%c0_1, %c0_2] : memref<1x16xf32, #tpu.memory_space<vmem>>, vector<1x16xf32>
    %c0_3 = arith.constant 0 : index
    %c0_4 = arith.constant 0 : index
    %c0_5 = arith.constant 0 : index
    %c0_6 = arith.constant 0 : index
    %2 = vector.load %arg1[%c0_3, %c0_4, %c0_5, %c0_6] : memref<1x5x5x32xf32, #tpu.memory_space<vmem>>, vector<1x1x3x32xf32>
    %3 = vector.shape_cast %2 : vector<1x1x3x32xf32> to vector<3x32xf32>
    %c0_7 = arith.constant 0 : index
    %c0_8 = arith.constant 0 : index
    %c1 = arith.constant 1 : index
    %c0_9 = arith.constant 0 : index
    %4 = vector.load %arg1[%c0_7, %c0_8, %c1, %c0_9] : memref<1x5x5x32xf32, #tpu.memory_space<vmem>>, vector<1x1x3x32xf32>
    %5 = vector.shape_cast %4 : vector<1x1x3x32xf32> to vector<3x32xf32>
    %c0_10 = arith.constant 0 : index
    %c1_11 = arith.constant 1 : index
    %c0_12 = arith.constant 0 : index
    %c0_13 = arith.constant 0 : index
    %6 = vector.load %arg1[%c0_10, %c1_11, %c0_12, %c0_13] : memref<1x5x5x32xf32, #tpu.memory_space<vmem>>, vector<1x1x3x32xf32>
    %7 = vector.shape_cast %6 : vector<1x1x3x32xf32> to vector<3x32xf32>
    %c0_14 = arith.constant 0 : index
    %c1_15 = arith.constant 1 : index
    %c1_16 = arith.constant 1 : index
    %c0_17 = arith.constant 0 : index
    %8 = vector.load %arg1[%c0_14, %c1_15, %c1_16, %c0_17] : memref<1x5x5x32xf32, #tpu.memory_space<vmem>>, vector<1x1x3x32xf32>
    %9 = vector.shape_cast %8 : vector<1x1x3x32xf32> to vector<3x32xf32>
    %10 = tpu.concatenate %3, %5, %7, %9 in 1 : vector<3x32xf32>, vector<3x32xf32>, vector<3x32xf32>, vector<3x32xf32> -> vector<3x128xf32>
    %11 = arith.truncf %10 : vector<3x128xf32> to vector<3x128xbf16>
    %cst = arith.constant dense<0.000000e+00> : vector<3x16xf32>
    %12 = tpu.matmul %11, %0, %cst {dimension_numbers = #tpu.dot_dimension_numbers<[1], [0], [0], [1], [0, 0, 1, 1], [], []>} : vector<3x128xbf16>, vector<128x16xbf16>, vector<3x16xf32> -> vector<3x16xf32>
    %c0_18 = arith.constant 0 : index
    %c1_19 = arith.constant 1 : index
    %c0_20 = arith.constant 0 : index
    %c0_21 = arith.constant 0 : index
    %13 = vector.load %arg1[%c0_18, %c1_19, %c0_20, %c0_21] : memref<1x5x5x32xf32, #tpu.memory_space<vmem>>, vector<1x1x3x32xf32>
    %14 = vector.shape_cast %13 : vector<1x1x3x32xf32> to vector<3x32xf32>
    %c0_22 = arith.constant 0 : index
    %c1_23 = arith.constant 1 : index
    %c1_24 = arith.constant 1 : index
    %c0_25 = arith.constant 0 : index
    %15 = vector.load %arg1[%c0_22, %c1_23, %c1_24, %c0_25] : memref<1x5x5x32xf32, #tpu.memory_space<vmem>>, vector<1x1x3x32xf32>
    %16 = vector.shape_cast %15 : vector<1x1x3x32xf32> to vector<3x32xf32>
    %c0_26 = arith.constant 0 : index
    %c2 = arith.constant 2 : index
    %c0_27 = arith.constant 0 : index
    %c0_28 = arith.constant 0 : index
    %17 = vector.load %arg1[%c0_26, %c2, %c0_27, %c0_28] : memref<1x5x5x32xf32, #tpu.memory_space<vmem>>, vector<1x1x3x32xf32>
    %18 = vector.shape_cast %17 : vector<1x1x3x32xf32> to vector<3x32xf32>
    %c0_29 = arith.constant 0 : index
    %c2_30 = arith.constant 2 : index
    %c1_31 = arith.constant 1 : index
    %c0_32 = arith.constant 0 : index
    %19 = vector.load %arg1[%c0_29, %c2_30, %c1_31, %c0_32] : memref<1x5x5x32xf32, #tpu.memory_space<vmem>>, vector<1x1x3x32xf32>
    %20 = vector.shape_cast %19 : vector<1x1x3x32xf32> to vector<3x32xf32>
    %21 = tpu.concatenate %14, %16, %18, %20 in 1 : vector<3x32xf32>, vector<3x32xf32>, vector<3x32xf32>, vector<3x32xf32> -> vector<3x128xf32>
    %22 = arith.truncf %21 : vector<3x128xf32> to vector<3x128xbf16>
    %cst_33 = arith.constant dense<0.000000e+00> : vector<3x16xf32>
    %23 = tpu.matmul %22, %0, %cst_33 {dimension_numbers = #tpu.dot_dimension_numbers<[1], [0], [0], [1], [0, 0, 1, 1], [], []>} : vector<3x128xbf16>, vector<128x16xbf16>, vector<3x16xf32> -> vector<3x16xf32>
    %c0_34 = arith.constant 0 : index
    %c2_35 = arith.constant 2 : index
    %c0_36 = arith.constant 0 : index
    %c0_37 = arith.constant 0 : index
    %24 = vector.load %arg1[%c0_34, %c2_35, %c0_36, %c0_37] : memref<1x5x5x32xf32, #tpu.memory_space<vmem>>, vector<1x1x3x32xf32>
    %25 = vector.shape_cast %24 : vector<1x1x3x32xf32> to vector<3x32xf32>
    %c0_38 = arith.constant 0 : index
    %c2_39 = arith.constant 2 : index
    %c1_40 = arith.constant 1 : index
    %c0_41 = arith.constant 0 : index
    %26 = vector.load %arg1[%c0_38, %c2_39, %c1_40, %c0_41] : memref<1x5x5x32xf32, #tpu.memory_space<vmem>>, vector<1x1x3x32xf32>
    %27 = vector.shape_cast %26 : vector<1x1x3x32xf32> to vector<3x32xf32>
    %c0_42 = arith.constant 0 : index
    %c3 = arith.constant 3 : index
    %c0_43 = arith.constant 0 : index
    %c0_44 = arith.constant 0 : index
    %28 = vector.load %arg1[%c0_42, %c3, %c0_43, %c0_44] : memref<1x5x5x32xf32, #tpu.memory_space<vmem>>, vector<1x1x3x32xf32>
    %29 = vector.shape_cast %28 : vector<1x1x3x32xf32> to vector<3x32xf32>
    %c0_45 = arith.constant 0 : index
    %c3_46 = arith.constant 3 : index
    %c1_47 = arith.constant 1 : index
    %c0_48 = arith.constant 0 : index
    %30 = vector.load %arg1[%c0_45, %c3_46, %c1_47, %c0_48] : memref<1x5x5x32xf32, #tpu.memory_space<vmem>>, vector<1x1x3x32xf32>
    %31 = vector.shape_cast %30 : vector<1x1x3x32xf32> to vector<3x32xf32>
    %32 = tpu.concatenate %25, %27, %29, %31 in 1 : vector<3x32xf32>, vector<3x32xf32>, vector<3x32xf32>, vector<3x32xf32> -> vector<3x128xf32>
    %33 = arith.truncf %32 : vector<3x128xf32> to vector<3x128xbf16>
    %cst_49 = arith.constant dense<0.000000e+00> : vector<3x16xf32>
    %34 = tpu.matmul %33, %0, %cst_49 {dimension_numbers = #tpu.dot_dimension_numbers<[1], [0], [0], [1], [0, 0, 1, 1], [], []>} : vector<3x128xbf16>, vector<128x16xbf16>, vector<3x16xf32> -> vector<3x16xf32>
    %35 = vector.shape_cast %12 : vector<3x16xf32> to vector<1x3x16xf32>
    %36 = vector.shape_cast %23 : vector<3x16xf32> to vector<1x3x16xf32>
    %37 = vector.shape_cast %34 : vector<3x16xf32> to vector<1x3x16xf32>
    %38 = tpu.concatenate %35, %36, %37 in 0 : vector<1x3x16xf32>, vector<1x3x16xf32>, vector<1x3x16xf32> -> vector<3x3x16xf32>
    %39 = vector.shape_cast %1 : vector<1x16xf32> to vector<1x1x16xf32>
    %40 = vector.broadcast %39 : vector<1x1x16xf32> to vector<3x3x16xf32>
    %41 = arith.addf %38, %40 : vector<3x3x16xf32>
    %cst_50 = arith.constant dense<0.000000e+00> : vector<16xf32>
    %42 = vector.multi_reduction <add>, %41, %cst_50 [0, 1] : vector<3x3x16xf32> to vector<16xf32>
    %43 = vector.shape_cast %42 : vector<16xf32> to vector<1x1x16xf32>
    %cst_51 = arith.constant 9.000000e+00 : f32
    %44 = vector.broadcast %cst_51 : f32 to vector<1x1x16xf32>
    %45 = arith.divf %43, %44 : vector<1x1x16xf32>
    %46 = arith.mulf %41, %41 : vector<3x3x16xf32>
    %cst_52 = arith.constant dense<0.000000e+00> : vector<16xf32>
    %47 = vector.multi_reduction <add>, %46, %cst_52 [0, 1] : vector<3x3x16xf32> to vector<16xf32>
    %48 = vector.shape_cast %47 : vector<16xf32> to vector<1x1x16xf32>
    %cst_53 = arith.constant 9.000000e+00 : f32
    %49 = vector.broadcast %cst_53 : f32 to vector<1x1x16xf32>
    %50 = arith.divf %48, %49 : vector<1x1x16xf32>
    %51 = arith.mulf %45, %45 : vector<1x1x16xf32>
    %52 = arith.subf %50, %51 : vector<1x1x16xf32>
    %53 = vector.broadcast %45 : vector<1x1x16xf32> to vector<3x3x16xf32>
    %54 = arith.subf %41, %53 : vector<3x3x16xf32>
    %cst_54 = arith.constant 0.000000e+00 : f32
    %55 = vector.broadcast %cst_54 : f32 to vector<1x1x16xf32>
    %56 = arith.maximumf %52, %55 : vector<1x1x16xf32>
    %cst_55 = arith.constant 9.99999974E-6 : f32
    %57 = vector.broadcast %cst_55 : f32 to vector<1x1x16xf32>
    %58 = arith.addf %56, %57 : vector<1x1x16xf32>
    %59 = math.rsqrt %58 : vector<1x1x16xf32>
    %60 = vector.broadcast %59 : vector<1x1x16xf32> to vector<3x3x16xf32>
    %61 = arith.mulf %54, %60 : vector<3x3x16xf32>
    %cst_56 = arith.constant 0.000000e+00 : f32
    %62 = vector.broadcast %cst_56 : f32 to vector<3x3x16xf32>
    %63 = arith.cmpf oge, %61, %62 : vector<3x3x16xf32>
    %cst_57 = arith.constant 2.000000e-01 : f32
    %64 = vector.broadcast %cst_57 : f32 to vector<3x3x16xf32>
    %65 = arith.mulf %64, %61 : vector<3x3x16xf32>
    %66 = arith.select %63, %61, %65 : vector<3x3x16xi1>, vector<3x3x16xf32>
    %c0_58 = arith.constant 0 : index
    %c0_59 = arith.constant 0 : index
    %c0_60 = arith.constant 0 : index
    %c0_61 = arith.constant 0 : index
    %67 = vector.load %arg4[%c0_58, %c0_59, %c0_60, %c0_61] : memref<1x3x3x16xf32, #tpu.memory_space<vmem>>, vector<1x3x3x16xf32>
    %68 = vector.shape_cast %67 : vector<1x3x3x16xf32> to vector<3x3x16xf32>
    %69 = vector.shape_cast %66 : vector<3x3x16xf32> to vector<1x3x3x16xf32>
    tpu.vector_store %arg4[%c0_58, %c0_59, %c0_60, %c0_61], %69 {strides = array<i32>} : memref<1x3x3x16xf32, #tpu.memory_space<vmem>>, vector<1x3x3x16xf32>,
    return
  }
  func.func @transform_0(%arg0: i32) -> (i32, i32, i32, i32) {
    %c0_i32 = arith.constant 0 : i32
    %c0_i32_0 = arith.constant 0 : i32
    %c0_i32_1 = arith.constant 0 : i32
    %c0_i32_2 = arith.constant 0 : i32
    return %arg0, %c0_i32, %c0_i32_0, %c0_i32_1 : i32, i32, i32, i32
  }
  func.func @transform_1(%arg0: i32) -> (i32, i32) {
    %c0_i32 = arith.constant 0 : i32
    %c0_i32_0 = arith.constant 0 : i32
    %c0_i32_1 = arith.constant 0 : i32
    return %c0_i32, %c0_i32_0 : i32, i32
  }
  func.func @transform_2(%arg0: i32) -> (i32, i32) {
    %c0_i32 = arith.constant 0 : i32
    %c0_i32_0 = arith.constant 0 : i32
    %c0_i32_1 = arith.constant 0 : i32
    return %c0_i32, %c0_i32_0 : i32, i32
  }
  func.func @transform_3(%arg0: i32) -> (i32, i32, i32, i32) {
    %c0_i32 = arith.constant 0 : i32
    %c0_i32_0 = arith.constant 0 : i32
    %c0_i32_1 = arith.constant 0 : i32
    %c0_i32_2 = arith.constant 0 : i32
    return %arg0, %c0_i32, %c0_i32_0, %c0_i32_1 : i32, i32, i32, i32
  }
}

module attributes {stable_mosaic.version = 11 : i64} {
  func.func @_fused_conv_group_kernel(%arg0: i32, %arg1: memref<1x7x7x16xf32, #tpu.memory_space<vmem>>, %arg2: memref<256x32xbf16, #tpu.memory_space<vmem>>, %arg3: memref<1x32xf32, #tpu.memory_space<vmem>>, %arg4: memref<1x4x4x32xf32, #tpu.memory_space<vmem>>) attributes {dimension_semantics = [#tpu.dimension_semantics<parallel>], iteration_bounds = array<i64: 2>, scalar_prefetch = 0 : i64, scratch_operands = 0 : i64, tpu.core_type = #tpu.core_type<tc>, window_params = [{transform_indices = @transform_0, window_bounds = array<i64: 1, 7, 7, 16>}, {pipeline_mode = #tpu.pipeline_mode<synchronous>, transform_indices = @transform_1, window_bounds = array<i64: 256, 32>}, {pipeline_mode = #tpu.pipeline_mode<synchronous>, transform_indices = @transform_2, window_bounds = array<i64: 1, 32>}, {transform_indices = @transform_3, window_bounds = array<i64: 1, 4, 4, 32>}]} {
    %c0 = arith.constant 0 : index
    %c0_0 = arith.constant 0 : index
    %0 = vector.load %arg2[%c0, %c0_0] : memref<256x32xbf16, #tpu.memory_space<vmem>>, vector<256x32xbf16>
    %c0_1 = arith.constant 0 : index
    %c0_2 = arith.constant 0 : index
    %1 = vector.load %arg3[%c0_1, %c0_2] : memref<1x32xf32, #tpu.memory_space<vmem>>, vector<1x32xf32>
    %c0_3 = arith.constant 0 : index
    %c0_4 = arith.constant 0 : index
    %c0_5 = arith.constant 0 : index
    %c0_6 = arith.constant 0 : index
    %2 = vector.load %arg1[%c0_3, %c0_4, %c0_5, %c0_6] : memref<1x7x7x16xf32, #tpu.memory_space<vmem>>, vector<1x1x4x16xf32>
    %3 = vector.shape_cast %2 : vector<1x1x4x16xf32> to vector<4x16xf32>
    %c0_7 = arith.constant 0 : index
    %c0_8 = arith.constant 0 : index
    %c1 = arith.constant 1 : index
    %c0_9 = arith.constant 0 : index
    %4 = vector.load %arg1[%c0_7, %c0_8, %c1, %c0_9] : memref<1x7x7x16xf32, #tpu.memory_space<vmem>>, vector<1x1x4x16xf32>
    %5 = vector.shape_cast %4 : vector<1x1x4x16xf32> to vector<4x16xf32>
    %c0_10 = arith.constant 0 : index
    %c0_11 = arith.constant 0 : index
    %c2 = arith.constant 2 : index
    %c0_12 = arith.constant 0 : index
    %6 = vector.load %arg1[%c0_10, %c0_11, %c2, %c0_12] : memref<1x7x7x16xf32, #tpu.memory_space<vmem>>, vector<1x1x4x16xf32>
    %7 = vector.shape_cast %6 : vector<1x1x4x16xf32> to vector<4x16xf32>
    %c0_13 = arith.constant 0 : index
    %c0_14 = arith.constant 0 : index
    %c3 = arith.constant 3 : index
    %c0_15 = arith.constant 0 : index
    %8 = vector.load %arg1[%c0_13, %c0_14, %c3, %c0_15] : memref<1x7x7x16xf32, #tpu.memory_space<vmem>>, vector<1x1x4x16xf32>
    %9 = vector.shape_cast %8 : vector<1x1x4x16xf32> to vector<4x16xf32>
    %c0_16 = arith.constant 0 : index
    %c1_17 = arith.constant 1 : index
    %c0_18 = arith.constant 0 : index
    %c0_19 = arith.constant 0 : index
    %10 = vector.load %arg1[%c0_16, %c1_17, %c0_18, %c0_19] : memref<1x7x7x16xf32, #tpu.memory_space<vmem>>, vector<1x1x4x16xf32>
    %11 = vector.shape_cast %10 : vector<1x1x4x16xf32> to vector<4x16xf32>
    %c0_20 = arith.constant 0 : index
    %c1_21 = arith.constant 1 : index
    %c1_22 = arith.constant 1 : index
    %c0_23 = arith.constant 0 : index
    %12 = vector.load %arg1[%c0_20, %c1_21, %c1_22, %c0_23] : memref<1x7x7x16xf32, #tpu.memory_space<vmem>>, vector<1x1x4x16xf32>
    %13 = vector.shape_cast %12 : vector<1x1x4x16xf32> to vector<4x16xf32>
    %c0_24 = arith.constant 0 : index
    %c1_25 = arith.constant 1 : index
    %c2_26 = arith.constant 2 : index
    %c0_27 = arith.constant 0 : index
    %14 = vector.load %arg1[%c0_24, %c1_25, %c2_26, %c0_27] : memref<1x7x7x16xf32, #tpu.memory_space<vmem>>, vector<1x1x4x16xf32>
    %15 = vector.shape_cast %14 : vector<1x1x4x16xf32> to vector<4x16xf32>
    %c0_28 = arith.constant 0 : index
    %c1_29 = arith.constant 1 : index
    %c3_30 = arith.constant 3 : index
    %c0_31 = arith.constant 0 : index
    %16 = vector.load %arg1[%c0_28, %c1_29, %c3_30, %c0_31] : memref<1x7x7x16xf32, #tpu.memory_space<vmem>>, vector<1x1x4x16xf32>
    %17 = vector.shape_cast %16 : vector<1x1x4x16xf32> to vector<4x16xf32>
    %c0_32 = arith.constant 0 : index
    %c2_33 = arith.constant 2 : index
    %c0_34 = arith.constant 0 : index
    %c0_35 = arith.constant 0 : index
    %18 = vector.load %arg1[%c0_32, %c2_33, %c0_34, %c0_35] : memref<1x7x7x16xf32, #tpu.memory_space<vmem>>, vector<1x1x4x16xf32>
    %19 = vector.shape_cast %18 : vector<1x1x4x16xf32> to vector<4x16xf32>
    %c0_36 = arith.constant 0 : index
    %c2_37 = arith.constant 2 : index
    %c1_38 = arith.constant 1 : index
    %c0_39 = arith.constant 0 : index
    %20 = vector.load %arg1[%c0_36, %c2_37, %c1_38, %c0_39] : memref<1x7x7x16xf32, #tpu.memory_space<vmem>>, vector<1x1x4x16xf32>
    %21 = vector.shape_cast %20 : vector<1x1x4x16xf32> to vector<4x16xf32>
    %c0_40 = arith.constant 0 : index
    %c2_41 = arith.constant 2 : index
    %c2_42 = arith.constant 2 : index
    %c0_43 = arith.constant 0 : index
    %22 = vector.load %arg1[%c0_40, %c2_41, %c2_42, %c0_43] : memref<1x7x7x16xf32, #tpu.memory_space<vmem>>, vector<1x1x4x16xf32>
    %23 = vector.shape_cast %22 : vector<1x1x4x16xf32> to vector<4x16xf32>
    %c0_44 = arith.constant 0 : index
    %c2_45 = arith.constant 2 : index
    %c3_46 = arith.constant 3 : index
    %c0_47 = arith.constant 0 : index
    %24 = vector.load %arg1[%c0_44, %c2_45, %c3_46, %c0_47] : memref<1x7x7x16xf32, #tpu.memory_space<vmem>>, vector<1x1x4x16xf32>
    %25 = vector.shape_cast %24 : vector<1x1x4x16xf32> to vector<4x16xf32>
    %c0_48 = arith.constant 0 : index
    %c3_49 = arith.constant 3 : index
    %c0_50 = arith.constant 0 : index
    %c0_51 = arith.constant 0 : index
    %26 = vector.load %arg1[%c0_48, %c3_49, %c0_50, %c0_51] : memref<1x7x7x16xf32, #tpu.memory_space<vmem>>, vector<1x1x4x16xf32>
    %27 = vector.shape_cast %26 : vector<1x1x4x16xf32> to vector<4x16xf32>
    %c0_52 = arith.constant 0 : index
    %c3_53 = arith.constant 3 : index
    %c1_54 = arith.constant 1 : index
    %c0_55 = arith.constant 0 : index
    %28 = vector.load %arg1[%c0_52, %c3_53, %c1_54, %c0_55] : memref<1x7x7x16xf32, #tpu.memory_space<vmem>>, vector<1x1x4x16xf32>
    %29 = vector.shape_cast %28 : vector<1x1x4x16xf32> to vector<4x16xf32>
    %c0_56 = arith.constant 0 : index
    %c3_57 = arith.constant 3 : index
    %c2_58 = arith.constant 2 : index
    %c0_59 = arith.constant 0 : index
    %30 = vector.load %arg1[%c0_56, %c3_57, %c2_58, %c0_59] : memref<1x7x7x16xf32, #tpu.memory_space<vmem>>, vector<1x1x4x16xf32>
    %31 = vector.shape_cast %30 : vector<1x1x4x16xf32> to vector<4x16xf32>
    %c0_60 = arith.constant 0 : index
    %c3_61 = arith.constant 3 : index
    %c3_62 = arith.constant 3 : index
    %c0_63 = arith.constant 0 : index
    %32 = vector.load %arg1[%c0_60, %c3_61, %c3_62, %c0_63] : memref<1x7x7x16xf32, #tpu.memory_space<vmem>>, vector<1x1x4x16xf32>
    %33 = vector.shape_cast %32 : vector<1x1x4x16xf32> to vector<4x16xf32>
    %34 = tpu.concatenate %3, %5, %7, %9, %11, %13, %15, %17, %19, %21, %23, %25, %27, %29, %31, %33 in 1 : vector<4x16xf32>, vector<4x16xf32>, vector<4x16xf32>, vector<4x16xf32>, vector<4x16xf32>, vector<4x16xf32>, vector<4x16xf32>, vector<4x16xf32>, vector<4x16xf32>, vector<4x16xf32>, vector<4x16xf32>, vector<4x16xf32>, vector<4x16xf32>, vector<4x16xf32>, vector<4x16xf32>, vector<4x16xf32> -> vector<4x256xf32>
    %35 = arith.truncf %34 : vector<4x256xf32> to vector<4x256xbf16>
    %cst = arith.constant dense<0.000000e+00> : vector<4x32xf32>
    %36 = tpu.matmul %35, %0, %cst {dimension_numbers = #tpu.dot_dimension_numbers<[1], [0], [0], [1], [0, 0, 1, 1], [], []>} : vector<4x256xbf16>, vector<256x32xbf16>, vector<4x32xf32> -> vector<4x32xf32>
    %c0_64 = arith.constant 0 : index
    %c1_65 = arith.constant 1 : index
    %c0_66 = arith.constant 0 : index
    %c0_67 = arith.constant 0 : index
    %37 = vector.load %arg1[%c0_64, %c1_65, %c0_66, %c0_67] : memref<1x7x7x16xf32, #tpu.memory_space<vmem>>, vector<1x1x4x16xf32>
    %38 = vector.shape_cast %37 : vector<1x1x4x16xf32> to vector<4x16xf32>
    %c0_68 = arith.constant 0 : index
    %c1_69 = arith.constant 1 : index
    %c1_70 = arith.constant 1 : index
    %c0_71 = arith.constant 0 : index
    %39 = vector.load %arg1[%c0_68, %c1_69, %c1_70, %c0_71] : memref<1x7x7x16xf32, #tpu.memory_space<vmem>>, vector<1x1x4x16xf32>
    %40 = vector.shape_cast %39 : vector<1x1x4x16xf32> to vector<4x16xf32>
    %c0_72 = arith.constant 0 : index
    %c1_73 = arith.constant 1 : index
    %c2_74 = arith.constant 2 : index
    %c0_75 = arith.constant 0 : index
    %41 = vector.load %arg1[%c0_72, %c1_73, %c2_74, %c0_75] : memref<1x7x7x16xf32, #tpu.memory_space<vmem>>, vector<1x1x4x16xf32>
    %42 = vector.shape_cast %41 : vector<1x1x4x16xf32> to vector<4x16xf32>
    %c0_76 = arith.constant 0 : index
    %c1_77 = arith.constant 1 : index
    %c3_78 = arith.constant 3 : index
    %c0_79 = arith.constant 0 : index
    %43 = vector.load %arg1[%c0_76, %c1_77, %c3_78, %c0_79] : memref<1x7x7x16xf32, #tpu.memory_space<vmem>>, vector<1x1x4x16xf32>
    %44 = vector.shape_cast %43 : vector<1x1x4x16xf32> to vector<4x16xf32>
    %c0_80 = arith.constant 0 : index
    %c2_81 = arith.constant 2 : index
    %c0_82 = arith.constant 0 : index
    %c0_83 = arith.constant 0 : index
    %45 = vector.load %arg1[%c0_80, %c2_81, %c0_82, %c0_83] : memref<1x7x7x16xf32, #tpu.memory_space<vmem>>, vector<1x1x4x16xf32>
    %46 = vector.shape_cast %45 : vector<1x1x4x16xf32> to vector<4x16xf32>
    %c0_84 = arith.constant 0 : index
    %c2_85 = arith.constant 2 : index
    %c1_86 = arith.constant 1 : index
    %c0_87 = arith.constant 0 : index
    %47 = vector.load %arg1[%c0_84, %c2_85, %c1_86, %c0_87] : memref<1x7x7x16xf32, #tpu.memory_space<vmem>>, vector<1x1x4x16xf32>
    %48 = vector.shape_cast %47 : vector<1x1x4x16xf32> to vector<4x16xf32>
    %c0_88 = arith.constant 0 : index
    %c2_89 = arith.constant 2 : index
    %c2_90 = arith.constant 2 : index
    %c0_91 = arith.constant 0 : index
    %49 = vector.load %arg1[%c0_88, %c2_89, %c2_90, %c0_91] : memref<1x7x7x16xf32, #tpu.memory_space<vmem>>, vector<1x1x4x16xf32>
    %50 = vector.shape_cast %49 : vector<1x1x4x16xf32> to vector<4x16xf32>
    %c0_92 = arith.constant 0 : index
    %c2_93 = arith.constant 2 : index
    %c3_94 = arith.constant 3 : index
    %c0_95 = arith.constant 0 : index
    %51 = vector.load %arg1[%c0_92, %c2_93, %c3_94, %c0_95] : memref<1x7x7x16xf32, #tpu.memory_space<vmem>>, vector<1x1x4x16xf32>
    %52 = vector.shape_cast %51 : vector<1x1x4x16xf32> to vector<4x16xf32>
    %c0_96 = arith.constant 0 : index
    %c3_97 = arith.constant 3 : index
    %c0_98 = arith.constant 0 : index
    %c0_99 = arith.constant 0 : index
    %53 = vector.load %arg1[%c0_96, %c3_97, %c0_98, %c0_99] : memref<1x7x7x16xf32, #tpu.memory_space<vmem>>, vector<1x1x4x16xf32>
    %54 = vector.shape_cast %53 : vector<1x1x4x16xf32> to vector<4x16xf32>
    %c0_100 = arith.constant 0 : index
    %c3_101 = arith.constant 3 : index
    %c1_102 = arith.constant 1 : index
    %c0_103 = arith.constant 0 : index
    %55 = vector.load %arg1[%c0_100, %c3_101, %c1_102, %c0_103] : memref<1x7x7x16xf32, #tpu.memory_space<vmem>>, vector<1x1x4x16xf32>
    %56 = vector.shape_cast %55 : vector<1x1x4x16xf32> to vector<4x16xf32>
    %c0_104 = arith.constant 0 : index
    %c3_105 = arith.constant 3 : index
    %c2_106 = arith.constant 2 : index
    %c0_107 = arith.constant 0 : index
    %57 = vector.load %arg1[%c0_104, %c3_105, %c2_106, %c0_107] : memref<1x7x7x16xf32, #tpu.memory_space<vmem>>, vector<1x1x4x16xf32>
    %58 = vector.shape_cast %57 : vector<1x1x4x16xf32> to vector<4x16xf32>
    %c0_108 = arith.constant 0 : index
    %c3_109 = arith.constant 3 : index
    %c3_110 = arith.constant 3 : index
    %c0_111 = arith.constant 0 : index
    %59 = vector.load %arg1[%c0_108, %c3_109, %c3_110, %c0_111] : memref<1x7x7x16xf32, #tpu.memory_space<vmem>>, vector<1x1x4x16xf32>
    %60 = vector.shape_cast %59 : vector<1x1x4x16xf32> to vector<4x16xf32>
    %c0_112 = arith.constant 0 : index
    %c4 = arith.constant 4 : index
    %c0_113 = arith.constant 0 : index
    %c0_114 = arith.constant 0 : index
    %61 = vector.load %arg1[%c0_112, %c4, %c0_113, %c0_114] : memref<1x7x7x16xf32, #tpu.memory_space<vmem>>, vector<1x1x4x16xf32>
    %62 = vector.shape_cast %61 : vector<1x1x4x16xf32> to vector<4x16xf32>
    %c0_115 = arith.constant 0 : index
    %c4_116 = arith.constant 4 : index
    %c1_117 = arith.constant 1 : index
    %c0_118 = arith.constant 0 : index
    %63 = vector.load %arg1[%c0_115, %c4_116, %c1_117, %c0_118] : memref<1x7x7x16xf32, #tpu.memory_space<vmem>>, vector<1x1x4x16xf32>
    %64 = vector.shape_cast %63 : vector<1x1x4x16xf32> to vector<4x16xf32>
    %c0_119 = arith.constant 0 : index
    %c4_120 = arith.constant 4 : index
    %c2_121 = arith.constant 2 : index
    %c0_122 = arith.constant 0 : index
    %65 = vector.load %arg1[%c0_119, %c4_120, %c2_121, %c0_122] : memref<1x7x7x16xf32, #tpu.memory_space<vmem>>, vector<1x1x4x16xf32>
    %66 = vector.shape_cast %65 : vector<1x1x4x16xf32> to vector<4x16xf32>
    %c0_123 = arith.constant 0 : index
    %c4_124 = arith.constant 4 : index
    %c3_125 = arith.constant 3 : index
    %c0_126 = arith.constant 0 : index
    %67 = vector.load %arg1[%c0_123, %c4_124, %c3_125, %c0_126] : memref<1x7x7x16xf32, #tpu.memory_space<vmem>>, vector<1x1x4x16xf32>
    %68 = vector.shape_cast %67 : vector<1x1x4x16xf32> to vector<4x16xf32>
    %69 = tpu.concatenate %38, %40, %42, %44, %46, %48, %50, %52, %54, %56, %58, %60, %62, %64, %66, %68 in 1 : vector<4x16xf32>, vector<4x16xf32>, vector<4x16xf32>, vector<4x16xf32>, vector<4x16xf32>, vector<4x16xf32>, vector<4x16xf32>, vector<4x16xf32>, vector<4x16xf32>, vector<4x16xf32>, vector<4x16xf32>, vector<4x16xf32>, vector<4x16xf32>, vector<4x16xf32>, vector<4x16xf32>, vector<4x16xf32> -> vector<4x256xf32>
    %70 = arith.truncf %69 : vector<4x256xf32> to vector<4x256xbf16>
    %cst_127 = arith.constant dense<0.000000e+00> : vector<4x32xf32>
    %71 = tpu.matmul %70, %0, %cst_127 {dimension_numbers = #tpu.dot_dimension_numbers<[1], [0], [0], [1], [0, 0, 1, 1], [], []>} : vector<4x256xbf16>, vector<256x32xbf16>, vector<4x32xf32> -> vector<4x32xf32>
    %c0_128 = arith.constant 0 : index
    %c2_129 = arith.constant 2 : index
    %c0_130 = arith.constant 0 : index
    %c0_131 = arith.constant 0 : index
    %72 = vector.load %arg1[%c0_128, %c2_129, %c0_130, %c0_131] : memref<1x7x7x16xf32, #tpu.memory_space<vmem>>, vector<1x1x4x16xf32>
    %73 = vector.shape_cast %72 : vector<1x1x4x16xf32> to vector<4x16xf32>
    %c0_132 = arith.constant 0 : index
    %c2_133 = arith.constant 2 : index
    %c1_134 = arith.constant 1 : index
    %c0_135 = arith.constant 0 : index
    %74 = vector.load %arg1[%c0_132, %c2_133, %c1_134, %c0_135] : memref<1x7x7x16xf32, #tpu.memory_space<vmem>>, vector<1x1x4x16xf32>
    %75 = vector.shape_cast %74 : vector<1x1x4x16xf32> to vector<4x16xf32>
    %c0_136 = arith.constant 0 : index
    %c2_137 = arith.constant 2 : index
    %c2_138 = arith.constant 2 : index
    %c0_139 = arith.constant 0 : index
    %76 = vector.load %arg1[%c0_136, %c2_137, %c2_138, %c0_139] : memref<1x7x7x16xf32, #tpu.memory_space<vmem>>, vector<1x1x4x16xf32>
    %77 = vector.shape_cast %76 : vector<1x1x4x16xf32> to vector<4x16xf32>
    %c0_140 = arith.constant 0 : index
    %c2_141 = arith.constant 2 : index
    %c3_142 = arith.constant 3 : index
    %c0_143 = arith.constant 0 : index
    %78 = vector.load %arg1[%c0_140, %c2_141, %c3_142, %c0_143] : memref<1x7x7x16xf32, #tpu.memory_space<vmem>>, vector<1x1x4x16xf32>
    %79 = vector.shape_cast %78 : vector<1x1x4x16xf32> to vector<4x16xf32>
    %c0_144 = arith.constant 0 : index
    %c3_145 = arith.constant 3 : index
    %c0_146 = arith.constant 0 : index
    %c0_147 = arith.constant 0 : index
    %80 = vector.load %arg1[%c0_144, %c3_145, %c0_146, %c0_147] : memref<1x7x7x16xf32, #tpu.memory_space<vmem>>, vector<1x1x4x16xf32>
    %81 = vector.shape_cast %80 : vector<1x1x4x16xf32> to vector<4x16xf32>
    %c0_148 = arith.constant 0 : index
    %c3_149 = arith.constant 3 : index
    %c1_150 = arith.constant 1 : index
    %c0_151 = arith.constant 0 : index
    %82 = vector.load %arg1[%c0_148, %c3_149, %c1_150, %c0_151] : memref<1x7x7x16xf32, #tpu.memory_space<vmem>>, vector<1x1x4x16xf32>
    %83 = vector.shape_cast %82 : vector<1x1x4x16xf32> to vector<4x16xf32>
    %c0_152 = arith.constant 0 : index
    %c3_153 = arith.constant 3 : index
    %c2_154 = arith.constant 2 : index
    %c0_155 = arith.constant 0 : index
    %84 = vector.load %arg1[%c0_152, %c3_153, %c2_154, %c0_155] : memref<1x7x7x16xf32, #tpu.memory_space<vmem>>, vector<1x1x4x16xf32>
    %85 = vector.shape_cast %84 : vector<1x1x4x16xf32> to vector<4x16xf32>
    %c0_156 = arith.constant 0 : index
    %c3_157 = arith.constant 3 : index
    %c3_158 = arith.constant 3 : index
    %c0_159 = arith.constant 0 : index
    %86 = vector.load %arg1[%c0_156, %c3_157, %c3_158, %c0_159] : memref<1x7x7x16xf32, #tpu.memory_space<vmem>>, vector<1x1x4x16xf32>
    %87 = vector.shape_cast %86 : vector<1x1x4x16xf32> to vector<4x16xf32>
    %c0_160 = arith.constant 0 : index
    %c4_161 = arith.constant 4 : index
    %c0_162 = arith.constant 0 : index
    %c0_163 = arith.constant 0 : index
    %88 = vector.load %arg1[%c0_160, %c4_161, %c0_162, %c0_163] : memref<1x7x7x16xf32, #tpu.memory_space<vmem>>, vector<1x1x4x16xf32>
    %89 = vector.shape_cast %88 : vector<1x1x4x16xf32> to vector<4x16xf32>
    %c0_164 = arith.constant 0 : index
    %c4_165 = arith.constant 4 : index
    %c1_166 = arith.constant 1 : index
    %c0_167 = arith.constant 0 : index
    %90 = vector.load %arg1[%c0_164, %c4_165, %c1_166, %c0_167] : memref<1x7x7x16xf32, #tpu.memory_space<vmem>>, vector<1x1x4x16xf32>
    %91 = vector.shape_cast %90 : vector<1x1x4x16xf32> to vector<4x16xf32>
    %c0_168 = arith.constant 0 : index
    %c4_169 = arith.constant 4 : index
    %c2_170 = arith.constant 2 : index
    %c0_171 = arith.constant 0 : index
    %92 = vector.load %arg1[%c0_168, %c4_169, %c2_170, %c0_171] : memref<1x7x7x16xf32, #tpu.memory_space<vmem>>, vector<1x1x4x16xf32>
    %93 = vector.shape_cast %92 : vector<1x1x4x16xf32> to vector<4x16xf32>
    %c0_172 = arith.constant 0 : index
    %c4_173 = arith.constant 4 : index
    %c3_174 = arith.constant 3 : index
    %c0_175 = arith.constant 0 : index
    %94 = vector.load %arg1[%c0_172, %c4_173, %c3_174, %c0_175] : memref<1x7x7x16xf32, #tpu.memory_space<vmem>>, vector<1x1x4x16xf32>
    %95 = vector.shape_cast %94 : vector<1x1x4x16xf32> to vector<4x16xf32>
    %c0_176 = arith.constant 0 : index
    %c5 = arith.constant 5 : index
    %c0_177 = arith.constant 0 : index
    %c0_178 = arith.constant 0 : index
    %96 = vector.load %arg1[%c0_176, %c5, %c0_177, %c0_178] : memref<1x7x7x16xf32, #tpu.memory_space<vmem>>, vector<1x1x4x16xf32>
    %97 = vector.shape_cast %96 : vector<1x1x4x16xf32> to vector<4x16xf32>
    %c0_179 = arith.constant 0 : index
    %c5_180 = arith.constant 5 : index
    %c1_181 = arith.constant 1 : index
    %c0_182 = arith.constant 0 : index
    %98 = vector.load %arg1[%c0_179, %c5_180, %c1_181, %c0_182] : memref<1x7x7x16xf32, #tpu.memory_space<vmem>>, vector<1x1x4x16xf32>
    %99 = vector.shape_cast %98 : vector<1x1x4x16xf32> to vector<4x16xf32>
    %c0_183 = arith.constant 0 : index
    %c5_184 = arith.constant 5 : index
    %c2_185 = arith.constant 2 : index
    %c0_186 = arith.constant 0 : index
    %100 = vector.load %arg1[%c0_183, %c5_184, %c2_185, %c0_186] : memref<1x7x7x16xf32, #tpu.memory_space<vmem>>, vector<1x1x4x16xf32>
    %101 = vector.shape_cast %100 : vector<1x1x4x16xf32> to vector<4x16xf32>
    %c0_187 = arith.constant 0 : index
    %c5_188 = arith.constant 5 : index
    %c3_189 = arith.constant 3 : index
    %c0_190 = arith.constant 0 : index
    %102 = vector.load %arg1[%c0_187, %c5_188, %c3_189, %c0_190] : memref<1x7x7x16xf32, #tpu.memory_space<vmem>>, vector<1x1x4x16xf32>
    %103 = vector.shape_cast %102 : vector<1x1x4x16xf32> to vector<4x16xf32>
    %104 = tpu.concatenate %73, %75, %77, %79, %81, %83, %85, %87, %89, %91, %93, %95, %97, %99, %101, %103 in 1 : vector<4x16xf32>, vector<4x16xf32>, vector<4x16xf32>, vector<4x16xf32>, vector<4x16xf32>, vector<4x16xf32>, vector<4x16xf32>, vector<4x16xf32>, vector<4x16xf32>, vector<4x16xf32>, vector<4x16xf32>, vector<4x16xf32>, vector<4x16xf32>, vector<4x16xf32>, vector<4x16xf32>, vector<4x16xf32> -> vector<4x256xf32>
    %105 = arith.truncf %104 : vector<4x256xf32> to vector<4x256xbf16>
    %cst_191 = arith.constant dense<0.000000e+00> : vector<4x32xf32>
    %106 = tpu.matmul %105, %0, %cst_191 {dimension_numbers = #tpu.dot_dimension_numbers<[1], [0], [0], [1], [0, 0, 1, 1], [], []>} : vector<4x256xbf16>, vector<256x32xbf16>, vector<4x32xf32> -> vector<4x32xf32>
    %c0_192 = arith.constant 0 : index
    %c3_193 = arith.constant 3 : index
    %c0_194 = arith.constant 0 : index
    %c0_195 = arith.constant 0 : index
    %107 = vector.load %arg1[%c0_192, %c3_193, %c0_194, %c0_195] : memref<1x7x7x16xf32, #tpu.memory_space<vmem>>, vector<1x1x4x16xf32>
    %108 = vector.shape_cast %107 : vector<1x1x4x16xf32> to vector<4x16xf32>
    %c0_196 = arith.constant 0 : index
    %c3_197 = arith.constant 3 : index
    %c1_198 = arith.constant 1 : index
    %c0_199 = arith.constant 0 : index
    %109 = vector.load %arg1[%c0_196, %c3_197, %c1_198, %c0_199] : memref<1x7x7x16xf32, #tpu.memory_space<vmem>>, vector<1x1x4x16xf32>
    %110 = vector.shape_cast %109 : vector<1x1x4x16xf32> to vector<4x16xf32>
    %c0_200 = arith.constant 0 : index
    %c3_201 = arith.constant 3 : index
    %c2_202 = arith.constant 2 : index
    %c0_203 = arith.constant 0 : index
    %111 = vector.load %arg1[%c0_200, %c3_201, %c2_202, %c0_203] : memref<1x7x7x16xf32, #tpu.memory_space<vmem>>, vector<1x1x4x16xf32>
    %112 = vector.shape_cast %111 : vector<1x1x4x16xf32> to vector<4x16xf32>
    %c0_204 = arith.constant 0 : index
    %c3_205 = arith.constant 3 : index
    %c3_206 = arith.constant 3 : index
    %c0_207 = arith.constant 0 : index
    %113 = vector.load %arg1[%c0_204, %c3_205, %c3_206, %c0_207] : memref<1x7x7x16xf32, #tpu.memory_space<vmem>>, vector<1x1x4x16xf32>
    %114 = vector.shape_cast %113 : vector<1x1x4x16xf32> to vector<4x16xf32>
    %c0_208 = arith.constant 0 : index
    %c4_209 = arith.constant 4 : index
    %c0_210 = arith.constant 0 : index
    %c0_211 = arith.constant 0 : index
    %115 = vector.load %arg1[%c0_208, %c4_209, %c0_210, %c0_211] : memref<1x7x7x16xf32, #tpu.memory_space<vmem>>, vector<1x1x4x16xf32>
    %116 = vector.shape_cast %115 : vector<1x1x4x16xf32> to vector<4x16xf32>
    %c0_212 = arith.constant 0 : index
    %c4_213 = arith.constant 4 : index
    %c1_214 = arith.constant 1 : index
    %c0_215 = arith.constant 0 : index
    %117 = vector.load %arg1[%c0_212, %c4_213, %c1_214, %c0_215] : memref<1x7x7x16xf32, #tpu.memory_space<vmem>>, vector<1x1x4x16xf32>
    %118 = vector.shape_cast %117 : vector<1x1x4x16xf32> to vector<4x16xf32>
    %c0_216 = arith.constant 0 : index
    %c4_217 = arith.constant 4 : index
    %c2_218 = arith.constant 2 : index
    %c0_219 = arith.constant 0 : index
    %119 = vector.load %arg1[%c0_216, %c4_217, %c2_218, %c0_219] : memref<1x7x7x16xf32, #tpu.memory_space<vmem>>, vector<1x1x4x16xf32>
    %120 = vector.shape_cast %119 : vector<1x1x4x16xf32> to vector<4x16xf32>
    %c0_220 = arith.constant 0 : index
    %c4_221 = arith.constant 4 : index
    %c3_222 = arith.constant 3 : index
    %c0_223 = arith.constant 0 : index
    %121 = vector.load %arg1[%c0_220, %c4_221, %c3_222, %c0_223] : memref<1x7x7x16xf32, #tpu.memory_space<vmem>>, vector<1x1x4x16xf32>
    %122 = vector.shape_cast %121 : vector<1x1x4x16xf32> to vector<4x16xf32>
    %c0_224 = arith.constant 0 : index
    %c5_225 = arith.constant 5 : index
    %c0_226 = arith.constant 0 : index
    %c0_227 = arith.constant 0 : index
    %123 = vector.load %arg1[%c0_224, %c5_225, %c0_226, %c0_227] : memref<1x7x7x16xf32, #tpu.memory_space<vmem>>, vector<1x1x4x16xf32>
    %124 = vector.shape_cast %123 : vector<1x1x4x16xf32> to vector<4x16xf32>
    %c0_228 = arith.constant 0 : index
    %c5_229 = arith.constant 5 : index
    %c1_230 = arith.constant 1 : index
    %c0_231 = arith.constant 0 : index
    %125 = vector.load %arg1[%c0_228, %c5_229, %c1_230, %c0_231] : memref<1x7x7x16xf32, #tpu.memory_space<vmem>>, vector<1x1x4x16xf32>
    %126 = vector.shape_cast %125 : vector<1x1x4x16xf32> to vector<4x16xf32>
    %c0_232 = arith.constant 0 : index
    %c5_233 = arith.constant 5 : index
    %c2_234 = arith.constant 2 : index
    %c0_235 = arith.constant 0 : index
    %127 = vector.load %arg1[%c0_232, %c5_233, %c2_234, %c0_235] : memref<1x7x7x16xf32, #tpu.memory_space<vmem>>, vector<1x1x4x16xf32>
    %128 = vector.shape_cast %127 : vector<1x1x4x16xf32> to vector<4x16xf32>
    %c0_236 = arith.constant 0 : index
    %c5_237 = arith.constant 5 : index
    %c3_238 = arith.constant 3 : index
    %c0_239 = arith.constant 0 : index
    %129 = vector.load %arg1[%c0_236, %c5_237, %c3_238, %c0_239] : memref<1x7x7x16xf32, #tpu.memory_space<vmem>>, vector<1x1x4x16xf32>
    %130 = vector.shape_cast %129 : vector<1x1x4x16xf32> to vector<4x16xf32>
    %c0_240 = arith.constant 0 : index
    %c6 = arith.constant 6 : index
    %c0_241 = arith.constant 0 : index
    %c0_242 = arith.constant 0 : index
    %131 = vector.load %arg1[%c0_240, %c6, %c0_241, %c0_242] : memref<1x7x7x16xf32, #tpu.memory_space<vmem>>, vector<1x1x4x16xf32>
    %132 = vector.shape_cast %131 : vector<1x1x4x16xf32> to vector<4x16xf32>
    %c0_243 = arith.constant 0 : index
    %c6_244 = arith.constant 6 : index
    %c1_245 = arith.constant 1 : index
    %c0_246 = arith.constant 0 : index
    %133 = vector.load %arg1[%c0_243, %c6_244, %c1_245, %c0_246] : memref<1x7x7x16xf32, #tpu.memory_space<vmem>>, vector<1x1x4x16xf32>
    %134 = vector.shape_cast %133 : vector<1x1x4x16xf32> to vector<4x16xf32>
    %c0_247 = arith.constant 0 : index
    %c6_248 = arith.constant 6 : index
    %c2_249 = arith.constant 2 : index
    %c0_250 = arith.constant 0 : index
    %135 = vector.load %arg1[%c0_247, %c6_248, %c2_249, %c0_250] : memref<1x7x7x16xf32, #tpu.memory_space<vmem>>, vector<1x1x4x16xf32>
    %136 = vector.shape_cast %135 : vector<1x1x4x16xf32> to vector<4x16xf32>
    %c0_251 = arith.constant 0 : index
    %c6_252 = arith.constant 6 : index
    %c3_253 = arith.constant 3 : index
    %c0_254 = arith.constant 0 : index
    %137 = vector.load %arg1[%c0_251, %c6_252, %c3_253, %c0_254] : memref<1x7x7x16xf32, #tpu.memory_space<vmem>>, vector<1x1x4x16xf32>
    %138 = vector.shape_cast %137 : vector<1x1x4x16xf32> to vector<4x16xf32>
    %139 = tpu.concatenate %108, %110, %112, %114, %116, %118, %120, %122, %124, %126, %128, %130, %132, %134, %136, %138 in 1 : vector<4x16xf32>, vector<4x16xf32>, vector<4x16xf32>, vector<4x16xf32>, vector<4x16xf32>, vector<4x16xf32>, vector<4x16xf32>, vector<4x16xf32>, vector<4x16xf32>, vector<4x16xf32>, vector<4x16xf32>, vector<4x16xf32>, vector<4x16xf32>, vector<4x16xf32>, vector<4x16xf32>, vector<4x16xf32> -> vector<4x256xf32>
    %140 = arith.truncf %139 : vector<4x256xf32> to vector<4x256xbf16>
    %cst_255 = arith.constant dense<0.000000e+00> : vector<4x32xf32>
    %141 = tpu.matmul %140, %0, %cst_255 {dimension_numbers = #tpu.dot_dimension_numbers<[1], [0], [0], [1], [0, 0, 1, 1], [], []>} : vector<4x256xbf16>, vector<256x32xbf16>, vector<4x32xf32> -> vector<4x32xf32>
    %142 = vector.shape_cast %36 : vector<4x32xf32> to vector<1x4x32xf32>
    %143 = vector.shape_cast %71 : vector<4x32xf32> to vector<1x4x32xf32>
    %144 = vector.shape_cast %106 : vector<4x32xf32> to vector<1x4x32xf32>
    %145 = vector.shape_cast %141 : vector<4x32xf32> to vector<1x4x32xf32>
    %146 = tpu.concatenate %142, %143, %144, %145 in 0 : vector<1x4x32xf32>, vector<1x4x32xf32>, vector<1x4x32xf32>, vector<1x4x32xf32> -> vector<4x4x32xf32>
    %147 = vector.shape_cast %1 : vector<1x32xf32> to vector<1x1x32xf32>
    %148 = vector.broadcast %147 : vector<1x1x32xf32> to vector<4x4x32xf32>
    %149 = arith.addf %146, %148 : vector<4x4x32xf32>
    %cst_256 = arith.constant dense<0.000000e+00> : vector<32xf32>
    %150 = vector.multi_reduction <add>, %149, %cst_256 [0, 1] : vector<4x4x32xf32> to vector<32xf32>
    %151 = vector.shape_cast %150 : vector<32xf32> to vector<1x1x32xf32>
    %cst_257 = arith.constant 1.600000e+01 : f32
    %152 = vector.broadcast %cst_257 : f32 to vector<1x1x32xf32>
    %153 = arith.divf %151, %152 : vector<1x1x32xf32>
    %154 = arith.mulf %149, %149 : vector<4x4x32xf32>
    %cst_258 = arith.constant dense<0.000000e+00> : vector<32xf32>
    %155 = vector.multi_reduction <add>, %154, %cst_258 [0, 1] : vector<4x4x32xf32> to vector<32xf32>
    %156 = vector.shape_cast %155 : vector<32xf32> to vector<1x1x32xf32>
    %cst_259 = arith.constant 1.600000e+01 : f32
    %157 = vector.broadcast %cst_259 : f32 to vector<1x1x32xf32>
    %158 = arith.divf %156, %157 : vector<1x1x32xf32>
    %159 = arith.mulf %153, %153 : vector<1x1x32xf32>
    %160 = arith.subf %158, %159 : vector<1x1x32xf32>
    %161 = vector.broadcast %153 : vector<1x1x32xf32> to vector<4x4x32xf32>
    %162 = arith.subf %149, %161 : vector<4x4x32xf32>
    %cst_260 = arith.constant 0.000000e+00 : f32
    %163 = vector.broadcast %cst_260 : f32 to vector<1x1x32xf32>
    %164 = arith.maximumf %160, %163 : vector<1x1x32xf32>
    %cst_261 = arith.constant 9.99999974E-6 : f32
    %165 = vector.broadcast %cst_261 : f32 to vector<1x1x32xf32>
    %166 = arith.addf %164, %165 : vector<1x1x32xf32>
    %167 = math.rsqrt %166 : vector<1x1x32xf32>
    %168 = vector.broadcast %167 : vector<1x1x32xf32> to vector<4x4x32xf32>
    %169 = arith.mulf %162, %168 : vector<4x4x32xf32>
    %cst_262 = arith.constant 0.000000e+00 : f32
    %170 = vector.broadcast %cst_262 : f32 to vector<4x4x32xf32>
    %171 = arith.cmpf oge, %169, %170 : vector<4x4x32xf32>
    %cst_263 = arith.constant 2.000000e-01 : f32
    %172 = vector.broadcast %cst_263 : f32 to vector<4x4x32xf32>
    %173 = arith.mulf %172, %169 : vector<4x4x32xf32>
    %174 = arith.select %171, %169, %173 : vector<4x4x32xi1>, vector<4x4x32xf32>
    %c0_264 = arith.constant 0 : index
    %c0_265 = arith.constant 0 : index
    %c0_266 = arith.constant 0 : index
    %c0_267 = arith.constant 0 : index
    %175 = vector.load %arg4[%c0_264, %c0_265, %c0_266, %c0_267] : memref<1x4x4x32xf32, #tpu.memory_space<vmem>>, vector<1x4x4x32xf32>
    %176 = vector.shape_cast %175 : vector<1x4x4x32xf32> to vector<4x4x32xf32>
    %177 = vector.shape_cast %174 : vector<4x4x32xf32> to vector<1x4x4x32xf32>
    tpu.vector_store %arg4[%c0_264, %c0_265, %c0_266, %c0_267], %177 {strides = array<i32>} : memref<1x4x4x32xf32, #tpu.memory_space<vmem>>, vector<1x4x4x32xf32>,
    return
  }
  func.func @transform_0(%arg0: i32) -> (i32, i32, i32, i32) {
    %c0_i32 = arith.constant 0 : i32
    %c0_i32_0 = arith.constant 0 : i32
    %c0_i32_1 = arith.constant 0 : i32
    %c0_i32_2 = arith.constant 0 : i32
    return %arg0, %c0_i32, %c0_i32_0, %c0_i32_1 : i32, i32, i32, i32
  }
  func.func @transform_1(%arg0: i32) -> (i32, i32) {
    %c0_i32 = arith.constant 0 : i32
    %c0_i32_0 = arith.constant 0 : i32
    %c0_i32_1 = arith.constant 0 : i32
    return %c0_i32, %c0_i32_0 : i32, i32
  }
  func.func @transform_2(%arg0: i32) -> (i32, i32) {
    %c0_i32 = arith.constant 0 : i32
    %c0_i32_0 = arith.constant 0 : i32
    %c0_i32_1 = arith.constant 0 : i32
    return %c0_i32, %c0_i32_0 : i32, i32
  }
  func.func @transform_3(%arg0: i32) -> (i32, i32, i32, i32) {
    %c0_i32 = arith.constant 0 : i32
    %c0_i32_0 = arith.constant 0 : i32
    %c0_i32_1 = arith.constant 0 : i32
    %c0_i32_2 = arith.constant 0 : i32
    return %arg0, %c0_i32, %c0_i32_0, %c0_i32_1 : i32, i32, i32, i32
  }
}

module attributes {stable_mosaic.version = 11 : i64} {
  func.func @_fused_conv_group_kernel(%arg0: i32, %arg1: memref<1x8x8x32xf32, #tpu.memory_space<vmem>>, %arg2: memref<512x1xbf16, #tpu.memory_space<vmem>>, %arg3: memref<1x1xf32, #tpu.memory_space<vmem>>, %arg4: memref<1x5x5x1xf32, #tpu.memory_space<vmem>>) attributes {dimension_semantics = [#tpu.dimension_semantics<parallel>], iteration_bounds = array<i64: 2>, scalar_prefetch = 0 : i64, scratch_operands = 0 : i64, tpu.core_type = #tpu.core_type<tc>, window_params = [{transform_indices = @transform_0, window_bounds = array<i64: 1, 8, 8, 32>}, {pipeline_mode = #tpu.pipeline_mode<synchronous>, transform_indices = @transform_1, window_bounds = array<i64: 512, 1>}, {pipeline_mode = #tpu.pipeline_mode<synchronous>, transform_indices = @transform_2, window_bounds = array<i64: 1, 1>}, {transform_indices = @transform_3, window_bounds = array<i64: 1, 5, 5, 1>}]} {
    %c0 = arith.constant 0 : index
    %c0_0 = arith.constant 0 : index
    %0 = vector.load %arg2[%c0, %c0_0] : memref<512x1xbf16, #tpu.memory_space<vmem>>, vector<512x1xbf16>
    %c0_1 = arith.constant 0 : index
    %c0_2 = arith.constant 0 : index
    %1 = vector.load %arg3[%c0_1, %c0_2] : memref<1x1xf32, #tpu.memory_space<vmem>>, vector<1x1xf32>
    %c0_3 = arith.constant 0 : index
    %c0_4 = arith.constant 0 : index
    %c0_5 = arith.constant 0 : index
    %c0_6 = arith.constant 0 : index
    %2 = vector.load %arg1[%c0_3, %c0_4, %c0_5, %c0_6] : memref<1x8x8x32xf32, #tpu.memory_space<vmem>>, vector<1x1x5x32xf32>
    %3 = vector.shape_cast %2 : vector<1x1x5x32xf32> to vector<5x32xf32>
    %c0_7 = arith.constant 0 : index
    %c0_8 = arith.constant 0 : index
    %c1 = arith.constant 1 : index
    %c0_9 = arith.constant 0 : index
    %4 = vector.load %arg1[%c0_7, %c0_8, %c1, %c0_9] : memref<1x8x8x32xf32, #tpu.memory_space<vmem>>, vector<1x1x5x32xf32>
    %5 = vector.shape_cast %4 : vector<1x1x5x32xf32> to vector<5x32xf32>
    %c0_10 = arith.constant 0 : index
    %c0_11 = arith.constant 0 : index
    %c2 = arith.constant 2 : index
    %c0_12 = arith.constant 0 : index
    %6 = vector.load %arg1[%c0_10, %c0_11, %c2, %c0_12] : memref<1x8x8x32xf32, #tpu.memory_space<vmem>>, vector<1x1x5x32xf32>
    %7 = vector.shape_cast %6 : vector<1x1x5x32xf32> to vector<5x32xf32>
    %c0_13 = arith.constant 0 : index
    %c0_14 = arith.constant 0 : index
    %c3 = arith.constant 3 : index
    %c0_15 = arith.constant 0 : index
    %8 = vector.load %arg1[%c0_13, %c0_14, %c3, %c0_15] : memref<1x8x8x32xf32, #tpu.memory_space<vmem>>, vector<1x1x5x32xf32>
    %9 = vector.shape_cast %8 : vector<1x1x5x32xf32> to vector<5x32xf32>
    %c0_16 = arith.constant 0 : index
    %c1_17 = arith.constant 1 : index
    %c0_18 = arith.constant 0 : index
    %c0_19 = arith.constant 0 : index
    %10 = vector.load %arg1[%c0_16, %c1_17, %c0_18, %c0_19] : memref<1x8x8x32xf32, #tpu.memory_space<vmem>>, vector<1x1x5x32xf32>
    %11 = vector.shape_cast %10 : vector<1x1x5x32xf32> to vector<5x32xf32>
    %c0_20 = arith.constant 0 : index
    %c1_21 = arith.constant 1 : index
    %c1_22 = arith.constant 1 : index
    %c0_23 = arith.constant 0 : index
    %12 = vector.load %arg1[%c0_20, %c1_21, %c1_22, %c0_23] : memref<1x8x8x32xf32, #tpu.memory_space<vmem>>, vector<1x1x5x32xf32>
    %13 = vector.shape_cast %12 : vector<1x1x5x32xf32> to vector<5x32xf32>
    %c0_24 = arith.constant 0 : index
    %c1_25 = arith.constant 1 : index
    %c2_26 = arith.constant 2 : index
    %c0_27 = arith.constant 0 : index
    %14 = vector.load %arg1[%c0_24, %c1_25, %c2_26, %c0_27] : memref<1x8x8x32xf32, #tpu.memory_space<vmem>>, vector<1x1x5x32xf32>
    %15 = vector.shape_cast %14 : vector<1x1x5x32xf32> to vector<5x32xf32>
    %c0_28 = arith.constant 0 : index
    %c1_29 = arith.constant 1 : index
    %c3_30 = arith.constant 3 : index
    %c0_31 = arith.constant 0 : index
    %16 = vector.load %arg1[%c0_28, %c1_29, %c3_30, %c0_31] : memref<1x8x8x32xf32, #tpu.memory_space<vmem>>, vector<1x1x5x32xf32>
    %17 = vector.shape_cast %16 : vector<1x1x5x32xf32> to vector<5x32xf32>
    %c0_32 = arith.constant 0 : index
    %c2_33 = arith.constant 2 : index
    %c0_34 = arith.constant 0 : index
    %c0_35 = arith.constant 0 : index
    %18 = vector.load %arg1[%c0_32, %c2_33, %c0_34, %c0_35] : memref<1x8x8x32xf32, #tpu.memory_space<vmem>>, vector<1x1x5x32xf32>
    %19 = vector.shape_cast %18 : vector<1x1x5x32xf32> to vector<5x32xf32>
    %c0_36 = arith.constant 0 : index
    %c2_37 = arith.constant 2 : index
    %c1_38 = arith.constant 1 : index
    %c0_39 = arith.constant 0 : index
    %20 = vector.load %arg1[%c0_36, %c2_37, %c1_38, %c0_39] : memref<1x8x8x32xf32, #tpu.memory_space<vmem>>, vector<1x1x5x32xf32>
    %21 = vector.shape_cast %20 : vector<1x1x5x32xf32> to vector<5x32xf32>
    %c0_40 = arith.constant 0 : index
    %c2_41 = arith.constant 2 : index
    %c2_42 = arith.constant 2 : index
    %c0_43 = arith.constant 0 : index
    %22 = vector.load %arg1[%c0_40, %c2_41, %c2_42, %c0_43] : memref<1x8x8x32xf32, #tpu.memory_space<vmem>>, vector<1x1x5x32xf32>
    %23 = vector.shape_cast %22 : vector<1x1x5x32xf32> to vector<5x32xf32>
    %c0_44 = arith.constant 0 : index
    %c2_45 = arith.constant 2 : index
    %c3_46 = arith.constant 3 : index
    %c0_47 = arith.constant 0 : index
    %24 = vector.load %arg1[%c0_44, %c2_45, %c3_46, %c0_47] : memref<1x8x8x32xf32, #tpu.memory_space<vmem>>, vector<1x1x5x32xf32>
    %25 = vector.shape_cast %24 : vector<1x1x5x32xf32> to vector<5x32xf32>
    %c0_48 = arith.constant 0 : index
    %c3_49 = arith.constant 3 : index
    %c0_50 = arith.constant 0 : index
    %c0_51 = arith.constant 0 : index
    %26 = vector.load %arg1[%c0_48, %c3_49, %c0_50, %c0_51] : memref<1x8x8x32xf32, #tpu.memory_space<vmem>>, vector<1x1x5x32xf32>
    %27 = vector.shape_cast %26 : vector<1x1x5x32xf32> to vector<5x32xf32>
    %c0_52 = arith.constant 0 : index
    %c3_53 = arith.constant 3 : index
    %c1_54 = arith.constant 1 : index
    %c0_55 = arith.constant 0 : index
    %28 = vector.load %arg1[%c0_52, %c3_53, %c1_54, %c0_55] : memref<1x8x8x32xf32, #tpu.memory_space<vmem>>, vector<1x1x5x32xf32>
    %29 = vector.shape_cast %28 : vector<1x1x5x32xf32> to vector<5x32xf32>
    %c0_56 = arith.constant 0 : index
    %c3_57 = arith.constant 3 : index
    %c2_58 = arith.constant 2 : index
    %c0_59 = arith.constant 0 : index
    %30 = vector.load %arg1[%c0_56, %c3_57, %c2_58, %c0_59] : memref<1x8x8x32xf32, #tpu.memory_space<vmem>>, vector<1x1x5x32xf32>
    %31 = vector.shape_cast %30 : vector<1x1x5x32xf32> to vector<5x32xf32>
    %c0_60 = arith.constant 0 : index
    %c3_61 = arith.constant 3 : index
    %c3_62 = arith.constant 3 : index
    %c0_63 = arith.constant 0 : index
    %32 = vector.load %arg1[%c0_60, %c3_61, %c3_62, %c0_63] : memref<1x8x8x32xf32, #tpu.memory_space<vmem>>, vector<1x1x5x32xf32>
    %33 = vector.shape_cast %32 : vector<1x1x5x32xf32> to vector<5x32xf32>
    %34 = tpu.concatenate %3, %5, %7, %9, %11, %13, %15, %17, %19, %21, %23, %25, %27, %29, %31, %33 in 1 : vector<5x32xf32>, vector<5x32xf32>, vector<5x32xf32>, vector<5x32xf32>, vector<5x32xf32>, vector<5x32xf32>, vector<5x32xf32>, vector<5x32xf32>, vector<5x32xf32>, vector<5x32xf32>, vector<5x32xf32>, vector<5x32xf32>, vector<5x32xf32>, vector<5x32xf32>, vector<5x32xf32>, vector<5x32xf32> -> vector<5x512xf32>
    %35 = arith.truncf %34 : vector<5x512xf32> to vector<5x512xbf16>
    %cst = arith.constant dense<0.000000e+00> : vector<5x1xf32>
    %36 = tpu.matmul %35, %0, %cst {dimension_numbers = #tpu.dot_dimension_numbers<[1], [0], [0], [1], [0, 0, 1, 1], [], []>} : vector<5x512xbf16>, vector<512x1xbf16>, vector<5x1xf32> -> vector<5x1xf32>
    %c0_64 = arith.constant 0 : index
    %c1_65 = arith.constant 1 : index
    %c0_66 = arith.constant 0 : index
    %c0_67 = arith.constant 0 : index
    %37 = vector.load %arg1[%c0_64, %c1_65, %c0_66, %c0_67] : memref<1x8x8x32xf32, #tpu.memory_space<vmem>>, vector<1x1x5x32xf32>
    %38 = vector.shape_cast %37 : vector<1x1x5x32xf32> to vector<5x32xf32>
    %c0_68 = arith.constant 0 : index
    %c1_69 = arith.constant 1 : index
    %c1_70 = arith.constant 1 : index
    %c0_71 = arith.constant 0 : index
    %39 = vector.load %arg1[%c0_68, %c1_69, %c1_70, %c0_71] : memref<1x8x8x32xf32, #tpu.memory_space<vmem>>, vector<1x1x5x32xf32>
    %40 = vector.shape_cast %39 : vector<1x1x5x32xf32> to vector<5x32xf32>
    %c0_72 = arith.constant 0 : index
    %c1_73 = arith.constant 1 : index
    %c2_74 = arith.constant 2 : index
    %c0_75 = arith.constant 0 : index
    %41 = vector.load %arg1[%c0_72, %c1_73, %c2_74, %c0_75] : memref<1x8x8x32xf32, #tpu.memory_space<vmem>>, vector<1x1x5x32xf32>
    %42 = vector.shape_cast %41 : vector<1x1x5x32xf32> to vector<5x32xf32>
    %c0_76 = arith.constant 0 : index
    %c1_77 = arith.constant 1 : index
    %c3_78 = arith.constant 3 : index
    %c0_79 = arith.constant 0 : index
    %43 = vector.load %arg1[%c0_76, %c1_77, %c3_78, %c0_79] : memref<1x8x8x32xf32, #tpu.memory_space<vmem>>, vector<1x1x5x32xf32>
    %44 = vector.shape_cast %43 : vector<1x1x5x32xf32> to vector<5x32xf32>
    %c0_80 = arith.constant 0 : index
    %c2_81 = arith.constant 2 : index
    %c0_82 = arith.constant 0 : index
    %c0_83 = arith.constant 0 : index
    %45 = vector.load %arg1[%c0_80, %c2_81, %c0_82, %c0_83] : memref<1x8x8x32xf32, #tpu.memory_space<vmem>>, vector<1x1x5x32xf32>
    %46 = vector.shape_cast %45 : vector<1x1x5x32xf32> to vector<5x32xf32>
    %c0_84 = arith.constant 0 : index
    %c2_85 = arith.constant 2 : index
    %c1_86 = arith.constant 1 : index
    %c0_87 = arith.constant 0 : index
    %47 = vector.load %arg1[%c0_84, %c2_85, %c1_86, %c0_87] : memref<1x8x8x32xf32, #tpu.memory_space<vmem>>, vector<1x1x5x32xf32>
    %48 = vector.shape_cast %47 : vector<1x1x5x32xf32> to vector<5x32xf32>
    %c0_88 = arith.constant 0 : index
    %c2_89 = arith.constant 2 : index
    %c2_90 = arith.constant 2 : index
    %c0_91 = arith.constant 0 : index
    %49 = vector.load %arg1[%c0_88, %c2_89, %c2_90, %c0_91] : memref<1x8x8x32xf32, #tpu.memory_space<vmem>>, vector<1x1x5x32xf32>
    %50 = vector.shape_cast %49 : vector<1x1x5x32xf32> to vector<5x32xf32>
    %c0_92 = arith.constant 0 : index
    %c2_93 = arith.constant 2 : index
    %c3_94 = arith.constant 3 : index
    %c0_95 = arith.constant 0 : index
    %51 = vector.load %arg1[%c0_92, %c2_93, %c3_94, %c0_95] : memref<1x8x8x32xf32, #tpu.memory_space<vmem>>, vector<1x1x5x32xf32>
    %52 = vector.shape_cast %51 : vector<1x1x5x32xf32> to vector<5x32xf32>
    %c0_96 = arith.constant 0 : index
    %c3_97 = arith.constant 3 : index
    %c0_98 = arith.constant 0 : index
    %c0_99 = arith.constant 0 : index
    %53 = vector.load %arg1[%c0_96, %c3_97, %c0_98, %c0_99] : memref<1x8x8x32xf32, #tpu.memory_space<vmem>>, vector<1x1x5x32xf32>
    %54 = vector.shape_cast %53 : vector<1x1x5x32xf32> to vector<5x32xf32>
    %c0_100 = arith.constant 0 : index
    %c3_101 = arith.constant 3 : index
    %c1_102 = arith.constant 1 : index
    %c0_103 = arith.constant 0 : index
    %55 = vector.load %arg1[%c0_100, %c3_101, %c1_102, %c0_103] : memref<1x8x8x32xf32, #tpu.memory_space<vmem>>, vector<1x1x5x32xf32>
    %56 = vector.shape_cast %55 : vector<1x1x5x32xf32> to vector<5x32xf32>
    %c0_104 = arith.constant 0 : index
    %c3_105 = arith.constant 3 : index
    %c2_106 = arith.constant 2 : index
    %c0_107 = arith.constant 0 : index
    %57 = vector.load %arg1[%c0_104, %c3_105, %c2_106, %c0_107] : memref<1x8x8x32xf32, #tpu.memory_space<vmem>>, vector<1x1x5x32xf32>
    %58 = vector.shape_cast %57 : vector<1x1x5x32xf32> to vector<5x32xf32>
    %c0_108 = arith.constant 0 : index
    %c3_109 = arith.constant 3 : index
    %c3_110 = arith.constant 3 : index
    %c0_111 = arith.constant 0 : index
    %59 = vector.load %arg1[%c0_108, %c3_109, %c3_110, %c0_111] : memref<1x8x8x32xf32, #tpu.memory_space<vmem>>, vector<1x1x5x32xf32>
    %60 = vector.shape_cast %59 : vector<1x1x5x32xf32> to vector<5x32xf32>
    %c0_112 = arith.constant 0 : index
    %c4 = arith.constant 4 : index
    %c0_113 = arith.constant 0 : index
    %c0_114 = arith.constant 0 : index
    %61 = vector.load %arg1[%c0_112, %c4, %c0_113, %c0_114] : memref<1x8x8x32xf32, #tpu.memory_space<vmem>>, vector<1x1x5x32xf32>
    %62 = vector.shape_cast %61 : vector<1x1x5x32xf32> to vector<5x32xf32>
    %c0_115 = arith.constant 0 : index
    %c4_116 = arith.constant 4 : index
    %c1_117 = arith.constant 1 : index
    %c0_118 = arith.constant 0 : index
    %63 = vector.load %arg1[%c0_115, %c4_116, %c1_117, %c0_118] : memref<1x8x8x32xf32, #tpu.memory_space<vmem>>, vector<1x1x5x32xf32>
    %64 = vector.shape_cast %63 : vector<1x1x5x32xf32> to vector<5x32xf32>
    %c0_119 = arith.constant 0 : index
    %c4_120 = arith.constant 4 : index
    %c2_121 = arith.constant 2 : index
    %c0_122 = arith.constant 0 : index
    %65 = vector.load %arg1[%c0_119, %c4_120, %c2_121, %c0_122] : memref<1x8x8x32xf32, #tpu.memory_space<vmem>>, vector<1x1x5x32xf32>
    %66 = vector.shape_cast %65 : vector<1x1x5x32xf32> to vector<5x32xf32>
    %c0_123 = arith.constant 0 : index
    %c4_124 = arith.constant 4 : index
    %c3_125 = arith.constant 3 : index
    %c0_126 = arith.constant 0 : index
    %67 = vector.load %arg1[%c0_123, %c4_124, %c3_125, %c0_126] : memref<1x8x8x32xf32, #tpu.memory_space<vmem>>, vector<1x1x5x32xf32>
    %68 = vector.shape_cast %67 : vector<1x1x5x32xf32> to vector<5x32xf32>
    %69 = tpu.concatenate %38, %40, %42, %44, %46, %48, %50, %52, %54, %56, %58, %60, %62, %64, %66, %68 in 1 : vector<5x32xf32>, vector<5x32xf32>, vector<5x32xf32>, vector<5x32xf32>, vector<5x32xf32>, vector<5x32xf32>, vector<5x32xf32>, vector<5x32xf32>, vector<5x32xf32>, vector<5x32xf32>, vector<5x32xf32>, vector<5x32xf32>, vector<5x32xf32>, vector<5x32xf32>, vector<5x32xf32>, vector<5x32xf32> -> vector<5x512xf32>
    %70 = arith.truncf %69 : vector<5x512xf32> to vector<5x512xbf16>
    %cst_127 = arith.constant dense<0.000000e+00> : vector<5x1xf32>
    %71 = tpu.matmul %70, %0, %cst_127 {dimension_numbers = #tpu.dot_dimension_numbers<[1], [0], [0], [1], [0, 0, 1, 1], [], []>} : vector<5x512xbf16>, vector<512x1xbf16>, vector<5x1xf32> -> vector<5x1xf32>
    %c0_128 = arith.constant 0 : index
    %c2_129 = arith.constant 2 : index
    %c0_130 = arith.constant 0 : index
    %c0_131 = arith.constant 0 : index
    %72 = vector.load %arg1[%c0_128, %c2_129, %c0_130, %c0_131] : memref<1x8x8x32xf32, #tpu.memory_space<vmem>>, vector<1x1x5x32xf32>
    %73 = vector.shape_cast %72 : vector<1x1x5x32xf32> to vector<5x32xf32>
    %c0_132 = arith.constant 0 : index
    %c2_133 = arith.constant 2 : index
    %c1_134 = arith.constant 1 : index
    %c0_135 = arith.constant 0 : index
    %74 = vector.load %arg1[%c0_132, %c2_133, %c1_134, %c0_135] : memref<1x8x8x32xf32, #tpu.memory_space<vmem>>, vector<1x1x5x32xf32>
    %75 = vector.shape_cast %74 : vector<1x1x5x32xf32> to vector<5x32xf32>
    %c0_136 = arith.constant 0 : index
    %c2_137 = arith.constant 2 : index
    %c2_138 = arith.constant 2 : index
    %c0_139 = arith.constant 0 : index
    %76 = vector.load %arg1[%c0_136, %c2_137, %c2_138, %c0_139] : memref<1x8x8x32xf32, #tpu.memory_space<vmem>>, vector<1x1x5x32xf32>
    %77 = vector.shape_cast %76 : vector<1x1x5x32xf32> to vector<5x32xf32>
    %c0_140 = arith.constant 0 : index
    %c2_141 = arith.constant 2 : index
    %c3_142 = arith.constant 3 : index
    %c0_143 = arith.constant 0 : index
    %78 = vector.load %arg1[%c0_140, %c2_141, %c3_142, %c0_143] : memref<1x8x8x32xf32, #tpu.memory_space<vmem>>, vector<1x1x5x32xf32>
    %79 = vector.shape_cast %78 : vector<1x1x5x32xf32> to vector<5x32xf32>
    %c0_144 = arith.constant 0 : index
    %c3_145 = arith.constant 3 : index
    %c0_146 = arith.constant 0 : index
    %c0_147 = arith.constant 0 : index
    %80 = vector.load %arg1[%c0_144, %c3_145, %c0_146, %c0_147] : memref<1x8x8x32xf32, #tpu.memory_space<vmem>>, vector<1x1x5x32xf32>
    %81 = vector.shape_cast %80 : vector<1x1x5x32xf32> to vector<5x32xf32>
    %c0_148 = arith.constant 0 : index
    %c3_149 = arith.constant 3 : index
    %c1_150 = arith.constant 1 : index
    %c0_151 = arith.constant 0 : index
    %82 = vector.load %arg1[%c0_148, %c3_149, %c1_150, %c0_151] : memref<1x8x8x32xf32, #tpu.memory_space<vmem>>, vector<1x1x5x32xf32>
    %83 = vector.shape_cast %82 : vector<1x1x5x32xf32> to vector<5x32xf32>
    %c0_152 = arith.constant 0 : index
    %c3_153 = arith.constant 3 : index
    %c2_154 = arith.constant 2 : index
    %c0_155 = arith.constant 0 : index
    %84 = vector.load %arg1[%c0_152, %c3_153, %c2_154, %c0_155] : memref<1x8x8x32xf32, #tpu.memory_space<vmem>>, vector<1x1x5x32xf32>
    %85 = vector.shape_cast %84 : vector<1x1x5x32xf32> to vector<5x32xf32>
    %c0_156 = arith.constant 0 : index
    %c3_157 = arith.constant 3 : index
    %c3_158 = arith.constant 3 : index
    %c0_159 = arith.constant 0 : index
    %86 = vector.load %arg1[%c0_156, %c3_157, %c3_158, %c0_159] : memref<1x8x8x32xf32, #tpu.memory_space<vmem>>, vector<1x1x5x32xf32>
    %87 = vector.shape_cast %86 : vector<1x1x5x32xf32> to vector<5x32xf32>
    %c0_160 = arith.constant 0 : index
    %c4_161 = arith.constant 4 : index
    %c0_162 = arith.constant 0 : index
    %c0_163 = arith.constant 0 : index
    %88 = vector.load %arg1[%c0_160, %c4_161, %c0_162, %c0_163] : memref<1x8x8x32xf32, #tpu.memory_space<vmem>>, vector<1x1x5x32xf32>
    %89 = vector.shape_cast %88 : vector<1x1x5x32xf32> to vector<5x32xf32>
    %c0_164 = arith.constant 0 : index
    %c4_165 = arith.constant 4 : index
    %c1_166 = arith.constant 1 : index
    %c0_167 = arith.constant 0 : index
    %90 = vector.load %arg1[%c0_164, %c4_165, %c1_166, %c0_167] : memref<1x8x8x32xf32, #tpu.memory_space<vmem>>, vector<1x1x5x32xf32>
    %91 = vector.shape_cast %90 : vector<1x1x5x32xf32> to vector<5x32xf32>
    %c0_168 = arith.constant 0 : index
    %c4_169 = arith.constant 4 : index
    %c2_170 = arith.constant 2 : index
    %c0_171 = arith.constant 0 : index
    %92 = vector.load %arg1[%c0_168, %c4_169, %c2_170, %c0_171] : memref<1x8x8x32xf32, #tpu.memory_space<vmem>>, vector<1x1x5x32xf32>
    %93 = vector.shape_cast %92 : vector<1x1x5x32xf32> to vector<5x32xf32>
    %c0_172 = arith.constant 0 : index
    %c4_173 = arith.constant 4 : index
    %c3_174 = arith.constant 3 : index
    %c0_175 = arith.constant 0 : index
    %94 = vector.load %arg1[%c0_172, %c4_173, %c3_174, %c0_175] : memref<1x8x8x32xf32, #tpu.memory_space<vmem>>, vector<1x1x5x32xf32>
    %95 = vector.shape_cast %94 : vector<1x1x5x32xf32> to vector<5x32xf32>
    %c0_176 = arith.constant 0 : index
    %c5 = arith.constant 5 : index
    %c0_177 = arith.constant 0 : index
    %c0_178 = arith.constant 0 : index
    %96 = vector.load %arg1[%c0_176, %c5, %c0_177, %c0_178] : memref<1x8x8x32xf32, #tpu.memory_space<vmem>>, vector<1x1x5x32xf32>
    %97 = vector.shape_cast %96 : vector<1x1x5x32xf32> to vector<5x32xf32>
    %c0_179 = arith.constant 0 : index
    %c5_180 = arith.constant 5 : index
    %c1_181 = arith.constant 1 : index
    %c0_182 = arith.constant 0 : index
    %98 = vector.load %arg1[%c0_179, %c5_180, %c1_181, %c0_182] : memref<1x8x8x32xf32, #tpu.memory_space<vmem>>, vector<1x1x5x32xf32>
    %99 = vector.shape_cast %98 : vector<1x1x5x32xf32> to vector<5x32xf32>
    %c0_183 = arith.constant 0 : index
    %c5_184 = arith.constant 5 : index
    %c2_185 = arith.constant 2 : index
    %c0_186 = arith.constant 0 : index
    %100 = vector.load %arg1[%c0_183, %c5_184, %c2_185, %c0_186] : memref<1x8x8x32xf32, #tpu.memory_space<vmem>>, vector<1x1x5x32xf32>
    %101 = vector.shape_cast %100 : vector<1x1x5x32xf32> to vector<5x32xf32>
    %c0_187 = arith.constant 0 : index
    %c5_188 = arith.constant 5 : index
    %c3_189 = arith.constant 3 : index
    %c0_190 = arith.constant 0 : index
    %102 = vector.load %arg1[%c0_187, %c5_188, %c3_189, %c0_190] : memref<1x8x8x32xf32, #tpu.memory_space<vmem>>, vector<1x1x5x32xf32>
    %103 = vector.shape_cast %102 : vector<1x1x5x32xf32> to vector<5x32xf32>
    %104 = tpu.concatenate %73, %75, %77, %79, %81, %83, %85, %87, %89, %91, %93, %95, %97, %99, %101, %103 in 1 : vector<5x32xf32>, vector<5x32xf32>, vector<5x32xf32>, vector<5x32xf32>, vector<5x32xf32>, vector<5x32xf32>, vector<5x32xf32>, vector<5x32xf32>, vector<5x32xf32>, vector<5x32xf32>, vector<5x32xf32>, vector<5x32xf32>, vector<5x32xf32>, vector<5x32xf32>, vector<5x32xf32>, vector<5x32xf32> -> vector<5x512xf32>
    %105 = arith.truncf %104 : vector<5x512xf32> to vector<5x512xbf16>
    %cst_191 = arith.constant dense<0.000000e+00> : vector<5x1xf32>
    %106 = tpu.matmul %105, %0, %cst_191 {dimension_numbers = #tpu.dot_dimension_numbers<[1], [0], [0], [1], [0, 0, 1, 1], [], []>} : vector<5x512xbf16>, vector<512x1xbf16>, vector<5x1xf32> -> vector<5x1xf32>
    %c0_192 = arith.constant 0 : index
    %c3_193 = arith.constant 3 : index
    %c0_194 = arith.constant 0 : index
    %c0_195 = arith.constant 0 : index
    %107 = vector.load %arg1[%c0_192, %c3_193, %c0_194, %c0_195] : memref<1x8x8x32xf32, #tpu.memory_space<vmem>>, vector<1x1x5x32xf32>
    %108 = vector.shape_cast %107 : vector<1x1x5x32xf32> to vector<5x32xf32>
    %c0_196 = arith.constant 0 : index
    %c3_197 = arith.constant 3 : index
    %c1_198 = arith.constant 1 : index
    %c0_199 = arith.constant 0 : index
    %109 = vector.load %arg1[%c0_196, %c3_197, %c1_198, %c0_199] : memref<1x8x8x32xf32, #tpu.memory_space<vmem>>, vector<1x1x5x32xf32>
    %110 = vector.shape_cast %109 : vector<1x1x5x32xf32> to vector<5x32xf32>
    %c0_200 = arith.constant 0 : index
    %c3_201 = arith.constant 3 : index
    %c2_202 = arith.constant 2 : index
    %c0_203 = arith.constant 0 : index
    %111 = vector.load %arg1[%c0_200, %c3_201, %c2_202, %c0_203] : memref<1x8x8x32xf32, #tpu.memory_space<vmem>>, vector<1x1x5x32xf32>
    %112 = vector.shape_cast %111 : vector<1x1x5x32xf32> to vector<5x32xf32>
    %c0_204 = arith.constant 0 : index
    %c3_205 = arith.constant 3 : index
    %c3_206 = arith.constant 3 : index
    %c0_207 = arith.constant 0 : index
    %113 = vector.load %arg1[%c0_204, %c3_205, %c3_206, %c0_207] : memref<1x8x8x32xf32, #tpu.memory_space<vmem>>, vector<1x1x5x32xf32>
    %114 = vector.shape_cast %113 : vector<1x1x5x32xf32> to vector<5x32xf32>
    %c0_208 = arith.constant 0 : index
    %c4_209 = arith.constant 4 : index
    %c0_210 = arith.constant 0 : index
    %c0_211 = arith.constant 0 : index
    %115 = vector.load %arg1[%c0_208, %c4_209, %c0_210, %c0_211] : memref<1x8x8x32xf32, #tpu.memory_space<vmem>>, vector<1x1x5x32xf32>
    %116 = vector.shape_cast %115 : vector<1x1x5x32xf32> to vector<5x32xf32>
    %c0_212 = arith.constant 0 : index
    %c4_213 = arith.constant 4 : index
    %c1_214 = arith.constant 1 : index
    %c0_215 = arith.constant 0 : index
    %117 = vector.load %arg1[%c0_212, %c4_213, %c1_214, %c0_215] : memref<1x8x8x32xf32, #tpu.memory_space<vmem>>, vector<1x1x5x32xf32>
    %118 = vector.shape_cast %117 : vector<1x1x5x32xf32> to vector<5x32xf32>
    %c0_216 = arith.constant 0 : index
    %c4_217 = arith.constant 4 : index
    %c2_218 = arith.constant 2 : index
    %c0_219 = arith.constant 0 : index
    %119 = vector.load %arg1[%c0_216, %c4_217, %c2_218, %c0_219] : memref<1x8x8x32xf32, #tpu.memory_space<vmem>>, vector<1x1x5x32xf32>
    %120 = vector.shape_cast %119 : vector<1x1x5x32xf32> to vector<5x32xf32>
    %c0_220 = arith.constant 0 : index
    %c4_221 = arith.constant 4 : index
    %c3_222 = arith.constant 3 : index
    %c0_223 = arith.constant 0 : index
    %121 = vector.load %arg1[%c0_220, %c4_221, %c3_222, %c0_223] : memref<1x8x8x32xf32, #tpu.memory_space<vmem>>, vector<1x1x5x32xf32>
    %122 = vector.shape_cast %121 : vector<1x1x5x32xf32> to vector<5x32xf32>
    %c0_224 = arith.constant 0 : index
    %c5_225 = arith.constant 5 : index
    %c0_226 = arith.constant 0 : index
    %c0_227 = arith.constant 0 : index
    %123 = vector.load %arg1[%c0_224, %c5_225, %c0_226, %c0_227] : memref<1x8x8x32xf32, #tpu.memory_space<vmem>>, vector<1x1x5x32xf32>
    %124 = vector.shape_cast %123 : vector<1x1x5x32xf32> to vector<5x32xf32>
    %c0_228 = arith.constant 0 : index
    %c5_229 = arith.constant 5 : index
    %c1_230 = arith.constant 1 : index
    %c0_231 = arith.constant 0 : index
    %125 = vector.load %arg1[%c0_228, %c5_229, %c1_230, %c0_231] : memref<1x8x8x32xf32, #tpu.memory_space<vmem>>, vector<1x1x5x32xf32>
    %126 = vector.shape_cast %125 : vector<1x1x5x32xf32> to vector<5x32xf32>
    %c0_232 = arith.constant 0 : index
    %c5_233 = arith.constant 5 : index
    %c2_234 = arith.constant 2 : index
    %c0_235 = arith.constant 0 : index
    %127 = vector.load %arg1[%c0_232, %c5_233, %c2_234, %c0_235] : memref<1x8x8x32xf32, #tpu.memory_space<vmem>>, vector<1x1x5x32xf32>
    %128 = vector.shape_cast %127 : vector<1x1x5x32xf32> to vector<5x32xf32>
    %c0_236 = arith.constant 0 : index
    %c5_237 = arith.constant 5 : index
    %c3_238 = arith.constant 3 : index
    %c0_239 = arith.constant 0 : index
    %129 = vector.load %arg1[%c0_236, %c5_237, %c3_238, %c0_239] : memref<1x8x8x32xf32, #tpu.memory_space<vmem>>, vector<1x1x5x32xf32>
    %130 = vector.shape_cast %129 : vector<1x1x5x32xf32> to vector<5x32xf32>
    %c0_240 = arith.constant 0 : index
    %c6 = arith.constant 6 : index
    %c0_241 = arith.constant 0 : index
    %c0_242 = arith.constant 0 : index
    %131 = vector.load %arg1[%c0_240, %c6, %c0_241, %c0_242] : memref<1x8x8x32xf32, #tpu.memory_space<vmem>>, vector<1x1x5x32xf32>
    %132 = vector.shape_cast %131 : vector<1x1x5x32xf32> to vector<5x32xf32>
    %c0_243 = arith.constant 0 : index
    %c6_244 = arith.constant 6 : index
    %c1_245 = arith.constant 1 : index
    %c0_246 = arith.constant 0 : index
    %133 = vector.load %arg1[%c0_243, %c6_244, %c1_245, %c0_246] : memref<1x8x8x32xf32, #tpu.memory_space<vmem>>, vector<1x1x5x32xf32>
    %134 = vector.shape_cast %133 : vector<1x1x5x32xf32> to vector<5x32xf32>
    %c0_247 = arith.constant 0 : index
    %c6_248 = arith.constant 6 : index
    %c2_249 = arith.constant 2 : index
    %c0_250 = arith.constant 0 : index
    %135 = vector.load %arg1[%c0_247, %c6_248, %c2_249, %c0_250] : memref<1x8x8x32xf32, #tpu.memory_space<vmem>>, vector<1x1x5x32xf32>
    %136 = vector.shape_cast %135 : vector<1x1x5x32xf32> to vector<5x32xf32>
    %c0_251 = arith.constant 0 : index
    %c6_252 = arith.constant 6 : index
    %c3_253 = arith.constant 3 : index
    %c0_254 = arith.constant 0 : index
    %137 = vector.load %arg1[%c0_251, %c6_252, %c3_253, %c0_254] : memref<1x8x8x32xf32, #tpu.memory_space<vmem>>, vector<1x1x5x32xf32>
    %138 = vector.shape_cast %137 : vector<1x1x5x32xf32> to vector<5x32xf32>
    %139 = tpu.concatenate %108, %110, %112, %114, %116, %118, %120, %122, %124, %126, %128, %130, %132, %134, %136, %138 in 1 : vector<5x32xf32>, vector<5x32xf32>, vector<5x32xf32>, vector<5x32xf32>, vector<5x32xf32>, vector<5x32xf32>, vector<5x32xf32>, vector<5x32xf32>, vector<5x32xf32>, vector<5x32xf32>, vector<5x32xf32>, vector<5x32xf32>, vector<5x32xf32>, vector<5x32xf32>, vector<5x32xf32>, vector<5x32xf32> -> vector<5x512xf32>
    %140 = arith.truncf %139 : vector<5x512xf32> to vector<5x512xbf16>
    %cst_255 = arith.constant dense<0.000000e+00> : vector<5x1xf32>
    %141 = tpu.matmul %140, %0, %cst_255 {dimension_numbers = #tpu.dot_dimension_numbers<[1], [0], [0], [1], [0, 0, 1, 1], [], []>} : vector<5x512xbf16>, vector<512x1xbf16>, vector<5x1xf32> -> vector<5x1xf32>
    %c0_256 = arith.constant 0 : index
    %c4_257 = arith.constant 4 : index
    %c0_258 = arith.constant 0 : index
    %c0_259 = arith.constant 0 : index
    %142 = vector.load %arg1[%c0_256, %c4_257, %c0_258, %c0_259] : memref<1x8x8x32xf32, #tpu.memory_space<vmem>>, vector<1x1x5x32xf32>
    %143 = vector.shape_cast %142 : vector<1x1x5x32xf32> to vector<5x32xf32>
    %c0_260 = arith.constant 0 : index
    %c4_261 = arith.constant 4 : index
    %c1_262 = arith.constant 1 : index
    %c0_263 = arith.constant 0 : index
    %144 = vector.load %arg1[%c0_260, %c4_261, %c1_262, %c0_263] : memref<1x8x8x32xf32, #tpu.memory_space<vmem>>, vector<1x1x5x32xf32>
    %145 = vector.shape_cast %144 : vector<1x1x5x32xf32> to vector<5x32xf32>
    %c0_264 = arith.constant 0 : index
    %c4_265 = arith.constant 4 : index
    %c2_266 = arith.constant 2 : index
    %c0_267 = arith.constant 0 : index
    %146 = vector.load %arg1[%c0_264, %c4_265, %c2_266, %c0_267] : memref<1x8x8x32xf32, #tpu.memory_space<vmem>>, vector<1x1x5x32xf32>
    %147 = vector.shape_cast %146 : vector<1x1x5x32xf32> to vector<5x32xf32>
    %c0_268 = arith.constant 0 : index
    %c4_269 = arith.constant 4 : index
    %c3_270 = arith.constant 3 : index
    %c0_271 = arith.constant 0 : index
    %148 = vector.load %arg1[%c0_268, %c4_269, %c3_270, %c0_271] : memref<1x8x8x32xf32, #tpu.memory_space<vmem>>, vector<1x1x5x32xf32>
    %149 = vector.shape_cast %148 : vector<1x1x5x32xf32> to vector<5x32xf32>
    %c0_272 = arith.constant 0 : index
    %c5_273 = arith.constant 5 : index
    %c0_274 = arith.constant 0 : index
    %c0_275 = arith.constant 0 : index
    %150 = vector.load %arg1[%c0_272, %c5_273, %c0_274, %c0_275] : memref<1x8x8x32xf32, #tpu.memory_space<vmem>>, vector<1x1x5x32xf32>
    %151 = vector.shape_cast %150 : vector<1x1x5x32xf32> to vector<5x32xf32>
    %c0_276 = arith.constant 0 : index
    %c5_277 = arith.constant 5 : index
    %c1_278 = arith.constant 1 : index
    %c0_279 = arith.constant 0 : index
    %152 = vector.load %arg1[%c0_276, %c5_277, %c1_278, %c0_279] : memref<1x8x8x32xf32, #tpu.memory_space<vmem>>, vector<1x1x5x32xf32>
    %153 = vector.shape_cast %152 : vector<1x1x5x32xf32> to vector<5x32xf32>
    %c0_280 = arith.constant 0 : index
    %c5_281 = arith.constant 5 : index
    %c2_282 = arith.constant 2 : index
    %c0_283 = arith.constant 0 : index
    %154 = vector.load %arg1[%c0_280, %c5_281, %c2_282, %c0_283] : memref<1x8x8x32xf32, #tpu.memory_space<vmem>>, vector<1x1x5x32xf32>
    %155 = vector.shape_cast %154 : vector<1x1x5x32xf32> to vector<5x32xf32>
    %c0_284 = arith.constant 0 : index
    %c5_285 = arith.constant 5 : index
    %c3_286 = arith.constant 3 : index
    %c0_287 = arith.constant 0 : index
    %156 = vector.load %arg1[%c0_284, %c5_285, %c3_286, %c0_287] : memref<1x8x8x32xf32, #tpu.memory_space<vmem>>, vector<1x1x5x32xf32>
    %157 = vector.shape_cast %156 : vector<1x1x5x32xf32> to vector<5x32xf32>
    %c0_288 = arith.constant 0 : index
    %c6_289 = arith.constant 6 : index
    %c0_290 = arith.constant 0 : index
    %c0_291 = arith.constant 0 : index
    %158 = vector.load %arg1[%c0_288, %c6_289, %c0_290, %c0_291] : memref<1x8x8x32xf32, #tpu.memory_space<vmem>>, vector<1x1x5x32xf32>
    %159 = vector.shape_cast %158 : vector<1x1x5x32xf32> to vector<5x32xf32>
    %c0_292 = arith.constant 0 : index
    %c6_293 = arith.constant 6 : index
    %c1_294 = arith.constant 1 : index
    %c0_295 = arith.constant 0 : index
    %160 = vector.load %arg1[%c0_292, %c6_293, %c1_294, %c0_295] : memref<1x8x8x32xf32, #tpu.memory_space<vmem>>, vector<1x1x5x32xf32>
    %161 = vector.shape_cast %160 : vector<1x1x5x32xf32> to vector<5x32xf32>
    %c0_296 = arith.constant 0 : index
    %c6_297 = arith.constant 6 : index
    %c2_298 = arith.constant 2 : index
    %c0_299 = arith.constant 0 : index
    %162 = vector.load %arg1[%c0_296, %c6_297, %c2_298, %c0_299] : memref<1x8x8x32xf32, #tpu.memory_space<vmem>>, vector<1x1x5x32xf32>
    %163 = vector.shape_cast %162 : vector<1x1x5x32xf32> to vector<5x32xf32>
    %c0_300 = arith.constant 0 : index
    %c6_301 = arith.constant 6 : index
    %c3_302 = arith.constant 3 : index
    %c0_303 = arith.constant 0 : index
    %164 = vector.load %arg1[%c0_300, %c6_301, %c3_302, %c0_303] : memref<1x8x8x32xf32, #tpu.memory_space<vmem>>, vector<1x1x5x32xf32>
    %165 = vector.shape_cast %164 : vector<1x1x5x32xf32> to vector<5x32xf32>
    %c0_304 = arith.constant 0 : index
    %c7 = arith.constant 7 : index
    %c0_305 = arith.constant 0 : index
    %c0_306 = arith.constant 0 : index
    %166 = vector.load %arg1[%c0_304, %c7, %c0_305, %c0_306] : memref<1x8x8x32xf32, #tpu.memory_space<vmem>>, vector<1x1x5x32xf32>
    %167 = vector.shape_cast %166 : vector<1x1x5x32xf32> to vector<5x32xf32>
    %c0_307 = arith.constant 0 : index
    %c7_308 = arith.constant 7 : index
    %c1_309 = arith.constant 1 : index
    %c0_310 = arith.constant 0 : index
    %168 = vector.load %arg1[%c0_307, %c7_308, %c1_309, %c0_310] : memref<1x8x8x32xf32, #tpu.memory_space<vmem>>, vector<1x1x5x32xf32>
    %169 = vector.shape_cast %168 : vector<1x1x5x32xf32> to vector<5x32xf32>
    %c0_311 = arith.constant 0 : index
    %c7_312 = arith.constant 7 : index
    %c2_313 = arith.constant 2 : index
    %c0_314 = arith.constant 0 : index
    %170 = vector.load %arg1[%c0_311, %c7_312, %c2_313, %c0_314] : memref<1x8x8x32xf32, #tpu.memory_space<vmem>>, vector<1x1x5x32xf32>
    %171 = vector.shape_cast %170 : vector<1x1x5x32xf32> to vector<5x32xf32>
    %c0_315 = arith.constant 0 : index
    %c7_316 = arith.constant 7 : index
    %c3_317 = arith.constant 3 : index
    %c0_318 = arith.constant 0 : index
    %172 = vector.load %arg1[%c0_315, %c7_316, %c3_317, %c0_318] : memref<1x8x8x32xf32, #tpu.memory_space<vmem>>, vector<1x1x5x32xf32>
    %173 = vector.shape_cast %172 : vector<1x1x5x32xf32> to vector<5x32xf32>
    %174 = tpu.concatenate %143, %145, %147, %149, %151, %153, %155, %157, %159, %161, %163, %165, %167, %169, %171, %173 in 1 : vector<5x32xf32>, vector<5x32xf32>, vector<5x32xf32>, vector<5x32xf32>, vector<5x32xf32>, vector<5x32xf32>, vector<5x32xf32>, vector<5x32xf32>, vector<5x32xf32>, vector<5x32xf32>, vector<5x32xf32>, vector<5x32xf32>, vector<5x32xf32>, vector<5x32xf32>, vector<5x32xf32>, vector<5x32xf32> -> vector<5x512xf32>
    %175 = arith.truncf %174 : vector<5x512xf32> to vector<5x512xbf16>
    %cst_319 = arith.constant dense<0.000000e+00> : vector<5x1xf32>
    %176 = tpu.matmul %175, %0, %cst_319 {dimension_numbers = #tpu.dot_dimension_numbers<[1], [0], [0], [1], [0, 0, 1, 1], [], []>} : vector<5x512xbf16>, vector<512x1xbf16>, vector<5x1xf32> -> vector<5x1xf32>
    %177 = vector.shape_cast %36 : vector<5x1xf32> to vector<1x5x1xf32>
    %178 = vector.shape_cast %71 : vector<5x1xf32> to vector<1x5x1xf32>
    %179 = vector.shape_cast %106 : vector<5x1xf32> to vector<1x5x1xf32>
    %180 = vector.shape_cast %141 : vector<5x1xf32> to vector<1x5x1xf32>
    %181 = vector.shape_cast %176 : vector<5x1xf32> to vector<1x5x1xf32>
    %182 = tpu.concatenate %177, %178, %179, %180, %181 in 0 : vector<1x5x1xf32>, vector<1x5x1xf32>, vector<1x5x1xf32>, vector<1x5x1xf32>, vector<1x5x1xf32> -> vector<5x5x1xf32>
    %183 = vector.shape_cast %1 : vector<1x1xf32> to vector<1x1x1xf32>
    %184 = vector.broadcast %183 : vector<1x1x1xf32> to vector<5x5x1xf32>
    %185 = arith.addf %182, %184 : vector<5x5x1xf32>
    %c0_320 = arith.constant 0 : index
    %c0_321 = arith.constant 0 : index
    %c0_322 = arith.constant 0 : index
    %c0_323 = arith.constant 0 : index
    %186 = vector.load %arg4[%c0_320, %c0_321, %c0_322, %c0_323] : memref<1x5x5x1xf32, #tpu.memory_space<vmem>>, vector<1x5x5x1xf32>
    %187 = vector.shape_cast %186 : vector<1x5x5x1xf32> to vector<5x5x1xf32>
    %188 = vector.shape_cast %185 : vector<5x5x1xf32> to vector<1x5x5x1xf32>
    tpu.vector_store %arg4[%c0_320, %c0_321, %c0_322, %c0_323], %188 {strides = array<i32>} : memref<1x5x5x1xf32, #tpu.memory_space<vmem>>, vector<1x5x5x1xf32>,
    return
  }
  func.func @transform_0(%arg0: i32) -> (i32, i32, i32, i32) {
    %c0_i32 = arith.constant 0 : i32
    %c0_i32_0 = arith.constant 0 : i32
    %c0_i32_1 = arith.constant 0 : i32
    %c0_i32_2 = arith.constant 0 : i32
    return %arg0, %c0_i32, %c0_i32_0, %c0_i32_1 : i32, i32, i32, i32
  }
  func.func @transform_1(%arg0: i32) -> (i32, i32) {
    %c0_i32 = arith.constant 0 : i32
    %c0_i32_0 = arith.constant 0 : i32
    %c0_i32_1 = arith.constant 0 : i32
    return %c0_i32, %c0_i32_0 : i32, i32
  }
  func.func @transform_2(%arg0: i32) -> (i32, i32) {
    %c0_i32 = arith.constant 0 : i32
    %c0_i32_0 = arith.constant 0 : i32
    %c0_i32_1 = arith.constant 0 : i32
    return %c0_i32, %c0_i32_0 : i32, i32
  }
  func.func @transform_3(%arg0: i32) -> (i32, i32, i32, i32) {
    %c0_i32 = arith.constant 0 : i32
    %c0_i32_0 = arith.constant 0 : i32
    %c0_i32_1 = arith.constant 0 : i32
    %c0_i32_2 = arith.constant 0 : i32
    return %arg0, %c0_i32, %c0_i32_0, %c0_i32_1 : i32, i32, i32, i32
  }
}

</mosaic_0001>

<bundles_post_ra>
// kernel: mesh_rgb_discriminator_forward.8
= control target key start
LH: loop header
LB: loop body
LE: loop exit
PB: predicated region body
PF: predicated region fallthrough
CT: control target
= control target key end

     0   :  { %s1469_s12 = smov 0   ;;  %s1857_s0 = inlined_call_operand.vmem [shape: f32[2,10,10,16], index: 0, kind: input, shape index: {}]   ;;  %s1858_s1 = inlined_call_operand.vmem [shape: bf16[64,8], index: 1, kind: input, shape index: {}]   ;;  %s1859_s2 = inlined_call_operand.vmem [shape: f32[1,8], index: 2, kind: input, shape index: {}]   ;;  %s1860_s3 = inlined_call_operand.vmem [shape: f32[2,9,9,8], index: 3, kind: output, shape index: {}]  }
   0x1 LB: > { %s1070_s13 = sadd.s32 4294967295, %s1442_s12   ;;  %p1074_p0 = scmp.ge.s32.totalorder %s1442_s12, 1  ;;  %s1442_s12 = sphi %s1469_s12, %s13_s12  }
   0x2   : > { %p137_p1 = scmp.lt.s32.totalorder %s1442_s12, 3 }
   0x4   : > { %p138_p2 = pnand %p1074_p0, %p137_p1 }
   0x5   : > { %p161_p3 = scmp.lt.s32.totalorder (!%p138_p2), %s1070_s13, 1  ;;  %v1480_v0 = vld [vmem:[%s1858_s1] sm:$0xff] (!%p138_p2)   ;;  %v1444_v1 = vmov (!%p138_p2), 0.0   ;;  %v1490_v2 = vld [vmem:[%s1858_s1 + $0x8] sm:$0xff] (!%p138_p2)   ;;  %v1505_v3 = vld [vmem:[%s1858_s1 + $0x10] sm:$0xff] (!%p138_p2)   ;;  %vm1445_vm0 = vmmov (!%p138_p2), 0  }
   0x6   : > { %141 = sbr.rel (%p138_p2) target bundleno = 430 (0x1ae), region = 32  ;;  %1174 = vmatprep.subr.bf16.mxu0 (!%p138_p2), %v1444_v1  ;;  %1186 = vmatprep.subr.bf16.mxu1 (!%p138_p2), %v1444_v1  ;;  %s1446_s24 = smov (!%p138_p2), 48   ;;  %v1529_v12 = vld [vmem:[%s1858_s1 + $0x18] sm:$0xff] (!%p138_p2)   ;;  %vm214_vm1 = vcmask (!%p138_p2), 130048   ;;  %vm217_vm2 = vcmask (!%p138_p2), 261120   ;;  %vm220_vm3 = vcmask (!%p138_p2), 392192  }
   0x7   : > { %1175 = vmatpush3.bf16.msra.mxu0 (!%p138_p2), %v1480_v0  ;;  %1187 = vmatpush3.bf16.msra.mxu1 (!%p138_p2), %v1480_v0  ;;  %s1447_s27 = smov (!%p138_p2), 16   ;;  %s1448_s28 = smov (!%p138_p2), 32   ;;  %vm248_vm4 = vcmask (!%p138_p2), 523264   ;;  %vm995_vm6 = vcmask (!%p138_p2), 64512   ;;  %vm997_vm8 = vcmask (!%p138_p2), 57344  }
   0x8   : > { %1176 = vmatprep.subr.bf16.mxu0 (!%p138_p2), %v1444_v1  ;;  %1188 = vmatprep.subr.bf16.mxu1 (!%p138_p2), %v1444_v1 }
   0x9   : > { %1182 = vmatprep.mubr.msk.bf16.mxu0 (!%p138_p2), %vm1445_vm0, %v1444_v1  ;;  %1194 = vmatprep.mubr.msk.bf16.mxu1 (!%p138_p2), %vm1445_vm0, %v1444_v1 }
   0xb   : > { %1177 = vmatpush3.bf16.msra.mxu0 (!%p138_p2), %v1490_v2  ;;  %1189 = vmatpush3.bf16.msra.mxu1 (!%p138_p2), %v1490_v2 }
   0xc   : > { %1178 = vmatprep.subr.bf16.mxu0 (!%p138_p2), %v1444_v1  ;;  %1190 = vmatprep.subr.bf16.mxu1 (!%p138_p2), %v1444_v1 }
   0xd   : > { %s1862_s13 = smov (!%p161_p3, %s1070_s13), 1 }
   0xe   : > { %s1282_s18 = smul.u32 160, %s1862_s13 }
   0xf   : > { %1179 = vmatpush3.bf16.msra.mxu0 %v1505_v3  ;;  %1191 = vmatpush3.bf16.msra.mxu1 %v1505_v3  ;;  %s1283_s4 = smul.u32 144, %s1862_s13 }
  0x10   : > { %s1499_s21 = scalar_lea.vmem %s1857_s0, %s1282_s18  ;;  %1180 = vmatprep.subr.bf16.mxu0 %v1444_v1  ;;  %1192 = vmatprep.subr.bf16.mxu1 %v1444_v1 }
  0x11   : > { %v1079_v4 = vld [vmem:[%s1499_s21 + $0x11] sm:$0xff]  ;;  %v1080_v5 = vld [vmem:[%s1499_s21 + $0x19] sm:$0x1]  ;;  %v183_v6 = vld [vmem:[%s1499_s21 + $0x1] sm:$0xff]  ;;  %s1799_s7 = scalar_lea.vmem %s1860_s3, %s1283_s4 }
  0x12   : > { %v1307_v7 = vpack.i.bf16 %v1080_v5, %v1079_v4  ;;  %v184_v8 = vld [vmem:[%s1499_s21 + $0x9] sm:$0x1]  ;;  %v1515_v9 = vld [vmem:[%s1499_s21 + $0x10] sm:$0xff]  ;;  %v1518_v10 = vld [vmem:[%s1499_s21 + $0x18] sm:$0x1] }
  0x13   : > { %v1297_v11 = vpack.i.bf16 %v184_v8, %v183_v6  ;;  %v1302_v13 = vpack.i.bf16 %v1518_v10, %v1515_v9  ;;  %v1535_v14 = vld [vmem:[%s1499_s21 + $0x20] sm:$0xff]  ;;  %v1538_v15 = vld [vmem:[%s1499_s21 + $0x28] sm:$0x1]  ;;  %v1089_v17 = vld [vmem:[%s1499_s21 + $0x29] sm:$0x1]  ;;  %1181 = vmatpush3.bf16.msra.mxu0 %v1529_v12  ;;  %1193 = vmatpush3.bf16.msra.mxu1 %v1529_v12 }
  0x14   : > { %1308 = vrot.lane.b32.xlu1 %v1307_v7, %s1446_s24  ;;  %v1088_v16 = vld [vmem:[%s1499_s21 + $0x21] sm:$0xff]  ;;  %v1322_v18 = vpack.i.bf16 %v1538_v15, %v1535_v14  ;;  %1198 = vmatprep.subr.bf16.mxu0 %v1444_v1  ;;  %v1552_v20 = vld [vmem:[%s1499_s21 + $0x30] sm:$0xff]  ;;  %v1555_v21 = vld [vmem:[%s1499_s21 + $0x38] sm:$0x1] }
  0x15   : > { %1298 = vrot.lane.b32.xlu0 %v1297_v11, %s1447_s27  ;;  %v1317_v19 = vpack.i.bf16 %v1089_v17, %v1088_v16  ;;  %1210 = vmatprep.subr.bf16.mxu1 %v1444_v1  ;;  %v1327_v22 = vpack.i.bf16 %v1555_v21, %v1552_v20  ;;  %v1093_v23 = vld [vmem:[%s1499_s21 + $0x31] sm:$0xff]  ;;  %v1094_v24 = vld [vmem:[%s1499_s21 + $0x39] sm:$0x1]  ;;  %v1568_v26 = vld [vmem:[%s1499_s21 + $0x40] sm:$0xff] }
  0x16   : > { %v1342_v25 = vpack.i.bf16 %v1094_v24, %v1093_v23  ;;  %v1571_v27 = vld [vmem:[%s1499_s21 + $0x48] sm:$0x1]  ;;  %v1099_v29 = vld [vmem:[%s1499_s21 + $0x49] sm:$0x1]  ;;  %v1580_v32 = vld [vmem:[%s1499_s21 + $0x50] sm:$0xff] }
  0x17   : > { %v1098_v28 = vld [vmem:[%s1499_s21 + $0x41] sm:$0xff]  ;;  %v1352_v30 = vpack.i.bf16 %v1571_v27, %v1568_v26  ;;  %v1583_v33 = vld [vmem:[%s1499_s21 + $0x58] sm:$0x1]  ;;  %v1104_v36 = vld [vmem:[%s1499_s21 + $0x59] sm:$0x1] }
  0x18   : > { %1313 = vrot.lane.b32.xlu1 %v1307_v7, %s1447_s27  ;;  %v1347_v31 = vpack.i.bf16 %v1099_v29, %v1098_v28  ;;  %v1357_v34 = vpack.i.bf16 %v1583_v33, %v1580_v32  ;;  %v1103_v35 = vld [vmem:[%s1499_s21 + $0x51] sm:$0xff]  ;;  %v1594_v38 = vld [vmem:[%s1499_s21 + $0x60] sm:$0xff]  ;;  %v1597_v39 = vld [vmem:[%s1499_s21 + $0x68] sm:$0x1] }
  0x19   : > { %1303 = vrot.lane.b32.xlu0 %v1302_v13, %s1448_s28  ;;  %v1372_v37 = vpack.i.bf16 %v1104_v36, %v1103_v35  ;;  %v1108_v40 = vld [vmem:[%s1499_s21 + $0x61] sm:$0xff]  ;;  %v1109_v41 = vld [vmem:[%s1499_s21 + $0x69] sm:$0x1]  ;;  %v1382_v42 = vpack.i.bf16 %v1597_v39, %v1594_v38  ;;  %v1606_v44 = vld [vmem:[%s1499_s21 + $0x70] sm:$0xff] }
  0x1a   : > { %v1377_v43 = vpack.i.bf16 %v1109_v41, %v1108_v40  ;;  %v1609_v45 = vld [vmem:[%s1499_s21 + $0x78] sm:$0x1]  ;;  %v1114_v48 = vld [vmem:[%s1499_s21 + $0x79] sm:$0x1]  ;;  %v1620_v50 = vld [vmem:[%s1499_s21 + $0x80] sm:$0xff] }
  0x1b   : > { %v1387_v46 = vpack.i.bf16 %v1609_v45, %v1606_v44  ;;  %v1113_v47 = vld [vmem:[%s1499_s21 + $0x71] sm:$0xff]  ;;  %v1623_v51 = vld [vmem:[%s1499_s21 + $0x88] sm:$0x1]  ;;  %v1119_v53 = vld [vmem:[%s1499_s21 + $0x89] sm:$0x1] }
  0x1c   : > { %1323 = vrot.lane.b32.xlu1 %v1322_v18, %s1448_s28  ;;  %v1402_v49 = vpack.i.bf16 %v1114_v48, %v1113_v47  ;;  %v1118_v52 = vld [vmem:[%s1499_s21 + $0x81] sm:$0xff]  ;;  %v1412_v54 = vpack.i.bf16 %v1623_v51, %v1620_v50  ;;  %v1121_v56 = vld [vmem:[%s1499_s21 + $0x90] sm:$0xff]  ;;  %v1122_v57 = vld [vmem:[%s1499_s21 + $0x98] sm:$0x1] }
  0x1d   : > { %1318 = vrot.lane.b32.xlu0 %v1317_v19, %s1447_s27  ;;  %v1407_v55 = vpack.i.bf16 %v1119_v53, %v1118_v52  ;;  %v1417_v58 = vpack.i.bf16 %v1122_v57, %v1121_v56  ;;  %v1123_v59 = vld [vmem:[%s1499_s21 + $0x91] sm:$0xff]  ;;  %v1124_v60 = vld [vmem:[%s1499_s21 + $0x99] sm:$0x1]  ;;  %v181_v6 = vld [vmem:[%s1499_s21] sm:$0xff] }
  0x1e   : > { %v1427_v61 = vpack.i.bf16 %v1124_v60, %v1123_v59  ;;  %v182_v7 = vld [vmem:[%s1499_s21 + $0x8] sm:$0x1] }
  0x20   : > { %1333 = vrot.lane.b32.xlu1 %v1317_v19, %s1446_s24 }
  0x21   : > { %1328 = vrot.lane.b32.xlu0 %v1327_v22, %s1448_s28 }
  0x24   : > { %1343 = vrot.lane.b32.xlu1 %v1342_v25, %s1447_s27 }
  0x25   : > { %1338 = vrot.lane.b32.xlu0 %v1342_v25, %s1446_s24 }
  0x28   : > { %1353 = vrot.lane.b32.xlu1 %v1352_v30, %s1448_s28 }
  0x29   : > { %1348 = vrot.lane.b32.xlu0 %v1347_v31, %s1447_s27 }
  0x2c   : > { %1363 = vrot.lane.b32.xlu1 %v1347_v31, %s1446_s24 }
  0x2d   : > { %1358 = vrot.lane.b32.xlu0 %v1357_v34, %s1448_s28 }
  0x30   : > { %1373 = vrot.lane.b32.xlu1 %v1372_v37, %s1447_s27 }
  0x31   : > { %1368 = vrot.lane.b32.xlu0 %v1372_v37, %s1446_s24 }
  0x34   : > { %1383 = vrot.lane.b32.xlu1 %v1382_v42, %s1448_s28 }
  0x35   : > { %1378 = vrot.lane.b32.xlu0 %v1377_v43, %s1447_s27 }
  0x38   : > { %1393 = vrot.lane.b32.xlu1 %v1377_v43, %s1446_s24 }
  0x39   : > { %1388 = vrot.lane.b32.xlu0 %v1387_v46, %s1448_s28 }
  0x3c   : > { %1403 = vrot.lane.b32.xlu1 %v1402_v49, %s1447_s27 }
  0x3d   : > { %1398 = vrot.lane.b32.xlu0 %v1402_v49, %s1446_s24 }
  0x40   : > { %1413 = vrot.lane.b32.xlu1 %v1412_v54, %s1448_s28 }
  0x41   : > { %1408 = vrot.lane.b32.xlu0 %v1407_v55, %s1447_s27 }
  0x44   : > { %1423 = vrot.lane.b32.xlu1 %v1407_v55, %s1446_s24 }
  0x45   : > { %1418 = vrot.lane.b32.xlu0 %v1417_v58, %s1448_s28 }
  0x49   : > { %1428 = vrot.lane.b32.xlu0 %v1427_v61, %s1446_s24 }
  0x86   : > { %v1309_v62 = vpop.permute.xlu1 %1308 }
  0x87   : > { %v1299_v63 = vpop.permute.xlu0 %1298  ;;  %v1311_v11 = vunpack.i.h.bf16 %v1309_v62  ;;  %v1310_v13 = vunpack.i.l.bf16 %v1309_v62 }
  0x88   : > { %v1301_v4 = vunpack.i.h.bf16 %v1299_v63  ;;  %v1300_v5 = vunpack.i.l.bf16 %v1299_v63 }
  0x8a   : > { %v1314_v8 = vpop.permute.xlu1 %1313  ;;  %v215_v23 = vsel %vm214_vm1, %v181_v6, %v1300_v5  ;;  %v216_v24 = vsel %vm214_vm1, %v182_v7, %v1301_v4 }
  0x8b   : > { %v1316_v16 = vunpack.i.h.bf16 %v1314_v8  ;;  %v1315_v17 = vunpack.i.l.bf16 %v1314_v8  ;;  %v1304_v18 = vpop.permute.xlu0 %1303 }
  0x8c   : > { %v1306_v19 = vunpack.i.h.bf16 %v1304_v18  ;;  %v1305_v22 = vunpack.i.l.bf16 %v1304_v18 }
  0x8d   : > { %v320_v25 = vsel %vm214_vm1, %v1515_v9, %v1315_v17  ;;  %v321_v28 = vsel %vm214_vm1, %v1518_v10, %v1316_v16 }
  0x8e   : > { %v218_v29 = vsel %vm217_vm2, %v215_v23, %v1305_v22  ;;  %v219_v30 = vsel %vm217_vm2, %v216_v24, %v1306_v19  ;;  %v1324_v31 = vpop.permute.xlu1 %1323 }
  0x8f   : > { %v1326_v34 = vunpack.i.h.bf16 %v1324_v31  ;;  %v1325_v35 = vunpack.i.l.bf16 %v1324_v31  ;;  %v1319_v36 = vpop.permute.xlu0 %1318  ;;  %v221_v37 = vsel %vm220_vm3, %v218_v29, %v1310_v13  ;;  %v222_v40 = vsel %vm220_vm3, %v219_v30, %v1311_v11 }
  0x90   : > { %v223_v41 = vpack.c.bf16 %v222_v40, %v221_v37  ;;  %v1321_v43 = vunpack.i.h.bf16 %v1319_v36  ;;  %v1320_v46 = vunpack.i.l.bf16 %v1319_v36 }
  0x91   : > { %v322_v42 = vsel %vm217_vm2, %v320_v25, %v1325_v35  ;;  %v323_v9 = vsel %vm217_vm2, %v321_v28, %v1326_v34 }
  0x92   : > { %1183 = vmatmul.mubr.msk.bf16.vlgmr.msra.gmra.mrb[0].mxu0 %vm248_vm4, %v223_v41  ;;  %v1334_v10 = vpop.permute.xlu1 %1333  ;;  %v399_v58 = vsel %vm214_vm1, %v1538_v15, %v1321_v43  ;;  %v398_v59 = vsel %vm214_vm1, %v1535_v14, %v1320_v46 }
  0x93   : > { %1199 = vmatpush3.bf16.msra.mxu0 %v1480_v0  ;;  %v1336_v47 = vunpack.i.h.bf16 %v1334_v10  ;;  %v1335_v48 = vunpack.i.l.bf16 %v1334_v10  ;;  %v1329_v49 = vpop.permute.xlu0 %1328  ;;  %1206 = vmatprep.mubr.msk.bf16.mxu0 %vm1445_vm0, %v1444_v1 }
  0x94   : > { %1200 = vmatprep.subr.bf16.mxu0 %v1444_v1  ;;  %v1331_v55 = vunpack.i.h.bf16 %v1329_v49  ;;  %v1330_v56 = vunpack.i.l.bf16 %v1329_v49 }
  0x95   : > { %v324_v52 = vsel %vm220_vm3, %v322_v42, %v1335_v48  ;;  %v325_v53 = vsel %vm220_vm3, %v323_v9, %v1336_v47 }
  0x96   : > { %v326_v54 = vpack.c.bf16 %v325_v53, %v324_v52  ;;  %v1344_v57 = vpop.permute.xlu1 %1343  ;;  %v400_v15 = vsel %vm217_vm2, %v398_v59, %v1330_v56  ;;  %v401_v14 = vsel %vm217_vm2, %v399_v58, %v1331_v55 }
  0x97   : > { %1201 = vmatpush3.bf16.msra.mxu0 %v1490_v2  ;;  %v1339_v60 = vpop.permute.xlu0 %1338  ;;  %v1346_v61 = vunpack.i.h.bf16 %v1344_v57  ;;  %v1345_v62 = vunpack.i.l.bf16 %v1344_v57 }
  0x98   : > { %1195 = vmatmul.mubr.msk.bf16.vlgmr.msra.gmra.mrb[0].mxu1 %vm248_vm4, %v326_v54  ;;  %1202 = vmatprep.subr.bf16.mxu0 %v1444_v1  ;;  %v1341_v63 = vunpack.i.h.bf16 %v1339_v60  ;;  %v1340_v4 = vunpack.i.l.bf16 %v1339_v60 }
  0x99   : > { %1211 = vmatpush3.bf16.msra.mxu1 %v1480_v0  ;;  %1218 = vmatprep.mubr.msk.bf16.mxu1 %vm1445_vm0, %v1444_v1  ;;  %v477_v6 = vsel %vm214_vm1, %v1555_v21, %v1346_v61  ;;  %v476_v7 = vsel %vm214_vm1, %v1552_v20, %v1345_v62 }
  0x9a   : > { %1212 = vmatprep.subr.bf16.mxu1 %v1444_v1  ;;  %v1354_v5 = vpop.permute.xlu1 %1353  ;;  %v402_v16 = vsel %vm220_vm3, %v400_v15, %v1340_v4  ;;  %v403_v17 = vsel %vm220_vm3, %v401_v14, %v1341_v63 }
  0x9b   : > { %1203 = vmatpush3.bf16.msra.mxu0 %v1505_v3  ;;  %v1356_v8 = vunpack.i.h.bf16 %v1354_v5  ;;  %v1355_v11 = vunpack.i.l.bf16 %v1354_v5  ;;  %v1349_v13 = vpop.permute.xlu0 %1348  ;;  %v404_v24 = vpack.c.bf16 %v403_v17, %v402_v16 }
  0x9c   : > { %1204 = vmatprep.subr.bf16.mxu0 %v1444_v1  ;;  %v1351_v30 = vunpack.i.h.bf16 %v1349_v13  ;;  %v1350_v31 = vunpack.i.l.bf16 %v1349_v13 }
  0x9d   : > { %1213 = vmatpush3.bf16.msra.mxu1 %v1490_v2  ;;  %v478_v18 = vsel %vm217_vm2, %v476_v7, %v1355_v11  ;;  %v479_v21 = vsel %vm217_vm2, %v477_v6, %v1356_v8 }
  0x9e   : > { %1214 = vmatprep.subr.bf16.mxu1 %v1444_v1  ;;  %v1364_v20 = vpop.permute.xlu1 %1363  ;;  %v555_v41 = vsel %vm214_vm1, %v1571_v27, %v1351_v30  ;;  %v554_v42 = vsel %vm214_vm1, %v1568_v26, %v1350_v31 }
  0x9f   : > { %1205 = vmatpush3.bf16.msra.mxu0 %v1529_v12  ;;  %v1366_v19 = vunpack.i.h.bf16 %v1364_v20  ;;  %v1365_v22 = vunpack.i.l.bf16 %v1364_v20  ;;  %v1359_v23 = vpop.permute.xlu0 %1358 }
  0xa0   : > { %1222 = vmatprep.subr.bf16.mxu0 %v1444_v1  ;;  %v1361_v36 = vunpack.i.h.bf16 %v1359_v23  ;;  %v1360_v37 = vunpack.i.l.bf16 %v1359_v23 }
  0xa1   : > { %1215 = vmatpush3.bf16.msra.mxu1 %v1505_v3  ;;  %v480_v25 = vsel %vm220_vm3, %v478_v18, %v1365_v22  ;;  %v481_v28 = vsel %vm220_vm3, %v479_v21, %v1366_v19 }
  0xa2   : > { %1207 = vmatmul.mubr.msk.bf16.vlgmr.msra.gmra.mrb[4].mxu0 %vm248_vm4, %v404_v24  ;;  %1216 = vmatprep.subr.bf16.mxu1 %v1444_v1  ;;  %v1374_v29 = vpop.permute.xlu1 %1373  ;;  %v482_v35 = vpack.c.bf16 %v481_v28, %v480_v25  ;;  %v556_v27 = vsel %vm217_vm2, %v554_v42, %v1360_v37  ;;  %v557_v26 = vsel %vm217_vm2, %v555_v41, %v1361_v36 }
  0xa3   : > { %1223 = vmatpush3.bf16.msra.mxu0 %v1480_v0  ;;  %v1369_v34 = vpop.permute.xlu0 %1368  ;;  %1230 = vmatprep.mubr.msk.bf16.mxu0 %vm1445_vm0, %v1444_v1  ;;  %v1376_v9 = vunpack.i.h.bf16 %v1374_v29  ;;  %v1375_v10 = vunpack.i.l.bf16 %v1374_v29 }
  0xa4   : > { %1224 = vmatprep.subr.bf16.mxu0 %v1444_v1  ;;  %v1371_v46 = vunpack.i.h.bf16 %v1369_v34  ;;  %v1370_v47 = vunpack.i.l.bf16 %v1369_v34 }
  0xa5   : > { %1217 = vmatpush3.bf16.msra.mxu1 %v1529_v12  ;;  %v633_v53 = vsel %vm214_vm1, %v1583_v33, %v1376_v9  ;;  %v632_v54 = vsel %vm214_vm1, %v1580_v32, %v1375_v10 }
  0xa6   : > { %1234 = vmatprep.subr.bf16.mxu1 %v1444_v1  ;;  %v1384_v40 = vpop.permute.xlu1 %1383  ;;  %v558_v56 = vsel %vm220_vm3, %v556_v27, %v1370_v47  ;;  %v559_v57 = vsel %vm220_vm3, %v557_v26, %v1371_v46 }
  0xa7   : > { %1225 = vmatpush3.bf16.msra.mxu0 %v1490_v2  ;;  %v1379_v43 = vpop.permute.xlu0 %1378  ;;  %v1386_v48 = vunpack.i.h.bf16 %v1384_v40  ;;  %v1385_v49 = vunpack.i.l.bf16 %v1384_v40  ;;  %v560_v62 = vpack.c.bf16 %v559_v57, %v558_v56 }
  0xa8   : > { %1219 = vmatmul.mubr.msk.bf16.vlgmr.msra.gmra.mrb[4].mxu1 %vm248_vm4, %v482_v35  ;;  %1226 = vmatprep.subr.bf16.mxu0 %v1444_v1  ;;  %v1381_v15 = vunpack.i.h.bf16 %v1379_v43  ;;  %v1380_v14 = vunpack.i.l.bf16 %v1379_v43 }
  0xa9   : > { %1235 = vmatpush3.bf16.msra.mxu1 %v1480_v0  ;;  %1242 = vmatprep.mubr.msk.bf16.mxu1 %vm1445_vm0, %v1444_v1  ;;  %v634_v60 = vsel %vm217_vm2, %v632_v54, %v1385_v49  ;;  %v635_v33 = vsel %vm217_vm2, %v633_v53, %v1386_v48 }
  0xaa   : > { %1236 = vmatprep.subr.bf16.mxu1 %v1444_v1  ;;  %v1394_v52 = vpop.permute.xlu1 %1393  ;;  %v711_v17 = vsel %vm214_vm1, %v1597_v39, %v1381_v15  ;;  %v710_v18 = vsel %vm214_vm1, %v1594_v38, %v1380_v14 }
  0xab   : > { %1227 = vmatpush3.bf16.msra.mxu0 %v1505_v3  ;;  %v1389_v55 = vpop.permute.xlu0 %1388  ;;  %v1396_v58 = vunpack.i.h.bf16 %v1394_v52  ;;  %v1395_v59 = vunpack.i.l.bf16 %v1394_v52 }
  0xac   : > { %1228 = vmatprep.subr.bf16.mxu0 %v1444_v1  ;;  %v1391_v13 = vunpack.i.h.bf16 %v1389_v55  ;;  %v1390_v16 = vunpack.i.l.bf16 %v1389_v55 }
  0xad   : > { %1237 = vmatpush3.bf16.msra.mxu1 %v1490_v2  ;;  %v636_v63 = vsel %vm220_vm3, %v634_v60, %v1395_v59  ;;  %v637_v4 = vsel %vm220_vm3, %v635_v33, %v1396_v58 }
  0xae   : > { %1238 = vmatprep.subr.bf16.mxu1 %v1444_v1  ;;  %v1404_v32 = vpop.permute.xlu1 %1403  ;;  %v638_v6 = vpack.c.bf16 %v637_v4, %v636_v63  ;;  %v712_v38 = vsel %vm217_vm2, %v710_v18, %v1390_v16  ;;  %v713_v25 = vsel %vm217_vm2, %v711_v17, %v1391_v13 }
  0xaf   : > { %1229 = vmatpush3.bf16.msra.mxu0 %v1529_v12  ;;  %v1399_v61 = vpop.permute.xlu0 %1398  ;;  %v1406_v21 = vunpack.i.h.bf16 %v1404_v32  ;;  %v1405_v20 = vunpack.i.l.bf16 %v1404_v32 }
  0xb0   : > { %1246 = vmatprep.subr.bf16.mxu0 %v1444_v1  ;;  %v1401_v28 = vunpack.i.h.bf16 %v1399_v61  ;;  %v1400_v29 = vunpack.i.l.bf16 %v1399_v61 }
  0xb1   : > { %1239 = vmatpush3.bf16.msra.mxu1 %v1505_v3  ;;  %v789_v35 = vsel %vm214_vm1, %v1609_v45, %v1406_v21  ;;  %v788_v36 = vsel %vm214_vm1, %v1606_v44, %v1405_v20 }
  0xb2   : > { %1231 = vmatmul.mubr.msk.bf16.vlgmr.msra.gmra.mrb[8].mxu0 %vm248_vm4, %v560_v62  ;;  %1240 = vmatprep.subr.bf16.mxu1 %v1444_v1  ;;  %v1414_v11 = vpop.permute.xlu1 %1413  ;;  %v714_v42 = vsel %vm220_vm3, %v712_v38, %v1400_v29  ;;  %v715_v9 = vsel %vm220_vm3, %v713_v25, %v1401_v28 }
  0xb3   : > { %1247 = vmatpush3.bf16.msra.mxu0 %v1480_v0  ;;  %v1409_v5 = vpop.permute.xlu0 %1408  ;;  %1254 = vmatprep.mubr.msk.bf16.mxu0 %vm1445_vm0, %v1444_v1  ;;  %v716_v26 = vpack.c.bf16 %v715_v9, %v714_v42 }
  0xb4   : > { %1248 = vmatprep.subr.bf16.mxu0 %v1444_v1  ;;  %v1411_v7 = vunpack.i.h.bf16 %v1409_v5  ;;  %v1410_v8 = vunpack.i.l.bf16 %v1409_v5 }
  0xb5   : > { %1241 = vmatpush3.bf16.msra.mxu1 %v1529_v12 }
  0xb6   : > { %1258 = vmatprep.subr.bf16.mxu1 %v1444_v1  ;;  %v867_v19 = vsel %vm214_vm1, %v1623_v51, %v1411_v7  ;;  %v866_v22 = vsel %vm214_vm1, %v1620_v50, %v1410_v8  ;;  %v1416_v50 = vunpack.i.h.bf16 %v1414_v11  ;;  %v1415_v51 = vunpack.i.l.bf16 %v1414_v11  ;;  %v1424_v34 = vpop.permute.xlu1 %1423 }
  0xb7   : > { %1249 = vmatpush3.bf16.msra.mxu0 %v1490_v2  ;;  %v1419_v23 = vpop.permute.xlu0 %1418  ;;  %v1426_v10 = vunpack.i.h.bf16 %v1424_v34  ;;  %v1425_v43 = vunpack.i.l.bf16 %v1424_v34 }
  0xb8   : > { %1243 = vmatmul.mubr.msk.bf16.vlgmr.msra.gmra.mrb[8].mxu1 %vm248_vm4, %v638_v6  ;;  %1250 = vmatprep.subr.bf16.mxu0 %v1444_v1  ;;  %v1421_v39 = vunpack.i.h.bf16 %v1419_v23  ;;  %v1420_v24 = vunpack.i.l.bf16 %v1419_v23  ;;  %v790_v45 = vsel %vm217_vm2, %v788_v36, %v1415_v51  ;;  %v791_v46 = vsel %vm217_vm2, %v789_v35, %v1416_v50 }
  0xb9   : > { %1259 = vmatpush3.bf16.msra.mxu1 %v1480_v0  ;;  %1266 = vmatprep.mubr.msk.bf16.mxu1 %vm1445_vm0, %v1444_v1  ;;  %v792_v48 = vsel %vm220_vm3, %v790_v45, %v1425_v43  ;;  %v793_v49 = vsel %vm220_vm3, %v791_v46, %v1426_v10 }
  0xba   : > { %1260 = vmatprep.subr.bf16.mxu1 %v1444_v1  ;;  %v868_v30 = vsel %vm217_vm2, %v866_v22, %v1420_v24  ;;  %v869_v31 = vsel %vm217_vm2, %v867_v19, %v1421_v39  ;;  %v794_v52 = vpack.c.bf16 %v793_v49, %v792_v48 }
  0xbb   : > { %1251 = vmatpush3.bf16.msra.mxu0 %v1505_v3  ;;  %v1429_v37 = vpop.permute.xlu0 %1428 }
  0xbc   : > { %1252 = vmatprep.subr.bf16.mxu0 %v1444_v1  ;;  %v1431_v40 = vunpack.i.h.bf16 %v1429_v37  ;;  %v1430_v41 = vunpack.i.l.bf16 %v1429_v37 }
  0xbd   : > { %1261 = vmatpush3.bf16.msra.mxu1 %v1490_v2 }
  0xbe   : > { %1262 = vmatprep.subr.bf16.mxu1 %v1444_v1  ;;  %v870_v44 = vsel %vm220_vm3, %v868_v30, %v1430_v41  ;;  %v871_v47 = vsel %vm220_vm3, %v869_v31, %v1431_v40 }
  0xbf   : > { %1253 = vmatpush3.bf16.msra.mxu0 %v1529_v12  ;;  %v872_v27 = vpack.c.bf16 %v871_v47, %v870_v44 }
  0xc0   : > { %1270 = vmatprep.subr.bf16.mxu0 %v1444_v1 }
  0xc1   : > { %1263 = vmatpush3.bf16.msra.mxu1 %v1505_v3 }
  0xc2   : > { %1255 = vmatmul.mubr.msk.bf16.vlgmr.msra.gmra.mrb[12].mxu0 %vm248_vm4, %v716_v26  ;;  %1264 = vmatprep.subr.bf16.mxu1 %v1444_v1 }
  0xc3   : > { %1271 = vmatpush3.bf16.msra.mxu0 %v1480_v0  ;;  %1278 = vmatprep.mubr.msk.bf16.mxu0 %vm1445_vm0, %v1444_v1  ;;  %v1792_v0 = vld [vmem:[%s1859_s2] ss:$0 sm:$0xff] }
  0xc4   : > { %1272 = vmatprep.subr.bf16.mxu0 %v1444_v1 }
  0xc5   : > { %1265 = vmatpush3.bf16.msra.mxu1 %v1529_v12 }
  0xc7   : > { %1273 = vmatpush3.bf16.msra.mxu0 %v1490_v2 }
  0xc8   : > { %1267 = vmatmul.mubr.msk.bf16.vlgmr.msra.gmra.mrb[12].mxu1 %vm248_vm4, %v794_v52  ;;  %1274 = vmatprep.subr.bf16.mxu0 %v1444_v1 }
  0xcb   : > { %1275 = vmatpush3.bf16.msra.mxu0 %v1505_v3 }
  0xcc   : > { %1276 = vmatprep.subr.bf16.mxu0 %v1444_v1 }
  0xcf   : > { %1277 = vmatpush3.bf16.msra.mxu0 %v1529_v12 }
  0xd2   : > { %1279 = vmatmul.mubr.msk.bf16.vlgmr.msra.gmra.mrb[16].mxu0 %vm248_vm4, %v872_v27 }
 0x165   : > { %v286_v53 = vpop.f32.mrb[0].mxu0 }
 0x166   : > { %v923_v2 = vadd.f32 %v1792_v0, %v286_v53  ;;  %v1184_v54 = vpop.f32.mrb[1].mxu0 }
 0x167   : > { %v289_v55 = vpop.f32.mrb[2].mxu0 }
 0x168   : > { %vm941_vm5 = vcmp.ge.f32.partialorder %v923_v2, 0.0  ;;  %v959_v1 = vmul.f32 0.2, %v923_v2  ;;  %v924_v3 = vadd.f32 %v1792_v0, %v289_v55  ;;  %v1185_v12 = vpop.f32.mrb[3].mxu0 }
 0x16a   : > { %v977_v56 = vsel %vm941_vm5, %v923_v2, %v959_v1  ;;  %vm942_vm7 = vcmp.ge.f32.partialorder %v924_v3, 0.0  ;;  %v960_v57 = vmul.f32 0.2, %v924_v3 }
 0x16b   : > { %996 = vst.msk [vmem:[%s1799_s7] sm:$0xff] %vm995_vm6, %v977_v56  ;;  %v364_v58 = vpop.f32.mrb[0].mxu1 }
 0x16c   : > { %v978_v59 = vsel %vm942_vm7, %v924_v3, %v960_v57  ;;  %v925_v60 = vadd.f32 %v1792_v0, %v364_v58  ;;  %v1196_v33 = vpop.f32.mrb[1].mxu1 }
 0x16d   : > { %998 = vst.msk [vmem:[%s1799_s7 + $0x8] sm:$0x1] %vm997_vm8, %v978_v59  ;;  %v367_v32 = vpop.f32.mrb[2].mxu1 }
 0x16e   : > { %vm943_vm9 = vcmp.ge.f32.partialorder %v925_v60, 0.0  ;;  %v961_v61 = vmul.f32 0.2, %v925_v60  ;;  %v926_v62 = vadd.f32 %v1792_v0, %v367_v32  ;;  %v1197_v63 = vpop.f32.mrb[3].mxu1 }
 0x170   : > { %v979_v4 = vsel %vm943_vm9, %v925_v60, %v961_v61  ;;  %vm944_vm10 = vcmp.ge.f32.partialorder %v926_v62, 0.0  ;;  %v962_v15 = vmul.f32 0.2, %v926_v62 }
 0x171   : > { %999 = vst.msk [vmem:[%s1799_s7 + $0x10] sm:$0xff] %vm995_vm6, %v979_v4 }
 0x172   : > { %v980_v14 = vsel %vm944_vm10, %v926_v62, %v962_v15 }
 0x173   : > { %1000 = vst.msk [vmem:[%s1799_s7 + $0x18] sm:$0x1] %vm997_vm8, %v980_v14 }
 0x175   : > { %v442_v5 = vpop.f32.mrb[4].mxu0 }
 0x176   : > { %v927_v6 = vadd.f32 %v1792_v0, %v442_v5  ;;  %v1208_v7 = vpop.f32.mrb[5].mxu0 }
 0x177   : > { %v445_v8 = vpop.f32.mrb[6].mxu0 }
 0x178   : > { %vm945_vm11 = vcmp.ge.f32.partialorder %v927_v6, 0.0  ;;  %v963_v11 = vmul.f32 0.2, %v927_v6  ;;  %v928_v13 = vadd.f32 %v1792_v0, %v445_v8  ;;  %v1209_v16 = vpop.f32.mrb[7].mxu0 }
 0x17a   : > { %v981_v17 = vsel %vm945_vm11, %v927_v6, %v963_v11  ;;  %vm946_vm12 = vcmp.ge.f32.partialorder %v928_v13, 0.0  ;;  %v964_v18 = vmul.f32 0.2, %v928_v13 }
 0x17b   : > { %1001 = vst.msk [vmem:[%s1799_s7 + $0x20] sm:$0xff] %vm995_vm6, %v981_v17  ;;  %v520_v21 = vpop.f32.mrb[4].mxu1 }
 0x17c   : > { %v982_v20 = vsel %vm946_vm12, %v928_v13, %v964_v18  ;;  %v929_v19 = vadd.f32 %v1792_v0, %v520_v21  ;;  %v1220_v22 = vpop.f32.mrb[5].mxu1 }
 0x17d   : > { %1002 = vst.msk [vmem:[%s1799_s7 + $0x28] sm:$0x1] %vm997_vm8, %v982_v20  ;;  %v523_v23 = vpop.f32.mrb[6].mxu1 }
 0x17e   : > { %vm947_vm13 = vcmp.ge.f32.partialorder %v929_v19, 0.0  ;;  %v965_v39 = vmul.f32 0.2, %v929_v19  ;;  %v930_v24 = vadd.f32 %v1792_v0, %v523_v23  ;;  %v1221_v38 = vpop.f32.mrb[7].mxu1 }
 0x180   : > { %v983_v25 = vsel %vm947_vm13, %v929_v19, %v965_v39  ;;  %vm948_vm14 = vcmp.ge.f32.partialorder %v930_v24, 0.0  ;;  %v966_v28 = vmul.f32 0.2, %v930_v24 }
 0x181   : > { %1003 = vst.msk [vmem:[%s1799_s7 + $0x30] sm:$0xff] %vm995_vm6, %v983_v25 }
 0x182   : > { %v984_v29 = vsel %vm948_vm14, %v930_v24, %v966_v28 }
 0x183   : > { %1004 = vst.msk [vmem:[%s1799_s7 + $0x38] sm:$0x1] %vm997_vm8, %v984_v29 }
 0x185   : > { %v598_v50 = vpop.f32.mrb[8].mxu0 }
 0x186   : > { %v931_v51 = vadd.f32 %v1792_v0, %v598_v50  ;;  %v1232_v30 = vpop.f32.mrb[9].mxu0 }
 0x187   : > { %v601_v31 = vpop.f32.mrb[10].mxu0 }
 0x188   : > { %vm949_vm15 = vcmp.ge.f32.partialorder %v931_v51, 0.0  ;;  %v967_v34 = vmul.f32 0.2, %v931_v51  ;;  %v932_v35 = vadd.f32 %v1792_v0, %v601_v31  ;;  %v1233_v36 = vpop.f32.mrb[11].mxu0 }
 0x18a   : > { %v985_v37 = vsel %vm949_vm15, %v931_v51, %v967_v34  ;;  %vm950_vm0 = vcmp.ge.f32.partialorder %v932_v35, 0.0  ;;  %v968_v40 = vmul.f32 0.2, %v932_v35 }
 0x18b   : > { %1005 = vst.msk [vmem:[%s1799_s7 + $0x40] sm:$0xff] %vm995_vm6, %v985_v37  ;;  %v676_v41 = vpop.f32.mrb[8].mxu1 }
 0x18c   : > { %v986_v42 = vsel %vm950_vm0, %v932_v35, %v968_v40  ;;  %v933_v9 = vadd.f32 %v1792_v0, %v676_v41  ;;  %v1244_v10 = vpop.f32.mrb[9].mxu1 }
 0x18d   : > { %1006 = vst.msk [vmem:[%s1799_s7 + $0x48] sm:$0x1] %vm997_vm8, %v986_v42  ;;  %v679_v43 = vpop.f32.mrb[10].mxu1 }
 0x18e   : > { %vm951_vm1 = vcmp.ge.f32.partialorder %v933_v9, 0.0  ;;  %v969_v45 = vmul.f32 0.2, %v933_v9  ;;  %v934_v46 = vadd.f32 %v1792_v0, %v679_v43  ;;  %v1245_v44 = vpop.f32.mrb[11].mxu1 }
 0x190   : > { %v987_v47 = vsel %vm951_vm1, %v933_v9, %v969_v45  ;;  %vm952_vm2 = vcmp.ge.f32.partialorder %v934_v46, 0.0  ;;  %v970_v27 = vmul.f32 0.2, %v934_v46 }
 0x191   : > { %1007 = vst.msk [vmem:[%s1799_s7 + $0x50] sm:$0xff] %vm995_vm6, %v987_v47 }
 0x192   : > { %v988_v26 = vsel %vm952_vm2, %v934_v46, %v970_v27 }
 0x193   : > { %1008 = vst.msk [vmem:[%s1799_s7 + $0x58] sm:$0x1] %vm997_vm8, %v988_v26 }
 0x195   : > { %v754_v48 = vpop.f32.mrb[12].mxu0 }
 0x196   : > { %v935_v49 = vadd.f32 %v1792_v0, %v754_v48  ;;  %v1256_v52 = vpop.f32.mrb[13].mxu0 }
 0x197   : > { %v757_v53 = vpop.f32.mrb[14].mxu0 }
 0x198   : > { %vm953_vm3 = vcmp.ge.f32.partialorder %v935_v49, 0.0  ;;  %v971_v2 = vmul.f32 0.2, %v935_v49  ;;  %v936_v54 = vadd.f32 %v1792_v0, %v757_v53  ;;  %v1257_v55 = vpop.f32.mrb[15].mxu0 }
 0x19a   : > { %v989_v1 = vsel %vm953_vm3, %v935_v49, %v971_v2  ;;  %vm954_vm4 = vcmp.ge.f32.partialorder %v936_v54, 0.0  ;;  %v972_v3 = vmul.f32 0.2, %v936_v54 }
 0x19b   : > { %1009 = vst.msk [vmem:[%s1799_s7 + $0x60] sm:$0xff] %vm995_vm6, %v989_v1  ;;  %v832_v12 = vpop.f32.mrb[12].mxu1 }
 0x19c   : > { %v990_v56 = vsel %vm954_vm4, %v936_v54, %v972_v3  ;;  %v937_v57 = vadd.f32 %v1792_v0, %v832_v12  ;;  %v1268_v58 = vpop.f32.mrb[13].mxu1 }
 0x19d   : > { %1010 = vst.msk [vmem:[%s1799_s7 + $0x68] sm:$0x1] %vm997_vm8, %v990_v56  ;;  %v835_v59 = vpop.f32.mrb[14].mxu1 }
 0x19e   : > { %vm955_vm5 = vcmp.ge.f32.partialorder %v937_v57, 0.0  ;;  %v973_v60 = vmul.f32 0.2, %v937_v57  ;;  %v938_v33 = vadd.f32 %v1792_v0, %v835_v59  ;;  %v1269_v32 = vpop.f32.mrb[15].mxu1 }
 0x1a0   : > { %v991_v61 = vsel %vm955_vm5, %v937_v57, %v973_v60  ;;  %vm956_vm7 = vcmp.ge.f32.partialorder %v938_v33, 0.0  ;;  %v974_v62 = vmul.f32 0.2, %v938_v33 }
 0x1a1   : > { %1011 = vst.msk [vmem:[%s1799_s7 + $0x70] sm:$0xff] %vm995_vm6, %v991_v61 }
 0x1a2   : > { %v992_v63 = vsel %vm956_vm7, %v938_v33, %v974_v62 }
 0x1a3   : > { %1012 = vst.msk [vmem:[%s1799_s7 + $0x78] sm:$0x1] %vm997_vm8, %v992_v63 }
 0x1a5   : > { %v910_v4 = vpop.f32.mrb[16].mxu0 }
 0x1a6   : > { %v939_v15 = vadd.f32 %v1792_v0, %v910_v4  ;;  %v1280_v14 = vpop.f32.mrb[17].mxu0 }
 0x1a7   : > { %v913_v5 = vpop.f32.mrb[18].mxu0 }
 0x1a8   : > { %vm957_vm9 = vcmp.ge.f32.partialorder %v939_v15, 0.0  ;;  %v975_v6 = vmul.f32 0.2, %v939_v15  ;;  %v940_v7 = vadd.f32 %v1792_v0, %v913_v5  ;;  %v1281_v8 = vpop.f32.mrb[19].mxu0 }
 0x1aa   : > { %v993_v11 = vsel %vm957_vm9, %v939_v15, %v975_v6  ;;  %vm958_vm10 = vcmp.ge.f32.partialorder %v940_v7, 0.0  ;;  %v976_v13 = vmul.f32 0.2, %v940_v7 }
 0x1ab   : > { %1013 = vst.msk [vmem:[%s1799_s7 + $0x80] sm:$0xff] %vm995_vm6, %v993_v11 }
 0x1ac   : > { %v994_v16 = vsel %vm958_vm10, %v940_v7, %v976_v13 }
 0x1ad   : > { %1014 = vst.msk [vmem:[%s1799_s7 + $0x88] sm:$0x1] %vm997_vm8, %v994_v16 }
 0x1ae PF: > { %s13_s12 = sadd.s32 1, %s1442_s12  }
 0x1af   : > { %p10_p4 = scmp.ge.s32.totalorder %s13_s12, 4  }
 0x1b1   :  { %12 = sbr.rel (!%p10_p4) target bundleno = 1 (0x1), region = 71 }

// kernel: mesh_rgb_discriminator_forward.9
= control target key start
LH: loop header
LB: loop body
LE: loop exit
PB: predicated region body
PF: predicated region fallthrough
CT: control target
= control target key end

     0   :  { %s924_s12 = smov 0   ;;  %s1154_s0 = inlined_call_operand.vmem [shape: f32[2,7,7,32], index: 0, kind: input, shape index: {}]   ;;  %s1155_s1 = inlined_call_operand.vmem [shape: bf16[128,16], index: 1, kind: input, shape index: {}]   ;;  %s1156_s2 = inlined_call_operand.vmem [shape: f32[1,16], index: 2, kind: input, shape index: {}]   ;;  %s1157_s3 = inlined_call_operand.vmem [shape: f32[2,5,5,16], index: 3, kind: output, shape index: {}]  }
   0x1 LB: > { %s673_s13 = sadd.s32 4294967295, %s897_s12   ;;  %p677_p0 = scmp.ge.s32.totalorder %s897_s12, 1  ;;  %s897_s12 = sphi %s924_s12, %s13_s12  }
   0x2   : > { %p137_p1 = scmp.lt.s32.totalorder %s897_s12, 3 }
   0x4   : > { %p138_p2 = pnand %p677_p0, %p137_p1 }
   0x5   : > { %p161_p3 = scmp.lt.s32.totalorder (!%p138_p2), %s673_s13, 1  ;;  %v935_v0 = vld [vmem:[%s1155_s1] sm:$0xff] (!%p138_p2)   ;;  %v899_v1 = vmov (!%p138_p2), 0.0   ;;  %v945_v2 = vld [vmem:[%s1155_s1 + $0x8] sm:$0xff] (!%p138_p2)   ;;  %v960_v3 = vld [vmem:[%s1155_s1 + $0x10] sm:$0xff] (!%p138_p2)   ;;  %s900_s24 = smov (!%p138_p2), 32  }
   0x6   : > { %141 = sbr.rel (%p138_p2) target bundleno = 464 (0x1d0), region = 32  ;;  %746 = vmatprep.subr.bf16.mxu0 (!%p138_p2), %v899_v1  ;;  %766 = vmatprep.subr.bf16.mxu1 (!%p138_p2), %v899_v1  ;;  %s901_s25 = smov (!%p138_p2), 96   ;;  %vm902_vm0 = vmmov (!%p138_p2), 0   ;;  %v987_v11 = vld [vmem:[%s1155_s1 + $0x18] sm:$0xff] (!%p138_p2)   ;;  %v1002_v15 = vld [vmem:[%s1155_s1 + $0x20] sm:$0xff] (!%p138_p2)   ;;  %v1014_v19 = vld [vmem:[%s1155_s1 + $0x28] sm:$0xff] (!%p138_p2)  }
   0x7   : > { %747 = vmatpush3.bf16.msra.mxu0 (!%p138_p2), %v935_v0  ;;  %767 = vmatpush3.bf16.msra.mxu1 (!%p138_p2), %v935_v0  ;;  %s903_s28 = smov (!%p138_p2), 64   ;;  %v1025_v21 = vld [vmem:[%s1155_s1 + $0x30] sm:$0xff] (!%p138_p2)   ;;  %v1036_v23 = vld [vmem:[%s1155_s1 + $0x38] sm:$0xff] (!%p138_p2)   ;;  %vm206_vm1 = vcmask (!%p138_p2), 261120   ;;  %vm208_vm2 = vcmask (!%p138_p2), 523264   ;;  %vm210_vm3 = vcmask (!%p138_p2), 785408  }
   0x8   : > { %748 = vmatprep.subr.bf16.mxu0 (!%p138_p2), %v899_v1  ;;  %768 = vmatprep.subr.bf16.mxu1 (!%p138_p2), %v899_v1  ;;  %vm544_vm4 = vcmask (!%p138_p2), 126976  }
   0x9   : > { %762 = vmatprep.mubr.msk.bf16.mxu0 (!%p138_p2), %vm902_vm0, %v899_v1  ;;  %782 = vmatprep.mubr.msk.bf16.mxu1 (!%p138_p2), %vm902_vm0, %v899_v1 }
   0xb   : > { %749 = vmatpush3.bf16.msra.mxu0 (!%p138_p2), %v945_v2  ;;  %769 = vmatpush3.bf16.msra.mxu1 (!%p138_p2), %v945_v2 }
   0xc   : > { %750 = vmatprep.subr.bf16.mxu0 (!%p138_p2), %v899_v1  ;;  %770 = vmatprep.subr.bf16.mxu1 (!%p138_p2), %v899_v1 }
   0xd   : > { %s1159_s13 = smov (!%p161_p3, %s673_s13), 1 }
   0xe   : > { %s846_s18 = smul.u32 56, %s1159_s13 }
   0xf   : > { %751 = vmatpush3.bf16.msra.mxu0 %v960_v3  ;;  %771 = vmatpush3.bf16.msra.mxu1 %v960_v3  ;;  %s847_s14 = smul.u32 40, %s1159_s13 }
  0x10   : > { %s954_s21 = scalar_lea.vmem %s1154_s0, %s846_s18  ;;  %752 = vmatprep.subr.bf16.mxu0 %v899_v1  ;;  %772 = vmatprep.subr.bf16.mxu1 %v899_v1 }
  0x11   : > { %v190_v4 = vld [vmem:[%s954_s21 + $0x1] sm:$0x1f]  ;;  %v681_v5 = vld [vmem:[%s954_s21 + $0x9] sm:$0x1f]  ;;  %v691_v6 = vld [vmem:[%s954_s21 + $0x11] sm:$0x1f]  ;;  %s170_s17 = scalar_lea.vmem %s1157_s3, %s847_s14 }
  0x12   : > { %195 = vrot.lane.b32.xlu0 %v190_v4, %s900_s24  ;;  %v861_v7 = vpack.i.bf16 %v691_v6, %v681_v5  ;;  %203 = vrot.lane.b32.xlu1 %v681_v5, %s901_s25  ;;  %v971_v8 = vld [vmem:[%s954_s21 + $0x8] sm:$0x1f]  ;;  %v974_v9 = vld [vmem:[%s954_s21 + $0x10] sm:$0x1f] }
  0x13   : > { %v977_v10 = vld [vmem:[%s954_s21 + $0x18] sm:$0x1f]  ;;  %v695_v14 = vld [vmem:[%s954_s21 + $0x21] sm:$0x1f]  ;;  %753 = vmatpush3.bf16.msra.mxu0 %v987_v11  ;;  %773 = vmatpush3.bf16.msra.mxu1 %v987_v11  ;;  %v696_v18 = vld [vmem:[%s954_s21 + $0x28] sm:$0x1f] }
  0x14   : > { %v866_v12 = vpack.i.bf16 %v977_v10, %v974_v9  ;;  %v693_v13 = vld [vmem:[%s954_s21 + $0x19] sm:$0x1f]  ;;  %754 = vmatprep.subr.bf16.mxu0 %v899_v1  ;;  %774 = vmatprep.subr.bf16.mxu1 %v899_v1  ;;  %v694_v17 = vld [vmem:[%s954_s21 + $0x20] sm:$0x1f]  ;;  %v697_v22 = vld [vmem:[%s954_s21 + $0x29] sm:$0x1f] }
  0x15   : > { %v871_v16 = vpack.i.bf16 %v695_v14, %v693_v13  ;;  %v876_v20 = vpack.i.bf16 %v696_v18, %v694_v17  ;;  %v189_v26 = vld [vmem:[%s954_s21] sm:$0x1f] }
  0x16   : > { %199 = vrot.lane.b32.xlu0 %v971_v8, %s903_s28  ;;  %862 = vrot.lane.b32.xlu1 %v861_v7, %s900_s24 }
  0x17   : > { %755 = vmatpush3.bf16.msra.mxu0 %v1002_v15  ;;  %775 = vmatpush3.bf16.msra.mxu1 %v1002_v15 }
  0x18   : > { %756 = vmatprep.subr.bf16.mxu0 %v899_v1  ;;  %776 = vmatprep.subr.bf16.mxu1 %v899_v1 }
  0x1a   : > { %867 = vrot.lane.b32.xlu0 %v866_v12, %s903_s28  ;;  %312 = vrot.lane.b32.xlu1 %v691_v6, %s901_s25 }
  0x1b   : > { %757 = vmatpush3.bf16.msra.mxu0 %v1014_v19  ;;  %777 = vmatpush3.bf16.msra.mxu1 %v1014_v19 }
  0x1c   : > { %758 = vmatprep.subr.bf16.mxu0 %v899_v1  ;;  %778 = vmatprep.subr.bf16.mxu1 %v899_v1 }
  0x1e   : > { %370 = vrot.lane.b32.xlu0 %v693_v13, %s901_s25  ;;  %872 = vrot.lane.b32.xlu1 %v871_v16, %s900_s24 }
  0x1f   : > { %759 = vmatpush3.bf16.msra.mxu0 %v1025_v21  ;;  %779 = vmatpush3.bf16.msra.mxu1 %v1025_v21 }
  0x20   : > { %760 = vmatprep.subr.bf16.mxu0 %v899_v1  ;;  %780 = vmatprep.subr.bf16.mxu1 %v899_v1 }
  0x22   : > { %877 = vrot.lane.b32.xlu0 %v876_v20, %s903_s28  ;;  %428 = vrot.lane.b32.xlu1 %v695_v14, %s901_s25 }
  0x23   : > { %761 = vmatpush3.bf16.msra.mxu0 %v1036_v23  ;;  %781 = vmatpush3.bf16.msra.mxu1 %v1036_v23 }
  0x24   : > { %786 = vmatprep.subr.bf16.mxu0 %v899_v1  ;;  %806 = vmatprep.subr.bf16.mxu1 %v899_v1 }
  0x26   : > { %486 = vrot.lane.b32.xlu0 %v697_v22, %s901_s25 }
  0x84   : > { %v196_v24 = vpop.permute.xlu0 %195  ;;  %v204_v25 = vpop.permute.xlu1 %203 }
  0x85   : > { %v207_v27 = vsel %vm206_vm1, %v189_v26, %v196_v24 }
  0x88   : > { %v200_v28 = vpop.permute.xlu0 %199  ;;  %v863_v29 = vpop.permute.xlu1 %862 }
  0x89   : > { %v209_v30 = vsel %vm208_vm2, %v207_v27, %v200_v28  ;;  %v864_v31 = vunpack.i.l.bf16 %v863_v29  ;;  %v865_v50 = vunpack.i.h.bf16 %v863_v29 }
  0x8a   : > { %v211_v32 = vsel %vm210_vm3, %v209_v30, %v204_v25 }
  0x8b   : > { %v212_v33 = vpack.c.bf16 %v211_v32, %v211_v32  ;;  %v315_v36 = vsel %vm206_vm1, %v971_v8, %v864_v31  ;;  %v373_v52 = vsel %vm206_vm1, %v974_v9, %v865_v50 }
  0x8c   : > { %v868_v34 = vpop.permute.xlu0 %867  ;;  %v313_v35 = vpop.permute.xlu1 %312 }
  0x8d   : > { %v869_v37 = vunpack.i.l.bf16 %v868_v34  ;;  %763 = vmatmul.mubr.bf16.vlgmr.msra.gmra.mrb[0].mxu0 %v212_v33  ;;  %v870_v51 = vunpack.i.h.bf16 %v868_v34 }
  0x8e   : > { %787 = vmatpush3.bf16.msra.mxu0 %v935_v0  ;;  %802 = vmatprep.mubr.msk.bf16.mxu0 %vm902_vm0, %v899_v1 }
  0x8f   : > { %v316_v38 = vsel %vm208_vm2, %v315_v36, %v869_v37  ;;  %788 = vmatprep.subr.bf16.mxu0 %v899_v1  ;;  %v374_v54 = vsel %vm208_vm2, %v373_v52, %v870_v51 }
  0x90   : > { %v317_v39 = vsel %vm210_vm3, %v316_v38, %v313_v35  ;;  %v371_v40 = vpop.permute.xlu0 %370  ;;  %v873_v41 = vpop.permute.xlu1 %872 }
  0x91   : > { %v318_v42 = vpack.c.bf16 %v317_v39, %v317_v39  ;;  %v875_v43 = vunpack.i.h.bf16 %v873_v41  ;;  %v874_v53 = vunpack.i.l.bf16 %v873_v41  ;;  %v375_v56 = vsel %vm210_vm3, %v374_v54, %v371_v40 }
  0x92   : > { %789 = vmatpush3.bf16.msra.mxu0 %v945_v2  ;;  %v376_v58 = vpack.c.bf16 %v375_v56, %v375_v56 }
  0x93   : > { %783 = vmatmul.mubr.bf16.vlgmr.msra.gmra.mrb[0].mxu1 %v318_v42  ;;  %790 = vmatprep.subr.bf16.mxu0 %v899_v1  ;;  %v489_v45 = vsel %vm206_vm1, %v694_v17, %v875_v43  ;;  %v431_v57 = vsel %vm206_vm1, %v977_v10, %v874_v53 }
  0x94   : > { %807 = vmatpush3.bf16.msra.mxu1 %v935_v0  ;;  %v878_v44 = vpop.permute.xlu0 %877  ;;  %822 = vmatprep.mubr.msk.bf16.mxu1 %vm902_vm0, %v899_v1  ;;  %v429_v59 = vpop.permute.xlu1 %428 }
  0x95   : > { %808 = vmatprep.subr.bf16.mxu1 %v899_v1  ;;  %v880_v46 = vunpack.i.h.bf16 %v878_v44  ;;  %v879_v55 = vunpack.i.l.bf16 %v878_v44 }
  0x96   : > { %791 = vmatpush3.bf16.msra.mxu0 %v960_v3 }
  0x97   : > { %792 = vmatprep.subr.bf16.mxu0 %v899_v1  ;;  %v490_v47 = vsel %vm208_vm2, %v489_v45, %v880_v46  ;;  %v432_v60 = vsel %vm208_vm2, %v431_v57, %v879_v55 }
  0x98   : > { %809 = vmatpush3.bf16.msra.mxu1 %v945_v2  ;;  %v487_v48 = vpop.permute.xlu0 %486  ;;  %v433_v61 = vsel %vm210_vm3, %v432_v60, %v429_v59 }
  0x99   : > { %810 = vmatprep.subr.bf16.mxu1 %v899_v1  ;;  %v491_v49 = vsel %vm210_vm3, %v490_v47, %v487_v48  ;;  %v434_v62 = vpack.c.bf16 %v433_v61, %v433_v61 }
  0x9a   : > { %793 = vmatpush3.bf16.msra.mxu0 %v987_v11  ;;  %v492_v63 = vpack.c.bf16 %v491_v49, %v491_v49 }
  0x9b   : > { %794 = vmatprep.subr.bf16.mxu0 %v899_v1 }
  0x9c   : > { %811 = vmatpush3.bf16.msra.mxu1 %v960_v3 }
  0x9d   : > { %812 = vmatprep.subr.bf16.mxu1 %v899_v1 }
  0x9e   : > { %795 = vmatpush3.bf16.msra.mxu0 %v1002_v15 }
  0x9f   : > { %796 = vmatprep.subr.bf16.mxu0 %v899_v1 }
  0xa0   : > { %813 = vmatpush3.bf16.msra.mxu1 %v987_v11 }
  0xa1   : > { %814 = vmatprep.subr.bf16.mxu1 %v899_v1 }
  0xa2   : > { %797 = vmatpush3.bf16.msra.mxu0 %v1014_v19 }
  0xa3   : > { %798 = vmatprep.subr.bf16.mxu0 %v899_v1 }
  0xa4   : > { %815 = vmatpush3.bf16.msra.mxu1 %v1002_v15 }
  0xa5   : > { %816 = vmatprep.subr.bf16.mxu1 %v899_v1 }
  0xa6   : > { %799 = vmatpush3.bf16.msra.mxu0 %v1025_v21 }
  0xa7   : > { %800 = vmatprep.subr.bf16.mxu0 %v899_v1 }
  0xa8   : > { %817 = vmatpush3.bf16.msra.mxu1 %v1014_v19 }
  0xa9   : > { %818 = vmatprep.subr.bf16.mxu1 %v899_v1 }
  0xaa   : > { %801 = vmatpush3.bf16.msra.mxu0 %v1036_v23 }
  0xab   : > { %826 = vmatprep.subr.bf16.mxu0 %v899_v1 }
  0xac   : > { %819 = vmatpush3.bf16.msra.mxu1 %v1025_v21 }
  0xad   : > { %803 = vmatmul.mubr.bf16.vlgmr.msra.gmra.mrb[4].mxu0 %v376_v58  ;;  %820 = vmatprep.subr.bf16.mxu1 %v899_v1 }
  0xae   : > { %827 = vmatpush3.bf16.msra.mxu0 %v935_v0  ;;  %842 = vmatprep.mubr.msk.bf16.mxu0 %vm902_vm0, %v899_v1  ;;  %v698_v0 = vld [vmem:[%s1156_s2] ss:$0 sm:$0xff] }
  0xaf   : > { %828 = vmatprep.subr.bf16.mxu0 %v899_v1 }
  0xb0   : > { %821 = vmatpush3.bf16.msra.mxu1 %v1036_v23 }
  0xb2   : > { %829 = vmatpush3.bf16.msra.mxu0 %v945_v2 }
  0xb3   : > { %823 = vmatmul.mubr.bf16.vlgmr.msra.gmra.mrb[4].mxu1 %v434_v62  ;;  %830 = vmatprep.subr.bf16.mxu0 %v899_v1 }
  0xb6   : > { %831 = vmatpush3.bf16.msra.mxu0 %v960_v3 }
  0xb7   : > { %832 = vmatprep.subr.bf16.mxu0 %v899_v1 }
  0xba   : > { %833 = vmatpush3.bf16.msra.mxu0 %v987_v11 }
  0xbb   : > { %834 = vmatprep.subr.bf16.mxu0 %v899_v1 }
  0xbe   : > { %835 = vmatpush3.bf16.msra.mxu0 %v1002_v15 }
  0xbf   : > { %836 = vmatprep.subr.bf16.mxu0 %v899_v1 }
  0xc2   : > { %837 = vmatpush3.bf16.msra.mxu0 %v1014_v19 }
  0xc3   : > { %838 = vmatprep.subr.bf16.mxu0 %v899_v1 }
  0xc6   : > { %839 = vmatpush3.bf16.msra.mxu0 %v1025_v21 }
  0xc7   : > { %840 = vmatprep.subr.bf16.mxu0 %v899_v1 }
  0xca   : > { %841 = vmatpush3.bf16.msra.mxu0 %v1036_v23 }
  0xcd   : > { %843 = vmatmul.mubr.bf16.vlgmr.msra.gmra.mrb[8].mxu0 %v492_v63 }
 0x160   : > { %v295_v2 = vpop.f32.mrb[0].mxu0 }
 0x161   : > { %v764_v3 = vpop.f32.mrb[1].mxu0  ;;  %v1120_v5 = vadd.f32 %v698_v0, %v295_v2 }
 0x162   : > { %v298_v4 = vpop.f32.mrb[2].mxu0 }
 0x163   : > { %v765_v6 = vpop.f32.mrb[3].mxu0  ;;  %v562_v8 = vmul.f32 %v1120_v5, %v1120_v5  ;;  %v545_v11 = vsel %vm544_vm4, %v1120_v5, 0.0 }
 0x165   : > { %v567_v16 = vsel %vm544_vm4, %v562_v8, 0.0 }
 0x166   : > { %v353_v7 = vpop.f32.mrb[0].mxu1 }
 0x167   : > { %v1124_v1 = vadd.f32 %v698_v0, %v353_v7  ;;  %v784_v9 = vpop.f32.mrb[1].mxu1 }
 0x168   : > { %v356_v10 = vpop.f32.mrb[2].mxu1 }
 0x169   : > { %v546_v12 = vsel %vm544_vm4, %v1124_v1, 0.0  ;;  %v563_v13 = vmul.f32 %v1124_v1, %v1124_v1  ;;  %v785_v14 = vpop.f32.mrb[3].mxu1 }
 0x16a   : > { %v547_v15 = vadd.f32 %v546_v12, %v545_v11 }
 0x16b   : > { %v568_v17 = vsel %vm544_vm4, %v563_v13, 0.0 }
 0x16c   : > { %v569_v18 = vadd.f32 %v568_v17, %v567_v16 }
 0x180   : > { %v411_v19 = vpop.f32.mrb[4].mxu0 }
 0x181   : > { %v541_v20 = vadd.f32 %v698_v0, %v411_v19  ;;  %v804_v21 = vpop.f32.mrb[5].mxu0 }
 0x182   : > { %v414_v22 = vpop.f32.mrb[6].mxu0 }
 0x183   : > { %v548_v23 = vsel %vm544_vm4, %v541_v20, 0.0  ;;  %v564_v24 = vmul.f32 %v541_v20, %v541_v20  ;;  %v805_v25 = vpop.f32.mrb[7].mxu0 }
 0x184   : > { %v549_v26 = vadd.f32 %v548_v23, %v547_v15 }
 0x185   : > { %v570_v27 = vsel %vm544_vm4, %v564_v24, 0.0 }
 0x186   : > { %v571_v28 = vadd.f32 %v570_v27, %v569_v18  ;;  %v469_v29 = vpop.f32.mrb[4].mxu1 }
 0x187   : > { %v542_v30 = vadd.f32 %v698_v0, %v469_v29  ;;  %v824_v31 = vpop.f32.mrb[5].mxu1 }
 0x188   : > { %v472_v32 = vpop.f32.mrb[6].mxu1 }
 0x189   : > { %v550_v33 = vsel %vm544_vm4, %v542_v30, 0.0  ;;  %v565_v34 = vmul.f32 %v542_v30, %v542_v30  ;;  %v825_v35 = vpop.f32.mrb[7].mxu1 }
 0x18a   : > { %v551_v36 = vadd.f32 %v550_v33, %v549_v26 }
 0x18b   : > { %v572_v37 = vsel %vm544_vm4, %v565_v34, 0.0 }
 0x18c   : > { %v573_v38 = vadd.f32 %v572_v37, %v571_v28 }
 0x1a0   : > { %v527_v39 = vpop.f32.mrb[8].mxu0 }
 0x1a1   : > { %v543_v40 = vadd.f32 %v698_v0, %v527_v39  ;;  %v844_v41 = vpop.f32.mrb[9].mxu0 }
 0x1a2   : > { %v530_v42 = vpop.f32.mrb[10].mxu0 }
 0x1a3   : > { %v552_v43 = vsel %vm544_vm4, %v543_v40, 0.0  ;;  %v566_v44 = vmul.f32 %v543_v40, %v543_v40  ;;  %v845_v45 = vpop.f32.mrb[11].mxu0 }
 0x1a4   : > { %v553_v46 = vadd.f32 %v552_v43, %v551_v36 }
 0x1a5   : > { %v574_v47 = vsel %vm544_vm4, %v566_v44, 0.0 }
 0x1a6   : > { %v554_v48 = vrot.slane %v553_v46, 4  ;;  %v575_v49 = vadd.f32 %v574_v47, %v573_v38 }
 0x1a8   : > { %v555_v50 = vadd.f32 %v554_v48, %v553_v46  ;;  %v576_v51 = vrot.slane %v575_v49, 4 }
 0x1aa   : > { %v556_v52 = vrot.slane %v555_v50, 2  ;;  %v577_v53 = vadd.f32 %v576_v51, %v575_v49 }
 0x1ac   : > { %v557_v54 = vadd.f32 %v556_v52, %v555_v50  ;;  %v578_v55 = vrot.slane %v577_v53, 2 }
 0x1ae   : > { %v558_v56 = vrot.slane %v557_v54, 1  ;;  %v579_v57 = vadd.f32 %v578_v55, %v577_v53 }
 0x1b0   : > { %v559_v58 = vadd.f32 %v558_v56, %v557_v54  ;;  %v580_v59 = vrot.slane %v579_v57, 1 }
 0x1b2   : > { %v561_v60 = vmul.f32 0.04, %v559_v58  ;;  %v581_v61 = vadd.f32 %v580_v59, %v579_v57 }
 0x1b4   : > { %v582_v62 = vmul.f32 0.04, %v581_v61  ;;  %v583_v63 = vmul.f32 %v561_v60, %v561_v60  ;;  %v585_v0 = vsub.f32 %v1120_v5, %v561_v60  ;;  %v586_v2 = vsub.f32 %v1124_v1, %v561_v60 }
 0x1b5   : > { %v587_v3 = vsub.f32 %v541_v20, %v561_v60  ;;  %v588_v4 = vsub.f32 %v542_v30, %v561_v60  ;;  %v589_v6 = vsub.f32 %v543_v40, %v561_v60 }
 0x1b6   : > { %v584_v7 = vsub.f32 %v582_v62, %v583_v63 }
 0x1b8   : > { %v590_v8 = vmax.f32 %v584_v7, 0.0 }
 0x1ba   : > { %v591_v9 = vadd.f32 1e-05, %v590_v8 }
 0x1bc   : > { %889 = vrsqrt.f32 %v591_v9 }
 0x1c6   : > { %v890_v10 = vpop.eup %889 }
 0x1c7   : > { %v593_v11 = vmul.f32 %v890_v10, %v585_v0  ;;  %v594_v12 = vmul.f32 %v890_v10, %v586_v2  ;;  %v595_v13 = vmul.f32 %v890_v10, %v587_v3  ;;  %v596_v14 = vmul.f32 %v890_v10, %v588_v4 }
 0x1c8   : > { %v597_v15 = vmul.f32 %v890_v10, %v589_v6 }
 0x1c9   : > { %vm598_vm5 = vcmp.ge.f32.partialorder %v593_v11, 0.0  ;;  %vm599_vm6 = vcmp.ge.f32.partialorder %v594_v12, 0.0  ;;  %vm600_vm7 = vcmp.ge.f32.partialorder %v595_v13, 0.0  ;;  %vm601_vm8 = vcmp.ge.f32.partialorder %v596_v14, 0.0 }
 0x1ca   : > { %vm602_vm9 = vcmp.ge.f32.partialorder %v597_v15, 0.0  ;;  %v603_v5 = vmul.f32 0.2, %v593_v11  ;;  %v604_v1 = vmul.f32 0.2, %v594_v12 }
 0x1cb   : > { %v605_v16 = vmul.f32 0.2, %v595_v13  ;;  %v606_v17 = vmul.f32 0.2, %v596_v14  ;;  %v607_v18 = vmul.f32 0.2, %v597_v15 }
 0x1cc   : > { %v608_v19 = vsel %vm598_vm5, %v593_v11, %v603_v5  ;;  %v609_v20 = vsel %vm599_vm6, %v594_v12, %v604_v1 }
 0x1cd   : > { %v610_v21 = vsel %vm600_vm7, %v595_v13, %v605_v16  ;;  %v611_v22 = vsel %vm601_vm8, %v596_v14, %v606_v17  ;;  %v612_v23 = vsel %vm602_vm9, %v597_v15, %v607_v18  ;;  %613 = vst.msk [vmem:[%s170_s17] sm:$0x1f] %vm544_vm4, %v608_v19  ;;  %614 = vst.msk [vmem:[%s170_s17 + $0x8] sm:$0x1f] %vm544_vm4, %v609_v20 }
 0x1ce   : > { %615 = vst.msk [vmem:[%s170_s17 + $0x10] sm:$0x1f] %vm544_vm4, %v610_v21  ;;  %616 = vst.msk [vmem:[%s170_s17 + $0x18] sm:$0x1f] %vm544_vm4, %v611_v22 }
 0x1cf   : > { %617 = vst.msk [vmem:[%s170_s17 + $0x20] sm:$0x1f] %vm544_vm4, %v612_v23 }
 0x1d0 PF: > { %s13_s12 = sadd.s32 1, %s897_s12  }
 0x1d1   : > { %p10_p4 = scmp.ge.s32.totalorder %s13_s12, 4  }
 0x1d3   :  { %12 = sbr.rel (!%p10_p4) target bundleno = 1 (0x1), region = 67 }

// kernel: mesh_rgb_discriminator_forward.10
= control target key start
LH: loop header
LB: loop body
LE: loop exit
PB: predicated region body
PF: predicated region fallthrough
CT: control target
= control target key end

     0   :  { %s1401_s12 = smov 0   ;;  %s1817_s0 = inlined_call_operand.vmem [shape: f32[2,9,9,16], index: 0, kind: input, shape index: {}]   ;;  %s1818_s1 = inlined_call_operand.vmem [shape: bf16[256,32], index: 1, kind: input, shape index: {}]   ;;  %s1819_s2 = inlined_call_operand.vmem [shape: f32[1,32], index: 2, kind: input, shape index: {}]   ;;  %s1820_s3 = inlined_call_operand.vmem [shape: f32[2,6,6,32], index: 3, kind: output, shape index: {}]  }
   0x1 LB: > { %s1011_s13 = sadd.s32 4294967295, %s1372_s12   ;;  %p1015_p0 = scmp.ge.s32.totalorder %s1372_s12, 1  ;;  %s1372_s12 = sphi %s1401_s12, %s13_s12  }
   0x2   : > { %p137_p1 = scmp.lt.s32.totalorder %s1372_s12, 3 }
   0x4   : > { %p138_p2 = pnand %p1015_p0, %p137_p1 }
   0x5   : > { %p161_p3 = scmp.lt.s32.totalorder (!%p138_p2), %s1011_s13, 1  ;;  %v1412_v0 = vld [vmem:[%s1818_s1 + $0x40] sm:$0xff] (!%p138_p2)   ;;  %v1424_v2 = vld [vmem:[%s1818_s1 + $0x48] sm:$0xff] (!%p138_p2)   ;;  %v1440_v4 = vld [vmem:[%s1818_s1 + $0x50] sm:$0xff] (!%p138_p2)   ;;  %s1374_s30 = smov (!%p138_p2), 48   ;;  %vm280_vm0 = vcmask (!%p138_p2), 130048  }
   0x6   : > { %141 = sbr.rel (%p138_p2) target bundleno = 495 (0x1ef), region = 32  ;;  %v1417_v1 = vld [vmem:[%s1818_s1] sm:$0xff] (!%p138_p2)   ;;  %1069 = vmatprep.subr.bf16.mxu0 (!%p138_p2), %v1412_v0  ;;  %1091 = vmatprep.subr.bf16.mxu1 (!%p138_p2), %v1412_v0  ;;  %v1433_v3 = vld [vmem:[%s1818_s1 + $0x8] sm:$0xff] (!%p138_p2)   ;;  %v1461_v10 = vld [vmem:[%s1818_s1 + $0x10] sm:$0xff] (!%p138_p2)   ;;  %s1375_s4 = smov (!%p138_p2), 16   ;;  %vm282_vm1 = vcmask (!%p138_p2), 261120  }
   0x7   : > { %1070 = vmatpush3.bf16.msra.mxu0 (!%p138_p2), %v1417_v1  ;;  %1092 = vmatpush3.bf16.msra.mxu1 (!%p138_p2), %v1417_v1  ;;  %s1376_s5 = smov (!%p138_p2), 32   ;;  %s1377_s6 = smov (!%p138_p2), 64   ;;  %v1503_v29 = vld [vmem:[%s1818_s1 + $0x58] sm:$0xff] (!%p138_p2)   ;;  %v1515_v32 = vld [vmem:[%s1818_s1 + $0x60] sm:$0xff] (!%p138_p2)   ;;  %v1532_v35 = vld [vmem:[%s1818_s1 + $0x68] sm:$0xff] (!%p138_p2)   ;;  %vm284_vm2 = vcmask (!%p138_p2), 392192  }
   0x8   : > { %1071 = vmatprep.subr.bf16.mxu0 (!%p138_p2), %v1424_v2  ;;  %1093 = vmatprep.subr.bf16.mxu1 (!%p138_p2), %v1424_v2  ;;  %v1508_v30 = vld [vmem:[%s1818_s1 + $0x18] sm:$0xff] (!%p138_p2)   ;;  %v1525_v34 = vld [vmem:[%s1818_s1 + $0x20] sm:$0xff] (!%p138_p2)   ;;  %s1378_s17 = smov (!%p138_p2), 80   ;;  %v1543_v38 = vld [vmem:[%s1818_s1 + $0x28] sm:$0xff] (!%p138_p2)   ;;  %s1379_s22 = smov (!%p138_p2), 96   ;;  %vm286_vm3 = vcmask (!%p138_p2), 523264  }
   0x9   : > { %v1550_v39 = vld [vmem:[%s1818_s1 + $0x70] sm:$0xff] (!%p138_p2)   ;;  %s1380_s28 = smov (!%p138_p2), 112   ;;  %v1570_v45 = vld [vmem:[%s1818_s1 + $0x78] sm:$0xff] (!%p138_p2)   ;;  %vm288_vm4 = vcmask (!%p138_p2), 654336   ;;  %vm290_vm5 = vcmask (!%p138_p2), 785408   ;;  %vm292_vm6 = vcmask (!%p138_p2), 916480  }
   0xa   : > { %v1561_v42 = vld [vmem:[%s1818_s1 + $0x30] sm:$0xff] (!%p138_p2)   ;;  %v1580_v48 = vld [vmem:[%s1818_s1 + $0x38] sm:$0xff] (!%p138_p2)   ;;  %vm871_vm7 = vcmask (!%p138_p2), 259072  }
   0xb   : > { %1072 = vmatpush3.bf16.msra.mxu0 (!%p138_p2), %v1433_v3  ;;  %1094 = vmatpush3.bf16.msra.mxu1 (!%p138_p2), %v1433_v3 }
   0xc   : > { %1073 = vmatprep.subr.bf16.mxu0 (!%p138_p2), %v1440_v4  ;;  %1095 = vmatprep.subr.bf16.mxu1 (!%p138_p2), %v1440_v4 }
   0xd   : > { %s1822_s13 = smov (!%p161_p3, %s1011_s13), 1 }
   0xe   : > { %s1201_s20 = smul.u32 144, %s1822_s13 }
   0xf   : > { %1074 = vmatpush3.bf16.msra.mxu0 %v1461_v10  ;;  %1096 = vmatpush3.bf16.msra.mxu1 %v1461_v10 }
  0x10   : > { %s1446_s27 = scalar_lea.vmem %s1817_s0, %s1201_s20  ;;  %1075 = vmatprep.subr.bf16.mxu0 %v1503_v29  ;;  %1097 = vmatprep.subr.bf16.mxu1 %v1503_v29 }
  0x11   : > { %v1449_v5 = vld [vmem:[%s1446_s27 + $0x23] sm:$0x3f]  ;;  %v1019_v12 = vld [vmem:[%s1446_s27 + $0x11] sm:$0x3f] }
  0x12   : > { %v208_v6 = vld [vmem:[%s1446_s27 + $0x3] sm:$0x3f]  ;;  %v1027_v13 = vld [vmem:[%s1446_s27 + $0x31] sm:$0x3f] }
  0x13   : > { %v1228_v7 = vpack.i.bf16 %v208_v6, %v1449_v5  ;;  %v1454_v8 = vld [vmem:[%s1446_s27 + $0x21] sm:$0x3f]  ;;  %v1233_v15 = vpack.i.bf16 %v1019_v12, %v1027_v13  ;;  %v1020_v18 = vld [vmem:[%s1446_s27 + $0x12] sm:$0x3f]  ;;  %1076 = vmatpush3.bf16.msra.mxu0 %v1508_v30  ;;  %1098 = vmatpush3.bf16.msra.mxu1 %v1508_v30 }
  0x14   : > { %v206_v9 = vld [vmem:[%s1446_s27 + $0x1] sm:$0x3f]  ;;  %v1028_v19 = vld [vmem:[%s1446_s27 + $0x32] sm:$0x3f]  ;;  %1077 = vmatprep.subr.bf16.mxu0 %v1515_v32  ;;  %1099 = vmatprep.subr.bf16.mxu1 %v1515_v32 }
  0x15   : > { %v1218_v11 = vpack.i.bf16 %v206_v9, %v1454_v8  ;;  %v207_v14 = vld [vmem:[%s1446_s27 + $0x2] sm:$0x3f]  ;;  %1229 = vrot.lane.b32.xlu1 %v1228_v7, %s1374_s30  ;;  %v1479_v20 = vld [vmem:[%s1446_s27 + $0x10] sm:$0x3f]  ;;  %v1243_v22 = vpack.i.bf16 %v1020_v18, %v1028_v19 }
  0x16   : > { %v1472_v16 = vld [vmem:[%s1446_s27 + $0x22] sm:$0x3f]  ;;  %v1482_v21 = vld [vmem:[%s1446_s27 + $0x30] sm:$0x3f] }
  0x17   : > { %1219 = vrot.lane.b32.xlu0 %v1218_v11, %s1375_s4  ;;  %v1223_v17 = vpack.i.bf16 %v207_v14, %v1472_v16  ;;  %v1238_v23 = vpack.i.bf16 %v1479_v20, %v1482_v21  ;;  %v1021_v24 = vld [vmem:[%s1446_s27 + $0x13] sm:$0x3f]  ;;  %v1494_v27 = vld [vmem:[%s1446_s27 + $0x20] sm:$0x3f]  ;;  %1078 = vmatpush3.bf16.msra.mxu0 %v1525_v34 }
  0x18   : > { %v1029_v25 = vld [vmem:[%s1446_s27 + $0x33] sm:$0x3f]  ;;  %v1497_v28 = vld [vmem:[%s1446_s27 + $0x40] sm:$0x3f]  ;;  %1079 = vmatprep.subr.bf16.mxu0 %v1532_v35  ;;  %1100 = vmatpush3.bf16.msra.mxu1 %v1525_v34 }
  0x19   : > { %1234 = vrot.lane.b32.xlu1 %v1233_v15, %s1375_s4  ;;  %v1253_v26 = vpack.i.bf16 %v1021_v24, %v1029_v25  ;;  %v1047_v31 = vld [vmem:[%s1446_s27 + $0x41] sm:$0x3f]  ;;  %v1263_v33 = vpack.i.bf16 %v1494_v27, %v1497_v28  ;;  %1101 = vmatprep.subr.bf16.mxu1 %v1532_v35  ;;  %v1052_v44 = vld [vmem:[%s1446_s27 + $0x52] sm:$0x3f] }
  0x1a   : > { %v1049_v36 = vld [vmem:[%s1446_s27 + $0x43] sm:$0x3f]  ;;  %v1273_v37 = vpack.i.bf16 %v1454_v8, %v1047_v31  ;;  %v1051_v46 = vld [vmem:[%s1446_s27 + $0x51] sm:$0x3f] }
  0x1b   : > { %1224 = vrot.lane.b32.xlu0 %v1223_v17, %s1376_s5  ;;  %v1048_v40 = vld [vmem:[%s1446_s27 + $0x42] sm:$0x3f]  ;;  %v1283_v41 = vpack.i.bf16 %v1449_v5, %v1049_v36  ;;  %1080 = vmatpush3.bf16.msra.mxu0 %v1543_v38  ;;  %v1288_v49 = vpack.i.bf16 %v1051_v46, %v1047_v31  ;;  %v1584_v50 = vld [vmem:[%s1446_s27 + $0x50] sm:$0x3f] }
  0x1c   : > { %v1278_v43 = vpack.i.bf16 %v1472_v16, %v1048_v40  ;;  %1081 = vmatprep.subr.bf16.mxu0 %v1550_v39  ;;  %1102 = vmatpush3.bf16.msra.mxu1 %v1543_v38  ;;  %v1293_v47 = vpack.i.bf16 %v1052_v44, %v1048_v40  ;;  %v1587_v51 = vld [vmem:[%s1446_s27 + $0x60] sm:$0x3f]  ;;  %v1053_v52 = vld [vmem:[%s1446_s27 + $0x53] sm:$0x3f] }
  0x1d   : > { %1244 = vrot.lane.b32.xlu1 %v1243_v22, %s1376_s5  ;;  %1103 = vmatprep.subr.bf16.mxu1 %v1550_v39  ;;  %v1303_v53 = vpack.i.bf16 %v1587_v51, %v1584_v50  ;;  %v1298_v54 = vpack.i.bf16 %v1053_v52, %v1049_v36  ;;  %v1056_v55 = vld [vmem:[%s1446_s27 + $0x62] sm:$0x3f]  ;;  %v1060_v60 = vld [vmem:[%s1446_s27 + $0x72] sm:$0x3f] }
  0x1e   : > { %v1055_v56 = vld [vmem:[%s1446_s27 + $0x61] sm:$0x3f]  ;;  %v1313_v57 = vpack.i.bf16 %v1056_v55, %v1052_v44  ;;  %v1059_v61 = vld [vmem:[%s1446_s27 + $0x71] sm:$0x3f]  ;;  %v1323_v62 = vpack.i.bf16 %v1060_v60, %v1056_v55 }
  0x1f   : > { %1239 = vrot.lane.b32.xlu0 %v1238_v23, %s1377_s6  ;;  %1082 = vmatpush3.bf16.msra.mxu0 %v1561_v42  ;;  %v1308_v58 = vpack.i.bf16 %v1055_v56, %v1051_v46  ;;  %v1057_v59 = vld [vmem:[%s1446_s27 + $0x63] sm:$0x3f]  ;;  %v1318_v63 = vpack.i.bf16 %v1059_v61, %v1055_v56  ;;  %v1613_v5 = vld [vmem:[%s1446_s27 + $0x70] sm:$0x3f] }
  0x20   : > { %1083 = vmatprep.subr.bf16.mxu0 %v1570_v45  ;;  %1104 = vmatpush3.bf16.msra.mxu1 %v1561_v42  ;;  %v1062_v6 = vld [vmem:[%s1446_s27 + $0x80] sm:$0x3f]  ;;  %v1061_v7 = vld [vmem:[%s1446_s27 + $0x73] sm:$0x3f] }
  0x21   : > { %1254 = vrot.lane.b32.xlu1 %v1253_v26, %s1374_s30  ;;  %1105 = vmatprep.subr.bf16.mxu1 %v1570_v45  ;;  %v1333_v8 = vpack.i.bf16 %v1062_v6, %v1613_v5  ;;  %v1328_v9 = vpack.i.bf16 %v1061_v7, %v1057_v59  ;;  %v1064_v11 = vld [vmem:[%s1446_s27 + $0x82] sm:$0x3f] }
  0x22   : > { %v1063_v12 = vld [vmem:[%s1446_s27 + $0x81] sm:$0x3f]  ;;  %v1343_v13 = vpack.i.bf16 %v1064_v11, %v1060_v60 }
  0x23   : > { %1249 = vrot.lane.b32.xlu0 %v1233_v15, %s1378_s17  ;;  %1084 = vmatpush3.bf16.msra.mxu0 %v1580_v48  ;;  %v1338_v14 = vpack.i.bf16 %v1063_v12, %v1059_v61  ;;  %v1065_v15 = vld [vmem:[%s1446_s27 + $0x83] sm:$0x3f] }
  0x24   : > { %1113 = vmatprep.subr.bf16.mxu0 %v1412_v0  ;;  %1106 = vmatpush3.bf16.msra.mxu1 %v1580_v48 }
  0x25   : > { %1264 = vrot.lane.b32.xlu1 %v1263_v33, %s1377_s6  ;;  %1135 = vmatprep.subr.bf16.mxu1 %v1412_v0 }
  0x27   : > { %1259 = vrot.lane.b32.xlu0 %v1243_v22, %s1379_s22 }
  0x29   : > { %1274 = vrot.lane.b32.xlu1 %v1273_v37, %s1378_s17 }
  0x2b   : > { %1269 = vrot.lane.b32.xlu0 %v1253_v26, %s1380_s28  ;;  %v205_v26 = vld [vmem:[%s1446_s27] sm:$0x3f] }
  0x2d   : > { %1284 = vrot.lane.b32.xlu1 %v1283_v41, %s1380_s28 }
  0x2f   : > { %1279 = vrot.lane.b32.xlu0 %v1278_v43, %s1379_s22 }
  0x31   : > { %1294 = vrot.lane.b32.xlu1 %v1293_v47, %s1376_s5 }
  0x33   : > { %1289 = vrot.lane.b32.xlu0 %v1288_v49, %s1375_s4 }
  0x35   : > { %1304 = vrot.lane.b32.xlu1 %v1303_v53, %s1377_s6 }
  0x37   : > { %1299 = vrot.lane.b32.xlu0 %v1298_v54, %s1374_s30 }
  0x39   : > { %1314 = vrot.lane.b32.xlu1 %v1313_v57, %s1379_s22 }
  0x3b   : > { %1309 = vrot.lane.b32.xlu0 %v1308_v58, %s1378_s17 }
  0x3d   : > { %652 = vrot.lane.b32.xlu1 %v1057_v59, %s1380_s28 }
  0x3f   : > { %574 = vrot.lane.b32.xlu0 %v1053_v52, %s1380_s28 }
  0x41   : > { %1324 = vrot.lane.b32.xlu1 %v1323_v62, %s1376_s5 }
  0x43   : > { %1319 = vrot.lane.b32.xlu0 %v1318_v63, %s1375_s4  ;;  %s1202_s4 = smul.u32 48, %s1822_s13 }
  0x45   : > { %1334 = vrot.lane.b32.xlu1 %v1333_v8, %s1377_s6  ;;  %s170_s10 = scalar_lea.vmem %s1820_s3, %s1202_s4 }
  0x47   : > { %1329 = vrot.lane.b32.xlu0 %v1328_v9, %s1374_s30 }
  0x49   : > { %1344 = vrot.lane.b32.xlu1 %v1343_v13, %s1379_s22 }
  0x4b   : > { %1339 = vrot.lane.b32.xlu0 %v1338_v14, %s1378_s17 }
  0x4d   : > { %808 = vrot.lane.b32.xlu1 %v1065_v15, %s1380_s28 }
  0x4f   : > { %730 = vrot.lane.b32.xlu0 %v1061_v7, %s1380_s28 }
  0x87   : > { %v1230_v16 = vpop.permute.xlu1 %1229 }
  0x88   : > { %v1232_v43 = vunpack.i.h.bf16 %v1230_v16  ;;  %v1231_v44 = vunpack.i.l.bf16 %v1230_v16 }
  0x89   : > { %v1220_v17 = vpop.permute.xlu0 %1219 }
  0x8a   : > { %v1222_v24 = vunpack.i.h.bf16 %v1220_v17  ;;  %v1221_v25 = vunpack.i.l.bf16 %v1220_v17 }
  0x8b   : > { %v1235_v18 = vpop.permute.xlu1 %1234 }
  0x8c   : > { %v1237_v40 = vunpack.i.h.bf16 %v1235_v18  ;;  %v1236_v41 = vunpack.i.l.bf16 %v1235_v18  ;;  %v281_v46 = vsel %vm280_vm0, %v205_v26, %v1222_v24  ;;  %v294_v47 = vsel %vm280_vm0, %v1494_v27, %v1221_v25 }
  0x8d   : > { %v1225_v19 = vpop.permute.xlu0 %1224 }
  0x8e   : > { %v1227_v31 = vunpack.i.h.bf16 %v1225_v19  ;;  %v1226_v33 = vunpack.i.l.bf16 %v1225_v19  ;;  %v491_v61 = vsel %vm280_vm0, %v1479_v20, %v1237_v40  ;;  %v498_v62 = vsel %vm280_vm0, %v1482_v21, %v1236_v41 }
  0x8f   : > { %v1245_v22 = vpop.permute.xlu1 %1244 }
  0x90   : > { %v283_v49 = vsel %vm282_vm1, %v281_v46, %v1227_v31  ;;  %v295_v52 = vsel %vm282_vm1, %v294_v47, %v1226_v33  ;;  %v1247_v56 = vunpack.i.h.bf16 %v1245_v22  ;;  %v1246_v57 = vunpack.i.l.bf16 %v1245_v22 }
  0x91   : > { %v1240_v23 = vpop.permute.xlu0 %1239  ;;  %v285_v27 = vsel %vm284_vm2, %v283_v49, %v1232_v43  ;;  %v296_v63 = vsel %vm284_vm2, %v295_v52, %v1231_v44 }
  0x92   : > { %v1242_v53 = vunpack.i.h.bf16 %v1240_v23  ;;  %v1241_v54 = vunpack.i.l.bf16 %v1240_v23  ;;  %v492_v20 = vsel %vm282_vm1, %v491_v61, %v1247_v56  ;;  %v499_v14 = vsel %vm282_vm1, %v498_v62, %v1246_v57 }
  0x93   : > { %v1255_v36 = vpop.permute.xlu1 %1254 }
  0x94   : > { %v287_v8 = vsel %vm286_vm3, %v285_v27, %v1242_v53  ;;  %v297_v9 = vsel %vm286_vm3, %v296_v63, %v1241_v54  ;;  %v1257_v11 = vunpack.i.h.bf16 %v1255_v36  ;;  %v1256_v12 = vunpack.i.l.bf16 %v1255_v36 }
  0x95   : > { %v1250_v37 = vpop.permute.xlu0 %1249 }
  0x96   : > { %v1252_v58 = vunpack.i.h.bf16 %v1250_v37  ;;  %v1251_v59 = vunpack.i.l.bf16 %v1250_v37  ;;  %v493_v31 = vsel %vm284_vm2, %v492_v20, %v1257_v11  ;;  %v500_v33 = vsel %vm284_vm2, %v499_v14, %v1256_v12 }
  0x97   : > { %v1265_v55 = vpop.permute.xlu1 %1264 }
  0x98   : > { %v289_v21 = vsel %vm288_vm4, %v287_v8, %v1252_v58  ;;  %v298_v16 = vsel %vm288_vm4, %v297_v9, %v1251_v59  ;;  %v1267_v17 = vunpack.i.h.bf16 %v1265_v55  ;;  %v1266_v18 = vunpack.i.l.bf16 %v1265_v55 }
  0x99   : > { %v1260_v60 = vpop.permute.xlu0 %1259 }
  0x9a   : > { %v1262_v6 = vunpack.i.h.bf16 %v1260_v60  ;;  %v1261_v7 = vunpack.i.l.bf16 %v1260_v60  ;;  %v494_v49 = vsel %vm286_vm3, %v493_v31, %v1267_v17  ;;  %v501_v52 = vsel %vm286_vm3, %v500_v33, %v1266_v18 }
  0x9b   : > { %v1275_v13 = vpop.permute.xlu1 %1274 }
  0x9c   : > { %v291_v23 = vsel %vm290_vm5, %v289_v21, %v1262_v6  ;;  %v1277_v24 = vunpack.i.h.bf16 %v1275_v13  ;;  %v1276_v25 = vunpack.i.l.bf16 %v1275_v13  ;;  %v299_v26 = vsel %vm290_vm5, %v298_v16, %v1261_v7 }
  0x9d   : > { %v1270_v15 = vpop.permute.xlu0 %1269 }
  0x9e   : > { %v1272_v19 = vunpack.i.h.bf16 %v1270_v15  ;;  %v1271_v22 = vunpack.i.l.bf16 %v1270_v15  ;;  %v495_v55 = vsel %vm288_vm4, %v494_v49, %v1277_v24  ;;  %v502_v56 = vsel %vm288_vm4, %v501_v52, %v1276_v25 }
  0x9f   : > { %v1285_v36 = vpop.permute.xlu1 %1284 }
  0xa0   : > { %v300_v37 = vsel %vm292_vm6, %v299_v26, %v1271_v22  ;;  %v293_v40 = vsel %vm292_vm6, %v291_v23, %v1272_v19  ;;  %v1287_v43 = vunpack.i.h.bf16 %v1285_v36  ;;  %v1286_v44 = vunpack.i.l.bf16 %v1285_v36 }
  0xa1   : > { %v1280_v41 = vpop.permute.xlu0 %1279  ;;  %v1653_v46 = vpack.c.bf16 %v300_v37, %v300_v37  ;;  %v301_v47 = vpack.c.bf16 %v293_v40, %v293_v40 }
  0xa2   : > { %v1282_v53 = vunpack.i.h.bf16 %v1280_v41  ;;  %v1281_v54 = vunpack.i.l.bf16 %v1280_v41 }
  0xa3   : > { %431 = vmatprep.mubr.bf16.mxu0 %v1653_v46  ;;  %v1295_v59 = vpop.permute.xlu1 %1294 }
  0xa4   : > { %v496_v57 = vsel %vm290_vm5, %v495_v55, %v1282_v53  ;;  %432 = vmatmul.mubr.bf16.vlgmr.msra.gmra.mrb[0].mxu0 %v301_v47  ;;  %v503_v58 = vsel %vm290_vm5, %v502_v56, %v1281_v54  ;;  %v1297_v62 = vunpack.i.h.bf16 %v1295_v59  ;;  %v1296_v27 = vunpack.i.l.bf16 %v1295_v59 }
  0xa5   : > { %1114 = vmatpush3.bf16.msra.mxu0 %v1417_v1  ;;  %v504_v60 = vsel %vm292_vm6, %v503_v58, %v1286_v44  ;;  %v497_v61 = vsel %vm292_vm6, %v496_v57, %v1287_v43  ;;  %v1290_v63 = vpop.permute.xlu0 %1289 }
  0xa6   : > { %1115 = vmatprep.subr.bf16.mxu0 %v1424_v2  ;;  %v1666_v6 = vpack.c.bf16 %v504_v60, %v504_v60  ;;  %v505_v7 = vpack.c.bf16 %v497_v61, %v497_v61  ;;  %v1292_v8 = vunpack.i.h.bf16 %v1290_v63  ;;  %v1291_v9 = vunpack.i.l.bf16 %v1290_v63 }
  0xa7   : > { %v1305_v13 = vpop.permute.xlu1 %1304 }
  0xa8   : > { %539 = vmatprep.mubr.bf16.mxu1 %v1666_v6  ;;  %v655_v11 = vsel %vm280_vm0, %v1584_v50, %v1292_v8  ;;  %v577_v12 = vsel %vm280_vm0, %v1497_v28, %v1291_v9  ;;  %v1307_v20 = vunpack.i.h.bf16 %v1305_v13  ;;  %v1306_v14 = vunpack.i.l.bf16 %v1305_v13 }
  0xa9   : > { %1116 = vmatpush3.bf16.msra.mxu0 %v1433_v3  ;;  %540 = vmatmul.mubr.bf16.vlgmr.msra.gmra.mrb[0].mxu1 %v505_v7  ;;  %v1300_v21 = vpop.permute.xlu0 %1299  ;;  %v578_v15 = vsel %vm282_vm1, %v577_v12, %v1296_v27  ;;  %v656_v16 = vsel %vm282_vm1, %v655_v11, %v1297_v62 }
  0xaa   : > { %1136 = vmatpush3.bf16.msra.mxu1 %v1417_v1  ;;  %1117 = vmatprep.subr.bf16.mxu0 %v1440_v4  ;;  %v1302_v17 = vunpack.i.h.bf16 %v1300_v21  ;;  %v1301_v50 = vunpack.i.l.bf16 %v1300_v21 }
  0xab   : > { %1137 = vmatprep.subr.bf16.mxu1 %v1424_v2  ;;  %v1315_v19 = vpop.permute.xlu1 %1314 }
  0xac   : > { %v579_v28 = vsel %vm284_vm2, %v578_v15, %v1301_v50  ;;  %v657_v18 = vsel %vm284_vm2, %v656_v16, %v1302_v17  ;;  %v1317_v22 = vunpack.i.h.bf16 %v1315_v19  ;;  %v1316_v23 = vunpack.i.l.bf16 %v1315_v19 }
  0xad   : > { %1118 = vmatpush3.bf16.msra.mxu0 %v1461_v10  ;;  %v1310_v24 = vpop.permute.xlu0 %1309  ;;  %v658_v25 = vsel %vm286_vm3, %v657_v18, %v1307_v20  ;;  %v580_v26 = vsel %vm286_vm3, %v579_v28, %v1306_v14 }
  0xae   : > { %1138 = vmatpush3.bf16.msra.mxu1 %v1433_v3  ;;  %1119 = vmatprep.subr.bf16.mxu0 %v1503_v29  ;;  %v1312_v31 = vunpack.i.h.bf16 %v1310_v24  ;;  %v1311_v33 = vunpack.i.l.bf16 %v1310_v24 }
  0xaf   : > { %1139 = vmatprep.subr.bf16.mxu1 %v1440_v4  ;;  %v653_v36 = vpop.permute.xlu1 %652 }
  0xb0   : > { %v659_v37 = vsel %vm288_vm4, %v658_v25, %v1312_v31  ;;  %v581_v40 = vsel %vm288_vm4, %v580_v26, %v1311_v33 }
  0xb1   : > { %1120 = vmatpush3.bf16.msra.mxu0 %v1508_v30  ;;  %v660_v41 = vsel %vm290_vm5, %v659_v37, %v1317_v22  ;;  %v575_v43 = vpop.permute.xlu0 %574  ;;  %v582_v44 = vsel %vm290_vm5, %v581_v40, %v1316_v23 }
  0xb2   : > { %1140 = vmatpush3.bf16.msra.mxu1 %v1461_v10  ;;  %1121 = vmatprep.subr.bf16.mxu0 %v1515_v32  ;;  %v661_v47 = vsel %vm292_vm6, %v660_v41, %v653_v36  ;;  %v583_v49 = vsel %vm292_vm6, %v582_v44, %v575_v43 }
  0xb3   : > { %1141 = vmatprep.subr.bf16.mxu1 %v1503_v29  ;;  %v1697_v52 = vpack.c.bf16 %v661_v47, %v661_v47  ;;  %v1699_v53 = vpack.c.bf16 %v583_v49, %v583_v49  ;;  %v1325_v54 = vpop.permute.xlu1 %1324 }
  0xb4   : > { %v1327_v55 = vunpack.i.h.bf16 %v1325_v54  ;;  %v1326_v56 = vunpack.i.l.bf16 %v1325_v54 }
  0xb5   : > { %1122 = vmatpush3.bf16.msra.mxu0 %v1525_v34  ;;  %617 = vmatprep.mubr.bf16.mxu0 %v1699_v53  ;;  %v1320_v57 = vpop.permute.xlu0 %1319 }
  0xb6   : > { %1142 = vmatpush3.bf16.msra.mxu1 %v1508_v30  ;;  %1123 = vmatprep.subr.bf16.mxu0 %v1532_v35  ;;  %v1322_v58 = vunpack.i.h.bf16 %v1320_v57  ;;  %v1321_v59 = vunpack.i.l.bf16 %v1320_v57 }
  0xb7   : > { %1143 = vmatprep.subr.bf16.mxu1 %v1515_v32  ;;  %695 = vmatprep.mubr.bf16.mxu1 %v1697_v52  ;;  %v1335_v62 = vpop.permute.xlu1 %1334 }
  0xb8   : > { %v811_v60 = vsel %vm280_vm0, %v1613_v5, %v1322_v58  ;;  %v733_v61 = vsel %vm280_vm0, %v1587_v51, %v1321_v59  ;;  %v1337_v27 = vunpack.i.h.bf16 %v1335_v62  ;;  %v1336_v63 = vunpack.i.l.bf16 %v1335_v62 }
  0xb9   : > { %1124 = vmatpush3.bf16.msra.mxu0 %v1543_v38  ;;  %v1330_v7 = vpop.permute.xlu0 %1329  ;;  %v734_v8 = vsel %vm282_vm1, %v733_v61, %v1326_v56  ;;  %v812_v9 = vsel %vm282_vm1, %v811_v60, %v1327_v55 }
  0xba   : > { %1144 = vmatpush3.bf16.msra.mxu1 %v1525_v34  ;;  %1125 = vmatprep.subr.bf16.mxu0 %v1550_v39  ;;  %v1332_v11 = vunpack.i.h.bf16 %v1330_v7  ;;  %v1331_v12 = vunpack.i.l.bf16 %v1330_v7 }
  0xbb   : > { %1145 = vmatprep.subr.bf16.mxu1 %v1532_v35  ;;  %v1345_v13 = vpop.permute.xlu1 %1344 }
  0xbc   : > { %v735_v51 = vsel %vm284_vm2, %v734_v8, %v1331_v12  ;;  %v813_v5 = vsel %vm284_vm2, %v812_v9, %v1332_v11  ;;  %v1347_v20 = vunpack.i.h.bf16 %v1345_v13  ;;  %v1346_v14 = vunpack.i.l.bf16 %v1345_v13 }
  0xbd   : > { %1126 = vmatpush3.bf16.msra.mxu0 %v1561_v42  ;;  %v1340_v21 = vpop.permute.xlu0 %1339  ;;  %v814_v15 = vsel %vm286_vm3, %v813_v5, %v1337_v27  ;;  %v736_v16 = vsel %vm286_vm3, %v735_v51, %v1336_v63 }
  0xbe   : > { %1146 = vmatpush3.bf16.msra.mxu1 %v1543_v38  ;;  %1127 = vmatprep.subr.bf16.mxu0 %v1570_v45  ;;  %v1342_v17 = vunpack.i.h.bf16 %v1340_v21  ;;  %v1341_v50 = vunpack.i.l.bf16 %v1340_v21 }
  0xbf   : > { %1147 = vmatprep.subr.bf16.mxu1 %v1550_v39  ;;  %v809_v19 = vpop.permute.xlu1 %808 }
  0xc0   : > { %v815_v28 = vsel %vm288_vm4, %v814_v15, %v1342_v17  ;;  %v737_v18 = vsel %vm288_vm4, %v736_v16, %v1341_v50 }
  0xc1   : > { %1128 = vmatpush3.bf16.msra.mxu0 %v1580_v48  ;;  %v816_v22 = vsel %vm290_vm5, %v815_v28, %v1347_v20  ;;  %v731_v23 = vpop.permute.xlu0 %730  ;;  %v738_v24 = vsel %vm290_vm5, %v737_v18, %v1346_v14 }
  0xc2   : > { %1148 = vmatpush3.bf16.msra.mxu1 %v1561_v42  ;;  %1157 = vmatprep.subr.bf16.mxu0 %v1412_v0  ;;  %v739_v25 = vsel %vm292_vm6, %v738_v24, %v731_v23  ;;  %v817_v31 = vsel %vm292_vm6, %v816_v22, %v809_v19 }
  0xc3   : > { %1149 = vmatprep.subr.bf16.mxu1 %v1570_v45  ;;  %v740_v26 = vpack.c.bf16 %v739_v25, %v739_v25  ;;  %v818_v33 = vpack.c.bf16 %v817_v31, %v817_v31 }
  0xc4   : > { %618 = vmatmul.mubr.bf16.vlgmr.msra.gmra.mrb[4].mxu0 %v1653_v46 }
  0xc5   : > { %1158 = vmatpush3.bf16.msra.mxu0 %v1417_v1  ;;  %773 = vmatprep.mubr.bf16.mxu0 %v740_v26 }
  0xc6   : > { %1150 = vmatpush3.bf16.msra.mxu1 %v1580_v48  ;;  %1159 = vmatprep.subr.bf16.mxu0 %v1424_v2 }
  0xc7   : > { %1179 = vmatprep.subr.bf16.mxu1 %v1412_v0 }
  0xc9   : > { %696 = vmatmul.mubr.bf16.vlgmr.msra.gmra.mrb[4].mxu1 %v1666_v6  ;;  %1160 = vmatpush3.bf16.msra.mxu0 %v1433_v3 }
  0xca   : > { %1180 = vmatpush3.bf16.msra.mxu1 %v1417_v1  ;;  %1161 = vmatprep.subr.bf16.mxu0 %v1440_v4 }
  0xcb   : > { %1181 = vmatprep.subr.bf16.mxu1 %v1424_v2  ;;  %851 = vmatprep.mubr.bf16.mxu1 %v818_v33  ;;  %v1066_v2 = vld [vmem:[%s1819_s2] ss:$0 sm:$0xff] }
  0xcd   : > { %1162 = vmatpush3.bf16.msra.mxu0 %v1461_v10 }
  0xce   : > { %1182 = vmatpush3.bf16.msra.mxu1 %v1433_v3  ;;  %1163 = vmatprep.subr.bf16.mxu0 %v1503_v29 }
  0xcf   : > { %1183 = vmatprep.subr.bf16.mxu1 %v1440_v4 }
  0xd1   : > { %1164 = vmatpush3.bf16.msra.mxu0 %v1508_v30 }
  0xd2   : > { %1184 = vmatpush3.bf16.msra.mxu1 %v1461_v10  ;;  %1165 = vmatprep.subr.bf16.mxu0 %v1515_v32 }
  0xd3   : > { %1185 = vmatprep.subr.bf16.mxu1 %v1503_v29 }
  0xd5   : > { %1166 = vmatpush3.bf16.msra.mxu0 %v1525_v34 }
  0xd6   : > { %1186 = vmatpush3.bf16.msra.mxu1 %v1508_v30  ;;  %1167 = vmatprep.subr.bf16.mxu0 %v1532_v35 }
  0xd7   : > { %1187 = vmatprep.subr.bf16.mxu1 %v1515_v32 }
  0xd9   : > { %1168 = vmatpush3.bf16.msra.mxu0 %v1543_v38 }
  0xda   : > { %1188 = vmatpush3.bf16.msra.mxu1 %v1525_v34  ;;  %1169 = vmatprep.subr.bf16.mxu0 %v1550_v39 }
  0xdb   : > { %1189 = vmatprep.subr.bf16.mxu1 %v1532_v35 }
  0xdd   : > { %1170 = vmatpush3.bf16.msra.mxu0 %v1561_v42 }
  0xde   : > { %1190 = vmatpush3.bf16.msra.mxu1 %v1543_v38  ;;  %1171 = vmatprep.subr.bf16.mxu0 %v1570_v45 }
  0xdf   : > { %1191 = vmatprep.subr.bf16.mxu1 %v1550_v39 }
  0xe1   : > { %1172 = vmatpush3.bf16.msra.mxu0 %v1580_v48 }
  0xe2   : > { %1192 = vmatpush3.bf16.msra.mxu1 %v1561_v42 }
  0xe3   : > { %1193 = vmatprep.subr.bf16.mxu1 %v1570_v45 }
  0xe4   : > { %774 = vmatmul.mubr.bf16.vlgmr.msra.gmra.mrb[8].mxu0 %v1699_v53 }
  0xe6   : > { %1194 = vmatpush3.bf16.msra.mxu1 %v1580_v48 }
  0xe9   : > { %852 = vmatmul.mubr.bf16.vlgmr.msra.gmra.mrb[8].mxu1 %v1697_v52 }
 0x177   : > { %v1085_v0 = vpop.f32.mrb[0].mxu0 }
 0x178   : > { %v1086_v1 = vpop.f32.mrb[1].mxu0 }
 0x179   : > { %v1087_v3 = vadd.f32 %v1086_v1, %v1085_v0  ;;  %v1088_v4 = vpop.f32.mrb[2].mxu0 }
 0x17a   : > { %v1089_v10 = vpop.f32.mrb[3].mxu0 }
 0x17b   : > { %v1774_v29 = vadd.f32 %v1087_v3, %v1066_v2 }
 0x17c   : > { %v1107_v30 = vpop.f32.mrb[0].mxu1 }
 0x17d   : > { %v1108_v32 = vpop.f32.mrb[1].mxu1  ;;  %v891_v39 = vmul.f32 %v1774_v29, %v1774_v29  ;;  %v872_v45 = vsel %vm871_vm7, %v1774_v29, 0.0 }
 0x17e   : > { %v1109_v34 = vadd.f32 %v1108_v32, %v1107_v30  ;;  %v1110_v35 = vpop.f32.mrb[2].mxu1 }
 0x17f   : > { %v1111_v38 = vpop.f32.mrb[3].mxu1  ;;  %v897_v36 = vsel %vm871_vm7, %v891_v39, 0.0 }
 0x180   : > { %v1778_v42 = vadd.f32 %v1109_v34, %v1066_v2 }
 0x182   : > { %v873_v48 = vsel %vm871_vm7, %v1778_v42, 0.0  ;;  %v892_v46 = vmul.f32 %v1778_v42, %v1778_v42 }
 0x183   : > { %v874_v6 = vadd.f32 %v873_v48, %v872_v45 }
 0x184   : > { %v898_v37 = vsel %vm871_vm7, %v892_v46, 0.0 }
 0x185   : > { %v899_v40 = vadd.f32 %v898_v37, %v897_v36 }
 0x197   : > { %v1129_v41 = vpop.f32.mrb[4].mxu0 }
 0x198   : > { %v1130_v43 = vpop.f32.mrb[5].mxu0 }
 0x199   : > { %v1131_v44 = vadd.f32 %v1130_v43, %v1129_v41  ;;  %v1132_v47 = vpop.f32.mrb[6].mxu0 }
 0x19a   : > { %v1133_v49 = vpop.f32.mrb[7].mxu0 }
 0x19b   : > { %v1788_v52 = vadd.f32 %v1131_v44, %v1066_v2 }
 0x19c   : > { %v1151_v53 = vpop.f32.mrb[4].mxu1 }
 0x19d   : > { %v875_v54 = vsel %vm871_vm7, %v1788_v52, 0.0  ;;  %v893_v55 = vmul.f32 %v1788_v52, %v1788_v52  ;;  %v1152_v56 = vpop.f32.mrb[5].mxu1 }
 0x19e   : > { %v876_v57 = vadd.f32 %v875_v54, %v874_v6  ;;  %v1153_v58 = vadd.f32 %v1152_v56, %v1151_v53  ;;  %v1154_v59 = vpop.f32.mrb[6].mxu1 }
 0x19f   : > { %v900_v60 = vsel %vm871_vm7, %v893_v55, 0.0  ;;  %v1155_v61 = vpop.f32.mrb[7].mxu1 }
 0x1a0   : > { %v901_v62 = vadd.f32 %v900_v60, %v899_v40  ;;  %v868_v27 = vadd.f32 %v1153_v58, %v1066_v2 }
 0x1a2   : > { %v877_v63 = vsel %vm871_vm7, %v868_v27, 0.0  ;;  %v894_v7 = vmul.f32 %v868_v27, %v868_v27 }
 0x1a3   : > { %v878_v8 = vadd.f32 %v877_v63, %v876_v57 }
 0x1a4   : > { %v902_v9 = vsel %vm871_vm7, %v894_v7, 0.0 }
 0x1a5   : > { %v903_v11 = vadd.f32 %v902_v9, %v901_v62 }
 0x1b7   : > { %v1173_v12 = vpop.f32.mrb[8].mxu0 }
 0x1b8   : > { %v1174_v51 = vpop.f32.mrb[9].mxu0 }
 0x1b9   : > { %v1175_v5 = vadd.f32 %v1174_v51, %v1173_v12  ;;  %v1176_v13 = vpop.f32.mrb[10].mxu0 }
 0x1ba   : > { %v1177_v20 = vpop.f32.mrb[11].mxu0 }
 0x1bb   : > { %v869_v14 = vadd.f32 %v1175_v5, %v1066_v2 }
 0x1bc   : > { %v1195_v21 = vpop.f32.mrb[8].mxu1 }
 0x1bd   : > { %v879_v15 = vsel %vm871_vm7, %v869_v14, 0.0  ;;  %v895_v16 = vmul.f32 %v869_v14, %v869_v14  ;;  %v1196_v17 = vpop.f32.mrb[9].mxu1 }
 0x1be   : > { %v880_v50 = vadd.f32 %v879_v15, %v878_v8  ;;  %v1197_v28 = vadd.f32 %v1196_v17, %v1195_v21  ;;  %v1198_v18 = vpop.f32.mrb[10].mxu1 }
 0x1bf   : > { %v904_v19 = vsel %vm871_vm7, %v895_v16, 0.0  ;;  %v1199_v22 = vpop.f32.mrb[11].mxu1 }
 0x1c0   : > { %v905_v23 = vadd.f32 %v904_v19, %v903_v11  ;;  %v870_v24 = vadd.f32 %v1197_v28, %v1066_v2 }
 0x1c2   : > { %v881_v25 = vsel %vm871_vm7, %v870_v24, 0.0  ;;  %v896_v26 = vmul.f32 %v870_v24, %v870_v24 }
 0x1c3   : > { %v882_v31 = vadd.f32 %v881_v25, %v880_v50 }
 0x1c4   : > { %v906_v33 = vsel %vm871_vm7, %v896_v26, 0.0 }
 0x1c5   : > { %v883_v0 = vrot.slane %v882_v31, 4  ;;  %v907_v1 = vadd.f32 %v906_v33, %v905_v23 }
 0x1c7   : > { %v884_v3 = vadd.f32 %v883_v0, %v882_v31  ;;  %v908_v4 = vrot.slane %v907_v1, 4 }
 0x1c9   : > { %v885_v10 = vrot.slane %v884_v3, 2  ;;  %v909_v30 = vadd.f32 %v908_v4, %v907_v1 }
 0x1cb   : > { %v886_v32 = vadd.f32 %v885_v10, %v884_v3  ;;  %v910_v34 = vrot.slane %v909_v30, 2 }
 0x1cd   : > { %v887_v35 = vrot.slane %v886_v32, 1  ;;  %v911_v38 = vadd.f32 %v910_v34, %v909_v30 }
 0x1cf   : > { %v888_v39 = vadd.f32 %v887_v35, %v886_v32  ;;  %v912_v45 = vrot.slane %v911_v38, 1 }
 0x1d1   : > { %v890_v2 = vmul.f32 0.027777778, %v888_v39  ;;  %v913_v48 = vadd.f32 %v912_v45, %v911_v38 }
 0x1d3   : > { %v914_v46 = vmul.f32 0.027777778, %v913_v48  ;;  %v915_v6 = vmul.f32 %v890_v2, %v890_v2  ;;  %v917_v36 = vsub.f32 %v1774_v29, %v890_v2  ;;  %v918_v37 = vsub.f32 %v1778_v42, %v890_v2 }
 0x1d4   : > { %v919_v40 = vsub.f32 %v1788_v52, %v890_v2  ;;  %v920_v41 = vsub.f32 %v868_v27, %v890_v2  ;;  %v921_v43 = vsub.f32 %v869_v14, %v890_v2  ;;  %v922_v44 = vsub.f32 %v870_v24, %v890_v2 }
 0x1d5   : > { %v916_v47 = vsub.f32 %v914_v46, %v915_v6 }
 0x1d7   : > { %v923_v49 = vmax.f32 %v916_v47, 0.0 }
 0x1d9   : > { %v924_v53 = vadd.f32 1e-05, %v923_v49 }
 0x1db   : > { %1364 = vrsqrt.f32 %v924_v53 }
 0x1e5   : > { %v1365_v54 = vpop.eup %1364 }
 0x1e6   : > { %v926_v55 = vmul.f32 %v1365_v54, %v917_v36  ;;  %v927_v56 = vmul.f32 %v1365_v54, %v918_v37  ;;  %v928_v57 = vmul.f32 %v1365_v54, %v919_v40  ;;  %v929_v58 = vmul.f32 %v1365_v54, %v920_v41 }
 0x1e7   : > { %v930_v59 = vmul.f32 %v1365_v54, %v921_v43  ;;  %v931_v60 = vmul.f32 %v1365_v54, %v922_v44 }
 0x1e8   : > { %vm932_vm8 = vcmp.ge.f32.partialorder %v926_v55, 0.0  ;;  %vm933_vm9 = vcmp.ge.f32.partialorder %v927_v56, 0.0  ;;  %vm934_vm10 = vcmp.ge.f32.partialorder %v928_v57, 0.0  ;;  %vm935_vm11 = vcmp.ge.f32.partialorder %v929_v58, 0.0 }
 0x1e9   : > { %vm936_vm12 = vcmp.ge.f32.partialorder %v930_v59, 0.0  ;;  %vm937_vm13 = vcmp.ge.f32.partialorder %v931_v60, 0.0  ;;  %v938_v29 = vmul.f32 0.2, %v926_v55  ;;  %v939_v42 = vmul.f32 0.2, %v927_v56 }
 0x1ea   : > { %v940_v52 = vmul.f32 0.2, %v928_v57  ;;  %v941_v61 = vmul.f32 0.2, %v929_v58  ;;  %v942_v62 = vmul.f32 0.2, %v930_v59 }
 0x1eb   : > { %v943_v27 = vmul.f32 0.2, %v931_v60  ;;  %v944_v63 = vsel %vm932_vm8, %v926_v55, %v938_v29  ;;  %v945_v7 = vsel %vm933_vm9, %v927_v56, %v939_v42 }
 0x1ec   : > { %v946_v8 = vsel %vm934_vm10, %v928_v57, %v940_v52  ;;  %v947_v9 = vsel %vm935_vm11, %v929_v58, %v941_v61  ;;  %v948_v11 = vsel %vm936_vm12, %v930_v59, %v942_v62  ;;  %950 = vst.msk [vmem:[%s170_s10] sm:$0x3f] %vm871_vm7, %v944_v63  ;;  %951 = vst.msk [vmem:[%s170_s10 + $0x8] sm:$0x3f] %vm871_vm7, %v945_v7 }
 0x1ed   : > { %v949_v12 = vsel %vm937_vm13, %v931_v60, %v943_v27  ;;  %952 = vst.msk [vmem:[%s170_s10 + $0x10] sm:$0x3f] %vm871_vm7, %v946_v8  ;;  %953 = vst.msk [vmem:[%s170_s10 + $0x18] sm:$0x3f] %vm871_vm7, %v947_v9 }
 0x1ee   : > { %954 = vst.msk [vmem:[%s170_s10 + $0x20] sm:$0x3f] %vm871_vm7, %v948_v11  ;;  %955 = vst.msk [vmem:[%s170_s10 + $0x28] sm:$0x3f] %vm871_vm7, %v949_v12 }
 0x1ef PF: > { %s13_s12 = sadd.s32 1, %s1372_s12  }
 0x1f0   : > { %p10_p4 = scmp.ge.s32.totalorder %s13_s12, 4  }
 0x1f2   :  { %12 = sbr.rel (!%p10_p4) target bundleno = 1 (0x1), region = 70 }

// kernel: mesh_rgb_discriminator_forward.11
= control target key start
LH: loop header
LB: loop body
LE: loop exit
PB: predicated region body
PF: predicated region fallthrough
CT: control target
= control target key end

     0   :  { %s1774_s14 = smov 0   ;;  %s2338_s0 = inlined_call_operand.vmem [shape: f32[2,10,10,32], index: 0, kind: input, shape index: {}]   ;;  %s2339_s1 = inlined_call_operand.vmem [shape: bf16[512,1], index: 1, kind: input, shape index: {}]   ;;  %s2340_s2 = inlined_call_operand.<no memory space> [shape: f32[1,1], index: 2, kind: input, shape index: {}]   ;;  %s2341_s3 = inlined_call_operand.vmem [shape: f32[2,7,7,1], index: 3, kind: output, shape index: {}]  }
   0x1   :  { %v8_v0 = vstv %s2340_s2 }
   0x2   :  { %9 = vst [vmem:[#allocation2] sm:$0x1] %v8_v0 }
   0x3 LB: > { %s1279_s15 = sadd.s32 4294967295, %s1746_s14   ;;  %p1283_p0 = scmp.ge.s32.totalorder %s1746_s14, 1  ;;  %s1746_s14 = sphi %s1774_s14, %s15_s14  }
   0x4   : > { %p139_p1 = scmp.lt.s32.totalorder %s1746_s14, 3 }
   0x6   : > { %p140_p2 = pnand %p1283_p0, %p139_p1 }
   0x7   : > { %p163_p3 = scmp.lt.s32.totalorder (!%p140_p2), %s1279_s15, 1  ;;  %v1785_v1 = vld [vmem:[%s2339_s1 + $0x40] sm:$0xff] (!%p140_p2)   ;;  %v1811_v5 = vld [vmem:[%s2339_s1 + $0x48] sm:$0xff] (!%p140_p2)   ;;  %s1748_s4 = smov (!%p140_p2), 64   ;;  %v1856_v27 = vld [vmem:[%s2339_s1 + $0x50] sm:$0xff] (!%p140_p2)   ;;  %vm306_vm0 = vcmask (!%p140_p2), 261120  }
   0x8   : > { %143 = sbr.rel (%p140_p2) target bundleno = 567 (0x237), region = 32  ;;  %v1790_v2 = vld [vmem:[%s2339_s1 + $0xc0] sm:$0xff] (!%p140_p2)   ;;  %1357 = vmatprep.subr.bf16.mxu0 (!%p140_p2), %v1785_v1  ;;  %v1822_v6 = vld [vmem:[%s2339_s1 + $0xc8] sm:$0xff] (!%p140_p2)   ;;  %s1749_s5 = smov (!%p140_p2), 32   ;;  %v1862_v28 = vld [vmem:[%s2339_s1 + $0xd0] sm:$0xff] (!%p140_p2)   ;;  %vm308_vm1 = vcmask (!%p140_p2), 523264  }
   0x9   : > { %v1797_v3 = vld [vmem:[%s2339_s1] sm:$0xff] (!%p140_p2)   ;;  %1379 = vmatprep.subr.bf16.mxu1 (!%p140_p2), %v1790_v2  ;;  %v1843_v23 = vld [vmem:[%s2339_s1 + $0x8] sm:$0xff] (!%p140_p2)   ;;  %s1750_s16 = smov (!%p140_p2), 96   ;;  %v1872_v31 = vld [vmem:[%s2339_s1 + $0x10] sm:$0xff] (!%p140_p2)   ;;  %vm310_vm2 = vcmask (!%p140_p2), 785408   ;;  %vm1216_vm3 = vcmask (!%p140_p2), 6144  }
   0xa   : > { %1358 = vmatpush3.bf16.msra.mxu0 (!%p140_p2), %v1797_v3  ;;  %v1806_v4 = vld [vmem:[%s2339_s1 + $0x80] sm:$0xff] (!%p140_p2)   ;;  %v1849_v25 = vld [vmem:[%s2339_s1 + $0x88] sm:$0xff] (!%p140_p2)   ;;  %v1878_v32 = vld [vmem:[%s2339_s1 + $0x90] sm:$0xff] (!%p140_p2)  }
   0xb   : > { %1380 = vmatpush3.bf16.msra.mxu1 (!%p140_p2), %v1806_v4  ;;  %1359 = vmatprep.subr.bf16.mxu0 (!%p140_p2), %v1811_v5  ;;  %v1884_v33 = vld [vmem:[%s2339_s1 + $0x58] sm:$0xff] (!%p140_p2)   ;;  %v1912_v39 = vld [vmem:[%s2339_s1 + $0x60] sm:$0xff] (!%p140_p2)   ;;  %v1940_v45 = vld [vmem:[%s2339_s1 + $0x68] sm:$0xff] (!%p140_p2)  }
   0xc   : > { %1381 = vmatprep.subr.bf16.mxu1 (!%p140_p2), %v1822_v6  ;;  %v1891_v35 = vld [vmem:[%s2339_s1 + $0xd8] sm:$0xff] (!%p140_p2)   ;;  %v1918_v40 = vld [vmem:[%s2339_s1 + $0xe0] sm:$0xff] (!%p140_p2)   ;;  %v1946_v46 = vld [vmem:[%s2339_s1 + $0xe8] sm:$0xff] (!%p140_p2)  }
   0xd   : > { %v1899_v37 = vld [vmem:[%s2339_s1 + $0x18] sm:$0xff] (!%p140_p2)   ;;  %v1926_v42 = vld [vmem:[%s2339_s1 + $0x20] sm:$0xff] (!%p140_p2)   ;;  %v1953_v47 = vld [vmem:[%s2339_s1 + $0x28] sm:$0xff] (!%p140_p2)  }
   0xe   : > { %1360 = vmatpush3.bf16.msra.mxu0 (!%p140_p2), %v1843_v23  ;;  %v1906_v38 = vld [vmem:[%s2339_s1 + $0x98] sm:$0xff] (!%p140_p2)   ;;  %v1934_v44 = vld [vmem:[%s2339_s1 + $0xa0] sm:$0xff] (!%p140_p2)   ;;  %v1961_v49 = vld [vmem:[%s2339_s1 + $0xa8] sm:$0xff] (!%p140_p2)  }
   0xf   : > { %s2343_s15 = smov (!%p163_p3, %s1279_s15), 1  ;;  %1382 = vmatpush3.bf16.msra.mxu1 %v1849_v25  ;;  %1361 = vmatprep.subr.bf16.mxu0 %v1856_v27  ;;  %v1969_v51 = vld [vmem:[%s2339_s1 + $0x70] sm:$0xff]   ;;  %v1995_v56 = vld [vmem:[%s2339_s1 + $0x78] sm:$0xff]  }
  0x10   : > { %s1665_s21 = smul.u32 160, %s2343_s15  ;;  %1383 = vmatprep.subr.bf16.mxu1 %v1862_v28  ;;  %v1976_v53 = vld [vmem:[%s2339_s1 + $0xf0] sm:$0xff]   ;;  %v2001_v57 = vld [vmem:[%s2339_s1 + $0xf8] sm:$0xff]  }
  0x11   : > { %v1983_v54 = vld [vmem:[%s2339_s1 + $0x30] sm:$0xff]   ;;  %v2008_v58 = vld [vmem:[%s2339_s1 + $0x38] sm:$0xff]  }
  0x12   : > { %s1816_s28 = scalar_lea.vmem %s2338_s0, %s1665_s21  ;;  %1362 = vmatpush3.bf16.msra.mxu0 %v1872_v31  ;;  %v1989_v55 = vld [vmem:[%s2339_s1 + $0xb0] sm:$0xff]   ;;  %v2014_v59 = vld [vmem:[%s2339_s1 + $0xb8] sm:$0xff]  }
  0x13   : > { %v1288_v7 = vld [vmem:[%s1816_s28 + $0x12] sm:$0x7f]  ;;  %v241_v12 = vld [vmem:[%s1816_s28 + $0x2] sm:$0x7f]  ;;  %1384 = vmatpush3.bf16.msra.mxu1 %v1878_v32  ;;  %1363 = vmatprep.subr.bf16.mxu0 %v1884_v33 }
  0x14   : > { %v1296_v8 = vld [vmem:[%s1816_s28 + $0x32] sm:$0x7f]  ;;  %v1292_v13 = vld [vmem:[%s1816_s28 + $0x22] sm:$0x7f]  ;;  %1385 = vmatprep.subr.bf16.mxu1 %v1891_v35 }
  0x15   : > { %v1287_v9 = vld [vmem:[%s1816_s28 + $0x11] sm:$0x7f]  ;;  %v1688_v10 = vpack.i.bf16 %v1296_v8, %v1288_v7  ;;  %v240_v15 = vld [vmem:[%s1816_s28 + $0x1] sm:$0x7f]  ;;  %v1693_v17 = vpack.i.bf16 %v1292_v13, %v241_v12 }
  0x16   : > { %v1295_v11 = vld [vmem:[%s1816_s28 + $0x31] sm:$0x7f]  ;;  %v1291_v16 = vld [vmem:[%s1816_s28 + $0x21] sm:$0x7f]  ;;  %1364 = vmatpush3.bf16.msra.mxu0 %v1899_v37 }
  0x17   : > { %v1678_v14 = vpack.i.bf16 %v1295_v11, %v1287_v9  ;;  %1689 = vrot.lane.b32.xlu1 %v1688_v10, %s1748_s4  ;;  %v1683_v18 = vpack.i.bf16 %v1291_v16, %v240_v15  ;;  %v242_v19 = vld [vmem:[%s1816_s28 + $0x3] sm:$0x7f]  ;;  %v1289_v21 = vld [vmem:[%s1816_s28 + $0x13] sm:$0x7f]  ;;  %1386 = vmatpush3.bf16.msra.mxu1 %v1906_v38 }
  0x18   : > { %v1293_v20 = vld [vmem:[%s1816_s28 + $0x23] sm:$0x7f]  ;;  %v1297_v22 = vld [vmem:[%s1816_s28 + $0x33] sm:$0x7f]  ;;  %1365 = vmatprep.subr.bf16.mxu0 %v1912_v39  ;;  %1387 = vmatprep.subr.bf16.mxu1 %v1918_v40 }
  0x19   : > { %1679 = vrot.lane.b32.xlu0 %v1678_v14, %s1749_s5  ;;  %v1703_v24 = vpack.i.bf16 %v1293_v20, %v242_v19  ;;  %v1698_v26 = vpack.i.bf16 %v1297_v22, %v1289_v21  ;;  %v1332_v29 = vld [vmem:[%s1816_s28 + $0x42] sm:$0x7f]  ;;  %v1335_v34 = vld [vmem:[%s1816_s28 + $0x51] sm:$0x7f] }
  0x1a   : > { %v1331_v30 = vld [vmem:[%s1816_s28 + $0x41] sm:$0x7f]  ;;  %v1336_v41 = vld [vmem:[%s1816_s28 + $0x52] sm:$0x7f]  ;;  %1366 = vmatpush3.bf16.msra.mxu0 %v1926_v42 }
  0x1b   : > { %1694 = vrot.lane.b32.xlu1 %v1693_v17, %s1748_s4  ;;  %v1333_v36 = vld [vmem:[%s1816_s28 + $0x43] sm:$0x7f]  ;;  %v1337_v43 = vld [vmem:[%s1816_s28 + $0x53] sm:$0x7f]  ;;  %1388 = vmatpush3.bf16.msra.mxu1 %v1934_v44 }
  0x1c   : > { %1367 = vmatprep.subr.bf16.mxu0 %v1940_v45  ;;  %v1340_v48 = vld [vmem:[%s1816_s28 + $0x62] sm:$0x7f]  ;;  %1389 = vmatprep.subr.bf16.mxu1 %v1946_v46  ;;  %v1343_v60 = vld [vmem:[%s1816_s28 + $0x71] sm:$0x7f] }
  0x1d   : > { %1684 = vrot.lane.b32.xlu0 %v1683_v18, %s1749_s5  ;;  %v1339_v50 = vld [vmem:[%s1816_s28 + $0x61] sm:$0x7f]  ;;  %v1344_v61 = vld [vmem:[%s1816_s28 + $0x72] sm:$0x7f] }
  0x1e   : > { %1368 = vmatpush3.bf16.msra.mxu0 %v1953_v47  ;;  %v1341_v52 = vld [vmem:[%s1816_s28 + $0x63] sm:$0x7f]  ;;  %v1345_v62 = vld [vmem:[%s1816_s28 + $0x73] sm:$0x7f] }
  0x1f   : > { %1704 = vrot.lane.b32.xlu1 %v1703_v24, %s1750_s16  ;;  %1390 = vmatpush3.bf16.msra.mxu1 %v1961_v49  ;;  %v1347_v63 = vld [vmem:[%s1816_s28 + $0x81] sm:$0x7f]  ;;  %v1351_v8 = vld [vmem:[%s1816_s28 + $0x91] sm:$0x7f] }
  0x20   : > { %1369 = vmatprep.subr.bf16.mxu0 %v1969_v51  ;;  %1391 = vmatprep.subr.bf16.mxu1 %v1976_v53  ;;  %v1348_v0 = vld [vmem:[%s1816_s28 + $0x82] sm:$0x7f]  ;;  %v1352_v9 = vld [vmem:[%s1816_s28 + $0x92] sm:$0x7f] }
  0x21   : > { %1699 = vrot.lane.b32.xlu0 %v1698_v26, %s1750_s16  ;;  %v1349_v7 = vld [vmem:[%s1816_s28 + $0x83] sm:$0x7f]  ;;  %v1353_v10 = vld [vmem:[%s1816_s28 + $0x93] sm:$0x7f] }
  0x22   : > { %1370 = vmatpush3.bf16.msra.mxu0 %v1983_v54  ;;  %v1294_v13 = vld [vmem:[%s1816_s28 + $0x30] sm:$0x7f]  ;;  %v1290_v17 = vld [vmem:[%s1816_s28 + $0x20] sm:$0x7f] }
  0x23   : > { %607 = vrot.lane.b32.xlu1 %v1332_v29, %s1748_s4  ;;  %1392 = vmatpush3.bf16.msra.mxu1 %v1989_v55  ;;  %v239_v19 = vld [vmem:[%s1816_s28] sm:$0x7f]  ;;  %v1286_v20 = vld [vmem:[%s1816_s28 + $0x10] sm:$0x7f] }
  0x24   : > { %1371 = vmatprep.subr.bf16.mxu0 %v1995_v56  ;;  %1393 = vmatprep.subr.bf16.mxu1 %v2001_v57 }
  0x25   : > { %603 = vrot.lane.b32.xlu0 %v1331_v30, %s1749_s5 }
  0x26   : > { %1372 = vmatpush3.bf16.msra.mxu0 %v2008_v58 }
  0x27   : > { %704 = vrot.lane.b32.xlu1 %v1335_v34, %s1749_s5  ;;  %1394 = vmatpush3.bf16.msra.mxu1 %v2014_v59 }
  0x28   : > { %1401 = vmatprep.subr.bf16.mxu0 %v1785_v1  ;;  %1423 = vmatprep.subr.bf16.mxu1 %v1790_v2 }
  0x29   : > { %611 = vrot.lane.b32.xlu0 %v1333_v36, %s1750_s16 }
  0x2b   : > { %712 = vrot.lane.b32.xlu1 %v1337_v43, %s1750_s16 }
  0x2d   : > { %708 = vrot.lane.b32.xlu0 %v1336_v41, %s1748_s4 }
  0x2f   : > { %809 = vrot.lane.b32.xlu1 %v1340_v48, %s1748_s4 }
  0x31   : > { %805 = vrot.lane.b32.xlu0 %v1339_v50, %s1749_s5 }
  0x33   : > { %906 = vrot.lane.b32.xlu1 %v1343_v60, %s1749_s5 }
  0x35   : > { %813 = vrot.lane.b32.xlu0 %v1341_v52, %s1750_s16 }
  0x37   : > { %914 = vrot.lane.b32.xlu1 %v1345_v62, %s1750_s16 }
  0x39   : > { %910 = vrot.lane.b32.xlu0 %v1344_v61, %s1748_s4 }
  0x3b   : > { %1011 = vrot.lane.b32.xlu1 %v1348_v0, %s1748_s4 }
  0x3d   : > { %1007 = vrot.lane.b32.xlu0 %v1347_v63, %s1749_s5 }
  0x3f   : > { %1108 = vrot.lane.b32.xlu1 %v1351_v8, %s1749_s5 }
  0x41   : > { %1015 = vrot.lane.b32.xlu0 %v1349_v7, %s1750_s16 }
  0x43   : > { %1116 = vrot.lane.b32.xlu1 %v1353_v10, %s1750_s16 }
  0x45   : > { %1112 = vrot.lane.b32.xlu0 %v1352_v9, %s1748_s4 }
  0x89   : > { %v1690_v11 = vpop.permute.xlu1 %1689 }
  0x8a   : > { %v1692_v29 = vunpack.i.h.bf16 %v1690_v11  ;;  %v1691_v30 = vunpack.i.l.bf16 %v1690_v11  ;;  %v1330_v11 = vld [vmem:[%s1816_s28 + $0x40] sm:$0x7f] }
  0x8b   : > { %v1680_v12 = vpop.permute.xlu0 %1679 }
  0x8c   : > { %v1682_v14 = vunpack.i.h.bf16 %v1680_v12  ;;  %v1681_v15 = vunpack.i.l.bf16 %v1680_v12 }
  0x8d   : > { %v1695_v16 = vpop.permute.xlu1 %1694 }
  0x8e   : > { %v1697_v21 = vunpack.i.h.bf16 %v1695_v16  ;;  %v1696_v22 = vunpack.i.l.bf16 %v1695_v16  ;;  %v318_v34 = vsel %vm306_vm0, %v1294_v13, %v1682_v14  ;;  %v312_v48 = vsel %vm306_vm0, %v1286_v20, %v1681_v15 }
  0x8f   : > { %v1685_v18 = vpop.permute.xlu0 %1684  ;;  %v319_v7 = vsel %vm308_vm1, %v318_v34, %v1692_v29  ;;  %v313_v8 = vsel %vm308_vm1, %v312_v48, %v1691_v30  ;;  %v1334_v29 = vld [vmem:[%s1816_s28 + $0x50] sm:$0x7f] }
  0x90   : > { %v1687_v24 = vunpack.i.h.bf16 %v1685_v18  ;;  %v1686_v26 = vunpack.i.l.bf16 %v1685_v18 }
  0x91   : > { %v1705_v43 = vpop.permute.xlu1 %1704 }
  0x92   : > { %v315_v36 = vsel %vm306_vm0, %v1290_v17, %v1687_v24  ;;  %v307_v41 = vsel %vm306_vm0, %v239_v19, %v1686_v26  ;;  %v1707_v50 = vunpack.i.h.bf16 %v1705_v43  ;;  %v1706_v52 = vunpack.i.l.bf16 %v1705_v43 }
  0x93   : > { %v1700_v60 = vpop.permute.xlu0 %1699  ;;  %v309_v63 = vsel %vm308_vm1, %v307_v41, %v1696_v22  ;;  %v316_v0 = vsel %vm308_vm1, %v315_v36, %v1697_v21 }
  0x94   : > { %v1702_v61 = vunpack.i.h.bf16 %v1700_v60  ;;  %v1701_v62 = vunpack.i.l.bf16 %v1700_v60  ;;  %v311_v9 = vsel %vm310_vm2, %v309_v63, %v1706_v52  ;;  %v317_v10 = vsel %vm310_vm2, %v316_v0, %v1707_v50  ;;  %v1338_v52 = vld [vmem:[%s1816_s28 + $0x60] sm:$0x7f] }
  0x95   : > { %v321_v14 = vpack.c.bf16 %v311_v9, %v311_v9  ;;  %v2055_v15 = vpack.c.bf16 %v317_v10, %v317_v10  ;;  %v608_v16 = vpop.permute.xlu1 %607  ;;  %v1342_v9 = vld [vmem:[%s1816_s28 + $0x70] sm:$0x7f] }
  0x96   : > { %v320_v12 = vsel %vm310_vm2, %v319_v7, %v1702_v61  ;;  %v314_v13 = vsel %vm310_vm2, %v313_v8, %v1701_v62 }
  0x97   : > { %v2057_v17 = vpack.c.bf16 %v320_v12, %v320_v12  ;;  %v322_v18 = vpack.c.bf16 %v314_v13, %v314_v13  ;;  %v604_v19 = vpop.permute.xlu0 %603 }
  0x98   : > { %v614_v20 = vsel %vm306_vm0, %v1330_v11, %v604_v19 }
  0x99   : > { %549 = vmatprep.mubr.bf16.mxu0 %v322_v18  ;;  %589 = vmatprep.mubr.bf16.mxu1 %v2057_v17  ;;  %v615_v21 = vsel %vm308_vm1, %v614_v20, %v608_v16  ;;  %v705_v30 = vpop.permute.xlu1 %704 }
  0x9a   : > { %550 = vmatmul.mubr.bf16.vlgmr.msra.gmra.mrb[0].mxu0 %v321_v14  ;;  %590 = vmatmul.mubr.bf16.vlgmr.msra.gmra.mrb[0].mxu1 %v2055_v15  ;;  %v715_v34 = vsel %vm306_vm0, %v1334_v29, %v705_v30 }
  0x9b   : > { %1402 = vmatpush3.bf16.msra.mxu0 %v1797_v3  ;;  %1424 = vmatpush3.bf16.msra.mxu1 %v1806_v4  ;;  %v612_v22 = vpop.permute.xlu0 %611 }
  0x9c   : > { %650 = vmatprep.mubr.bf16.mxu0 %v2055_v15  ;;  %1403 = vmatprep.subr.bf16.mxu0 %v1811_v5  ;;  %v616_v24 = vsel %vm310_vm2, %v615_v21, %v612_v22 }
  0x9d   : > { %1425 = vmatprep.subr.bf16.mxu1 %v1822_v6  ;;  %v2069_v26 = vpack.c.bf16 %v616_v24, %v616_v24  ;;  %v713_v43 = vpop.permute.xlu1 %712 }
  0x9f   : > { %1404 = vmatpush3.bf16.msra.mxu0 %v1843_v23  ;;  %1426 = vmatpush3.bf16.msra.mxu1 %v1849_v25  ;;  %v709_v36 = vpop.permute.xlu0 %708 }
  0xa0   : > { %1405 = vmatprep.subr.bf16.mxu0 %v1856_v27  ;;  %1427 = vmatprep.subr.bf16.mxu1 %v1862_v28  ;;  %v716_v41 = vsel %vm308_vm1, %v715_v34, %v709_v36 }
  0xa1   : > { %690 = vmatprep.mubr.bf16.mxu1 %v2069_v26  ;;  %v717_v48 = vsel %vm310_vm2, %v716_v41, %v713_v43  ;;  %v810_v62 = vpop.permute.xlu1 %809 }
  0xa2   : > { %v2104_v50 = vpack.c.bf16 %v717_v48, %v717_v48 }
  0xa3   : > { %1406 = vmatpush3.bf16.msra.mxu0 %v1872_v31  ;;  %1428 = vmatpush3.bf16.msra.mxu1 %v1878_v32  ;;  %v806_v60 = vpop.permute.xlu0 %805 }
  0xa4   : > { %1407 = vmatprep.subr.bf16.mxu0 %v1884_v33  ;;  %1429 = vmatprep.subr.bf16.mxu1 %v1891_v35  ;;  %v816_v61 = vsel %vm306_vm0, %v1338_v52, %v806_v60 }
  0xa5   : > { %v817_v63 = vsel %vm308_vm1, %v816_v61, %v810_v62  ;;  %v907_v10 = vpop.permute.xlu1 %906 }
  0xa6   : > { %v917_v11 = vsel %vm306_vm0, %v1342_v9, %v907_v10 }
  0xa7   : > { %1408 = vmatpush3.bf16.msra.mxu0 %v1899_v37  ;;  %1430 = vmatpush3.bf16.msra.mxu1 %v1906_v38  ;;  %v814_v0 = vpop.permute.xlu0 %813 }
  0xa8   : > { %1409 = vmatprep.subr.bf16.mxu0 %v1912_v39  ;;  %1431 = vmatprep.subr.bf16.mxu1 %v1918_v40  ;;  %v818_v7 = vsel %vm310_vm2, %v817_v63, %v814_v0 }
  0xa9   : > { %v2146_v8 = vpack.c.bf16 %v818_v7, %v818_v7  ;;  %v915_v14 = vpop.permute.xlu1 %914 }
  0xab   : > { %1410 = vmatpush3.bf16.msra.mxu0 %v1926_v42  ;;  %1432 = vmatpush3.bf16.msra.mxu1 %v1934_v44  ;;  %v911_v12 = vpop.permute.xlu0 %910 }
  0xac   : > { %1411 = vmatprep.subr.bf16.mxu0 %v1940_v45  ;;  %1433 = vmatprep.subr.bf16.mxu1 %v1946_v46  ;;  %v918_v13 = vsel %vm308_vm1, %v917_v11, %v911_v12 }
  0xad   : > { %v1012_v20 = vpop.permute.xlu1 %1011 }
  0xaf   : > { %1412 = vmatpush3.bf16.msra.mxu0 %v1953_v47  ;;  %1434 = vmatpush3.bf16.msra.mxu1 %v1961_v49 }
  0xb0   : > { %1413 = vmatprep.subr.bf16.mxu0 %v1969_v51  ;;  %1435 = vmatprep.subr.bf16.mxu1 %v1976_v53 }
  0xb1   : > { %v1109_v30 = vpop.permute.xlu1 %1108 }
  0xb3   : > { %1414 = vmatpush3.bf16.msra.mxu0 %v1983_v54  ;;  %1436 = vmatpush3.bf16.msra.mxu1 %v1989_v55 }
  0xb4   : > { %1415 = vmatprep.subr.bf16.mxu0 %v1995_v56  ;;  %1437 = vmatprep.subr.bf16.mxu1 %v2001_v57 }
  0xb5   : > { %v1117_v43 = vpop.permute.xlu1 %1116 }
  0xb7   : > { %1416 = vmatpush3.bf16.msra.mxu0 %v2008_v58  ;;  %1438 = vmatpush3.bf16.msra.mxu1 %v2014_v59 }
  0xb8   : > { %1445 = vmatprep.subr.bf16.mxu0 %v1785_v1  ;;  %1467 = vmatprep.subr.bf16.mxu1 %v1790_v2 }
  0xba   : > { %651 = vmatmul.mubr.bf16.vlgmr.msra.gmra.mrb[4].mxu0 %v322_v18  ;;  %691 = vmatmul.mubr.bf16.vlgmr.msra.gmra.mrb[4].mxu1 %v2057_v17  ;;  %v1008_v18 = vpop.permute.xlu0 %1007 }
  0xbb   : > { %1446 = vmatpush3.bf16.msra.mxu0 %v1797_v3  ;;  %751 = vmatprep.mubr.bf16.mxu0 %v2057_v17 }
  0xbc   : > { %1468 = vmatpush3.bf16.msra.mxu1 %v1806_v4  ;;  %1447 = vmatprep.subr.bf16.mxu0 %v1811_v5 }
  0xbd   : > { %1469 = vmatprep.subr.bf16.mxu1 %v1822_v6  ;;  %791 = vmatprep.mubr.bf16.mxu1 %v2104_v50 }
  0xbe   : > { %v1016_v22 = vpop.permute.xlu0 %1015 }
  0xbf   : > { %1448 = vmatpush3.bf16.msra.mxu0 %v1843_v23 }
  0xc0   : > { %1470 = vmatpush3.bf16.msra.mxu1 %v1849_v25  ;;  %1449 = vmatprep.subr.bf16.mxu0 %v1856_v27 }
  0xc1   : > { %1471 = vmatprep.subr.bf16.mxu1 %v1862_v28 }
  0xc2   : > { %v1113_v36 = vpop.permute.xlu0 %1112 }
  0xc3   : > { %1450 = vmatpush3.bf16.msra.mxu0 %v1872_v31 }
  0xc4   : > { %1472 = vmatpush3.bf16.msra.mxu1 %v1878_v32  ;;  %1451 = vmatprep.subr.bf16.mxu0 %v1884_v33 }
  0xc5   : > { %1473 = vmatprep.subr.bf16.mxu1 %v1891_v35 }
  0xc7   : > { %1452 = vmatpush3.bf16.msra.mxu0 %v1899_v37 }
  0xc8   : > { %1474 = vmatpush3.bf16.msra.mxu1 %v1906_v38  ;;  %1453 = vmatprep.subr.bf16.mxu0 %v1912_v39 }
  0xc9   : > { %1475 = vmatprep.subr.bf16.mxu1 %v1918_v40 }
  0xcb   : > { %1454 = vmatpush3.bf16.msra.mxu0 %v1926_v42 }
  0xcc   : > { %1476 = vmatpush3.bf16.msra.mxu1 %v1934_v44  ;;  %1455 = vmatprep.subr.bf16.mxu0 %v1940_v45 }
  0xcd   : > { %1477 = vmatprep.subr.bf16.mxu1 %v1946_v46 }
  0xcf   : > { %1456 = vmatpush3.bf16.msra.mxu0 %v1953_v47 }
  0xd0   : > { %1478 = vmatpush3.bf16.msra.mxu1 %v1961_v49  ;;  %1457 = vmatprep.subr.bf16.mxu0 %v1969_v51 }
  0xd1   : > { %1479 = vmatprep.subr.bf16.mxu1 %v1976_v53 }
  0xd3   : > { %1458 = vmatpush3.bf16.msra.mxu0 %v1983_v54 }
  0xd4   : > { %1480 = vmatpush3.bf16.msra.mxu1 %v1989_v55  ;;  %1459 = vmatprep.subr.bf16.mxu0 %v1995_v56 }
  0xd5   : > { %1481 = vmatprep.subr.bf16.mxu1 %v2001_v57 }
  0xd7   : > { %1460 = vmatpush3.bf16.msra.mxu0 %v2008_v58 }
  0xd8   : > { %1482 = vmatpush3.bf16.msra.mxu1 %v2014_v59  ;;  %1489 = vmatprep.subr.bf16.mxu0 %v1785_v1 }
  0xd9   : > { %1511 = vmatprep.subr.bf16.mxu1 %v1790_v2 }
  0xda   : > { %752 = vmatmul.mubr.bf16.vlgmr.msra.gmra.mrb[8].mxu0 %v2055_v15  ;;  %v919_v15 = vsel %vm310_vm2, %v918_v13, %v915_v14 }
  0xdb   : > { %792 = vmatmul.mubr.bf16.vlgmr.msra.gmra.mrb[8].mxu1 %v2069_v26  ;;  %1490 = vmatpush3.bf16.msra.mxu0 %v1797_v3  ;;  %v2188_v16 = vpack.c.bf16 %v919_v15, %v919_v15 }
  0xdc   : > { %852 = vmatprep.mubr.bf16.mxu0 %v2069_v26  ;;  %1512 = vmatpush3.bf16.msra.mxu1 %v1806_v4 }
  0xdd   : > { %1491 = vmatprep.subr.bf16.mxu0 %v1811_v5  ;;  %1513 = vmatprep.subr.bf16.mxu1 %v1822_v6 }
  0xde   : > { %892 = vmatprep.mubr.bf16.mxu1 %v2146_v8 }
  0xdf   : > { %1492 = vmatpush3.bf16.msra.mxu0 %v1843_v23 }
  0xe0   : > { %1514 = vmatpush3.bf16.msra.mxu1 %v1849_v25  ;;  %1493 = vmatprep.subr.bf16.mxu0 %v1856_v27 }
  0xe1   : > { %1515 = vmatprep.subr.bf16.mxu1 %v1862_v28 }
  0xe3   : > { %1494 = vmatpush3.bf16.msra.mxu0 %v1872_v31 }
  0xe4   : > { %1516 = vmatpush3.bf16.msra.mxu1 %v1878_v32  ;;  %1495 = vmatprep.subr.bf16.mxu0 %v1884_v33 }
  0xe5   : > { %1517 = vmatprep.subr.bf16.mxu1 %v1891_v35 }
  0xe7   : > { %1496 = vmatpush3.bf16.msra.mxu0 %v1899_v37 }
  0xe8   : > { %1518 = vmatpush3.bf16.msra.mxu1 %v1906_v38  ;;  %1497 = vmatprep.subr.bf16.mxu0 %v1912_v39 }
  0xe9   : > { %1519 = vmatprep.subr.bf16.mxu1 %v1918_v40 }
  0xeb   : > { %1498 = vmatpush3.bf16.msra.mxu0 %v1926_v42 }
  0xec   : > { %1520 = vmatpush3.bf16.msra.mxu1 %v1934_v44  ;;  %1499 = vmatprep.subr.bf16.mxu0 %v1940_v45 }
  0xed   : > { %1521 = vmatprep.subr.bf16.mxu1 %v1946_v46 }
  0xef   : > { %1500 = vmatpush3.bf16.msra.mxu0 %v1953_v47 }
  0xf0   : > { %1522 = vmatpush3.bf16.msra.mxu1 %v1961_v49  ;;  %1501 = vmatprep.subr.bf16.mxu0 %v1969_v51 }
  0xf1   : > { %1523 = vmatprep.subr.bf16.mxu1 %v1976_v53 }
  0xf3   : > { %1502 = vmatpush3.bf16.msra.mxu0 %v1983_v54 }
  0xf4   : > { %1524 = vmatpush3.bf16.msra.mxu1 %v1989_v55  ;;  %1503 = vmatprep.subr.bf16.mxu0 %v1995_v56 }
  0xf5   : > { %1525 = vmatprep.subr.bf16.mxu1 %v2001_v57 }
  0xf7   : > { %1504 = vmatpush3.bf16.msra.mxu0 %v2008_v58 }
  0xf8   : > { %1526 = vmatpush3.bf16.msra.mxu1 %v2014_v59  ;;  %1533 = vmatprep.subr.bf16.mxu0 %v1785_v1 }
  0xf9   : > { %1555 = vmatprep.subr.bf16.mxu1 %v1790_v2 }
  0xfa   : > { %853 = vmatmul.mubr.bf16.vlgmr.msra.gmra.mrb[12].mxu0 %v2057_v17  ;;  %v1346_v17 = vld [vmem:[%s1816_s28 + $0x80] sm:$0x7f] }
  0xfb   : > { %893 = vmatmul.mubr.bf16.vlgmr.msra.gmra.mrb[12].mxu1 %v2104_v50  ;;  %1534 = vmatpush3.bf16.msra.mxu0 %v1797_v3  ;;  %v1018_v19 = vsel %vm306_vm0, %v1346_v17, %v1008_v18 }
  0xfc   : > { %953 = vmatprep.mubr.bf16.mxu0 %v2104_v50  ;;  %1556 = vmatpush3.bf16.msra.mxu1 %v1806_v4  ;;  %v1019_v21 = vsel %vm308_vm1, %v1018_v19, %v1012_v20 }
  0xfd   : > { %1535 = vmatprep.subr.bf16.mxu0 %v1811_v5  ;;  %1557 = vmatprep.subr.bf16.mxu1 %v1822_v6  ;;  %v1020_v24 = vsel %vm310_vm2, %v1019_v21, %v1016_v22 }
  0xfe   : > { %993 = vmatprep.mubr.bf16.mxu1 %v2188_v16  ;;  %v2230_v29 = vpack.c.bf16 %v1020_v24, %v1020_v24 }
  0xff   : > { %1536 = vmatpush3.bf16.msra.mxu0 %v1843_v23 }
 0x100   : > { %1558 = vmatpush3.bf16.msra.mxu1 %v1849_v25  ;;  %1537 = vmatprep.subr.bf16.mxu0 %v1856_v27 }
 0x101   : > { %1559 = vmatprep.subr.bf16.mxu1 %v1862_v28 }
 0x103   : > { %1538 = vmatpush3.bf16.msra.mxu0 %v1872_v31 }
 0x104   : > { %1560 = vmatpush3.bf16.msra.mxu1 %v1878_v32  ;;  %1539 = vmatprep.subr.bf16.mxu0 %v1884_v33 }
 0x105   : > { %1561 = vmatprep.subr.bf16.mxu1 %v1891_v35 }
 0x107   : > { %1540 = vmatpush3.bf16.msra.mxu0 %v1899_v37 }
 0x108   : > { %1562 = vmatpush3.bf16.msra.mxu1 %v1906_v38  ;;  %1541 = vmatprep.subr.bf16.mxu0 %v1912_v39 }
 0x109   : > { %1563 = vmatprep.subr.bf16.mxu1 %v1918_v40 }
 0x10b   : > { %1542 = vmatpush3.bf16.msra.mxu0 %v1926_v42 }
 0x10c   : > { %1564 = vmatpush3.bf16.msra.mxu1 %v1934_v44  ;;  %1543 = vmatprep.subr.bf16.mxu0 %v1940_v45 }
 0x10d   : > { %1565 = vmatprep.subr.bf16.mxu1 %v1946_v46 }
 0x10f   : > { %1544 = vmatpush3.bf16.msra.mxu0 %v1953_v47 }
 0x110   : > { %1566 = vmatpush3.bf16.msra.mxu1 %v1961_v49  ;;  %1545 = vmatprep.subr.bf16.mxu0 %v1969_v51 }
 0x111   : > { %1567 = vmatprep.subr.bf16.mxu1 %v1976_v53 }
 0x113   : > { %1546 = vmatpush3.bf16.msra.mxu0 %v1983_v54 }
 0x114   : > { %1568 = vmatpush3.bf16.msra.mxu1 %v1989_v55  ;;  %1547 = vmatprep.subr.bf16.mxu0 %v1995_v56 }
 0x115   : > { %1569 = vmatprep.subr.bf16.mxu1 %v2001_v57 }
 0x117   : > { %1548 = vmatpush3.bf16.msra.mxu0 %v2008_v58 }
 0x118   : > { %1570 = vmatpush3.bf16.msra.mxu1 %v2014_v59  ;;  %1577 = vmatprep.subr.bf16.mxu0 %v1785_v1 }
 0x119   : > { %1599 = vmatprep.subr.bf16.mxu1 %v1790_v2 }
 0x11a   : > { %954 = vmatmul.mubr.bf16.vlgmr.msra.gmra.mrb[16].mxu0 %v2069_v26  ;;  %v1350_v26 = vld [vmem:[%s1816_s28 + $0x90] sm:$0x7f]  ;;  %s1666_s28 = smul.u32 56, %s2343_s15 }
 0x11b   : > { %994 = vmatmul.mubr.bf16.vlgmr.msra.gmra.mrb[16].mxu1 %v2146_v8  ;;  %1578 = vmatpush3.bf16.msra.mxu0 %v1797_v3  ;;  %v1119_v34 = vsel %vm306_vm0, %v1350_v26, %v1109_v30 }
 0x11c   : > { %1054 = vmatprep.mubr.bf16.mxu0 %v2146_v8  ;;  %1600 = vmatpush3.bf16.msra.mxu1 %v1806_v4  ;;  %v1120_v41 = vsel %vm308_vm1, %v1119_v34, %v1113_v36  ;;  %s2312_s16 = scalar_lea.vmem %s2341_s3, %s1666_s28 }
 0x11d   : > { %1579 = vmatprep.subr.bf16.mxu0 %v1811_v5  ;;  %1601 = vmatprep.subr.bf16.mxu1 %v1822_v6  ;;  %v1121_v48 = vsel %vm310_vm2, %v1120_v41, %v1117_v43 }
 0x11e   : > { %1094 = vmatprep.mubr.bf16.mxu1 %v2230_v29  ;;  %v1122_v52 = vpack.c.bf16 %v1121_v48, %v1121_v48 }
 0x11f   : > { %1580 = vmatpush3.bf16.msra.mxu0 %v1843_v23 }
 0x120   : > { %1602 = vmatpush3.bf16.msra.mxu1 %v1849_v25  ;;  %1581 = vmatprep.subr.bf16.mxu0 %v1856_v27 }
 0x121   : > { %1603 = vmatprep.subr.bf16.mxu1 %v1862_v28 }
 0x123   : > { %1582 = vmatpush3.bf16.msra.mxu0 %v1872_v31 }
 0x124   : > { %1604 = vmatpush3.bf16.msra.mxu1 %v1878_v32  ;;  %1583 = vmatprep.subr.bf16.mxu0 %v1884_v33 }
 0x125   : > { %1605 = vmatprep.subr.bf16.mxu1 %v1891_v35 }
 0x127   : > { %1584 = vmatpush3.bf16.msra.mxu0 %v1899_v37 }
 0x128   : > { %1606 = vmatpush3.bf16.msra.mxu1 %v1906_v38  ;;  %1585 = vmatprep.subr.bf16.mxu0 %v1912_v39 }
 0x129   : > { %1607 = vmatprep.subr.bf16.mxu1 %v1918_v40 }
 0x12b   : > { %1586 = vmatpush3.bf16.msra.mxu0 %v1926_v42 }
 0x12c   : > { %1608 = vmatpush3.bf16.msra.mxu1 %v1934_v44  ;;  %1587 = vmatprep.subr.bf16.mxu0 %v1940_v45 }
 0x12d   : > { %1609 = vmatprep.subr.bf16.mxu1 %v1946_v46 }
 0x12f   : > { %1588 = vmatpush3.bf16.msra.mxu0 %v1953_v47 }
 0x130   : > { %1610 = vmatpush3.bf16.msra.mxu1 %v1961_v49  ;;  %1589 = vmatprep.subr.bf16.mxu0 %v1969_v51 }
 0x131   : > { %1611 = vmatprep.subr.bf16.mxu1 %v1976_v53 }
 0x133   : > { %1590 = vmatpush3.bf16.msra.mxu0 %v1983_v54 }
 0x134   : > { %1612 = vmatpush3.bf16.msra.mxu1 %v1989_v55  ;;  %1591 = vmatprep.subr.bf16.mxu0 %v1995_v56 }
 0x135   : > { %1613 = vmatprep.subr.bf16.mxu1 %v2001_v57 }
 0x137   : > { %1592 = vmatpush3.bf16.msra.mxu0 %v2008_v58 }
 0x138   : > { %1614 = vmatpush3.bf16.msra.mxu1 %v2014_v59  ;;  %1621 = vmatprep.subr.bf16.mxu0 %v1785_v1 }
 0x139   : > { %1643 = vmatprep.subr.bf16.mxu1 %v1790_v2 }
 0x13a   : > { %1055 = vmatmul.mubr.bf16.vlgmr.msra.gmra.mrb[20].mxu0 %v2104_v50 }
 0x13b   : > { %1095 = vmatmul.mubr.bf16.vlgmr.msra.gmra.mrb[20].mxu1 %v2188_v16  ;;  %1622 = vmatpush3.bf16.msra.mxu0 %v1797_v3 }
 0x13c   : > { %1155 = vmatprep.mubr.bf16.mxu0 %v2188_v16  ;;  %1644 = vmatpush3.bf16.msra.mxu1 %v1806_v4 }
 0x13d   : > { %1623 = vmatprep.subr.bf16.mxu0 %v1811_v5  ;;  %1645 = vmatprep.subr.bf16.mxu1 %v1822_v6 }
 0x13e   : > { %1195 = vmatprep.mubr.bf16.mxu1 %v1122_v52 }
 0x13f   : > { %1624 = vmatpush3.bf16.msra.mxu0 %v1843_v23 }
 0x140   : > { %1646 = vmatpush3.bf16.msra.mxu1 %v1849_v25  ;;  %1625 = vmatprep.subr.bf16.mxu0 %v1856_v27  ;;  %v2307_v27 = vld [vmem:[#allocation2] ss:$0 sm:$0xff] }
 0x141   : > { %1647 = vmatprep.subr.bf16.mxu1 %v1862_v28 }
 0x143   : > { %1626 = vmatpush3.bf16.msra.mxu0 %v1872_v31 }
 0x144   : > { %1648 = vmatpush3.bf16.msra.mxu1 %v1878_v32  ;;  %1627 = vmatprep.subr.bf16.mxu0 %v1884_v33 }
 0x145   : > { %1649 = vmatprep.subr.bf16.mxu1 %v1891_v35 }
 0x147   : > { %1628 = vmatpush3.bf16.msra.mxu0 %v1899_v37 }
 0x148   : > { %1650 = vmatpush3.bf16.msra.mxu1 %v1906_v38  ;;  %1629 = vmatprep.subr.bf16.mxu0 %v1912_v39 }
 0x149   : > { %1651 = vmatprep.subr.bf16.mxu1 %v1918_v40 }
 0x14b   : > { %1630 = vmatpush3.bf16.msra.mxu0 %v1926_v42 }
 0x14c   : > { %1652 = vmatpush3.bf16.msra.mxu1 %v1934_v44  ;;  %1631 = vmatprep.subr.bf16.mxu0 %v1940_v45 }
 0x14d   : > { %1653 = vmatprep.subr.bf16.mxu1 %v1946_v46 }
 0x14f   : > { %1632 = vmatpush3.bf16.msra.mxu0 %v1953_v47 }
 0x150   : > { %1654 = vmatpush3.bf16.msra.mxu1 %v1961_v49  ;;  %1633 = vmatprep.subr.bf16.mxu0 %v1969_v51 }
 0x151   : > { %1655 = vmatprep.subr.bf16.mxu1 %v1976_v53 }
 0x153   : > { %1634 = vmatpush3.bf16.msra.mxu0 %v1983_v54 }
 0x154   : > { %1656 = vmatpush3.bf16.msra.mxu1 %v1989_v55  ;;  %1635 = vmatprep.subr.bf16.mxu0 %v1995_v56 }
 0x155   : > { %1657 = vmatprep.subr.bf16.mxu1 %v2001_v57 }
 0x157   : > { %1636 = vmatpush3.bf16.msra.mxu0 %v2008_v58 }
 0x158   : > { %1658 = vmatpush3.bf16.msra.mxu1 %v2014_v59 }
 0x15a   : > { %1156 = vmatmul.mubr.bf16.vlgmr.msra.gmra.mrb[24].mxu0 %v2146_v8 }
 0x15b   : > { %1196 = vmatmul.mubr.bf16.vlgmr.msra.gmra.mrb[24].mxu1 %v2230_v29 }
 0x16d   : > { %v1373_v1 = vpop.f32.mrb[0].mxu0  ;;  %v1395_v2 = vpop.f32.mrb[0].mxu1 }
 0x16e   : > { %v1374_v3 = vpop.f32.mrb[1].mxu0  ;;  %v1396_v4 = vpop.f32.mrb[1].mxu1 }
 0x16f   : > { %v1375_v5 = vadd.f32 %v1374_v3, %v1373_v1  ;;  %v1397_v6 = vadd.f32 %v1396_v4, %v1395_v2  ;;  %v1376_v23 = vpop.f32.mrb[2].mxu0  ;;  %v1398_v25 = vpop.f32.mrb[2].mxu1 }
 0x170   : > { %v1377_v28 = vpop.f32.mrb[3].mxu0  ;;  %v1399_v31 = vpop.f32.mrb[3].mxu1 }
 0x171   : > { %v592_v32 = vadd.f32 %v1397_v6, %v1375_v5 }
 0x173   : > { %v1209_v33 = vadd.f32 %v2307_v27, %v592_v32 }
 0x175   : > { %1217 = vst.msk [vmem:[%s2312_s16] sm:$0x7f] %vm1216_vm3, %v1209_v33 }
 0x18d   : > { %v1417_v35 = vpop.f32.mrb[4].mxu0  ;;  %v1439_v37 = vpop.f32.mrb[4].mxu1 }
 0x18e   : > { %v1418_v38 = vpop.f32.mrb[5].mxu0  ;;  %v1440_v39 = vpop.f32.mrb[5].mxu1 }
 0x18f   : > { %v1419_v40 = vadd.f32 %v1418_v38, %v1417_v35  ;;  %v1441_v42 = vadd.f32 %v1440_v39, %v1439_v37  ;;  %v1420_v44 = vpop.f32.mrb[6].mxu0  ;;  %v1442_v45 = vpop.f32.mrb[6].mxu1 }
 0x190   : > { %v1421_v46 = vpop.f32.mrb[7].mxu0  ;;  %v1443_v47 = vpop.f32.mrb[7].mxu1 }
 0x191   : > { %v693_v49 = vadd.f32 %v1441_v42, %v1419_v40 }
 0x193   : > { %v1210_v51 = vadd.f32 %v2307_v27, %v693_v49 }
 0x195   : > { %1218 = vst.msk [vmem:[%s2312_s16 + $0x8] sm:$0x7f] %vm1216_vm3, %v1210_v51 }
 0x1ad   : > { %v1461_v53 = vpop.f32.mrb[8].mxu0 }
 0x1ae   : > { %v1483_v54 = vpop.f32.mrb[8].mxu1  ;;  %v1462_v55 = vpop.f32.mrb[9].mxu0 }
 0x1af   : > { %v1463_v56 = vadd.f32 %v1462_v55, %v1461_v53  ;;  %v1484_v57 = vpop.f32.mrb[9].mxu1  ;;  %v1464_v58 = vpop.f32.mrb[10].mxu0 }
 0x1b0   : > { %v1485_v59 = vadd.f32 %v1484_v57, %v1483_v54  ;;  %v1486_v50 = vpop.f32.mrb[10].mxu1  ;;  %v1465_v60 = vpop.f32.mrb[11].mxu0 }
 0x1b1   : > { %v1487_v61 = vpop.f32.mrb[11].mxu1 }
 0x1b2   : > { %v794_v62 = vadd.f32 %v1485_v59, %v1463_v56 }
 0x1b4   : > { %v1211_v63 = vadd.f32 %v2307_v27, %v794_v62 }
 0x1b6   : > { %1219 = vst.msk [vmem:[%s2312_s16 + $0x10] sm:$0x7f] %vm1216_vm3, %v1211_v63 }
 0x1cd   : > { %v1505_v0 = vpop.f32.mrb[12].mxu0 }
 0x1ce   : > { %v1527_v7 = vpop.f32.mrb[12].mxu1  ;;  %v1506_v8 = vpop.f32.mrb[13].mxu0 }
 0x1cf   : > { %v1507_v9 = vadd.f32 %v1506_v8, %v1505_v0  ;;  %v1528_v10 = vpop.f32.mrb[13].mxu1  ;;  %v1508_v11 = vpop.f32.mrb[14].mxu0 }
 0x1d0   : > { %v1529_v12 = vadd.f32 %v1528_v10, %v1527_v7  ;;  %v1530_v13 = vpop.f32.mrb[14].mxu1  ;;  %v1509_v14 = vpop.f32.mrb[15].mxu0 }
 0x1d1   : > { %v1531_v15 = vpop.f32.mrb[15].mxu1 }
 0x1d2   : > { %v895_v16 = vadd.f32 %v1529_v12, %v1507_v9 }
 0x1d4   : > { %v1212_v17 = vadd.f32 %v2307_v27, %v895_v16 }
 0x1d6   : > { %1220 = vst.msk [vmem:[%s2312_s16 + $0x18] sm:$0x7f] %vm1216_vm3, %v1212_v17 }
 0x1ed   : > { %v1549_v18 = vpop.f32.mrb[16].mxu0 }
 0x1ee   : > { %v1571_v19 = vpop.f32.mrb[16].mxu1  ;;  %v1550_v20 = vpop.f32.mrb[17].mxu0 }
 0x1ef   : > { %v1551_v21 = vadd.f32 %v1550_v20, %v1549_v18  ;;  %v1572_v22 = vpop.f32.mrb[17].mxu1  ;;  %v1552_v24 = vpop.f32.mrb[18].mxu0 }
 0x1f0   : > { %v1573_v29 = vadd.f32 %v1572_v22, %v1571_v19  ;;  %v1574_v26 = vpop.f32.mrb[18].mxu1  ;;  %v1553_v30 = vpop.f32.mrb[19].mxu0 }
 0x1f1   : > { %v1575_v34 = vpop.f32.mrb[19].mxu1 }
 0x1f2   : > { %v996_v36 = vadd.f32 %v1573_v29, %v1551_v21 }
 0x1f4   : > { %v1213_v41 = vadd.f32 %v2307_v27, %v996_v36 }
 0x1f6   : > { %1221 = vst.msk [vmem:[%s2312_s16 + $0x20] sm:$0x7f] %vm1216_vm3, %v1213_v41 }
 0x20d   : > { %v1593_v43 = vpop.f32.mrb[20].mxu0 }
 0x20e   : > { %v1615_v48 = vpop.f32.mrb[20].mxu1  ;;  %v1594_v52 = vpop.f32.mrb[21].mxu0 }
 0x20f   : > { %v1595_v1 = vadd.f32 %v1594_v52, %v1593_v43  ;;  %v1616_v2 = vpop.f32.mrb[21].mxu1  ;;  %v1596_v3 = vpop.f32.mrb[22].mxu0 }
 0x210   : > { %v1617_v4 = vadd.f32 %v1616_v2, %v1615_v48  ;;  %v1618_v5 = vpop.f32.mrb[22].mxu1  ;;  %v1597_v6 = vpop.f32.mrb[23].mxu0 }
 0x211   : > { %v1619_v23 = vpop.f32.mrb[23].mxu1 }
 0x212   : > { %v1097_v25 = vadd.f32 %v1617_v4, %v1595_v1 }
 0x214   : > { %v1214_v28 = vadd.f32 %v2307_v27, %v1097_v25 }
 0x216   : > { %1222 = vst.msk [vmem:[%s2312_s16 + $0x28] sm:$0x7f] %vm1216_vm3, %v1214_v28 }
 0x22d   : > { %v1637_v31 = vpop.f32.mrb[24].mxu0 }
 0x22e   : > { %v1659_v32 = vpop.f32.mrb[24].mxu1  ;;  %v1638_v33 = vpop.f32.mrb[25].mxu0 }
 0x22f   : > { %v1639_v35 = vadd.f32 %v1638_v33, %v1637_v31  ;;  %v1660_v37 = vpop.f32.mrb[25].mxu1  ;;  %v1640_v38 = vpop.f32.mrb[26].mxu0 }
 0x230   : > { %v1661_v39 = vadd.f32 %v1660_v37, %v1659_v32  ;;  %v1662_v40 = vpop.f32.mrb[26].mxu1  ;;  %v1641_v42 = vpop.f32.mrb[27].mxu0 }
 0x231   : > { %v1663_v44 = vpop.f32.mrb[27].mxu1 }
 0x232   : > { %v1198_v45 = vadd.f32 %v1661_v39, %v1639_v35 }
 0x234   : > { %v1215_v46 = vadd.f32 %v2307_v27, %v1198_v45 }
 0x236   : > { %1223 = vst.msk [vmem:[%s2312_s16 + $0x30] sm:$0x7f] %vm1216_vm3, %v1215_v46 }
 0x237 PF: > { %s15_s14 = sadd.s32 1, %s1746_s14  }
 0x238   : > { %p12_p4 = scmp.ge.s32.totalorder %s15_s14, 4  }
 0x23a   :  { %14 = sbr.rel (!%p12_p4) target bundleno = 3 (0x3), region = 71 }

// kernel: mesh_rgb_discriminator_forward.12
= control target key start
LH: loop header
LB: loop body
LE: loop exit
PB: predicated region body
PF: predicated region fallthrough
CT: control target
= control target key end

     0   :  { %s800_s12 = smov 0   ;;  %s954_s0 = inlined_call_operand.vmem [shape: f32[2,6,6,16], index: 0, kind: input, shape index: {}]   ;;  %s955_s1 = inlined_call_operand.vmem [shape: bf16[64,8], index: 1, kind: input, shape index: {}]   ;;  %s956_s2 = inlined_call_operand.vmem [shape: f32[1,8], index: 2, kind: input, shape index: {}]   ;;  %s957_s3 = inlined_call_operand.vmem [shape: f32[2,5,5,8], index: 3, kind: output, shape index: {}]  }
   0x1 LB: > { %s604_s13 = sadd.s32 4294967295, %s773_s12   ;;  %p608_p0 = scmp.ge.s32.totalorder %s773_s12, 1  ;;  %s773_s12 = sphi %s800_s12, %s13_s12  }
   0x2   : > { %p137_p1 = scmp.lt.s32.totalorder %s773_s12, 3 }
   0x4   : > { %p138_p2 = pnand %p608_p0, %p137_p1 }
   0x5   : > { %p161_p3 = scmp.lt.s32.totalorder (!%p138_p2), %s604_s13, 1  ;;  %v811_v0 = vld [vmem:[%s955_s1] sm:$0xff] (!%p138_p2)   ;;  %v775_v1 = vmov (!%p138_p2), 0.0   ;;  %v821_v2 = vld [vmem:[%s955_s1 + $0x8] sm:$0xff] (!%p138_p2)   ;;  %v836_v3 = vld [vmem:[%s955_s1 + $0x10] sm:$0xff] (!%p138_p2)   ;;  %vm776_vm0 = vmmov (!%p138_p2), 0  }
   0x6   : > { %141 = sbr.rel (%p138_p2) target bundleno = 391 (0x187), region = 32  ;;  %658 = vmatprep.subr.bf16.mxu0 (!%p138_p2), %v775_v1  ;;  %670 = vmatprep.subr.bf16.mxu1 (!%p138_p2), %v775_v1  ;;  %s777_s24 = smov (!%p138_p2), 16   ;;  %v860_v12 = vld [vmem:[%s955_s1 + $0x18] sm:$0xff] (!%p138_p2)   ;;  %vm198_vm1 = vcmask (!%p138_p2), 130048   ;;  %vm200_vm2 = vcmask (!%p138_p2), 261120   ;;  %vm202_vm3 = vcmask (!%p138_p2), 392192  }
   0x7   : > { %659 = vmatpush3.bf16.msra.mxu0 (!%p138_p2), %v811_v0  ;;  %671 = vmatpush3.bf16.msra.mxu1 (!%p138_p2), %v811_v0  ;;  %s778_s25 = smov (!%p138_p2), 48   ;;  %s779_s28 = smov (!%p138_p2), 32   ;;  %vm229_vm4 = vcmask (!%p138_p2), 523264   ;;  %vm543_vm6 = vcmask (!%p138_p2), 61440  }
   0x8   : > { %660 = vmatprep.subr.bf16.mxu0 (!%p138_p2), %v775_v1  ;;  %672 = vmatprep.subr.bf16.mxu1 (!%p138_p2), %v775_v1 }
   0x9   : > { %666 = vmatprep.mubr.msk.bf16.mxu0 (!%p138_p2), %vm776_vm0, %v775_v1  ;;  %678 = vmatprep.mubr.msk.bf16.mxu1 (!%p138_p2), %vm776_vm0, %v775_v1 }
   0xb   : > { %661 = vmatpush3.bf16.msra.mxu0 (!%p138_p2), %v821_v2  ;;  %673 = vmatpush3.bf16.msra.mxu1 (!%p138_p2), %v821_v2 }
   0xc   : > { %662 = vmatprep.subr.bf16.mxu0 (!%p138_p2), %v775_v1  ;;  %674 = vmatprep.subr.bf16.mxu1 (!%p138_p2), %v775_v1 }
   0xd   : > { %s959_s13 = smov (!%p161_p3, %s604_s13), 1 }
   0xe   : > { %s718_s18 = smul.u32 48, %s959_s13 }
   0xf   : > { %663 = vmatpush3.bf16.msra.mxu0 %v836_v3  ;;  %675 = vmatpush3.bf16.msra.mxu1 %v836_v3  ;;  %s719_s4 = smul.u32 40, %s959_s13 }
  0x10   : > { %s830_s21 = scalar_lea.vmem %s954_s0, %s718_s18  ;;  %664 = vmatprep.subr.bf16.mxu0 %v775_v1  ;;  %676 = vmatprep.subr.bf16.mxu1 %v775_v1 }
  0x11   : > { %v182_v4 = vld [vmem:[%s830_s21 + $0x1] sm:$0x1f]  ;;  %v619_v5 = vld [vmem:[%s830_s21 + $0x11] sm:$0x1f]  ;;  %v612_v6 = vld [vmem:[%s830_s21 + $0x9] sm:$0x1f]  ;;  %s939_s7 = scalar_lea.vmem %s957_s3, %s719_s4 }
  0x12   : > { %187 = vrot.lane.b32.xlu0 %v182_v4, %s777_s24  ;;  %v611_v7 = vld [vmem:[%s830_s21 + $0x8] sm:$0x1f]  ;;  %v733_v8 = vpack.i.bf16 %v619_v5, %v612_v6  ;;  %195 = vrot.lane.b32.xlu1 %v612_v6, %s778_s25  ;;  %v618_v9 = vld [vmem:[%s830_s21 + $0x10] sm:$0x1f] }
  0x13   : > { %v851_v10 = vld [vmem:[%s830_s21 + $0x18] sm:$0x1f]  ;;  %v625_v15 = vld [vmem:[%s830_s21 + $0x21] sm:$0x1f]  ;;  %v627_v17 = vld [vmem:[%s830_s21 + $0x28] sm:$0x1f]  ;;  %665 = vmatpush3.bf16.msra.mxu0 %v860_v12  ;;  %677 = vmatpush3.bf16.msra.mxu1 %v860_v12 }
  0x14   : > { %v622_v11 = vld [vmem:[%s830_s21 + $0x19] sm:$0x1f]  ;;  %v738_v13 = vpack.i.bf16 %v851_v10, %v618_v9  ;;  %v869_v16 = vld [vmem:[%s830_s21 + $0x20] sm:$0x1f]  ;;  %682 = vmatprep.subr.bf16.mxu0 %v775_v1  ;;  %694 = vmatprep.subr.bf16.mxu1 %v775_v1  ;;  %v628_v20 = vld [vmem:[%s830_s21 + $0x29] sm:$0x1f] }
  0x15   : > { %v743_v14 = vpack.i.bf16 %v622_v11, %v619_v5  ;;  %v748_v18 = vpack.i.bf16 %v625_v15, %v622_v11  ;;  %v753_v19 = vpack.i.bf16 %v627_v17, %v869_v16  ;;  %v758_v21 = vpack.i.bf16 %v628_v20, %v625_v15  ;;  %v181_v23 = vld [vmem:[%s830_s21] sm:$0x1f] }
  0x16   : > { %191 = vrot.lane.b32.xlu0 %v611_v7, %s779_s28  ;;  %734 = vrot.lane.b32.xlu1 %v733_v8, %s777_s24 }
  0x1a   : > { %739 = vrot.lane.b32.xlu0 %v738_v13, %s779_s28  ;;  %744 = vrot.lane.b32.xlu1 %v743_v14, %s778_s25 }
  0x1e   : > { %749 = vrot.lane.b32.xlu0 %v748_v18, %s777_s24  ;;  %754 = vrot.lane.b32.xlu1 %v753_v19, %s779_s28 }
  0x22   : > { %759 = vrot.lane.b32.xlu0 %v758_v21, %s778_s25 }
  0x84   : > { %v188_v22 = vpop.permute.xlu0 %187  ;;  %v196_v24 = vpop.permute.xlu1 %195 }
  0x85   : > { %v199_v25 = vsel %vm198_vm1, %v181_v23, %v188_v22 }
  0x88   : > { %v192_v26 = vpop.permute.xlu0 %191  ;;  %v735_v28 = vpop.permute.xlu1 %734 }
  0x89   : > { %v201_v27 = vsel %vm200_vm2, %v199_v25, %v192_v26  ;;  %v736_v30 = vunpack.i.l.bf16 %v735_v28  ;;  %v737_v32 = vunpack.i.h.bf16 %v735_v28 }
  0x8a   : > { %v203_v29 = vsel %vm202_vm3, %v201_v27, %v196_v24 }
  0x8b   : > { %v204_v31 = vpack.c.bf16 %v203_v29, %v203_v29  ;;  %v287_v33 = vsel %vm198_vm1, %v611_v7, %v736_v30  ;;  %v348_v40 = vsel %vm198_vm1, %v618_v9, %v737_v32 }
  0x8c   : > { %v740_v34 = vpop.permute.xlu0 %739  ;;  %v745_v36 = vpop.permute.xlu1 %744 }
  0x8d   : > { %667 = vmatmul.mubr.msk.bf16.vlgmr.msra.gmra.mrb[0].mxu0 %vm229_vm4, %v204_v31  ;;  %v741_v35 = vunpack.i.l.bf16 %v740_v34  ;;  %v746_v37 = vunpack.i.l.bf16 %v745_v36  ;;  %v742_v38 = vunpack.i.h.bf16 %v740_v34  ;;  %v747_v44 = vunpack.i.h.bf16 %v745_v36 }
  0x8e   : > { %683 = vmatpush3.bf16.msra.mxu0 %v811_v0  ;;  %690 = vmatprep.mubr.msk.bf16.mxu0 %vm776_vm0, %v775_v1 }
  0x8f   : > { %684 = vmatprep.subr.bf16.mxu0 %v775_v1  ;;  %v288_v39 = vsel %vm200_vm2, %v287_v33, %v741_v35  ;;  %v349_v47 = vsel %vm200_vm2, %v348_v40, %v742_v38 }
  0x90   : > { %v289_v41 = vsel %vm202_vm3, %v288_v39, %v746_v37  ;;  %v750_v42 = vpop.permute.xlu0 %749  ;;  %v755_v46 = vpop.permute.xlu1 %754  ;;  %v350_v50 = vsel %vm202_vm3, %v349_v47, %v747_v44 }
  0x91   : > { %v290_v43 = vpack.c.bf16 %v289_v41, %v289_v41  ;;  %v751_v45 = vunpack.i.l.bf16 %v750_v42  ;;  %v756_v48 = vunpack.i.l.bf16 %v755_v46  ;;  %v351_v53 = vpack.c.bf16 %v350_v50, %v350_v50 }
  0x92   : > { %685 = vmatpush3.bf16.msra.mxu0 %v821_v2  ;;  %v752_v56 = vunpack.i.h.bf16 %v750_v42  ;;  %v757_v58 = vunpack.i.h.bf16 %v755_v46 }
  0x93   : > { %686 = vmatprep.subr.bf16.mxu0 %v775_v1  ;;  %679 = vmatmul.mubr.msk.bf16.vlgmr.msra.gmra.mrb[0].mxu1 %vm229_vm4, %v290_v43  ;;  %v409_v51 = vsel %vm198_vm1, %v851_v10, %v751_v45 }
  0x94   : > { %695 = vmatpush3.bf16.msra.mxu1 %v811_v0  ;;  %702 = vmatprep.mubr.msk.bf16.mxu1 %vm776_vm0, %v775_v1  ;;  %v760_v49 = vpop.permute.xlu0 %759  ;;  %v410_v54 = vsel %vm200_vm2, %v409_v51, %v756_v48  ;;  %v470_v59 = vsel %vm198_vm1, %v869_v16, %v752_v56 }
  0x95   : > { %696 = vmatprep.subr.bf16.mxu1 %v775_v1  ;;  %v761_v52 = vunpack.i.l.bf16 %v760_v49  ;;  %v762_v60 = vunpack.i.h.bf16 %v760_v49  ;;  %v471_v61 = vsel %vm200_vm2, %v470_v59, %v757_v58 }
  0x96   : > { %687 = vmatpush3.bf16.msra.mxu0 %v836_v3 }
  0x97   : > { %688 = vmatprep.subr.bf16.mxu0 %v775_v1  ;;  %v411_v55 = vsel %vm202_vm3, %v410_v54, %v761_v52  ;;  %v472_v62 = vsel %vm202_vm3, %v471_v61, %v762_v60 }
  0x98   : > { %697 = vmatpush3.bf16.msra.mxu1 %v821_v2  ;;  %v412_v57 = vpack.c.bf16 %v411_v55, %v411_v55  ;;  %v473_v63 = vpack.c.bf16 %v472_v62, %v472_v62 }
  0x99   : > { %698 = vmatprep.subr.bf16.mxu1 %v775_v1 }
  0x9a   : > { %689 = vmatpush3.bf16.msra.mxu0 %v860_v12 }
  0x9b   : > { %706 = vmatprep.subr.bf16.mxu0 %v775_v1 }
  0x9c   : > { %699 = vmatpush3.bf16.msra.mxu1 %v836_v3 }
  0x9d   : > { %691 = vmatmul.mubr.msk.bf16.vlgmr.msra.gmra.mrb[4].mxu0 %vm229_vm4, %v351_v53  ;;  %700 = vmatprep.subr.bf16.mxu1 %v775_v1 }
  0x9e   : > { %707 = vmatpush3.bf16.msra.mxu0 %v811_v0  ;;  %714 = vmatprep.mubr.msk.bf16.mxu0 %vm776_vm0, %v775_v1  ;;  %v630_v0 = vld [vmem:[%s956_s2] ss:$0 sm:$0xff] }
  0x9f   : > { %708 = vmatprep.subr.bf16.mxu0 %v775_v1 }
  0xa0   : > { %701 = vmatpush3.bf16.msra.mxu1 %v860_v12 }
  0xa2   : > { %709 = vmatpush3.bf16.msra.mxu0 %v821_v2 }
  0xa3   : > { %710 = vmatprep.subr.bf16.mxu0 %v775_v1  ;;  %703 = vmatmul.mubr.msk.bf16.vlgmr.msra.gmra.mrb[4].mxu1 %vm229_vm4, %v412_v57 }
  0xa6   : > { %711 = vmatpush3.bf16.msra.mxu0 %v836_v3 }
  0xa7   : > { %712 = vmatprep.subr.bf16.mxu0 %v775_v1 }
  0xaa   : > { %713 = vmatpush3.bf16.msra.mxu0 %v860_v12 }
  0xad   : > { %715 = vmatmul.mubr.msk.bf16.vlgmr.msra.gmra.mrb[8].mxu0 %vm229_vm4, %v473_v63 }
 0x160   : > { %v267_v2 = vpop.f32.mrb[0].mxu0 }
 0x161   : > { %v523_v4 = vadd.f32 %v630_v0, %v267_v2  ;;  %v668_v5 = vpop.f32.mrb[1].mxu0 }
 0x162   : > { %v270_v6 = vpop.f32.mrb[2].mxu0 }
 0x163   : > { %vm528_vm5 = vcmp.ge.f32.partialorder %v523_v4, 0.0  ;;  %v533_v1 = vmul.f32 0.2, %v523_v4  ;;  %v669_v3 = vpop.f32.mrb[3].mxu0 }
 0x165   : > { %v538_v7 = vsel %vm528_vm5, %v523_v4, %v533_v1 }
 0x166   : > { %544 = vst.msk [vmem:[%s939_s7] sm:$0x1f] %vm543_vm6, %v538_v7  ;;  %v328_v8 = vpop.f32.mrb[0].mxu1 }
 0x167   : > { %v524_v9 = vadd.f32 %v630_v0, %v328_v8  ;;  %v680_v10 = vpop.f32.mrb[1].mxu1 }
 0x168   : > { %v331_v11 = vpop.f32.mrb[2].mxu1 }
 0x169   : > { %vm529_vm7 = vcmp.ge.f32.partialorder %v524_v9, 0.0  ;;  %v534_v12 = vmul.f32 0.2, %v524_v9  ;;  %v681_v13 = vpop.f32.mrb[3].mxu1 }
 0x16b   : > { %v539_v14 = vsel %vm529_vm7, %v524_v9, %v534_v12 }
 0x16c   : > { %545 = vst.msk [vmem:[%s939_s7 + $0x8] sm:$0x1f] %vm543_vm6, %v539_v14 }
 0x170   : > { %v389_v15 = vpop.f32.mrb[4].mxu0 }
 0x171   : > { %v525_v16 = vadd.f32 %v630_v0, %v389_v15  ;;  %v692_v17 = vpop.f32.mrb[5].mxu0 }
 0x172   : > { %v392_v18 = vpop.f32.mrb[6].mxu0 }
 0x173   : > { %vm530_vm8 = vcmp.ge.f32.partialorder %v525_v16, 0.0  ;;  %v535_v19 = vmul.f32 0.2, %v525_v16  ;;  %v693_v20 = vpop.f32.mrb[7].mxu0 }
 0x175   : > { %v540_v21 = vsel %vm530_vm8, %v525_v16, %v535_v19 }
 0x176   : > { %546 = vst.msk [vmem:[%s939_s7 + $0x10] sm:$0x1f] %vm543_vm6, %v540_v21  ;;  %v450_v22 = vpop.f32.mrb[4].mxu1 }
 0x177   : > { %v526_v23 = vadd.f32 %v630_v0, %v450_v22  ;;  %v704_v24 = vpop.f32.mrb[5].mxu1 }
 0x178   : > { %v453_v25 = vpop.f32.mrb[6].mxu1 }
 0x179   : > { %vm531_vm9 = vcmp.ge.f32.partialorder %v526_v23, 0.0  ;;  %v536_v26 = vmul.f32 0.2, %v526_v23  ;;  %v705_v27 = vpop.f32.mrb[7].mxu1 }
 0x17b   : > { %v541_v28 = vsel %vm531_vm9, %v526_v23, %v536_v26 }
 0x17c   : > { %547 = vst.msk [vmem:[%s939_s7 + $0x18] sm:$0x1f] %vm543_vm6, %v541_v28 }
 0x180   : > { %v511_v29 = vpop.f32.mrb[8].mxu0 }
 0x181   : > { %v527_v30 = vadd.f32 %v630_v0, %v511_v29  ;;  %v716_v31 = vpop.f32.mrb[9].mxu0 }
 0x182   : > { %v514_v32 = vpop.f32.mrb[10].mxu0 }
 0x183   : > { %vm532_vm10 = vcmp.ge.f32.partialorder %v527_v30, 0.0  ;;  %v537_v33 = vmul.f32 0.2, %v527_v30  ;;  %v717_v34 = vpop.f32.mrb[11].mxu0 }
 0x185   : > { %v542_v35 = vsel %vm532_vm10, %v527_v30, %v537_v33 }
 0x186   : > { %548 = vst.msk [vmem:[%s939_s7 + $0x20] sm:$0x1f] %vm543_vm6, %v542_v35 }
 0x187 PF: > { %s13_s12 = sadd.s32 1, %s773_s12  }
 0x188   : > { %p10_p4 = scmp.ge.s32.totalorder %s13_s12, 4  }
 0x18a   :  { %12 = sbr.rel (!%p10_p4) target bundleno = 1 (0x1), region = 67 }

// kernel: mesh_rgb_discriminator_forward.13
= control target key start
LH: loop header
LB: loop body
LE: loop exit
PB: predicated region body
PF: predicated region fallthrough
CT: control target
= control target key end

     0   :  { %s712_s12 = smov 0   ;;  %s842_s0 = inlined_call_operand.vmem [shape: f32[2,5,5,32], index: 0, kind: input, shape index: {}]   ;;  %s843_s1 = inlined_call_operand.vmem [shape: bf16[128,16], index: 1, kind: input, shape index: {}]   ;;  %s844_s2 = inlined_call_operand.vmem [shape: f32[1,16], index: 2, kind: input, shape index: {}]   ;;  %s845_s3 = inlined_call_operand.vmem [shape: f32[2,3,3,16], index: 3, kind: output, shape index: {}]  }
   0x1 LB: > { %s533_s13 = sadd.s32 4294967295, %s685_s12   ;;  %p537_p0 = scmp.ge.s32.totalorder %s685_s12, 1  ;;  %s685_s12 = sphi %s712_s12, %s13_s12  }
   0x2   : > { %p137_p1 = scmp.lt.s32.totalorder %s685_s12, 3 }
   0x4   : > { %p138_p2 = pnand %p537_p0, %p137_p1 }
   0x5   : > { %p161_p3 = scmp.lt.s32.totalorder (!%p138_p2), %s533_s13, 1  ;;  %v723_v0 = vld [vmem:[%s843_s1] sm:$0xff] (!%p138_p2)   ;;  %v687_v1 = vmov (!%p138_p2), 0.0   ;;  %v733_v2 = vld [vmem:[%s843_s1 + $0x8] sm:$0xff] (!%p138_p2)   ;;  %v748_v3 = vld [vmem:[%s843_s1 + $0x10] sm:$0xff] (!%p138_p2)   ;;  %s688_s24 = smov (!%p138_p2), 32  }
   0x6   : > { %141 = sbr.rel (%p138_p2) target bundleno = 430 (0x1ae), region = 32  ;;  %584 = vmatprep.subr.bf16.mxu0 (!%p138_p2), %v687_v1  ;;  %604 = vmatprep.subr.bf16.mxu1 (!%p138_p2), %v687_v1  ;;  %s689_s25 = smov (!%p138_p2), 96   ;;  %vm690_vm0 = vmmov (!%p138_p2), 0   ;;  %v769_v11 = vld [vmem:[%s843_s1 + $0x18] sm:$0xff] (!%p138_p2)   ;;  %v673_v13 = vld [vmem:[%s843_s1 + $0x20] sm:$0xff] (!%p138_p2)   ;;  %v674_v15 = vld [vmem:[%s843_s1 + $0x28] sm:$0xff] (!%p138_p2)  }
   0x7   : > { %585 = vmatpush3.bf16.msra.mxu0 (!%p138_p2), %v723_v0  ;;  %605 = vmatpush3.bf16.msra.mxu1 (!%p138_p2), %v723_v0  ;;  %s691_s28 = smov (!%p138_p2), 64   ;;  %v675_v16 = vld [vmem:[%s843_s1 + $0x30] sm:$0xff] (!%p138_p2)   ;;  %v676_v17 = vld [vmem:[%s843_s1 + $0x38] sm:$0xff] (!%p138_p2)   ;;  %vm206_vm1 = vcmask (!%p138_p2), 261120   ;;  %vm208_vm2 = vcmask (!%p138_p2), 523264   ;;  %vm210_vm3 = vcmask (!%p138_p2), 785408  }
   0x8   : > { %586 = vmatprep.subr.bf16.mxu0 (!%p138_p2), %v687_v1  ;;  %606 = vmatprep.subr.bf16.mxu1 (!%p138_p2), %v687_v1  ;;  %v554_v42 = vld [vmem:[%s844_s2] ss:$0 sm:$0xff] (!%p138_p2)  ;;  %vm426_vm4 = vcmask (!%p138_p2), 124928  }
   0x9   : > { %600 = vmatprep.mubr.msk.bf16.mxu0 (!%p138_p2), %vm690_vm0, %v687_v1  ;;  %620 = vmatprep.mubr.msk.bf16.mxu1 (!%p138_p2), %vm690_vm0, %v687_v1 }
   0xb   : > { %587 = vmatpush3.bf16.msra.mxu0 (!%p138_p2), %v733_v2  ;;  %607 = vmatpush3.bf16.msra.mxu1 (!%p138_p2), %v733_v2 }
   0xc   : > { %588 = vmatprep.subr.bf16.mxu0 (!%p138_p2), %v687_v1  ;;  %608 = vmatprep.subr.bf16.mxu1 (!%p138_p2), %v687_v1 }
   0xd   : > { %s847_s13 = smov (!%p161_p3, %s533_s13), 1 }
   0xe   : > { %s644_s18 = smul.u32 40, %s847_s13 }
   0xf   : > { %589 = vmatpush3.bf16.msra.mxu0 %v748_v3  ;;  %609 = vmatpush3.bf16.msra.mxu1 %v748_v3  ;;  %s645_s14 = smul.u32 12, %s847_s13 }
  0x10   : > { %s742_s21 = scalar_lea.vmem %s842_s0, %s644_s18  ;;  %590 = vmatprep.subr.bf16.mxu0 %v687_v1  ;;  %610 = vmatprep.subr.bf16.mxu1 %v687_v1 }
  0x11   : > { %v190_v4 = vld [vmem:[%s742_s21 + $0x1] sm:$0x7]  ;;  %v541_v5 = vld [vmem:[%s742_s21 + $0x9] sm:$0x7]  ;;  %v551_v6 = vld [vmem:[%s742_s21 + $0x11] sm:$0x7]  ;;  %s170_s17 = scalar_lea.vmem %s845_s3, %s645_s14 }
  0x12   : > { %195 = vrot.lane.b32.xlu0 %v190_v4, %s688_s24  ;;  %v659_v7 = vpack.i.bf16 %v551_v6, %v541_v5  ;;  %203 = vrot.lane.b32.xlu1 %v541_v5, %s689_s25  ;;  %v540_v8 = vld [vmem:[%s742_s21 + $0x8] sm:$0x7]  ;;  %v758_v9 = vld [vmem:[%s742_s21 + $0x10] sm:$0x7] }
  0x13   : > { %v552_v10 = vld [vmem:[%s742_s21 + $0x18] sm:$0x7]  ;;  %591 = vmatpush3.bf16.msra.mxu0 %v769_v11  ;;  %611 = vmatpush3.bf16.msra.mxu1 %v769_v11  ;;  %v189_v20 = vld [vmem:[%s742_s21] sm:$0x7] }
  0x14   : > { %v664_v12 = vpack.i.bf16 %v552_v10, %v758_v9  ;;  %592 = vmatprep.subr.bf16.mxu0 %v687_v1  ;;  %612 = vmatprep.subr.bf16.mxu1 %v687_v1  ;;  %v553_v14 = vld [vmem:[%s742_s21 + $0x19] sm:$0x7] }
  0x16   : > { %199 = vrot.lane.b32.xlu0 %v540_v8, %s691_s28  ;;  %660 = vrot.lane.b32.xlu1 %v659_v7, %s688_s24 }
  0x17   : > { %593 = vmatpush3.bf16.msra.mxu0 %v673_v13  ;;  %613 = vmatpush3.bf16.msra.mxu1 %v673_v13 }
  0x18   : > { %594 = vmatprep.subr.bf16.mxu0 %v687_v1  ;;  %614 = vmatprep.subr.bf16.mxu1 %v687_v1 }
  0x1a   : > { %665 = vrot.lane.b32.xlu0 %v664_v12, %s691_s28  ;;  %312 = vrot.lane.b32.xlu1 %v551_v6, %s689_s25 }
  0x1b   : > { %595 = vmatpush3.bf16.msra.mxu0 %v674_v15  ;;  %615 = vmatpush3.bf16.msra.mxu1 %v674_v15 }
  0x1c   : > { %596 = vmatprep.subr.bf16.mxu0 %v687_v1  ;;  %616 = vmatprep.subr.bf16.mxu1 %v687_v1 }
  0x1e   : > { %370 = vrot.lane.b32.xlu0 %v553_v14, %s689_s25 }
  0x1f   : > { %597 = vmatpush3.bf16.msra.mxu0 %v675_v16  ;;  %617 = vmatpush3.bf16.msra.mxu1 %v675_v16 }
  0x20   : > { %598 = vmatprep.subr.bf16.mxu0 %v687_v1  ;;  %618 = vmatprep.subr.bf16.mxu1 %v687_v1 }
  0x23   : > { %599 = vmatpush3.bf16.msra.mxu0 %v676_v17  ;;  %619 = vmatpush3.bf16.msra.mxu1 %v676_v17 }
  0x24   : > { %624 = vmatprep.subr.bf16.mxu0 %v687_v1 }
  0x84   : > { %v196_v18 = vpop.permute.xlu0 %195  ;;  %v204_v19 = vpop.permute.xlu1 %203 }
  0x85   : > { %v207_v21 = vsel %vm206_vm1, %v189_v20, %v196_v18 }
  0x88   : > { %v200_v22 = vpop.permute.xlu0 %199  ;;  %v661_v23 = vpop.permute.xlu1 %660 }
  0x89   : > { %v209_v24 = vsel %vm208_vm2, %v207_v21, %v200_v22  ;;  %v662_v25 = vunpack.i.l.bf16 %v661_v23  ;;  %v663_v35 = vunpack.i.h.bf16 %v661_v23 }
  0x8a   : > { %v211_v26 = vsel %vm210_vm3, %v209_v24, %v204_v19 }
  0x8b   : > { %v212_v27 = vpack.c.bf16 %v211_v26, %v211_v26  ;;  %v315_v29 = vsel %vm206_vm1, %v540_v8, %v662_v25  ;;  %v373_v37 = vsel %vm206_vm1, %v758_v9, %v663_v35 }
  0x8c   : > { %v666_v28 = vpop.permute.xlu0 %665  ;;  %v313_v31 = vpop.permute.xlu1 %312 }
  0x8d   : > { %v667_v30 = vunpack.i.l.bf16 %v666_v28  ;;  %601 = vmatmul.mubr.bf16.vlgmr.msra.gmra.mrb[0].mxu0 %v212_v27  ;;  %v668_v36 = vunpack.i.h.bf16 %v666_v28 }
  0x8e   : > { %625 = vmatpush3.bf16.msra.mxu0 %v723_v0  ;;  %640 = vmatprep.mubr.msk.bf16.mxu0 %vm690_vm0, %v687_v1 }
  0x8f   : > { %v316_v32 = vsel %vm208_vm2, %v315_v29, %v667_v30  ;;  %626 = vmatprep.subr.bf16.mxu0 %v687_v1  ;;  %v374_v39 = vsel %vm208_vm2, %v373_v37, %v668_v36 }
  0x90   : > { %v317_v33 = vsel %vm210_vm3, %v316_v32, %v313_v31  ;;  %v371_v38 = vpop.permute.xlu0 %370 }
  0x91   : > { %v318_v34 = vpack.c.bf16 %v317_v33, %v317_v33  ;;  %v375_v40 = vsel %vm210_vm3, %v374_v39, %v371_v38 }
  0x92   : > { %627 = vmatpush3.bf16.msra.mxu0 %v733_v2  ;;  %v376_v41 = vpack.c.bf16 %v375_v40, %v375_v40 }
  0x93   : > { %621 = vmatmul.mubr.bf16.vlgmr.msra.gmra.mrb[0].mxu1 %v318_v34  ;;  %628 = vmatprep.subr.bf16.mxu0 %v687_v1 }
  0x96   : > { %629 = vmatpush3.bf16.msra.mxu0 %v748_v3 }
  0x97   : > { %630 = vmatprep.subr.bf16.mxu0 %v687_v1 }
  0x9a   : > { %631 = vmatpush3.bf16.msra.mxu0 %v769_v11 }
  0x9b   : > { %632 = vmatprep.subr.bf16.mxu0 %v687_v1 }
  0x9e   : > { %633 = vmatpush3.bf16.msra.mxu0 %v673_v13 }
  0x9f   : > { %634 = vmatprep.subr.bf16.mxu0 %v687_v1 }
  0xa2   : > { %635 = vmatpush3.bf16.msra.mxu0 %v674_v15 }
  0xa3   : > { %636 = vmatprep.subr.bf16.mxu0 %v687_v1 }
  0xa6   : > { %637 = vmatpush3.bf16.msra.mxu0 %v675_v16 }
  0xa7   : > { %638 = vmatprep.subr.bf16.mxu0 %v687_v1 }
  0xaa   : > { %639 = vmatpush3.bf16.msra.mxu0 %v676_v17 }
  0xad   : > { %641 = vmatmul.mubr.bf16.vlgmr.msra.gmra.mrb[4].mxu0 %v376_v41 }
 0x160   : > { %v295_v43 = vpop.f32.mrb[0].mxu0 }
 0x161   : > { %v602_v44 = vpop.f32.mrb[1].mxu0  ;;  %v423_v46 = vadd.f32 %v554_v42, %v295_v43 }
 0x162   : > { %v298_v45 = vpop.f32.mrb[2].mxu0 }
 0x163   : > { %v603_v47 = vpop.f32.mrb[3].mxu0  ;;  %v440_v49 = vmul.f32 %v423_v46, %v423_v46  ;;  %v427_v53 = vsel %vm426_vm4, %v423_v46, 0.0 }
 0x165   : > { %v443_v58 = vsel %vm426_vm4, %v440_v49, 0.0 }
 0x166   : > { %v353_v48 = vpop.f32.mrb[0].mxu1 }
 0x167   : > { %v424_v50 = vadd.f32 %v554_v42, %v353_v48  ;;  %v622_v51 = vpop.f32.mrb[1].mxu1 }
 0x168   : > { %v356_v52 = vpop.f32.mrb[2].mxu1 }
 0x169   : > { %v428_v54 = vsel %vm426_vm4, %v424_v50, 0.0  ;;  %v441_v55 = vmul.f32 %v424_v50, %v424_v50  ;;  %v623_v56 = vpop.f32.mrb[3].mxu1 }
 0x16a   : > { %v429_v57 = vadd.f32 %v428_v54, %v427_v53 }
 0x16b   : > { %v444_v59 = vsel %vm426_vm4, %v441_v55, 0.0 }
 0x16c   : > { %v445_v60 = vadd.f32 %v444_v59, %v443_v58 }
 0x180   : > { %v411_v61 = vpop.f32.mrb[4].mxu0 }
 0x181   : > { %v425_v62 = vadd.f32 %v554_v42, %v411_v61  ;;  %v642_v63 = vpop.f32.mrb[5].mxu0 }
 0x182   : > { %v414_v0 = vpop.f32.mrb[6].mxu0 }
 0x183   : > { %v430_v1 = vsel %vm426_vm4, %v425_v62, 0.0  ;;  %v442_v2 = vmul.f32 %v425_v62, %v425_v62  ;;  %v643_v3 = vpop.f32.mrb[7].mxu0 }
 0x184   : > { %v431_v4 = vadd.f32 %v430_v1, %v429_v57 }
 0x185   : > { %v446_v5 = vsel %vm426_vm4, %v442_v2, 0.0 }
 0x186   : > { %v432_v6 = vrot.slane %v431_v4, 4  ;;  %v447_v7 = vadd.f32 %v446_v5, %v445_v60 }
 0x188   : > { %v433_v8 = vadd.f32 %v432_v6, %v431_v4  ;;  %v448_v9 = vrot.slane %v447_v7, 4 }
 0x18a   : > { %v434_v10 = vrot.slane %v433_v8, 2  ;;  %v449_v11 = vadd.f32 %v448_v9, %v447_v7 }
 0x18c   : > { %v435_v12 = vadd.f32 %v434_v10, %v433_v8  ;;  %v450_v13 = vrot.slane %v449_v11, 2 }
 0x18e   : > { %v436_v14 = vrot.slane %v435_v12, 1  ;;  %v451_v15 = vadd.f32 %v450_v13, %v449_v11 }
 0x190   : > { %v437_v16 = vadd.f32 %v436_v14, %v435_v12  ;;  %v452_v17 = vrot.slane %v451_v15, 1 }
 0x192   : > { %v439_v18 = vmul.f32 0.11111111, %v437_v16  ;;  %v453_v19 = vadd.f32 %v452_v17, %v451_v15 }
 0x194   : > { %v454_v20 = vmul.f32 0.11111111, %v453_v19  ;;  %v455_v21 = vmul.f32 %v439_v18, %v439_v18  ;;  %v457_v22 = vsub.f32 %v423_v46, %v439_v18  ;;  %v458_v23 = vsub.f32 %v424_v50, %v439_v18 }
 0x195   : > { %v459_v24 = vsub.f32 %v425_v62, %v439_v18 }
 0x196   : > { %v456_v25 = vsub.f32 %v454_v20, %v455_v21 }
 0x198   : > { %v460_v26 = vmax.f32 %v456_v25, 0.0 }
 0x19a   : > { %v461_v27 = vadd.f32 1e-05, %v460_v26 }
 0x19c   : > { %677 = vrsqrt.f32 %v461_v27 }
 0x1a6   : > { %v678_v28 = vpop.eup %677 }
 0x1a7   : > { %v463_v29 = vmul.f32 %v678_v28, %v457_v22  ;;  %v464_v30 = vmul.f32 %v678_v28, %v458_v23  ;;  %v465_v31 = vmul.f32 %v678_v28, %v459_v24 }
 0x1a9   : > { %vm466_vm5 = vcmp.ge.f32.partialorder %v463_v29, 0.0  ;;  %vm467_vm6 = vcmp.ge.f32.partialorder %v464_v30, 0.0  ;;  %vm468_vm7 = vcmp.ge.f32.partialorder %v465_v31, 0.0  ;;  %v469_v32 = vmul.f32 0.2, %v463_v29 }
 0x1aa   : > { %v470_v33 = vmul.f32 0.2, %v464_v30  ;;  %v471_v34 = vmul.f32 0.2, %v465_v31 }
 0x1ab   : > { %v472_v35 = vsel %vm466_vm5, %v463_v29, %v469_v32 }
 0x1ac   : > { %v473_v36 = vsel %vm467_vm6, %v464_v30, %v470_v33  ;;  %v474_v37 = vsel %vm468_vm7, %v465_v31, %v471_v34  ;;  %475 = vst.msk [vmem:[%s170_s17] sm:$0x7] %vm426_vm4, %v472_v35 }
 0x1ad   : > { %476 = vst.msk [vmem:[%s170_s17 + $0x4] sm:$0x7] %vm426_vm4, %v473_v36  ;;  %477 = vst.msk [vmem:[%s170_s17 + $0x8] sm:$0x7] %vm426_vm4, %v474_v37 }
 0x1ae PF: > { %s13_s12 = sadd.s32 1, %s685_s12  }
 0x1af   : > { %p10_p4 = scmp.ge.s32.totalorder %s13_s12, 4  }
 0x1b1   :  { %12 = sbr.rel (!%p10_p4) target bundleno = 1 (0x1), region = 65 }

// kernel: mesh_rgb_discriminator_forward.14
= control target key start
LH: loop header
LB: loop body
LE: loop exit
PB: predicated region body
PF: predicated region fallthrough
CT: control target
= control target key end

     0   :  { %s1140_s12 = smov 0   ;;  %s1460_s0 = inlined_call_operand.vmem [shape: f32[2,7,7,16], index: 0, kind: input, shape index: {}]   ;;  %s1461_s1 = inlined_call_operand.vmem [shape: bf16[256,32], index: 1, kind: input, shape index: {}]   ;;  %s1462_s2 = inlined_call_operand.vmem [shape: f32[1,32], index: 2, kind: input, shape index: {}]   ;;  %s1463_s3 = inlined_call_operand.vmem [shape: f32[2,4,4,32], index: 3, kind: output, shape index: {}]  }
   0x1 LB: > { %s831_s13 = sadd.s32 4294967295, %s1111_s12   ;;  %p835_p0 = scmp.ge.s32.totalorder %s1111_s12, 1  ;;  %s1111_s12 = sphi %s1140_s12, %s13_s12  }
   0x2   : > { %p137_p1 = scmp.lt.s32.totalorder %s1111_s12, 3 }
   0x4   : > { %p138_p2 = pnand %p835_p0, %p137_p1 }
   0x5   : > { %p161_p3 = scmp.lt.s32.totalorder (!%p138_p2), %s831_s13, 1  ;;  %v1151_v0 = vld [vmem:[%s1461_s1 + $0x40] sm:$0xff] (!%p138_p2)   ;;  %v1163_v2 = vld [vmem:[%s1461_s1 + $0x48] sm:$0xff] (!%p138_p2)   ;;  %v1179_v4 = vld [vmem:[%s1461_s1 + $0x50] sm:$0xff] (!%p138_p2)   ;;  %s1113_s30 = smov (!%p138_p2), 48   ;;  %vm280_vm0 = vcmask (!%p138_p2), 130048  }
   0x6   : > { %141 = sbr.rel (%p138_p2) target bundleno = 460 (0x1cc), region = 32  ;;  %v1156_v1 = vld [vmem:[%s1461_s1] sm:$0xff] (!%p138_p2)   ;;  %883 = vmatprep.subr.bf16.mxu0 (!%p138_p2), %v1151_v0  ;;  %905 = vmatprep.subr.bf16.mxu1 (!%p138_p2), %v1151_v0  ;;  %v1172_v3 = vld [vmem:[%s1461_s1 + $0x8] sm:$0xff] (!%p138_p2)   ;;  %v1200_v10 = vld [vmem:[%s1461_s1 + $0x10] sm:$0xff] (!%p138_p2)   ;;  %s1114_s4 = smov (!%p138_p2), 16   ;;  %vm282_vm1 = vcmask (!%p138_p2), 261120  }
   0x7   : > { %884 = vmatpush3.bf16.msra.mxu0 (!%p138_p2), %v1156_v1  ;;  %906 = vmatpush3.bf16.msra.mxu1 (!%p138_p2), %v1156_v1  ;;  %s1115_s5 = smov (!%p138_p2), 32   ;;  %v1240_v28 = vld [vmem:[%s1461_s1 + $0x58] sm:$0xff] (!%p138_p2)   ;;  %s1116_s10 = smov (!%p138_p2), 64   ;;  %v1253_v31 = vld [vmem:[%s1461_s1 + $0x60] sm:$0xff] (!%p138_p2)   ;;  %v1267_v33 = vld [vmem:[%s1461_s1 + $0x68] sm:$0xff] (!%p138_p2)   ;;  %vm284_vm2 = vcmask (!%p138_p2), 392192  }
   0x8   : > { %885 = vmatprep.subr.bf16.mxu0 (!%p138_p2), %v1163_v2  ;;  %907 = vmatprep.subr.bf16.mxu1 (!%p138_p2), %v1163_v2  ;;  %v1246_v30 = vld [vmem:[%s1461_s1 + $0x18] sm:$0xff] (!%p138_p2)   ;;  %v1259_v32 = vld [vmem:[%s1461_s1 + $0x20] sm:$0xff] (!%p138_p2)   ;;  %s1117_s19 = smov (!%p138_p2), 80   ;;  %v1279_v36 = vld [vmem:[%s1461_s1 + $0x28] sm:$0xff] (!%p138_p2)   ;;  %s1118_s24 = smov (!%p138_p2), 96   ;;  %vm286_vm3 = vcmask (!%p138_p2), 523264  }
   0x9   : > { %v1286_v37 = vld [vmem:[%s1461_s1 + $0x70] sm:$0xff] (!%p138_p2)   ;;  %v1305_v42 = vld [vmem:[%s1461_s1 + $0x78] sm:$0xff] (!%p138_p2)   ;;  %s1119_s6 = smov (!%p138_p2), 112   ;;  %vm288_vm4 = vcmask (!%p138_p2), 654336   ;;  %vm290_vm5 = vcmask (!%p138_p2), 785408   ;;  %vm292_vm6 = vcmask (!%p138_p2), 916480  }
   0xa   : > { %v1298_v41 = vld [vmem:[%s1461_s1 + $0x30] sm:$0xff] (!%p138_p2)   ;;  %v1318_v47 = vld [vmem:[%s1461_s1 + $0x38] sm:$0xff] (!%p138_p2)   ;;  %vm713_vm7 = vcmask (!%p138_p2), 257024  }
   0xb   : > { %886 = vmatpush3.bf16.msra.mxu0 (!%p138_p2), %v1172_v3  ;;  %908 = vmatpush3.bf16.msra.mxu1 (!%p138_p2), %v1172_v3 }
   0xc   : > { %887 = vmatprep.subr.bf16.mxu0 (!%p138_p2), %v1179_v4  ;;  %909 = vmatprep.subr.bf16.mxu1 (!%p138_p2), %v1179_v4 }
   0xd   : > { %s1465_s13 = smov (!%p161_p3, %s831_s13), 1 }
   0xe   : > { %s971_s20 = smul.u32 56, %s1465_s13 }
   0xf   : > { %888 = vmatpush3.bf16.msra.mxu0 %v1200_v10  ;;  %910 = vmatpush3.bf16.msra.mxu1 %v1200_v10 }
  0x10   : > { %s1185_s27 = scalar_lea.vmem %s1460_s0, %s971_s20  ;;  %889 = vmatprep.subr.bf16.mxu0 %v1240_v28  ;;  %911 = vmatprep.subr.bf16.mxu1 %v1240_v28 }
  0x11   : > { %v1188_v5 = vld [vmem:[%s1185_s27 + $0x13] sm:$0xf]  ;;  %v208_v6 = vld [vmem:[%s1185_s27 + $0x3] sm:$0xf]  ;;  %v840_v12 = vld [vmem:[%s1185_s27 + $0x9] sm:$0xf] }
  0x12   : > { %v997_v7 = vpack.i.bf16 %v208_v6, %v1188_v5  ;;  %v1193_v8 = vld [vmem:[%s1185_s27 + $0x11] sm:$0xf]  ;;  %v206_v9 = vld [vmem:[%s1185_s27 + $0x1] sm:$0xf]  ;;  %v848_v13 = vld [vmem:[%s1185_s27 + $0x19] sm:$0xf] }
  0x13   : > { %v987_v11 = vpack.i.bf16 %v206_v9, %v1193_v8  ;;  %v207_v14 = vld [vmem:[%s1185_s27 + $0x2] sm:$0xf]  ;;  %v1002_v15 = vpack.i.bf16 %v840_v12, %v848_v13  ;;  %v1211_v16 = vld [vmem:[%s1185_s27 + $0x12] sm:$0xf]  ;;  %v841_v18 = vld [vmem:[%s1185_s27 + $0xa] sm:$0xf]  ;;  %890 = vmatpush3.bf16.msra.mxu0 %v1246_v30  ;;  %912 = vmatpush3.bf16.msra.mxu1 %v1246_v30 }
  0x14   : > { %998 = vrot.lane.b32.xlu1 %v997_v7, %s1113_s30  ;;  %v992_v17 = vpack.i.bf16 %v207_v14, %v1211_v16  ;;  %v849_v19 = vld [vmem:[%s1185_s27 + $0x1a] sm:$0xf]  ;;  %v1218_v20 = vld [vmem:[%s1185_s27 + $0x8] sm:$0xf]  ;;  %v1232_v26 = vld [vmem:[%s1185_s27 + $0x10] sm:$0xf]  ;;  %891 = vmatprep.subr.bf16.mxu0 %v1253_v31 }
  0x15   : > { %988 = vrot.lane.b32.xlu0 %v987_v11, %s1114_s4  ;;  %v1221_v21 = vld [vmem:[%s1185_s27 + $0x18] sm:$0xf]  ;;  %v1012_v22 = vpack.i.bf16 %v841_v18, %v849_v19  ;;  %v842_v24 = vld [vmem:[%s1185_s27 + $0xb] sm:$0xf]  ;;  %v1235_v27 = vld [vmem:[%s1185_s27 + $0x20] sm:$0xf]  ;;  %913 = vmatprep.subr.bf16.mxu1 %v1253_v31 }
  0x16   : > { %v1007_v23 = vpack.i.bf16 %v1218_v20, %v1221_v21  ;;  %v850_v25 = vld [vmem:[%s1185_s27 + $0x1b] sm:$0xf]  ;;  %v1032_v34 = vpack.i.bf16 %v1232_v26, %v1235_v27  ;;  %v868_v35 = vld [vmem:[%s1185_s27 + $0x21] sm:$0xf]  ;;  %v873_v45 = vld [vmem:[%s1185_s27 + $0x2a] sm:$0xf] }
  0x17   : > { %v1022_v29 = vpack.i.bf16 %v842_v24, %v850_v25  ;;  %892 = vmatpush3.bf16.msra.mxu0 %v1259_v32  ;;  %914 = vmatpush3.bf16.msra.mxu1 %v1259_v32  ;;  %v1042_v38 = vpack.i.bf16 %v1193_v8, %v868_v35  ;;  %v870_v39 = vld [vmem:[%s1185_s27 + $0x23] sm:$0xf]  ;;  %v872_v46 = vld [vmem:[%s1185_s27 + $0x29] sm:$0xf]  ;;  %v875_v51 = vld [vmem:[%s1185_s27 + $0x30] sm:$0xf] }
  0x18   : > { %1003 = vrot.lane.b32.xlu1 %v1002_v15, %s1114_s4  ;;  %893 = vmatprep.subr.bf16.mxu0 %v1267_v33  ;;  %v869_v40 = vld [vmem:[%s1185_s27 + $0x22] sm:$0xf]  ;;  %v1052_v43 = vpack.i.bf16 %v1188_v5, %v870_v39  ;;  %v1057_v49 = vpack.i.bf16 %v872_v46, %v868_v35  ;;  %v1326_v50 = vld [vmem:[%s1185_s27 + $0x28] sm:$0xf]  ;;  %v877_v55 = vld [vmem:[%s1185_s27 + $0x32] sm:$0xf] }
  0x19   : > { %993 = vrot.lane.b32.xlu0 %v992_v17, %s1115_s5  ;;  %915 = vmatprep.subr.bf16.mxu1 %v1267_v33  ;;  %v1047_v44 = vpack.i.bf16 %v1211_v16, %v869_v40  ;;  %v1062_v48 = vpack.i.bf16 %v873_v45, %v869_v40  ;;  %v874_v52 = vld [vmem:[%s1185_s27 + $0x2b] sm:$0xf]  ;;  %v1072_v53 = vpack.i.bf16 %v875_v51, %v1326_v50  ;;  %v876_v56 = vld [vmem:[%s1185_s27 + $0x31] sm:$0xf]  ;;  %v205_v8 = vld [vmem:[%s1185_s27] sm:$0xf] }
  0x1a   : > { %v1067_v54 = vpack.i.bf16 %v874_v52, %v870_v39  ;;  %v1082_v57 = vpack.i.bf16 %v877_v55, %v873_v45  ;;  %v1077_v58 = vpack.i.bf16 %v876_v56, %v872_v46  ;;  %v878_v59 = vld [vmem:[%s1185_s27 + $0x33] sm:$0xf] }
  0x1b   : > { %894 = vmatpush3.bf16.msra.mxu0 %v1279_v36  ;;  %916 = vmatpush3.bf16.msra.mxu1 %v1279_v36 }
  0x1c   : > { %1013 = vrot.lane.b32.xlu1 %v1012_v22, %s1115_s5  ;;  %895 = vmatprep.subr.bf16.mxu0 %v1286_v37 }
  0x1d   : > { %1008 = vrot.lane.b32.xlu0 %v1007_v23, %s1116_s10  ;;  %917 = vmatprep.subr.bf16.mxu1 %v1286_v37 }
  0x1f   : > { %896 = vmatpush3.bf16.msra.mxu0 %v1298_v41  ;;  %918 = vmatpush3.bf16.msra.mxu1 %v1298_v41 }
  0x20   : > { %1023 = vrot.lane.b32.xlu1 %v1022_v29, %s1113_s30  ;;  %897 = vmatprep.subr.bf16.mxu0 %v1305_v42 }
  0x21   : > { %1018 = vrot.lane.b32.xlu0 %v1002_v15, %s1117_s19  ;;  %919 = vmatprep.subr.bf16.mxu1 %v1305_v42 }
  0x23   : > { %898 = vmatpush3.bf16.msra.mxu0 %v1318_v47  ;;  %920 = vmatpush3.bf16.msra.mxu1 %v1318_v47 }
  0x24   : > { %1033 = vrot.lane.b32.xlu1 %v1032_v34, %s1116_s10  ;;  %927 = vmatprep.subr.bf16.mxu0 %v1151_v0 }
  0x25   : > { %1028 = vrot.lane.b32.xlu0 %v1012_v22, %s1118_s24  ;;  %949 = vmatprep.subr.bf16.mxu1 %v1151_v0 }
  0x28   : > { %1043 = vrot.lane.b32.xlu1 %v1042_v38, %s1117_s19 }
  0x29   : > { %1038 = vrot.lane.b32.xlu0 %v1022_v29, %s1119_s6 }
  0x2c   : > { %1053 = vrot.lane.b32.xlu1 %v1052_v43, %s1119_s6 }
  0x2d   : > { %1048 = vrot.lane.b32.xlu0 %v1047_v44, %s1118_s24 }
  0x30   : > { %1063 = vrot.lane.b32.xlu1 %v1062_v48, %s1115_s5 }
  0x31   : > { %1058 = vrot.lane.b32.xlu0 %v1057_v49, %s1114_s4  ;;  %s882_s4 = sshll.u32 %s1465_s13, 4 }
  0x34   : > { %1073 = vrot.lane.b32.xlu1 %v1072_v53, %s1116_s10  ;;  %s170_s10 = scalar_lea.vmem %s1463_s3, %s882_s4 }
  0x35   : > { %1068 = vrot.lane.b32.xlu0 %v1067_v54, %s1113_s30 }
  0x38   : > { %1083 = vrot.lane.b32.xlu1 %v1082_v57, %s1118_s24 }
  0x39   : > { %1078 = vrot.lane.b32.xlu0 %v1077_v58, %s1117_s19 }
  0x3c   : > { %652 = vrot.lane.b32.xlu1 %v878_v59, %s1119_s6 }
  0x3d   : > { %574 = vrot.lane.b32.xlu0 %v874_v52, %s1119_s6 }
  0x86   : > { %v999_v60 = vpop.permute.xlu1 %998 }
  0x87   : > { %v989_v61 = vpop.permute.xlu0 %988  ;;  %v1001_v16 = vunpack.i.h.bf16 %v999_v60  ;;  %v1000_v17 = vunpack.i.l.bf16 %v999_v60 }
  0x88   : > { %v991_v6 = vunpack.i.h.bf16 %v989_v61  ;;  %v990_v7 = vunpack.i.l.bf16 %v989_v61 }
  0x8a   : > { %v1004_v62 = vpop.permute.xlu1 %1003  ;;  %v281_v18 = vsel %vm280_vm0, %v205_v8, %v991_v6  ;;  %v294_v19 = vsel %vm280_vm0, %v1232_v26, %v990_v7 }
  0x8b   : > { %v994_v63 = vpop.permute.xlu0 %993  ;;  %v1006_v14 = vunpack.i.h.bf16 %v1004_v62  ;;  %v1005_v15 = vunpack.i.l.bf16 %v1004_v62 }
  0x8c   : > { %v996_v9 = vunpack.i.h.bf16 %v994_v63  ;;  %v995_v11 = vunpack.i.l.bf16 %v994_v63 }
  0x8d   : > { %v491_v43 = vsel %vm280_vm0, %v1218_v20, %v1006_v14  ;;  %v498_v44 = vsel %vm280_vm0, %v1221_v21, %v1005_v15 }
  0x8e   : > { %v1014_v0 = vpop.permute.xlu1 %1013  ;;  %v283_v22 = vsel %vm282_vm1, %v281_v18, %v996_v9  ;;  %v295_v23 = vsel %vm282_vm1, %v294_v19, %v995_v11 }
  0x8f   : > { %v1009_v5 = vpop.permute.xlu0 %1008  ;;  %v1016_v34 = vunpack.i.h.bf16 %v1014_v0  ;;  %v1015_v35 = vunpack.i.l.bf16 %v1014_v0  ;;  %v285_v26 = vsel %vm284_vm2, %v283_v22, %v1001_v16  ;;  %v296_v45 = vsel %vm284_vm2, %v295_v23, %v1000_v17 }
  0x90   : > { %v1011_v24 = vunpack.i.h.bf16 %v1009_v5  ;;  %v1010_v25 = vunpack.i.l.bf16 %v1009_v5 }
  0x91   : > { %v492_v20 = vsel %vm282_vm1, %v491_v43, %v1016_v34  ;;  %v499_v55 = vsel %vm282_vm1, %v498_v44, %v1015_v35 }
  0x92   : > { %v1024_v12 = vpop.permute.xlu1 %1023  ;;  %v287_v49 = vsel %vm286_vm3, %v285_v26, %v1011_v24  ;;  %v297_v51 = vsel %vm286_vm3, %v296_v45, %v1010_v25 }
  0x93   : > { %v1019_v13 = vpop.permute.xlu0 %1018  ;;  %v1026_v52 = vunpack.i.h.bf16 %v1024_v12  ;;  %v1025_v53 = vunpack.i.l.bf16 %v1024_v12 }
  0x94   : > { %v1021_v38 = vunpack.i.h.bf16 %v1019_v13  ;;  %v1020_v39 = vunpack.i.l.bf16 %v1019_v13 }
  0x95   : > { %v493_v6 = vsel %vm284_vm2, %v492_v20, %v1026_v52  ;;  %v500_v7 = vsel %vm284_vm2, %v499_v55, %v1025_v53 }
  0x96   : > { %v1034_v29 = vpop.permute.xlu1 %1033  ;;  %v289_v21 = vsel %vm288_vm4, %v287_v49, %v1021_v38  ;;  %v298_v57 = vsel %vm288_vm4, %v297_v51, %v1020_v39 }
  0x97   : > { %v1029_v40 = vpop.permute.xlu0 %1028  ;;  %v1036_v58 = vunpack.i.h.bf16 %v1034_v29  ;;  %v1035_v59 = vunpack.i.l.bf16 %v1034_v29 }
  0x98   : > { %v1031_v46 = vunpack.i.h.bf16 %v1029_v40  ;;  %v1030_v48 = vunpack.i.l.bf16 %v1029_v40 }
  0x99   : > { %v494_v17 = vsel %vm286_vm3, %v493_v6, %v1036_v58  ;;  %v501_v18 = vsel %vm286_vm3, %v500_v7, %v1035_v59 }
  0x9a   : > { %v1044_v54 = vpop.permute.xlu1 %1043  ;;  %v291_v62 = vsel %vm290_vm5, %v289_v21, %v1031_v46  ;;  %v299_v5 = vsel %vm290_vm5, %v298_v57, %v1030_v48 }
  0x9b   : > { %v1039_v56 = vpop.permute.xlu0 %1038  ;;  %v1046_v63 = vunpack.i.h.bf16 %v1044_v54  ;;  %v1045_v0 = vunpack.i.l.bf16 %v1044_v54 }
  0x9c   : > { %v1041_v60 = vunpack.i.h.bf16 %v1039_v56  ;;  %v1040_v61 = vunpack.i.l.bf16 %v1039_v56 }
  0x9d   : > { %v495_v23 = vsel %vm288_vm4, %v494_v17, %v1046_v63  ;;  %v502_v24 = vsel %vm288_vm4, %v501_v18, %v1045_v0 }
  0x9e   : > { %v1054_v8 = vpop.permute.xlu1 %1053  ;;  %v300_v9 = vsel %vm292_vm6, %v299_v5, %v1040_v61  ;;  %v293_v11 = vsel %vm292_vm6, %v291_v62, %v1041_v60 }
  0x9f   : > { %v1049_v12 = vpop.permute.xlu0 %1048  ;;  %v1056_v13 = vunpack.i.h.bf16 %v1054_v8  ;;  %v1055_v14 = vunpack.i.l.bf16 %v1054_v8  ;;  %v1370_v15 = vpack.c.bf16 %v300_v9, %v300_v9  ;;  %v301_v16 = vpack.c.bf16 %v293_v11, %v293_v11 }
  0xa0   : > { %v1051_v19 = vunpack.i.h.bf16 %v1049_v12  ;;  %v1050_v22 = vunpack.i.l.bf16 %v1049_v12 }
  0xa1   : > { %431 = vmatprep.mubr.bf16.mxu0 %v1370_v15 }
  0xa2   : > { %v496_v25 = vsel %vm290_vm5, %v495_v23, %v1051_v19  ;;  %432 = vmatmul.mubr.bf16.vlgmr.msra.gmra.mrb[0].mxu0 %v301_v16  ;;  %v503_v29 = vsel %vm290_vm5, %v502_v24, %v1050_v22  ;;  %v1064_v34 = vpop.permute.xlu1 %1063 }
  0xa3   : > { %928 = vmatpush3.bf16.msra.mxu0 %v1156_v1  ;;  %v504_v35 = vsel %vm292_vm6, %v503_v29, %v1055_v14  ;;  %v497_v38 = vsel %vm292_vm6, %v496_v25, %v1056_v13  ;;  %v1066_v39 = vunpack.i.h.bf16 %v1064_v34  ;;  %v1065_v40 = vunpack.i.l.bf16 %v1064_v34  ;;  %v1059_v43 = vpop.permute.xlu0 %1058 }
  0xa4   : > { %929 = vmatprep.subr.bf16.mxu0 %v1163_v2  ;;  %v1383_v44 = vpack.c.bf16 %v504_v35, %v504_v35  ;;  %v505_v26 = vpack.c.bf16 %v497_v38, %v497_v38  ;;  %v1061_v45 = vunpack.i.h.bf16 %v1059_v43  ;;  %v1060_v46 = vunpack.i.l.bf16 %v1059_v43 }
  0xa6   : > { %539 = vmatprep.mubr.bf16.mxu1 %v1383_v44  ;;  %v655_v48 = vsel %vm280_vm0, %v1326_v50, %v1061_v45  ;;  %v577_v49 = vsel %vm280_vm0, %v1235_v27, %v1060_v46  ;;  %v1074_v51 = vpop.permute.xlu1 %1073 }
  0xa7   : > { %930 = vmatpush3.bf16.msra.mxu0 %v1172_v3  ;;  %540 = vmatmul.mubr.bf16.vlgmr.msra.gmra.mrb[0].mxu1 %v505_v26  ;;  %v1076_v52 = vunpack.i.h.bf16 %v1074_v51  ;;  %v1075_v53 = vunpack.i.l.bf16 %v1074_v51  ;;  %v1069_v54 = vpop.permute.xlu0 %1068  ;;  %v578_v20 = vsel %vm282_vm1, %v577_v49, %v1065_v40  ;;  %v656_v55 = vsel %vm282_vm1, %v655_v48, %v1066_v39 }
  0xa8   : > { %950 = vmatpush3.bf16.msra.mxu1 %v1156_v1  ;;  %931 = vmatprep.subr.bf16.mxu0 %v1179_v4  ;;  %v1071_v21 = vunpack.i.h.bf16 %v1069_v54  ;;  %v1070_v50 = vunpack.i.l.bf16 %v1069_v54 }
  0xa9   : > { %951 = vmatprep.subr.bf16.mxu1 %v1163_v2 }
  0xaa   : > { %v579_v27 = vsel %vm284_vm2, %v578_v20, %v1070_v50  ;;  %v657_v56 = vsel %vm284_vm2, %v656_v55, %v1071_v21  ;;  %v1084_v57 = vpop.permute.xlu1 %1083 }
  0xab   : > { %932 = vmatpush3.bf16.msra.mxu0 %v1200_v10  ;;  %v1086_v58 = vunpack.i.h.bf16 %v1084_v57  ;;  %v1085_v59 = vunpack.i.l.bf16 %v1084_v57  ;;  %v1079_v60 = vpop.permute.xlu0 %1078  ;;  %v658_v61 = vsel %vm286_vm3, %v657_v56, %v1076_v52  ;;  %v580_v1 = vsel %vm286_vm3, %v579_v27, %v1075_v53 }
  0xac   : > { %952 = vmatpush3.bf16.msra.mxu1 %v1172_v3  ;;  %933 = vmatprep.subr.bf16.mxu0 %v1240_v28  ;;  %v1081_v62 = vunpack.i.h.bf16 %v1079_v60  ;;  %v1080_v2 = vunpack.i.l.bf16 %v1079_v60 }
  0xad   : > { %953 = vmatprep.subr.bf16.mxu1 %v1179_v4 }
  0xae   : > { %v653_v63 = vpop.permute.xlu1 %652  ;;  %v659_v0 = vsel %vm288_vm4, %v658_v61, %v1081_v62  ;;  %v581_v5 = vsel %vm288_vm4, %v580_v1, %v1080_v2 }
  0xaf   : > { %934 = vmatpush3.bf16.msra.mxu0 %v1246_v30  ;;  %v660_v6 = vsel %vm290_vm5, %v659_v0, %v1086_v58  ;;  %v575_v7 = vpop.permute.xlu0 %574  ;;  %v582_v8 = vsel %vm290_vm5, %v581_v5, %v1085_v59 }
  0xb0   : > { %954 = vmatpush3.bf16.msra.mxu1 %v1200_v10  ;;  %935 = vmatprep.subr.bf16.mxu0 %v1253_v31  ;;  %v661_v3 = vsel %vm292_vm6, %v660_v6, %v653_v63  ;;  %v583_v4 = vsel %vm292_vm6, %v582_v8, %v575_v7 }
  0xb1   : > { %955 = vmatprep.subr.bf16.mxu1 %v1240_v28  ;;  %v662_v9 = vpack.c.bf16 %v661_v3, %v661_v3  ;;  %v584_v11 = vpack.c.bf16 %v583_v4, %v583_v4 }
  0xb3   : > { %936 = vmatpush3.bf16.msra.mxu0 %v1259_v32  ;;  %617 = vmatprep.mubr.bf16.mxu0 %v584_v11 }
  0xb4   : > { %956 = vmatpush3.bf16.msra.mxu1 %v1246_v30  ;;  %937 = vmatprep.subr.bf16.mxu0 %v1267_v33  ;;  %v879_v30 = vld [vmem:[%s1462_s2] ss:$0 sm:$0xff] }
  0xb5   : > { %957 = vmatprep.subr.bf16.mxu1 %v1253_v31  ;;  %695 = vmatprep.mubr.bf16.mxu1 %v662_v9 }
  0xb7   : > { %938 = vmatpush3.bf16.msra.mxu0 %v1279_v36 }
  0xb8   : > { %958 = vmatpush3.bf16.msra.mxu1 %v1259_v32  ;;  %939 = vmatprep.subr.bf16.mxu0 %v1286_v37 }
  0xb9   : > { %959 = vmatprep.subr.bf16.mxu1 %v1267_v33 }
  0xbb   : > { %940 = vmatpush3.bf16.msra.mxu0 %v1298_v41 }
  0xbc   : > { %960 = vmatpush3.bf16.msra.mxu1 %v1279_v36  ;;  %941 = vmatprep.subr.bf16.mxu0 %v1305_v42 }
  0xbd   : > { %961 = vmatprep.subr.bf16.mxu1 %v1286_v37 }
  0xbf   : > { %942 = vmatpush3.bf16.msra.mxu0 %v1318_v47 }
  0xc0   : > { %962 = vmatpush3.bf16.msra.mxu1 %v1298_v41 }
  0xc1   : > { %963 = vmatprep.subr.bf16.mxu1 %v1305_v42 }
  0xc2   : > { %618 = vmatmul.mubr.bf16.vlgmr.msra.gmra.mrb[4].mxu0 %v1370_v15 }
  0xc4   : > { %964 = vmatpush3.bf16.msra.mxu1 %v1318_v47 }
  0xc7   : > { %696 = vmatmul.mubr.bf16.vlgmr.msra.gmra.mrb[4].mxu1 %v1383_v44 }
 0x175   : > { %v899_v10 = vpop.f32.mrb[0].mxu0 }
 0x176   : > { %v900_v28 = vpop.f32.mrb[1].mxu0 }
 0x177   : > { %v901_v31 = vadd.f32 %v900_v28, %v899_v10  ;;  %v902_v32 = vpop.f32.mrb[2].mxu0 }
 0x178   : > { %v903_v33 = vpop.f32.mrb[3].mxu0 }
 0x179   : > { %v1435_v36 = vadd.f32 %v901_v31, %v879_v30 }
 0x17a   : > { %v921_v37 = vpop.f32.mrb[0].mxu1 }
 0x17b   : > { %v922_v41 = vpop.f32.mrb[1].mxu1  ;;  %v729_v47 = vmul.f32 %v1435_v36, %v1435_v36  ;;  %v714_v15 = vsel %vm713_vm7, %v1435_v36, 0.0 }
 0x17c   : > { %v923_v42 = vadd.f32 %v922_v41, %v921_v37  ;;  %v924_v12 = vpop.f32.mrb[2].mxu1 }
 0x17d   : > { %v925_v13 = vpop.f32.mrb[3].mxu1  ;;  %v733_v19 = vsel %vm713_vm7, %v729_v47, 0.0 }
 0x17e   : > { %v710_v14 = vadd.f32 %v923_v42, %v879_v30 }
 0x180   : > { %v715_v16 = vsel %vm713_vm7, %v710_v14, 0.0  ;;  %v730_v17 = vmul.f32 %v710_v14, %v710_v14 }
 0x181   : > { %v716_v18 = vadd.f32 %v715_v16, %v714_v15 }
 0x182   : > { %v734_v22 = vsel %vm713_vm7, %v730_v17, 0.0 }
 0x183   : > { %v735_v23 = vadd.f32 %v734_v22, %v733_v19 }
 0x195   : > { %v943_v24 = vpop.f32.mrb[4].mxu0 }
 0x196   : > { %v944_v25 = vpop.f32.mrb[5].mxu0 }
 0x197   : > { %v945_v29 = vadd.f32 %v944_v25, %v943_v24  ;;  %v946_v34 = vpop.f32.mrb[6].mxu0 }
 0x198   : > { %v947_v35 = vpop.f32.mrb[7].mxu0 }
 0x199   : > { %v711_v38 = vadd.f32 %v945_v29, %v879_v30 }
 0x19a   : > { %v965_v39 = vpop.f32.mrb[4].mxu1 }
 0x19b   : > { %v717_v40 = vsel %vm713_vm7, %v711_v38, 0.0  ;;  %v731_v43 = vmul.f32 %v711_v38, %v711_v38  ;;  %v966_v44 = vpop.f32.mrb[5].mxu1 }
 0x19c   : > { %v718_v26 = vadd.f32 %v717_v40, %v716_v18  ;;  %v967_v45 = vadd.f32 %v966_v44, %v965_v39  ;;  %v968_v46 = vpop.f32.mrb[6].mxu1 }
 0x19d   : > { %v736_v48 = vsel %vm713_vm7, %v731_v43, 0.0  ;;  %v969_v49 = vpop.f32.mrb[7].mxu1 }
 0x19e   : > { %v737_v51 = vadd.f32 %v736_v48, %v735_v23  ;;  %v712_v52 = vadd.f32 %v967_v45, %v879_v30 }
 0x1a0   : > { %v719_v53 = vsel %vm713_vm7, %v712_v52, 0.0  ;;  %v732_v54 = vmul.f32 %v712_v52, %v712_v52 }
 0x1a1   : > { %v720_v20 = vadd.f32 %v719_v53, %v718_v26 }
 0x1a2   : > { %v738_v55 = vsel %vm713_vm7, %v732_v54, 0.0 }
 0x1a3   : > { %v721_v21 = vrot.slane %v720_v20, 4  ;;  %v739_v50 = vadd.f32 %v738_v55, %v737_v51 }
 0x1a5   : > { %v722_v27 = vadd.f32 %v721_v21, %v720_v20  ;;  %v740_v56 = vrot.slane %v739_v50, 4 }
 0x1a7   : > { %v723_v57 = vrot.slane %v722_v27, 2  ;;  %v741_v58 = vadd.f32 %v740_v56, %v739_v50 }
 0x1a9   : > { %v724_v59 = vadd.f32 %v723_v57, %v722_v27  ;;  %v742_v60 = vrot.slane %v741_v58, 2 }
 0x1ab   : > { %v725_v61 = vrot.slane %v724_v59, 1  ;;  %v743_v1 = vadd.f32 %v742_v60, %v741_v58 }
 0x1ad   : > { %v726_v62 = vadd.f32 %v725_v61, %v724_v59  ;;  %v744_v2 = vrot.slane %v743_v1, 1 }
 0x1af   : > { %v728_v63 = vmul.f32 0.0625, %v726_v62  ;;  %v745_v0 = vadd.f32 %v744_v2, %v743_v1 }
 0x1b1   : > { %v746_v5 = vmul.f32 0.0625, %v745_v0  ;;  %v747_v6 = vmul.f32 %v728_v63, %v728_v63  ;;  %v749_v7 = vsub.f32 %v1435_v36, %v728_v63  ;;  %v750_v8 = vsub.f32 %v710_v14, %v728_v63 }
 0x1b2   : > { %v751_v3 = vsub.f32 %v711_v38, %v728_v63  ;;  %v752_v4 = vsub.f32 %v712_v52, %v728_v63 }
 0x1b3   : > { %v748_v9 = vsub.f32 %v746_v5, %v747_v6 }
 0x1b5   : > { %v753_v11 = vmax.f32 %v748_v9, 0.0 }
 0x1b7   : > { %v754_v10 = vadd.f32 1e-05, %v753_v11 }
 0x1b9   : > { %1103 = vrsqrt.f32 %v754_v10 }
 0x1c3   : > { %v1104_v28 = vpop.eup %1103 }
 0x1c4   : > { %v756_v30 = vmul.f32 %v1104_v28, %v749_v7  ;;  %v757_v31 = vmul.f32 %v1104_v28, %v750_v8  ;;  %v758_v32 = vmul.f32 %v1104_v28, %v751_v3  ;;  %v759_v33 = vmul.f32 %v1104_v28, %v752_v4 }
 0x1c6   : > { %vm760_vm8 = vcmp.ge.f32.partialorder %v756_v30, 0.0  ;;  %vm761_vm9 = vcmp.ge.f32.partialorder %v757_v31, 0.0  ;;  %vm762_vm10 = vcmp.ge.f32.partialorder %v758_v32, 0.0  ;;  %vm763_vm11 = vcmp.ge.f32.partialorder %v759_v33, 0.0 }
 0x1c7   : > { %v764_v36 = vmul.f32 0.2, %v756_v30  ;;  %v765_v37 = vmul.f32 0.2, %v757_v31  ;;  %v766_v41 = vmul.f32 0.2, %v758_v32 }
 0x1c8   : > { %v767_v42 = vmul.f32 0.2, %v759_v33 }
 0x1c9   : > { %v768_v12 = vsel %vm760_vm8, %v756_v30, %v764_v36  ;;  %v769_v13 = vsel %vm761_vm9, %v757_v31, %v765_v37  ;;  %v770_v47 = vsel %vm762_vm10, %v758_v32, %v766_v41 }
 0x1ca   : > { %v771_v14 = vsel %vm763_vm11, %v759_v33, %v767_v42  ;;  %772 = vst.msk [vmem:[%s170_s10] sm:$0xf] %vm713_vm7, %v768_v12  ;;  %773 = vst.msk [vmem:[%s170_s10 + $0x4] sm:$0xf] %vm713_vm7, %v769_v13 }
 0x1cb   : > { %774 = vst.msk [vmem:[%s170_s10 + $0x8] sm:$0xf] %vm713_vm7, %v770_v47  ;;  %775 = vst.msk [vmem:[%s170_s10 + $0xc] sm:$0xf] %vm713_vm7, %v771_v14 }
 0x1cc PF: > { %s13_s12 = sadd.s32 1, %s1111_s12  }
 0x1cd   : > { %p10_p4 = scmp.ge.s32.totalorder %s13_s12, 4  }
 0x1cf   :  { %12 = sbr.rel (!%p10_p4) target bundleno = 1 (0x1), region = 68 }

// kernel: mesh_rgb_discriminator_forward.15
= control target key start
LH: loop header
LB: loop body
LE: loop exit
PB: predicated region body
PF: predicated region fallthrough
CT: control target
= control target key end

     0   :  { %s1473_s14 = smov 0   ;;  %s1940_s0 = inlined_call_operand.vmem [shape: f32[2,8,8,32], index: 0, kind: input, shape index: {}]   ;;  %s1941_s1 = inlined_call_operand.vmem [shape: bf16[512,1], index: 1, kind: input, shape index: {}]   ;;  %s1942_s2 = inlined_call_operand.<no memory space> [shape: f32[1,1], index: 2, kind: input, shape index: {}]   ;;  %s1943_s3 = inlined_call_operand.vmem [shape: f32[2,5,5,1], index: 3, kind: output, shape index: {}]  }
   0x1   :  { %v8_v0 = vstv %s1942_s2 }
   0x2   :  { %9 = vst [vmem:[#allocation2] sm:$0x1] %v8_v0 }
   0x3 LB: > { %s1073_s15 = sadd.s32 4294967295, %s1445_s14   ;;  %p1077_p0 = scmp.ge.s32.totalorder %s1445_s14, 1  ;;  %s1445_s14 = sphi %s1473_s14, %s15_s14  }
   0x4   : > { %p139_p1 = scmp.lt.s32.totalorder %s1445_s14, 3 }
   0x6   : > { %p140_p2 = pnand %p1077_p0, %p139_p1 }
   0x7   : > { %p163_p3 = scmp.lt.s32.totalorder (!%p140_p2), %s1073_s15, 1  ;;  %v1484_v1 = vld [vmem:[%s1941_s1 + $0x40] sm:$0xff] (!%p140_p2)   ;;  %v1515_v5 = vld [vmem:[%s1941_s1 + $0x48] sm:$0xff] (!%p140_p2)   ;;  %s1447_s29 = smov (!%p140_p2), 64   ;;  %v1555_v27 = vld [vmem:[%s1941_s1 + $0x50] sm:$0xff] (!%p140_p2)   ;;  %vm306_vm0 = vcmask (!%p140_p2), 261120  }
   0x8   : > { %143 = sbr.rel (%p140_p2) target bundleno = 500 (0x1f4), region = 32  ;;  %v1489_v2 = vld [vmem:[%s1941_s1 + $0xc0] sm:$0xff] (!%p140_p2)   ;;  %1145 = vmatprep.subr.bf16.mxu0 (!%p140_p2), %v1484_v1  ;;  %s1448_s30 = smov (!%p140_p2), 32   ;;  %v1536_v22 = vld [vmem:[%s1941_s1 + $0xc8] sm:$0xff] (!%p140_p2)   ;;  %v1561_v28 = vld [vmem:[%s1941_s1 + $0xd0] sm:$0xff] (!%p140_p2)   ;;  %vm308_vm1 = vcmask (!%p140_p2), 523264  }
   0x9   : > { %v1496_v3 = vld [vmem:[%s1941_s1] sm:$0xff] (!%p140_p2)   ;;  %1167 = vmatprep.subr.bf16.mxu1 (!%p140_p2), %v1489_v2  ;;  %v1542_v24 = vld [vmem:[%s1941_s1 + $0x8] sm:$0xff] (!%p140_p2)   ;;  %s1449_s16 = smov (!%p140_p2), 96   ;;  %v1572_v31 = vld [vmem:[%s1941_s1 + $0x10] sm:$0xff] (!%p140_p2)   ;;  %vm310_vm2 = vcmask (!%p140_p2), 785408   ;;  %vm1012_vm3 = vcmask (!%p140_p2), 4096  }
   0xa   : > { %1146 = vmatpush3.bf16.msra.mxu0 (!%p140_p2), %v1496_v3  ;;  %v1505_v4 = vld [vmem:[%s1941_s1 + $0x80] sm:$0xff] (!%p140_p2)   ;;  %v1549_v26 = vld [vmem:[%s1941_s1 + $0x88] sm:$0xff] (!%p140_p2)   ;;  %v1577_v32 = vld [vmem:[%s1941_s1 + $0x90] sm:$0xff] (!%p140_p2)  }
   0xb   : > { %1168 = vmatpush3.bf16.msra.mxu1 (!%p140_p2), %v1505_v4  ;;  %1147 = vmatprep.subr.bf16.mxu0 (!%p140_p2), %v1515_v5  ;;  %v1584_v34 = vld [vmem:[%s1941_s1 + $0x58] sm:$0xff] (!%p140_p2)   ;;  %v1612_v40 = vld [vmem:[%s1941_s1 + $0x60] sm:$0xff] (!%p140_p2)   ;;  %v1640_v46 = vld [vmem:[%s1941_s1 + $0x68] sm:$0xff] (!%p140_p2)  }
   0xc   : > { %1169 = vmatprep.subr.bf16.mxu1 (!%p140_p2), %v1536_v22  ;;  %v1592_v36 = vld [vmem:[%s1941_s1 + $0xd8] sm:$0xff] (!%p140_p2)   ;;  %v1619_v41 = vld [vmem:[%s1941_s1 + $0xe0] sm:$0xff] (!%p140_p2)   ;;  %v1647_v47 = vld [vmem:[%s1941_s1 + $0xe8] sm:$0xff] (!%p140_p2)  }
   0xd   : > { %v1599_v37 = vld [vmem:[%s1941_s1 + $0x18] sm:$0xff] (!%p140_p2)   ;;  %v1626_v42 = vld [vmem:[%s1941_s1 + $0x20] sm:$0xff] (!%p140_p2)   ;;  %v1654_v48 = vld [vmem:[%s1941_s1 + $0x28] sm:$0xff] (!%p140_p2)  }
   0xe   : > { %1148 = vmatpush3.bf16.msra.mxu0 (!%p140_p2), %v1542_v24  ;;  %v1605_v38 = vld [vmem:[%s1941_s1 + $0x98] sm:$0xff] (!%p140_p2)   ;;  %v1633_v44 = vld [vmem:[%s1941_s1 + $0xa0] sm:$0xff] (!%p140_p2)   ;;  %v1661_v50 = vld [vmem:[%s1941_s1 + $0xa8] sm:$0xff] (!%p140_p2)  }
   0xf   : > { %s1945_s15 = smov (!%p163_p3, %s1073_s15), 1  ;;  %1170 = vmatpush3.bf16.msra.mxu1 %v1549_v26  ;;  %1149 = vmatprep.subr.bf16.mxu0 %v1555_v27  ;;  %v1670_v52 = vld [vmem:[%s1941_s1 + $0x70] sm:$0xff]   ;;  %v1694_v56 = vld [vmem:[%s1941_s1 + $0x78] sm:$0xff]  }
  0x10   : > { %s1144_s21 = sshll.u32 %s1945_s15, 6  ;;  %1171 = vmatprep.subr.bf16.mxu1 %v1561_v28  ;;  %v1676_v53 = vld [vmem:[%s1941_s1 + $0xf0] sm:$0xff]   ;;  %v1701_v57 = vld [vmem:[%s1941_s1 + $0xf8] sm:$0xff]  }
  0x11   : > { %s1510_s26 = scalar_lea.vmem %s1940_s0, %s1144_s21  ;;  %v1682_v54 = vld [vmem:[%s1941_s1 + $0x30] sm:$0xff]   ;;  %v1707_v58 = vld [vmem:[%s1941_s1 + $0x38] sm:$0xff]  }
  0x12   : > { %v1083_v6 = vld [vmem:[%s1510_s26 + $0xa] sm:$0x1f]  ;;  %v1091_v7 = vld [vmem:[%s1510_s26 + $0x1a] sm:$0x1f]  ;;  %v241_v11 = vld [vmem:[%s1510_s26 + $0x2] sm:$0x1f]  ;;  %1150 = vmatpush3.bf16.msra.mxu0 %v1572_v31 }
  0x13   : > { %v1082_v8 = vld [vmem:[%s1510_s26 + $0x9] sm:$0x1f]  ;;  %v1387_v9 = vpack.i.bf16 %v1091_v7, %v1083_v6  ;;  %v1090_v10 = vld [vmem:[%s1510_s26 + $0x19] sm:$0x1f]  ;;  %v1087_v12 = vld [vmem:[%s1510_s26 + $0x12] sm:$0x1f]  ;;  %1172 = vmatpush3.bf16.msra.mxu1 %v1577_v32  ;;  %1151 = vmatprep.subr.bf16.mxu0 %v1584_v34 }
  0x14   : > { %v1377_v13 = vpack.i.bf16 %v1090_v10, %v1082_v8  ;;  %v240_v14 = vld [vmem:[%s1510_s26 + $0x1] sm:$0x1f]  ;;  %v1086_v15 = vld [vmem:[%s1510_s26 + $0x11] sm:$0x1f]  ;;  %v1392_v16 = vpack.i.bf16 %v1087_v12, %v241_v11  ;;  %v1084_v20 = vld [vmem:[%s1510_s26 + $0xb] sm:$0x1f]  ;;  %1173 = vmatprep.subr.bf16.mxu1 %v1592_v36 }
  0x15   : > { %1388 = vrot.lane.b32.xlu1 %v1387_v9, %s1447_s29  ;;  %v1382_v17 = vpack.i.bf16 %v1086_v15, %v240_v14  ;;  %v242_v18 = vld [vmem:[%s1510_s26 + $0x3] sm:$0x1f]  ;;  %v1088_v19 = vld [vmem:[%s1510_s26 + $0x13] sm:$0x1f]  ;;  %v1092_v21 = vld [vmem:[%s1510_s26 + $0x1b] sm:$0x1f] }
  0x16   : > { %1378 = vrot.lane.b32.xlu0 %v1377_v13, %s1448_s30  ;;  %v1402_v23 = vpack.i.bf16 %v1088_v19, %v242_v18  ;;  %v1397_v25 = vpack.i.bf16 %v1092_v21, %v1084_v20  ;;  %v1126_v29 = vld [vmem:[%s1510_s26 + $0x21] sm:$0x1f]  ;;  %v1130_v33 = vld [vmem:[%s1510_s26 + $0x29] sm:$0x1f]  ;;  %1152 = vmatpush3.bf16.msra.mxu0 %v1599_v37  ;;  %v1135_v45 = vld [vmem:[%s1510_s26 + $0x32] sm:$0x1f] }
  0x17   : > { %v1127_v30 = vld [vmem:[%s1510_s26 + $0x22] sm:$0x1f]  ;;  %v1132_v39 = vld [vmem:[%s1510_s26 + $0x2b] sm:$0x1f]  ;;  %1174 = vmatpush3.bf16.msra.mxu1 %v1605_v38  ;;  %1153 = vmatprep.subr.bf16.mxu0 %v1612_v40  ;;  %v1134_v49 = vld [vmem:[%s1510_s26 + $0x31] sm:$0x1f] }
  0x18   : > { %v1128_v35 = vld [vmem:[%s1510_s26 + $0x23] sm:$0x1f]  ;;  %v1131_v43 = vld [vmem:[%s1510_s26 + $0x2a] sm:$0x1f]  ;;  %1175 = vmatprep.subr.bf16.mxu1 %v1619_v41  ;;  %v1136_v51 = vld [vmem:[%s1510_s26 + $0x33] sm:$0x1f] }
  0x19   : > { %1393 = vrot.lane.b32.xlu1 %v1392_v16, %s1447_s29  ;;  %v1688_v55 = vld [vmem:[%s1941_s1 + $0xb0] sm:$0xff]   ;;  %v1713_v59 = vld [vmem:[%s1941_s1 + $0xb8] sm:$0xff]   ;;  %v239_v12 = vld [vmem:[%s1510_s26] sm:$0x1f] }
  0x1a   : > { %1383 = vrot.lane.b32.xlu0 %v1382_v17, %s1448_s30  ;;  %1154 = vmatpush3.bf16.msra.mxu0 %v1626_v42  ;;  %v1138_v60 = vld [vmem:[%s1510_s26 + $0x39] sm:$0x1f]  ;;  %v1085_v10 = vld [vmem:[%s1510_s26 + $0x10] sm:$0x1f]  ;;  %v1081_v13 = vld [vmem:[%s1510_s26 + $0x8] sm:$0x1f] }
  0x1b   : > { %1176 = vmatpush3.bf16.msra.mxu1 %v1633_v44  ;;  %1155 = vmatprep.subr.bf16.mxu0 %v1640_v46  ;;  %v1139_v61 = vld [vmem:[%s1510_s26 + $0x3a] sm:$0x1f] }
  0x1c   : > { %1177 = vmatprep.subr.bf16.mxu1 %v1647_v47  ;;  %v1140_v62 = vld [vmem:[%s1510_s26 + $0x3b] sm:$0x1f] }
  0x1d   : > { %1403 = vrot.lane.b32.xlu1 %v1402_v23, %s1449_s16  ;;  %v1089_v6 = vld [vmem:[%s1510_s26 + $0x18] sm:$0x1f] }
  0x1e   : > { %1398 = vrot.lane.b32.xlu0 %v1397_v25, %s1449_s16  ;;  %1156 = vmatpush3.bf16.msra.mxu0 %v1654_v48 }
  0x1f   : > { %1178 = vmatpush3.bf16.msra.mxu1 %v1661_v50  ;;  %1157 = vmatprep.subr.bf16.mxu0 %v1670_v52 }
  0x20   : > { %1179 = vmatprep.subr.bf16.mxu1 %v1676_v53 }
  0x21   : > { %607 = vrot.lane.b32.xlu1 %v1127_v30, %s1447_s29 }
  0x22   : > { %603 = vrot.lane.b32.xlu0 %v1126_v29, %s1448_s30  ;;  %1158 = vmatpush3.bf16.msra.mxu0 %v1682_v54 }
  0x23   : > { %1180 = vmatpush3.bf16.msra.mxu1 %v1688_v55  ;;  %1159 = vmatprep.subr.bf16.mxu0 %v1694_v56 }
  0x24   : > { %1181 = vmatprep.subr.bf16.mxu1 %v1701_v57 }
  0x25   : > { %704 = vrot.lane.b32.xlu1 %v1130_v33, %s1448_s30 }
  0x26   : > { %611 = vrot.lane.b32.xlu0 %v1128_v35, %s1449_s16  ;;  %1160 = vmatpush3.bf16.msra.mxu0 %v1707_v58 }
  0x27   : > { %1182 = vmatpush3.bf16.msra.mxu1 %v1713_v59  ;;  %1189 = vmatprep.subr.bf16.mxu0 %v1484_v1 }
  0x28   : > { %1211 = vmatprep.subr.bf16.mxu1 %v1489_v2 }
  0x29   : > { %712 = vrot.lane.b32.xlu1 %v1132_v39, %s1449_s16 }
  0x2a   : > { %708 = vrot.lane.b32.xlu0 %v1131_v43, %s1447_s29 }
  0x2d   : > { %809 = vrot.lane.b32.xlu1 %v1135_v45, %s1447_s29 }
  0x2e   : > { %805 = vrot.lane.b32.xlu0 %v1134_v49, %s1448_s30 }
  0x31   : > { %906 = vrot.lane.b32.xlu1 %v1138_v60, %s1448_s30 }
  0x32   : > { %813 = vrot.lane.b32.xlu0 %v1136_v51, %s1449_s16 }
  0x35   : > { %914 = vrot.lane.b32.xlu1 %v1140_v62, %s1449_s16 }
  0x36   : > { %910 = vrot.lane.b32.xlu0 %v1139_v61, %s1447_s29 }
  0x87   : > { %v1389_v63 = vpop.permute.xlu1 %1388 }
  0x88   : > { %v1379_v0 = vpop.permute.xlu0 %1378  ;;  %v1391_v18 = vunpack.i.h.bf16 %v1389_v63  ;;  %v1390_v19 = vunpack.i.l.bf16 %v1389_v63  ;;  %v1125_v63 = vld [vmem:[%s1510_s26 + $0x20] sm:$0x1f] }
  0x89   : > { %v1381_v7 = vunpack.i.h.bf16 %v1379_v0  ;;  %v1380_v8 = vunpack.i.l.bf16 %v1379_v0 }
  0x8b   : > { %v1394_v9 = vpop.permute.xlu1 %1393  ;;  %v318_v20 = vsel %vm306_vm0, %v1089_v6, %v1381_v7  ;;  %v312_v29 = vsel %vm306_vm0, %v1081_v13, %v1380_v8 }
  0x8c   : > { %v1384_v11 = vpop.permute.xlu0 %1383  ;;  %v1396_v14 = vunpack.i.h.bf16 %v1394_v9  ;;  %v1395_v15 = vunpack.i.l.bf16 %v1394_v9  ;;  %v319_v51 = vsel %vm308_vm1, %v318_v20, %v1391_v18  ;;  %v313_v60 = vsel %vm308_vm1, %v312_v29, %v1390_v19 }
  0x8d   : > { %v1386_v16 = vunpack.i.h.bf16 %v1384_v11  ;;  %v1385_v17 = vunpack.i.l.bf16 %v1384_v11 }
  0x8f   : > { %v315_v21 = vsel %vm306_vm0, %v1085_v10, %v1386_v16  ;;  %v307_v23 = vsel %vm306_vm0, %v239_v12, %v1385_v17  ;;  %v1404_v25 = vpop.permute.xlu1 %1403 }
  0x90   : > { %v1406_v30 = vunpack.i.h.bf16 %v1404_v25  ;;  %v1405_v33 = vunpack.i.l.bf16 %v1404_v25  ;;  %v1399_v35 = vpop.permute.xlu0 %1398  ;;  %v309_v45 = vsel %vm308_vm1, %v307_v23, %v1395_v15  ;;  %v316_v49 = vsel %vm308_vm1, %v315_v21, %v1396_v14  ;;  %v1133_v21 = vld [vmem:[%s1510_s26 + $0x30] sm:$0x1f] }
  0x91   : > { %v1401_v39 = vunpack.i.h.bf16 %v1399_v35  ;;  %v1400_v43 = vunpack.i.l.bf16 %v1399_v35 }
  0x92   : > { %v311_v61 = vsel %vm310_vm2, %v309_v45, %v1405_v33  ;;  %v317_v62 = vsel %vm310_vm2, %v316_v49, %v1406_v30 }
  0x93   : > { %v320_v0 = vsel %vm310_vm2, %v319_v51, %v1401_v39  ;;  %v314_v6 = vsel %vm310_vm2, %v313_v60, %v1400_v43  ;;  %v321_v7 = vpack.c.bf16 %v311_v61, %v311_v61  ;;  %v1742_v8 = vpack.c.bf16 %v317_v62, %v317_v62  ;;  %v608_v9 = vpop.permute.xlu1 %607  ;;  %v1137_v39 = vld [vmem:[%s1510_s26 + $0x38] sm:$0x1f]  ;;  %v1129_v51 = vld [vmem:[%s1510_s26 + $0x28] sm:$0x1f]  ;;  %s1365_s26 = smul.u32 40, %s1945_s15 }
  0x94   : > { %v1744_v10 = vpack.c.bf16 %v320_v0, %v320_v0  ;;  %v1746_v11 = vpack.c.bf16 %v314_v6, %v314_v6  ;;  %v604_v12 = vpop.permute.xlu0 %603 }
  0x95   : > { %v614_v13 = vsel %vm306_vm0, %v1125_v63, %v604_v12  ;;  %s1925_s16 = scalar_lea.vmem %s1943_s3, %s1365_s26 }
  0x96   : > { %549 = vmatprep.mubr.bf16.mxu0 %v1746_v11  ;;  %589 = vmatprep.mubr.bf16.mxu1 %v1744_v10  ;;  %v615_v14 = vsel %vm308_vm1, %v614_v13, %v608_v9 }
  0x97   : > { %550 = vmatmul.mubr.bf16.vlgmr.msra.gmra.mrb[0].mxu0 %v321_v7  ;;  %590 = vmatmul.mubr.bf16.vlgmr.msra.gmra.mrb[0].mxu1 %v1742_v8  ;;  %v705_v15 = vpop.permute.xlu1 %704 }
  0x98   : > { %1190 = vmatpush3.bf16.msra.mxu0 %v1496_v3  ;;  %1212 = vmatpush3.bf16.msra.mxu1 %v1505_v4  ;;  %v612_v16 = vpop.permute.xlu0 %611  ;;  %v715_v63 = vsel %vm306_vm0, %v1129_v51, %v705_v15 }
  0x99   : > { %650 = vmatprep.mubr.bf16.mxu0 %v1742_v8  ;;  %1191 = vmatprep.subr.bf16.mxu0 %v1515_v5  ;;  %v616_v17 = vsel %vm310_vm2, %v615_v14, %v612_v16 }
  0x9a   : > { %1213 = vmatprep.subr.bf16.mxu1 %v1536_v22  ;;  %v1759_v18 = vpack.c.bf16 %v616_v17, %v616_v17 }
  0x9b   : > { %v713_v19 = vpop.permute.xlu1 %712 }
  0x9c   : > { %1192 = vmatpush3.bf16.msra.mxu0 %v1542_v24  ;;  %1214 = vmatpush3.bf16.msra.mxu1 %v1549_v26  ;;  %v709_v20 = vpop.permute.xlu0 %708 }
  0x9d   : > { %1193 = vmatprep.subr.bf16.mxu0 %v1555_v27  ;;  %1215 = vmatprep.subr.bf16.mxu1 %v1561_v28  ;;  %v716_v0 = vsel %vm308_vm1, %v715_v63, %v709_v20 }
  0x9e   : > { %690 = vmatprep.mubr.bf16.mxu1 %v1759_v18  ;;  %v717_v6 = vsel %vm310_vm2, %v716_v0, %v713_v19 }
  0x9f   : > { %v810_v23 = vpop.permute.xlu1 %809  ;;  %v1806_v7 = vpack.c.bf16 %v717_v6, %v717_v6 }
  0xa0   : > { %1194 = vmatpush3.bf16.msra.mxu0 %v1572_v31  ;;  %1216 = vmatpush3.bf16.msra.mxu1 %v1577_v32  ;;  %v806_v25 = vpop.permute.xlu0 %805 }
  0xa1   : > { %1195 = vmatprep.subr.bf16.mxu0 %v1584_v34  ;;  %1217 = vmatprep.subr.bf16.mxu1 %v1592_v36  ;;  %v816_v29 = vsel %vm306_vm0, %v1133_v21, %v806_v25 }
  0xa2   : > { %v817_v30 = vsel %vm308_vm1, %v816_v29, %v810_v23 }
  0xa3   : > { %v907_v43 = vpop.permute.xlu1 %906 }
  0xa4   : > { %1196 = vmatpush3.bf16.msra.mxu0 %v1599_v37  ;;  %1218 = vmatpush3.bf16.msra.mxu1 %v1605_v38  ;;  %v814_v33 = vpop.permute.xlu0 %813  ;;  %v917_v45 = vsel %vm306_vm0, %v1137_v39, %v907_v43 }
  0xa5   : > { %1197 = vmatprep.subr.bf16.mxu0 %v1612_v40  ;;  %1219 = vmatprep.subr.bf16.mxu1 %v1619_v41  ;;  %v1778_v35 = vsel %vm310_vm2, %v817_v30, %v814_v33 }
  0xa6   : > { %v1847_v9 = vpack.c.bf16 %v1778_v35, %v1778_v35 }
  0xa7   : > { %v915_v61 = vpop.permute.xlu1 %914 }
  0xa8   : > { %1198 = vmatpush3.bf16.msra.mxu0 %v1626_v42  ;;  %1220 = vmatpush3.bf16.msra.mxu1 %v1633_v44  ;;  %v911_v49 = vpop.permute.xlu0 %910 }
  0xa9   : > { %1199 = vmatprep.subr.bf16.mxu0 %v1640_v46  ;;  %1221 = vmatprep.subr.bf16.mxu1 %v1647_v47  ;;  %v918_v60 = vsel %vm308_vm1, %v917_v45, %v911_v49 }
  0xaa   : > { %v1791_v62 = vsel %vm310_vm2, %v918_v60, %v915_v61 }
  0xac   : > { %1200 = vmatpush3.bf16.msra.mxu0 %v1654_v48  ;;  %1222 = vmatpush3.bf16.msra.mxu1 %v1661_v50 }
  0xad   : > { %1201 = vmatprep.subr.bf16.mxu0 %v1670_v52  ;;  %1223 = vmatprep.subr.bf16.mxu1 %v1676_v53 }
  0xb0   : > { %1202 = vmatpush3.bf16.msra.mxu0 %v1682_v54  ;;  %1224 = vmatpush3.bf16.msra.mxu1 %v1688_v55 }
  0xb1   : > { %1203 = vmatprep.subr.bf16.mxu0 %v1694_v56  ;;  %1225 = vmatprep.subr.bf16.mxu1 %v1701_v57 }
  0xb4   : > { %1204 = vmatpush3.bf16.msra.mxu0 %v1707_v58  ;;  %1226 = vmatpush3.bf16.msra.mxu1 %v1713_v59 }
  0xb5   : > { %1233 = vmatprep.subr.bf16.mxu0 %v1484_v1  ;;  %1255 = vmatprep.subr.bf16.mxu1 %v1489_v2 }
  0xb7   : > { %651 = vmatmul.mubr.bf16.vlgmr.msra.gmra.mrb[4].mxu0 %v1746_v11  ;;  %691 = vmatmul.mubr.bf16.vlgmr.msra.gmra.mrb[4].mxu1 %v1744_v10 }
  0xb8   : > { %1234 = vmatpush3.bf16.msra.mxu0 %v1496_v3  ;;  %751 = vmatprep.mubr.bf16.mxu0 %v1744_v10 }
  0xb9   : > { %1256 = vmatpush3.bf16.msra.mxu1 %v1505_v4  ;;  %1235 = vmatprep.subr.bf16.mxu0 %v1515_v5 }
  0xba   : > { %1257 = vmatprep.subr.bf16.mxu1 %v1536_v22  ;;  %791 = vmatprep.mubr.bf16.mxu1 %v1806_v7 }
  0xbc   : > { %1236 = vmatpush3.bf16.msra.mxu0 %v1542_v24 }
  0xbd   : > { %1258 = vmatpush3.bf16.msra.mxu1 %v1549_v26  ;;  %1237 = vmatprep.subr.bf16.mxu0 %v1555_v27 }
  0xbe   : > { %1259 = vmatprep.subr.bf16.mxu1 %v1561_v28 }
  0xc0   : > { %1238 = vmatpush3.bf16.msra.mxu0 %v1572_v31 }
  0xc1   : > { %1260 = vmatpush3.bf16.msra.mxu1 %v1577_v32  ;;  %1239 = vmatprep.subr.bf16.mxu0 %v1584_v34 }
  0xc2   : > { %1261 = vmatprep.subr.bf16.mxu1 %v1592_v36 }
  0xc4   : > { %1240 = vmatpush3.bf16.msra.mxu0 %v1599_v37 }
  0xc5   : > { %1262 = vmatpush3.bf16.msra.mxu1 %v1605_v38  ;;  %1241 = vmatprep.subr.bf16.mxu0 %v1612_v40 }
  0xc6   : > { %1263 = vmatprep.subr.bf16.mxu1 %v1619_v41 }
  0xc8   : > { %1242 = vmatpush3.bf16.msra.mxu0 %v1626_v42 }
  0xc9   : > { %1264 = vmatpush3.bf16.msra.mxu1 %v1633_v44  ;;  %1243 = vmatprep.subr.bf16.mxu0 %v1640_v46 }
  0xca   : > { %1265 = vmatprep.subr.bf16.mxu1 %v1647_v47 }
  0xcc   : > { %1244 = vmatpush3.bf16.msra.mxu0 %v1654_v48 }
  0xcd   : > { %1266 = vmatpush3.bf16.msra.mxu1 %v1661_v50  ;;  %1245 = vmatprep.subr.bf16.mxu0 %v1670_v52 }
  0xce   : > { %1267 = vmatprep.subr.bf16.mxu1 %v1676_v53 }
  0xd0   : > { %1246 = vmatpush3.bf16.msra.mxu0 %v1682_v54 }
  0xd1   : > { %1268 = vmatpush3.bf16.msra.mxu1 %v1688_v55  ;;  %1247 = vmatprep.subr.bf16.mxu0 %v1694_v56 }
  0xd2   : > { %1269 = vmatprep.subr.bf16.mxu1 %v1701_v57 }
  0xd4   : > { %1248 = vmatpush3.bf16.msra.mxu0 %v1707_v58 }
  0xd5   : > { %1270 = vmatpush3.bf16.msra.mxu1 %v1713_v59  ;;  %1277 = vmatprep.subr.bf16.mxu0 %v1484_v1 }
  0xd6   : > { %1299 = vmatprep.subr.bf16.mxu1 %v1489_v2 }
  0xd7   : > { %752 = vmatmul.mubr.bf16.vlgmr.msra.gmra.mrb[8].mxu0 %v1742_v8  ;;  %v920_v8 = vpack.c.bf16 %v1791_v62, %v1791_v62 }
  0xd8   : > { %792 = vmatmul.mubr.bf16.vlgmr.msra.gmra.mrb[8].mxu1 %v1759_v18  ;;  %1278 = vmatpush3.bf16.msra.mxu0 %v1496_v3 }
  0xd9   : > { %852 = vmatprep.mubr.bf16.mxu0 %v1759_v18  ;;  %1300 = vmatpush3.bf16.msra.mxu1 %v1505_v4 }
  0xda   : > { %1279 = vmatprep.subr.bf16.mxu0 %v1515_v5  ;;  %1301 = vmatprep.subr.bf16.mxu1 %v1536_v22 }
  0xdb   : > { %892 = vmatprep.mubr.bf16.mxu1 %v1847_v9 }
  0xdc   : > { %1280 = vmatpush3.bf16.msra.mxu0 %v1542_v24 }
  0xdd   : > { %1302 = vmatpush3.bf16.msra.mxu1 %v1549_v26  ;;  %1281 = vmatprep.subr.bf16.mxu0 %v1555_v27 }
  0xde   : > { %1303 = vmatprep.subr.bf16.mxu1 %v1561_v28 }
  0xe0   : > { %1282 = vmatpush3.bf16.msra.mxu0 %v1572_v31 }
  0xe1   : > { %1304 = vmatpush3.bf16.msra.mxu1 %v1577_v32  ;;  %1283 = vmatprep.subr.bf16.mxu0 %v1584_v34 }
  0xe2   : > { %1305 = vmatprep.subr.bf16.mxu1 %v1592_v36 }
  0xe4   : > { %1284 = vmatpush3.bf16.msra.mxu0 %v1599_v37 }
  0xe5   : > { %1306 = vmatpush3.bf16.msra.mxu1 %v1605_v38  ;;  %1285 = vmatprep.subr.bf16.mxu0 %v1612_v40 }
  0xe6   : > { %1307 = vmatprep.subr.bf16.mxu1 %v1619_v41 }
  0xe8   : > { %1286 = vmatpush3.bf16.msra.mxu0 %v1626_v42 }
  0xe9   : > { %1308 = vmatpush3.bf16.msra.mxu1 %v1633_v44  ;;  %1287 = vmatprep.subr.bf16.mxu0 %v1640_v46 }
  0xea   : > { %1309 = vmatprep.subr.bf16.mxu1 %v1647_v47 }
  0xec   : > { %1288 = vmatpush3.bf16.msra.mxu0 %v1654_v48 }
  0xed   : > { %1310 = vmatpush3.bf16.msra.mxu1 %v1661_v50  ;;  %1289 = vmatprep.subr.bf16.mxu0 %v1670_v52 }
  0xee   : > { %1311 = vmatprep.subr.bf16.mxu1 %v1676_v53 }
  0xf0   : > { %1290 = vmatpush3.bf16.msra.mxu0 %v1682_v54 }
  0xf1   : > { %1312 = vmatpush3.bf16.msra.mxu1 %v1688_v55  ;;  %1291 = vmatprep.subr.bf16.mxu0 %v1694_v56 }
  0xf2   : > { %1313 = vmatprep.subr.bf16.mxu1 %v1701_v57 }
  0xf4   : > { %1292 = vmatpush3.bf16.msra.mxu0 %v1707_v58 }
  0xf5   : > { %1314 = vmatpush3.bf16.msra.mxu1 %v1713_v59  ;;  %1321 = vmatprep.subr.bf16.mxu0 %v1484_v1 }
  0xf6   : > { %1343 = vmatprep.subr.bf16.mxu1 %v1489_v2 }
  0xf7   : > { %853 = vmatmul.mubr.bf16.vlgmr.msra.gmra.mrb[12].mxu0 %v1744_v10 }
  0xf8   : > { %893 = vmatmul.mubr.bf16.vlgmr.msra.gmra.mrb[12].mxu1 %v1806_v7  ;;  %1322 = vmatpush3.bf16.msra.mxu0 %v1496_v3 }
  0xf9   : > { %953 = vmatprep.mubr.bf16.mxu0 %v1806_v7  ;;  %1344 = vmatpush3.bf16.msra.mxu1 %v1505_v4 }
  0xfa   : > { %1323 = vmatprep.subr.bf16.mxu0 %v1515_v5  ;;  %1345 = vmatprep.subr.bf16.mxu1 %v1536_v22 }
  0xfb   : > { %993 = vmatprep.mubr.bf16.mxu1 %v920_v8 }
  0xfc   : > { %1324 = vmatpush3.bf16.msra.mxu0 %v1542_v24 }
  0xfd   : > { %1346 = vmatpush3.bf16.msra.mxu1 %v1549_v26  ;;  %1325 = vmatprep.subr.bf16.mxu0 %v1555_v27  ;;  %v1141_v27 = vld [vmem:[#allocation2] ss:$0 sm:$0xff] }
  0xfe   : > { %1347 = vmatprep.subr.bf16.mxu1 %v1561_v28 }
 0x100   : > { %1326 = vmatpush3.bf16.msra.mxu0 %v1572_v31 }
 0x101   : > { %1348 = vmatpush3.bf16.msra.mxu1 %v1577_v32  ;;  %1327 = vmatprep.subr.bf16.mxu0 %v1584_v34 }
 0x102   : > { %1349 = vmatprep.subr.bf16.mxu1 %v1592_v36 }
 0x104   : > { %1328 = vmatpush3.bf16.msra.mxu0 %v1599_v37 }
 0x105   : > { %1350 = vmatpush3.bf16.msra.mxu1 %v1605_v38  ;;  %1329 = vmatprep.subr.bf16.mxu0 %v1612_v40 }
 0x106   : > { %1351 = vmatprep.subr.bf16.mxu1 %v1619_v41 }
 0x108   : > { %1330 = vmatpush3.bf16.msra.mxu0 %v1626_v42 }
 0x109   : > { %1352 = vmatpush3.bf16.msra.mxu1 %v1633_v44  ;;  %1331 = vmatprep.subr.bf16.mxu0 %v1640_v46 }
 0x10a   : > { %1353 = vmatprep.subr.bf16.mxu1 %v1647_v47 }
 0x10c   : > { %1332 = vmatpush3.bf16.msra.mxu0 %v1654_v48 }
 0x10d   : > { %1354 = vmatpush3.bf16.msra.mxu1 %v1661_v50  ;;  %1333 = vmatprep.subr.bf16.mxu0 %v1670_v52 }
 0x10e   : > { %1355 = vmatprep.subr.bf16.mxu1 %v1676_v53 }
 0x110   : > { %1334 = vmatpush3.bf16.msra.mxu0 %v1682_v54 }
 0x111   : > { %1356 = vmatpush3.bf16.msra.mxu1 %v1688_v55  ;;  %1335 = vmatprep.subr.bf16.mxu0 %v1694_v56 }
 0x112   : > { %1357 = vmatprep.subr.bf16.mxu1 %v1701_v57 }
 0x114   : > { %1336 = vmatpush3.bf16.msra.mxu0 %v1707_v58 }
 0x115   : > { %1358 = vmatpush3.bf16.msra.mxu1 %v1713_v59 }
 0x117   : > { %954 = vmatmul.mubr.bf16.vlgmr.msra.gmra.mrb[16].mxu0 %v1759_v18 }
 0x118   : > { %994 = vmatmul.mubr.bf16.vlgmr.msra.gmra.mrb[16].mxu1 %v1847_v9 }
 0x16a   : > { %v1161_v1 = vpop.f32.mrb[0].mxu0  ;;  %v1183_v2 = vpop.f32.mrb[0].mxu1 }
 0x16b   : > { %v1162_v3 = vpop.f32.mrb[1].mxu0  ;;  %v1184_v4 = vpop.f32.mrb[1].mxu1 }
 0x16c   : > { %v1163_v5 = vadd.f32 %v1162_v3, %v1161_v1  ;;  %v1185_v22 = vadd.f32 %v1184_v4, %v1183_v2  ;;  %v1164_v24 = vpop.f32.mrb[2].mxu0  ;;  %v1186_v26 = vpop.f32.mrb[2].mxu1 }
 0x16d   : > { %v1165_v28 = vpop.f32.mrb[3].mxu0  ;;  %v1187_v31 = vpop.f32.mrb[3].mxu1 }
 0x16e   : > { %v592_v32 = vadd.f32 %v1185_v22, %v1163_v5 }
 0x170   : > { %v1007_v34 = vadd.f32 %v1141_v27, %v592_v32 }
 0x172   : > { %1013 = vst.msk [vmem:[%s1925_s16] sm:$0x1f] %vm1012_vm3, %v1007_v34 }
 0x18a   : > { %v1205_v36 = vpop.f32.mrb[4].mxu0  ;;  %v1227_v37 = vpop.f32.mrb[4].mxu1 }
 0x18b   : > { %v1206_v38 = vpop.f32.mrb[5].mxu0  ;;  %v1228_v40 = vpop.f32.mrb[5].mxu1 }
 0x18c   : > { %v1207_v41 = vadd.f32 %v1206_v38, %v1205_v36  ;;  %v1229_v42 = vadd.f32 %v1228_v40, %v1227_v37  ;;  %v1208_v44 = vpop.f32.mrb[6].mxu0  ;;  %v1230_v46 = vpop.f32.mrb[6].mxu1 }
 0x18d   : > { %v1209_v47 = vpop.f32.mrb[7].mxu0  ;;  %v1231_v48 = vpop.f32.mrb[7].mxu1 }
 0x18e   : > { %v693_v50 = vadd.f32 %v1229_v42, %v1207_v41 }
 0x190   : > { %v1008_v52 = vadd.f32 %v1141_v27, %v693_v50 }
 0x192   : > { %1014 = vst.msk [vmem:[%s1925_s16 + $0x8] sm:$0x1f] %vm1012_vm3, %v1008_v52 }
 0x1aa   : > { %v1249_v53 = vpop.f32.mrb[8].mxu0 }
 0x1ab   : > { %v1271_v54 = vpop.f32.mrb[8].mxu1  ;;  %v1250_v55 = vpop.f32.mrb[9].mxu0 }
 0x1ac   : > { %v1251_v56 = vadd.f32 %v1250_v55, %v1249_v53  ;;  %v1272_v57 = vpop.f32.mrb[9].mxu1  ;;  %v1252_v58 = vpop.f32.mrb[10].mxu0 }
 0x1ad   : > { %v1273_v59 = vadd.f32 %v1272_v57, %v1271_v54  ;;  %v1274_v10 = vpop.f32.mrb[10].mxu1  ;;  %v1253_v11 = vpop.f32.mrb[11].mxu0 }
 0x1ae   : > { %v1275_v12 = vpop.f32.mrb[11].mxu1 }
 0x1af   : > { %v794_v13 = vadd.f32 %v1273_v59, %v1251_v56 }
 0x1b1   : > { %v1009_v14 = vadd.f32 %v1141_v27, %v794_v13 }
 0x1b3   : > { %1015 = vst.msk [vmem:[%s1925_s16 + $0x10] sm:$0x1f] %vm1012_vm3, %v1009_v14 }
 0x1ca   : > { %v1293_v15 = vpop.f32.mrb[12].mxu0 }
 0x1cb   : > { %v1315_v16 = vpop.f32.mrb[12].mxu1  ;;  %v1294_v17 = vpop.f32.mrb[13].mxu0 }
 0x1cc   : > { %v1295_v18 = vadd.f32 %v1294_v17, %v1293_v15  ;;  %v1316_v19 = vpop.f32.mrb[13].mxu1  ;;  %v1296_v20 = vpop.f32.mrb[14].mxu0 }
 0x1cd   : > { %v1317_v21 = vadd.f32 %v1316_v19, %v1315_v16  ;;  %v1318_v23 = vpop.f32.mrb[14].mxu1  ;;  %v1297_v25 = vpop.f32.mrb[15].mxu0 }
 0x1ce   : > { %v1319_v29 = vpop.f32.mrb[15].mxu1 }
 0x1cf   : > { %v895_v30 = vadd.f32 %v1317_v21, %v1295_v18 }
 0x1d1   : > { %v1010_v33 = vadd.f32 %v1141_v27, %v895_v30 }
 0x1d3   : > { %1016 = vst.msk [vmem:[%s1925_s16 + $0x18] sm:$0x1f] %vm1012_vm3, %v1010_v33 }
 0x1ea   : > { %v1337_v35 = vpop.f32.mrb[16].mxu0 }
 0x1eb   : > { %v1359_v39 = vpop.f32.mrb[16].mxu1  ;;  %v1338_v43 = vpop.f32.mrb[17].mxu0 }
 0x1ec   : > { %v1339_v45 = vadd.f32 %v1338_v43, %v1337_v35  ;;  %v1360_v49 = vpop.f32.mrb[17].mxu1  ;;  %v1340_v51 = vpop.f32.mrb[18].mxu0 }
 0x1ed   : > { %v1361_v60 = vadd.f32 %v1360_v49, %v1359_v39  ;;  %v1362_v61 = vpop.f32.mrb[18].mxu1  ;;  %v1341_v62 = vpop.f32.mrb[19].mxu0 }
 0x1ee   : > { %v1363_v63 = vpop.f32.mrb[19].mxu1 }
 0x1ef   : > { %v996_v0 = vadd.f32 %v1361_v60, %v1339_v45 }
 0x1f1   : > { %v1011_v6 = vadd.f32 %v1141_v27, %v996_v0 }
 0x1f3   : > { %1017 = vst.msk [vmem:[%s1925_s16 + $0x20] sm:$0x1f] %vm1012_vm3, %v1011_v6 }
 0x1f4 PF: > { %s15_s14 = sadd.s32 1, %s1445_s14  }
 0x1f5   : > { %p12_p4 = scmp.ge.s32.totalorder %s15_s14, 4  }
 0x1f7   :  { %14 = sbr.rel (!%p12_p4) target bundleno = 3 (0x3), region = 69 }

</bundles_post_ra>
